<compile_context>
chip_gen: v7x
topology: tpu7x:2x2x1
jax: 0.10.0
libtpu: 0.0.40
codegen_flags: <defaults>
</compile_context>

<pallas_src>
import jax
import jax.numpy as jnp
from jax import lax
from jax.experimental import pallas as pl
from jax.experimental.pallas import tpu as pltpu

LANE = 128  # pad all channel dims to a multiple of the TPU lane width


def cpad(n):
    return ((n + LANE - 1) // LANE) * LANE


# ----------------------------------------------------------------------------
# Pallas kernels
# ----------------------------------------------------------------------------
def _make_mm_kernel(relu, n_res, has_post):
    """act((x @ w) * scale + shift + sum(res)); optionally relu(. + post)."""

    def kernel(x_ref, w_ref, s_ref, b_ref, *rest):
        o_ref = rest[-1]
        res_refs = rest[:n_res]
        post_ref = rest[n_res] if has_post else None
        y = jnp.dot(x_ref[...], w_ref[...], preferred_element_type=jnp.float32)
        y = y * s_ref[...] + b_ref[...]
        for r in res_refs:
            y = y + r[...].astype(jnp.float32)
        if relu:
            y = jnp.maximum(y, 0.0)
        if has_post:
            y = jnp.maximum(y + post_ref[...].astype(jnp.float32), 0.0)
        o_ref[...] = y.astype(o_ref.dtype)

    return kernel


def _pick_tm(M):
    if M <= 256:
        return M          # block == full dim is always legal
    for tm in (256, 128, 64, 32, 16, 8):
        if M % tm == 0:
            return tm
    return M


def fused_matmul(x, w, scale, shift, residuals=(), relu=False,
                 post_residual=None):
    """x:(M,K), w:(K,N) -> bf16 (M,N). bf16 MXU operands, f32 accumulate."""
    M, K = x.shape
    N = w.shape[1]
    TM = _pick_tm(M)
    s2 = scale.reshape(1, N).astype(jnp.float32)
    b2 = shift.reshape(1, N).astype(jnp.float32)

    in_specs = [
        pl.BlockSpec((TM, K), lambda i: (i, 0)),
        pl.BlockSpec((K, N), lambda i: (0, 0)),
        pl.BlockSpec((1, N), lambda i: (0, 0)),
        pl.BlockSpec((1, N), lambda i: (0, 0)),
    ]
    args = [x.astype(jnp.bfloat16), w.astype(jnp.bfloat16), s2, b2]
    for r in residuals:
        in_specs.append(pl.BlockSpec((TM, N), lambda i: (i, 0)))
        args.append(r)
    if post_residual is not None:
        in_specs.append(pl.BlockSpec((TM, N), lambda i: (i, 0)))
        args.append(post_residual)

    return pl.pallas_call(
        _make_mm_kernel(relu, len(residuals), post_residual is not None),
        out_shape=jax.ShapeDtypeStruct((M, N), jnp.bfloat16),
        grid=(M // TM,),
        in_specs=in_specs,
        out_specs=pl.BlockSpec((TM, N), lambda i: (i, 0)),
        compiler_params=pltpu.CompilerParams(
            dimension_semantics=("parallel",)),
    )(*args)


def _make_conv_tap_kernel(kh, kw, stride, THo, Wo, B, relu):
    """KxK conv: per-tap windows are sliced from the phased input inside the
    kernel (in-VMEM im2col) and accumulated on the MXU in f32."""
    T = kh * kw

    def kernel(x_ref, w_ref, s_ref, b_ref, o_ref):
        i = pl.program_id(0)
        C = x_ref.shape[-1]
        N = o_ref.shape[-1]
        Mt = B * THo * Wo
        acc = jnp.zeros((Mt, N), jnp.float32)
        for t in range(T):                       # fully unrolled tap loop
            di, dj = t // kw, t % kw
            p = (di % stride) * stride + (dj % stride)   # stride phase
            qi, qj = di // stride, dj // stride          # offsets inside phase
            xt = x_ref[p, :, pl.ds(qi + i * THo, THo), pl.ds(qj, Wo), :]
            # f32 round-trip keeps the (B,THo,Wo,C)->(Mt,C) collapse
            # layout-trivial; cast back to bf16 for the MXU.
            xt2 = xt.astype(jnp.float32).reshape(Mt, C).astype(jnp.bfloat16)
            acc = acc + jnp.dot(xt2, w_ref[t],
                                preferred_element_type=jnp.float32)
        y = acc * s_ref[...] + b_ref[...]
        if relu:
            y = jnp.maximum(y, 0.0)
        o_ref[...] = y.reshape(o_ref.shape).astype(o_ref.dtype)

    return kernel


def conv_taps(x, w, scale, shift, stride, padding, relu):
    """General KxK conv (no residual). Only a stride-phased copy of the input
    goes to HBM (<= input size for stride>1, 1x for stride 1), never the
    kh*kw-expanded patch tensor."""
    B, H, W, C = x.shape
    O, I, kh, kw = w.shape
    s = stride
    Ho = (H + 2 * padding - kh) // s + 1
    Wo = (W + 2 * padding - kw) // s + 1
    Hp, Wp = H + 2 * padding, W + 2 * padding
    Hpp, Wpp = -(-Hp // s) * s, -(-Wp // s) * s       # round up to stride
    xpad = jnp.pad(x, ((0, 0),
                       (padding, Hpp - padding - H),
                       (padding, Wpp - padding - W),
                       (0, 0)))
    if s == 1:
        xph = xpad[None]
    else:
        xph = jnp.stack([xpad[:, ri::s, rj::s, :]
                         for ri in range(s) for rj in range(s)], axis=0)
    xph = xph.astype(jnp.bfloat16)
    w_taps = jnp.transpose(w, (2, 3, 1, 0)).reshape(kh * kw, I, O)
    w_taps = w_taps.astype(jnp.bfloat16)
    s2 = scale.reshape(1, O).astype(jnp.float32)
    b2 = shift.reshape(1, O).astype(jnp.float32)

    # tile over output rows; keep the per-step accumulator <= 256 rows
    THo = 1
    for t in range(1, Ho + 1):
        if Ho % t == 0 and B * t * Wo <= 256:
            THo = t

    return pl.pallas_call(
        _make_conv_tap_kernel(kh, kw, s, THo, Wo, B, relu),
        out_shape=jax.ShapeDtypeStruct((B, Ho, Wo, O), jnp.bfloat16),
        grid=(Ho // THo,),
        in_specs=[
            pl.BlockSpec(xph.shape, lambda i: (0, 0, 0, 0, 0)),   # resident
            pl.BlockSpec(w_taps.shape, lambda i: (0, 0, 0)),
            pl.BlockSpec((1, O), lambda i: (0, 0)),
            pl.BlockSpec((1, O), lambda i: (0, 0)),
        ],
        out_specs=pl.BlockSpec((B, THo, Wo, O), lambda i: (0, i, 0, 0)),
        compiler_params=pltpu.CompilerParams(
            dimension_semantics=("parallel",)),
    )(xph, w_taps, s2, b2)


# ----------------------------------------------------------------------------
# JAX glue: conv dispatcher, pooling, resize
# ----------------------------------------------------------------------------
def conv_bn_act(x, w, bn=None, stride=1, padding=0, relu=False,
                residuals=(), post_residual=None, conv_bias=None):
    """Conv2d + eval BatchNorm + residual(s) + ReLU, fused in one Pallas call.
    x: NHWC bf16 (channels padded), w: (O, I, kh, kw) (PyTorch layout, padded)."""
    B, H, W, Cin = x.shape
    O = w.shape[0]
    if bn is not None:
        scale = bn['weight'] / jnp.sqrt(bn['var'] + 1e-5)
        shift = bn['bias'] - bn['mean'] * scale
    else:
        scale = jnp.ones((O,), jnp.float32)
        shift = jnp.zeros((O,), jnp.float32)
    if conv_bias is not None:
        shift = shift + conv_bias * scale

    kh, kw = w.shape[2], w.shape[3]
    if kh == 1 and kw == 1 and stride == 1 and padding == 0:
        M = B * H * W
        res2 = tuple(r.reshape(M, O) for r in residuals)
        post2 = (post_residual.reshape(M, O)
                 if post_residual is not None else None)
        y = fused_matmul(x.reshape(M, Cin), w[:, :, 0, 0].T, scale, shift,
                         residuals=res2, relu=relu, post_residual=post2)
        return y.reshape(B, H, W, O)

    assert not residuals and post_residual is None
    return conv_taps(x, w, scale, shift, stride, padding, relu)


def avgpool_3x3_s2_p1(x):
    """nn.AvgPool2d(3, stride=2, padding=1), count_include_pad=True (NHWC)."""
    s = lax.reduce_window(x.astype(jnp.float32), 0.0, lax.add,
                          (1, 3, 3, 1), (1, 2, 2, 1),
                          [(0, 0), (1, 1), (1, 1), (0, 0)])
    return (s / 9.0).astype(jnp.bfloat16)


def adaptive_avg_pool(x, oh, ow):
    """nn.AdaptiveAvgPool2d((oh, ow)) on NHWC input."""
    B, H, W, C = x.shape
    xf = x.astype(jnp.float32)
    if H % oh == 0 and W % ow == 0:
        out = xf.reshape(B, oh, H // oh, ow, W // ow, C).mean(axis=(2, 4))
    else:  # general fallback (not hit in the test config)
        rows = []
        for i in range(oh):
            hs, he = (i * H) // oh, -((-(i + 1) * H) // oh)
            cols = [jnp.mean(
                xf[:, hs:he, (j * W) // ow: -((-(j + 1) * W) // ow), :],
                axis=(1, 2)) for j in range(ow)]
            rows.append(jnp.stack(cols, axis=1))
        out = jnp.stack(rows, axis=1)
    return out.astype(jnp.bfloat16)


# ----------------------------------------------------------------------------
# Parameter construction (deterministic, channel-padded to LANE multiples)
# ----------------------------------------------------------------------------
class KeyGen:
    def __init__(self, key):
        self.key = key

    def __call__(self):
        self.key, sub = jax.random.split(self.key)
        return sub


def conv_init(kg, O, I, kh, kw):
    std = (2.0 / (O * kh * kw)) ** 0.5          # kaiming_normal_(fan_out, relu)
    w = std * jax.random.normal(kg(), (O, I, kh, kw), dtype=jnp.float32)
    return jnp.pad(w, ((0, cpad(O) - O), (0, cpad(I) - I), (0, 0), (0, 0)))


def bn_init(C, weight_val=1.0):
    Cp = cpad(C)
    return {
        'weight': jnp.zeros((Cp,), jnp.float32).at[:C].set(weight_val),
        'bias': jnp.zeros((Cp,), jnp.float32),
        'mean': jnp.zeros((Cp,), jnp.float32),
        'var': jnp.ones((Cp,), jnp.float32),
    }


def bottleneck_params(kg, inplanes, planes, stride=1, downsample=None,
                      last_relu=True):
    q = planes // 4
    p = {
        'conv1': conv_init(kg, q, inplanes, 1, 1), 'bn1': bn_init(q),
        'conv2': conv_init(kg, q, q, 3, 3),        'bn2': bn_init(q),
        'conv3': conv_init(kg, planes, q, 1, 1),
        'bn3': bn_init(planes, weight_val=0.0),   # last-BN zero init
        'stride': stride, 'last_relu': last_relu, 'downsample': None,
    }
    if downsample is not None:
        ds = {'pool': downsample['pool']}
        if downsample['conv']:
            ds['conv'] = conv_init(kg, planes, inplanes, 1, 1)
            ds['bn'] = bn_init(planes)
        p['downsample'] = ds
    return p


def make_layer_params(kg, inplanes, planes, blocks, stride=1, last_relu=True):
    downsample = None
    if stride != 1 or inplanes != planes:
        downsample = {'pool': stride != 1, 'conv': inplanes != planes}
    layers = [bottleneck_params(kg, inplanes, planes, stride, downsample,
                                last_relu=True)]
    for i in range(1, blocks):
        layers.append(bottleneck_params(
            kg, planes, planes, 1, None,
            last_relu=last_relu if i == blocks - 1 else True))
    return layers


def maskgen_params(kg, groups, inplanes, mask_size):
    # TODO(synk): grouped conv (patch_groups > 1) is not modeled; groups == 1.
    return {
        'conv': conv_init(kg, groups * 4, inplanes, 3, 3),
        'bn': bn_init(groups * 4),
        'fc_w': conv_init(kg, groups, groups * 4, 1, 1),
        'fc_b': jnp.zeros((cpad(groups),), jnp.float32).at[:groups].set(10.0),
        'mask_size': mask_size,
        'groups': groups,
    }


def sar_module_params(kg, in_ch, out_ch, blocks, stride, groups=1,
                      mask_size=2, alpha=1):
    assert alpha == 1  # TODO(synk): alpha > 1 refine_transform path not modeled
    m = {'alpha': alpha, 'out_channels': out_ch}
    m['mask_gen'] = [maskgen_params(kg, groups, out_ch, mask_size)
                     for _ in range(blocks - 1)]
    m['base'] = make_layer_params(kg, in_ch, out_ch, blocks - 1, stride=2,
                                  last_relu=False)
    m['refine'] = make_layer_params(kg, in_ch, out_ch // alpha, blocks - 1,
                                    stride=1, last_relu=(alpha > 1))
    m['fusion'] = make_layer_params(kg, out_ch, out_ch, 1, stride=stride)
    return m


# ----------------------------------------------------------------------------
# Forward passes (eval-mode semantics)
# ----------------------------------------------------------------------------
def bottleneck_fwd(x, p, post_residual=None):
    out = conv_bn_act(x, p['conv1'], p['bn1'], relu=True)
    out = conv_bn_act(out, p['conv2'], p['bn2'], stride=p['stride'],
                      padding=1, relu=True)
    if p['downsample'] is not None:
        r = x
        if p['downsample']['pool']:
            r = avgpool_3x3_s2_p1(r)
        if 'conv' in p['downsample']:
            r = conv_bn_act(r, p['downsample']['conv'], p['downsample']['bn'],
                            relu=False)
    else:
        r = x
    return conv_bn_act(out, p['conv3'], p['bn3'], relu=p['last_relu'],
                       residuals=(r,), post_residual=post_residual)


def mask_gen_fwd(x, p, temperature=1.0):
    g = conv_bn_act(x, p['conv'], p['bn'], stride=1, padding=1, relu=True)
    g = adaptive_avg_pool(g, p['mask_size'], p['mask_size'])
    g = conv_bn_act(g, p['fc_w'], None, relu=False, conv_bias=p['fc_b'])
    g = jnp.transpose(g[..., :p['groups']], (0, 3, 1, 2))  # (B, groups, m, m)
    # TODO(synk): training-mode Gumbel noise / sigmoid straight-through not
    # modeled; eval-mode hard gate (x >= 0) is used.
    return (g >= 0).astype(jnp.float32)


def sar_module_fwd(x, p, temperature=1e-8):
    masks = []
    x_base = x
    for i in range(len(p['base'])):
        x_base = bottleneck_fwd(x_base, p['base'][i])
        masks.append(mask_gen_fwd(x_base, p['mask_gen'][i], temperature))

    # Refine branch keeps the input resolution (stride-1 blocks), so the
    # bilinear upsample target is the module input's spatial size.
    B, H, W, _ = x.shape
    x_base_up = jax.image.resize(
        x_base.astype(jnp.float32), (B, H, W, x_base.shape[-1]),
        method='bilinear').astype(jnp.bfloat16)

    # TODO(synk): block_refine is not defined in the reference file; the
    # refine branch is a standard Bottleneck that ignores the spatial mask.
    x_refine = x
    n = len(p['refine'])
    for i in range(n):
        # Fuse the final relu(upsample(base) + refine) into the last refine
        # block's conv3 epilogue (post-residual + ReLU).
        post = x_base_up if i == n - 1 else None
        x_refine = bottleneck_fwd(x_refine, p['refine'][i], post_residual=post)

    out = bottleneck_fwd(x_refine, p['fusion'][0])
    return out, masks


def sar_module_forward(x_nchw, params, temperature=1e-8):
    in_ch = x_nchw.shape[1]
    x = jnp.transpose(x_nchw, (0, 2, 3, 1)).astype(jnp.bfloat16)  # NCHW->NHWC
    x = jnp.pad(x, ((0, 0), (0, 0), (0, 0), (0, cpad(in_ch) - in_ch)))
    out, masks = sar_module_fwd(x, params, temperature)
    out_ch = params['out_channels']
    out = jnp.transpose(out[..., :out_ch].astype(jnp.float32), (0, 3, 1, 2))
    return out, masks


# ----------------------------------------------------------------------------
if __name__ == "__main__":
    base_key = jax.random.PRNGKey(0)
    kg = KeyGen(base_key)
    in_channels, out_channels = 16, 64
    params = sar_module_params(kg, in_channels, out_channels, blocks=2,
                               stride=2, groups=1, mask_size=2, alpha=1)

    x = jax.random.normal(jax.random.fold_in(base_key, 12345),
                          (2, in_channels, 16, 16), dtype=jnp.float32)

    fwd = jax.jit(lambda inp: sar_module_forward(inp, params,
                                                 temperature=1e-8))
    out, masks = fwd(x)
    jax.block_until_ready(out)
    jax.block_until_ready(masks)
    assert out.shape == (2, out_channels, 8, 8)
    assert len(masks) == 1 and masks[0].shape == (2, 1, 2, 2)
    print("KERNEL_OK")
</pallas_src>

<mosaic_0001>
module attributes {stable_mosaic.version = 11 : i64} {
  func.func @kernel(%arg0: i32, %arg1: memref<256x128xbf16, #tpu.memory_space<vmem>>, %arg2: memref<128x128xbf16, #tpu.memory_space<vmem>>, %arg3: memref<1x128xf32, #tpu.memory_space<vmem>>, %arg4: memref<1x128xf32, #tpu.memory_space<vmem>>, %arg5: memref<256x128xbf16, #tpu.memory_space<vmem>>) attributes {dimension_semantics = [#tpu.dimension_semantics<parallel>], iteration_bounds = array<i64: 2>, scalar_prefetch = 0 : i64, scratch_operands = 0 : i64, tpu.core_type = #tpu.core_type<tc>, window_params = [{transform_indices = @transform_0, window_bounds = array<i64: 256, 128>}, {pipeline_mode = #tpu.pipeline_mode<synchronous>, transform_indices = @transform_1, window_bounds = array<i64: 128, 128>}, {pipeline_mode = #tpu.pipeline_mode<synchronous>, transform_indices = @transform_2, window_bounds = array<i64: 1, 128>}, {pipeline_mode = #tpu.pipeline_mode<synchronous>, transform_indices = @transform_3, window_bounds = array<i64: 1, 128>}, {transform_indices = @transform_4, window_bounds = array<i64: 256, 128>}]} {
    %c0 = arith.constant 0 : index
    %c0_0 = arith.constant 0 : index
    %0 = vector.load %arg1[%c0, %c0_0] : memref<256x128xbf16, #tpu.memory_space<vmem>>, vector<256x128xbf16>
    %c0_1 = arith.constant 0 : index
    %c0_2 = arith.constant 0 : index
    %1 = vector.load %arg2[%c0_1, %c0_2] : memref<128x128xbf16, #tpu.memory_space<vmem>>, vector<128x128xbf16>
    %cst = arith.constant dense<0.000000e+00> : vector<256x128xf32>
    %2 = tpu.matmul %0, %1, %cst {dimension_numbers = #tpu.dot_dimension_numbers<[1], [0], [0], [1], [0, 0, 1, 1], [], []>} : vector<256x128xbf16>, vector<128x128xbf16>, vector<256x128xf32> -> vector<256x128xf32>
    %c0_3 = arith.constant 0 : index
    %c0_4 = arith.constant 0 : index
    %3 = vector.load %arg3[%c0_3, %c0_4] : memref<1x128xf32, #tpu.memory_space<vmem>>, vector<1x128xf32>
    %4 = vector.broadcast %3 : vector<1x128xf32> to vector<256x128xf32>
    %5 = arith.mulf %2, %4 : vector<256x128xf32>
    %c0_5 = arith.constant 0 : index
    %c0_6 = arith.constant 0 : index
    %6 = vector.load %arg4[%c0_5, %c0_6] : memref<1x128xf32, #tpu.memory_space<vmem>>, vector<1x128xf32>
    %7 = vector.broadcast %6 : vector<1x128xf32> to vector<256x128xf32>
    %8 = arith.addf %5, %7 : vector<256x128xf32>
    %cst_7 = arith.constant 0.000000e+00 : f32
    %9 = vector.broadcast %cst_7 : f32 to vector<256x128xf32>
    %10 = arith.maximumf %8, %9 : vector<256x128xf32>
    %11 = arith.truncf %10 : vector<256x128xf32> to vector<256x128xbf16>
    %c0_8 = arith.constant 0 : index
    %c0_9 = arith.constant 0 : index
    %12 = vector.load %arg5[%c0_8, %c0_9] : memref<256x128xbf16, #tpu.memory_space<vmem>>, vector<256x128xbf16>
    tpu.vector_store %arg5[%c0_8, %c0_9], %11 {strides = array<i32>} : memref<256x128xbf16, #tpu.memory_space<vmem>>, vector<256x128xbf16>,
    return
  }
  func.func @transform_0(%arg0: i32) -> (i32, i32) {
    %c0_i32 = arith.constant 0 : i32
    %c0_i32_0 = arith.constant 0 : i32
    return %arg0, %c0_i32 : i32, i32
  }
  func.func @transform_1(%arg0: i32) -> (i32, i32) {
    %c0_i32 = arith.constant 0 : i32
    %c0_i32_0 = arith.constant 0 : i32
    %c0_i32_1 = arith.constant 0 : i32
    return %c0_i32, %c0_i32_0 : i32, i32
  }
  func.func @transform_2(%arg0: i32) -> (i32, i32) {
    %c0_i32 = arith.constant 0 : i32
    %c0_i32_0 = arith.constant 0 : i32
    %c0_i32_1 = arith.constant 0 : i32
    return %c0_i32, %c0_i32_0 : i32, i32
  }
  func.func @transform_3(%arg0: i32) -> (i32, i32) {
    %c0_i32 = arith.constant 0 : i32
    %c0_i32_0 = arith.constant 0 : i32
    %c0_i32_1 = arith.constant 0 : i32
    return %c0_i32, %c0_i32_0 : i32, i32
  }
  func.func @transform_4(%arg0: i32) -> (i32, i32) {
    %c0_i32 = arith.constant 0 : i32
    %c0_i32_0 = arith.constant 0 : i32
    return %arg0, %c0_i32 : i32, i32
  }
}

module attributes {stable_mosaic.version = 11 : i64} {
  func.func @kernel(%arg0: i32, %arg1: memref<256x128xbf16, #tpu.memory_space<vmem>>, %arg2: memref<128x128xbf16, #tpu.memory_space<vmem>>, %arg3: memref<1x128xf32, #tpu.memory_space<vmem>>, %arg4: memref<1x128xf32, #tpu.memory_space<vmem>>, %arg5: memref<256x128xbf16, #tpu.memory_space<vmem>>) attributes {dimension_semantics = [#tpu.dimension_semantics<parallel>], iteration_bounds = array<i64: 2>, scalar_prefetch = 0 : i64, scratch_operands = 0 : i64, tpu.core_type = #tpu.core_type<tc>, window_params = [{transform_indices = @transform_0, window_bounds = array<i64: 256, 128>}, {pipeline_mode = #tpu.pipeline_mode<synchronous>, transform_indices = @transform_1, window_bounds = array<i64: 128, 128>}, {pipeline_mode = #tpu.pipeline_mode<synchronous>, transform_indices = @transform_2, window_bounds = array<i64: 1, 128>}, {pipeline_mode = #tpu.pipeline_mode<synchronous>, transform_indices = @transform_3, window_bounds = array<i64: 1, 128>}, {transform_indices = @transform_4, window_bounds = array<i64: 256, 128>}]} {
    %c0 = arith.constant 0 : index
    %c0_0 = arith.constant 0 : index
    %0 = vector.load %arg1[%c0, %c0_0] : memref<256x128xbf16, #tpu.memory_space<vmem>>, vector<256x128xbf16>
    %c0_1 = arith.constant 0 : index
    %c0_2 = arith.constant 0 : index
    %1 = vector.load %arg2[%c0_1, %c0_2] : memref<128x128xbf16, #tpu.memory_space<vmem>>, vector<128x128xbf16>
    %cst = arith.constant dense<0.000000e+00> : vector<256x128xf32>
    %2 = tpu.matmul %0, %1, %cst {dimension_numbers = #tpu.dot_dimension_numbers<[1], [0], [0], [1], [0, 0, 1, 1], [], []>} : vector<256x128xbf16>, vector<128x128xbf16>, vector<256x128xf32> -> vector<256x128xf32>
    %c0_3 = arith.constant 0 : index
    %c0_4 = arith.constant 0 : index
    %3 = vector.load %arg3[%c0_3, %c0_4] : memref<1x128xf32, #tpu.memory_space<vmem>>, vector<1x128xf32>
    %4 = vector.broadcast %3 : vector<1x128xf32> to vector<256x128xf32>
    %5 = arith.mulf %2, %4 : vector<256x128xf32>
    %c0_5 = arith.constant 0 : index
    %c0_6 = arith.constant 0 : index
    %6 = vector.load %arg4[%c0_5, %c0_6] : memref<1x128xf32, #tpu.memory_space<vmem>>, vector<1x128xf32>
    %7 = vector.broadcast %6 : vector<1x128xf32> to vector<256x128xf32>
    %8 = arith.addf %5, %7 : vector<256x128xf32>
    %9 = arith.truncf %8 : vector<256x128xf32> to vector<256x128xbf16>
    %c0_7 = arith.constant 0 : index
    %c0_8 = arith.constant 0 : index
    %10 = vector.load %arg5[%c0_7, %c0_8] : memref<256x128xbf16, #tpu.memory_space<vmem>>, vector<256x128xbf16>
    tpu.vector_store %arg5[%c0_7, %c0_8], %9 {strides = array<i32>} : memref<256x128xbf16, #tpu.memory_space<vmem>>, vector<256x128xbf16>,
    return
  }
  func.func @transform_0(%arg0: i32) -> (i32, i32) {
    %c0_i32 = arith.constant 0 : i32
    %c0_i32_0 = arith.constant 0 : i32
    return %arg0, %c0_i32 : i32, i32
  }
  func.func @transform_1(%arg0: i32) -> (i32, i32) {
    %c0_i32 = arith.constant 0 : i32
    %c0_i32_0 = arith.constant 0 : i32
    %c0_i32_1 = arith.constant 0 : i32
    return %c0_i32, %c0_i32_0 : i32, i32
  }
  func.func @transform_2(%arg0: i32) -> (i32, i32) {
    %c0_i32 = arith.constant 0 : i32
    %c0_i32_0 = arith.constant 0 : i32
    %c0_i32_1 = arith.constant 0 : i32
    return %c0_i32, %c0_i32_0 : i32, i32
  }
  func.func @transform_3(%arg0: i32) -> (i32, i32) {
    %c0_i32 = arith.constant 0 : i32
    %c0_i32_0 = arith.constant 0 : i32
    %c0_i32_1 = arith.constant 0 : i32
    return %c0_i32, %c0_i32_0 : i32, i32
  }
  func.func @transform_4(%arg0: i32) -> (i32, i32) {
    %c0_i32 = arith.constant 0 : i32
    %c0_i32_0 = arith.constant 0 : i32
    return %arg0, %c0_i32 : i32, i32
  }
}

module attributes {stable_mosaic.version = 11 : i64} {
  func.func @kernel(%arg0: i32, %arg1: memref<4x2x9x9x128xbf16, #tpu.memory_space<vmem>>, %arg2: memref<9x128x128xbf16, #tpu.memory_space<vmem>>, %arg3: memref<1x128xf32, #tpu.memory_space<vmem>>, %arg4: memref<1x128xf32, #tpu.memory_space<vmem>>, %arg5: memref<2x8x8x128xbf16, #tpu.memory_space<vmem>>) attributes {dimension_semantics = [#tpu.dimension_semantics<parallel>], iteration_bounds = array<i64: 1>, scalar_prefetch = 0 : i64, scratch_operands = 0 : i64, tpu.core_type = #tpu.core_type<tc>, window_params = [{pipeline_mode = #tpu.pipeline_mode<synchronous>, transform_indices = @transform_0, window_bounds = array<i64: 4, 2, 9, 9, 128>}, {pipeline_mode = #tpu.pipeline_mode<synchronous>, transform_indices = @transform_1, window_bounds = array<i64: 9, 128, 128>}, {pipeline_mode = #tpu.pipeline_mode<synchronous>, transform_indices = @transform_2, window_bounds = array<i64: 1, 128>}, {pipeline_mode = #tpu.pipeline_mode<synchronous>, transform_indices = @transform_3, window_bounds = array<i64: 1, 128>}, {transform_indices = @transform_4, window_bounds = array<i64: 2, 8, 8, 128>}]} {
    %cst = arith.constant 0.000000e+00 : f32
    %0 = vector.broadcast %cst : f32 to vector<128x128xf32>
    %c8_i32 = arith.constant 8 : i32
    %1 = arith.muli %arg0, %c8_i32 : i32
    %c0_i32 = arith.constant 0 : i32
    %2 = arith.addi %c0_i32, %1 : i32
    %c0 = arith.constant 0 : index
    %c0_0 = arith.constant 0 : index
    %3 = arith.index_cast %2 : i32 to index
    %c0_1 = arith.constant 0 : index
    %c0_2 = arith.constant 0 : index
    %4 = vector.load %arg1[%c0, %c0_0, %3, %c0_1, %c0_2] : memref<4x2x9x9x128xbf16, #tpu.memory_space<vmem>>, vector<1x2x8x8x128xbf16>
    %5 = vector.shape_cast %4 : vector<1x2x8x8x128xbf16> to vector<2x8x8x128xbf16>
    %6 = arith.extf %5 : vector<2x8x8x128xbf16> to vector<2x8x8x128xf32>
    %7 = vector.shape_cast %6 : vector<2x8x8x128xf32> to vector<128x128xf32>
    %8 = arith.truncf %7 : vector<128x128xf32> to vector<128x128xbf16>
    %c0_3 = arith.constant 0 : index
    %c0_4 = arith.constant 0 : index
    %c0_5 = arith.constant 0 : index
    %9 = vector.load %arg2[%c0_3, %c0_4, %c0_5] : memref<9x128x128xbf16, #tpu.memory_space<vmem>>, vector<1x128x128xbf16>
    %10 = vector.shape_cast %9 : vector<1x128x128xbf16> to vector<128x128xbf16>
    %cst_6 = arith.constant dense<0.000000e+00> : vector<128x128xf32>
    %11 = tpu.matmul %8, %10, %cst_6 {dimension_numbers = #tpu.dot_dimension_numbers<[1], [0], [0], [1], [0, 0, 1, 1], [], []>} : vector<128x128xbf16>, vector<128x128xbf16>, vector<128x128xf32> -> vector<128x128xf32>
    %12 = arith.addf %0, %11 : vector<128x128xf32>
    %c8_i32_7 = arith.constant 8 : i32
    %13 = arith.muli %arg0, %c8_i32_7 : i32
    %c0_i32_8 = arith.constant 0 : i32
    %14 = arith.addi %c0_i32_8, %13 : i32
    %c1 = arith.constant 1 : index
    %c0_9 = arith.constant 0 : index
    %15 = arith.index_cast %14 : i32 to index
    %c0_10 = arith.constant 0 : index
    %c0_11 = arith.constant 0 : index
    %16 = vector.load %arg1[%c1, %c0_9, %15, %c0_10, %c0_11] : memref<4x2x9x9x128xbf16, #tpu.memory_space<vmem>>, vector<1x2x8x8x128xbf16>
    %17 = vector.shape_cast %16 : vector<1x2x8x8x128xbf16> to vector<2x8x8x128xbf16>
    %18 = arith.extf %17 : vector<2x8x8x128xbf16> to vector<2x8x8x128xf32>
    %19 = vector.shape_cast %18 : vector<2x8x8x128xf32> to vector<128x128xf32>
    %20 = arith.truncf %19 : vector<128x128xf32> to vector<128x128xbf16>
    %c1_12 = arith.constant 1 : index
    %c0_13 = arith.constant 0 : index
    %c0_14 = arith.constant 0 : index
    %21 = vector.load %arg2[%c1_12, %c0_13, %c0_14] : memref<9x128x128xbf16, #tpu.memory_space<vmem>>, vector<1x128x128xbf16>
    %22 = vector.shape_cast %21 : vector<1x128x128xbf16> to vector<128x128xbf16>
    %cst_15 = arith.constant dense<0.000000e+00> : vector<128x128xf32>
    %23 = tpu.matmul %20, %22, %cst_15 {dimension_numbers = #tpu.dot_dimension_numbers<[1], [0], [0], [1], [0, 0, 1, 1], [], []>} : vector<128x128xbf16>, vector<128x128xbf16>, vector<128x128xf32> -> vector<128x128xf32>
    %24 = arith.addf %12, %23 : vector<128x128xf32>
    %c8_i32_16 = arith.constant 8 : i32
    %25 = arith.muli %arg0, %c8_i32_16 : i32
    %c0_i32_17 = arith.constant 0 : i32
    %26 = arith.addi %c0_i32_17, %25 : i32
    %c0_18 = arith.constant 0 : index
    %c0_19 = arith.constant 0 : index
    %27 = arith.index_cast %26 : i32 to index
    %c1_20 = arith.constant 1 : index
    %c0_21 = arith.constant 0 : index
    %28 = vector.load %arg1[%c0_18, %c0_19, %27, %c1_20, %c0_21] : memref<4x2x9x9x128xbf16, #tpu.memory_space<vmem>>, vector<1x2x8x8x128xbf16>
    %29 = vector.shape_cast %28 : vector<1x2x8x8x128xbf16> to vector<2x8x8x128xbf16>
    %30 = arith.extf %29 : vector<2x8x8x128xbf16> to vector<2x8x8x128xf32>
    %31 = vector.shape_cast %30 : vector<2x8x8x128xf32> to vector<128x128xf32>
    %32 = arith.truncf %31 : vector<128x128xf32> to vector<128x128xbf16>
    %c2 = arith.constant 2 : index
    %c0_22 = arith.constant 0 : index
    %c0_23 = arith.constant 0 : index
    %33 = vector.load %arg2[%c2, %c0_22, %c0_23] : memref<9x128x128xbf16, #tpu.memory_space<vmem>>, vector<1x128x128xbf16>
    %34 = vector.shape_cast %33 : vector<1x128x128xbf16> to vector<128x128xbf16>
    %cst_24 = arith.constant dense<0.000000e+00> : vector<128x128xf32>
    %35 = tpu.matmul %32, %34, %cst_24 {dimension_numbers = #tpu.dot_dimension_numbers<[1], [0], [0], [1], [0, 0, 1, 1], [], []>} : vector<128x128xbf16>, vector<128x128xbf16>, vector<128x128xf32> -> vector<128x128xf32>
    %36 = arith.addf %24, %35 : vector<128x128xf32>
    %c8_i32_25 = arith.constant 8 : i32
    %37 = arith.muli %arg0, %c8_i32_25 : i32
    %c0_i32_26 = arith.constant 0 : i32
    %38 = arith.addi %c0_i32_26, %37 : i32
    %c2_27 = arith.constant 2 : index
    %c0_28 = arith.constant 0 : index
    %39 = arith.index_cast %38 : i32 to index
    %c0_29 = arith.constant 0 : index
    %c0_30 = arith.constant 0 : index
    %40 = vector.load %arg1[%c2_27, %c0_28, %39, %c0_29, %c0_30] : memref<4x2x9x9x128xbf16, #tpu.memory_space<vmem>>, vector<1x2x8x8x128xbf16>
    %41 = vector.shape_cast %40 : vector<1x2x8x8x128xbf16> to vector<2x8x8x128xbf16>
    %42 = arith.extf %41 : vector<2x8x8x128xbf16> to vector<2x8x8x128xf32>
    %43 = vector.shape_cast %42 : vector<2x8x8x128xf32> to vector<128x128xf32>
    %44 = arith.truncf %43 : vector<128x128xf32> to vector<128x128xbf16>
    %c3 = arith.constant 3 : index
    %c0_31 = arith.constant 0 : index
    %c0_32 = arith.constant 0 : index
    %45 = vector.load %arg2[%c3, %c0_31, %c0_32] : memref<9x128x128xbf16, #tpu.memory_space<vmem>>, vector<1x128x128xbf16>
    %46 = vector.shape_cast %45 : vector<1x128x128xbf16> to vector<128x128xbf16>
    %cst_33 = arith.constant dense<0.000000e+00> : vector<128x128xf32>
    %47 = tpu.matmul %44, %46, %cst_33 {dimension_numbers = #tpu.dot_dimension_numbers<[1], [0], [0], [1], [0, 0, 1, 1], [], []>} : vector<128x128xbf16>, vector<128x128xbf16>, vector<128x128xf32> -> vector<128x128xf32>
    %48 = arith.addf %36, %47 : vector<128x128xf32>
    %c8_i32_34 = arith.constant 8 : i32
    %49 = arith.muli %arg0, %c8_i32_34 : i32
    %c0_i32_35 = arith.constant 0 : i32
    %50 = arith.addi %c0_i32_35, %49 : i32
    %c3_36 = arith.constant 3 : index
    %c0_37 = arith.constant 0 : index
    %51 = arith.index_cast %50 : i32 to index
    %c0_38 = arith.constant 0 : index
    %c0_39 = arith.constant 0 : index
    %52 = vector.load %arg1[%c3_36, %c0_37, %51, %c0_38, %c0_39] : memref<4x2x9x9x128xbf16, #tpu.memory_space<vmem>>, vector<1x2x8x8x128xbf16>
    %53 = vector.shape_cast %52 : vector<1x2x8x8x128xbf16> to vector<2x8x8x128xbf16>
    %54 = arith.extf %53 : vector<2x8x8x128xbf16> to vector<2x8x8x128xf32>
    %55 = vector.shape_cast %54 : vector<2x8x8x128xf32> to vector<128x128xf32>
    %56 = arith.truncf %55 : vector<128x128xf32> to vector<128x128xbf16>
    %c4 = arith.constant 4 : index
    %c0_40 = arith.constant 0 : index
    %c0_41 = arith.constant 0 : index
    %57 = vector.load %arg2[%c4, %c0_40, %c0_41] : memref<9x128x128xbf16, #tpu.memory_space<vmem>>, vector<1x128x128xbf16>
    %58 = vector.shape_cast %57 : vector<1x128x128xbf16> to vector<128x128xbf16>
    %cst_42 = arith.constant dense<0.000000e+00> : vector<128x128xf32>
    %59 = tpu.matmul %56, %58, %cst_42 {dimension_numbers = #tpu.dot_dimension_numbers<[1], [0], [0], [1], [0, 0, 1, 1], [], []>} : vector<128x128xbf16>, vector<128x128xbf16>, vector<128x128xf32> -> vector<128x128xf32>
    %60 = arith.addf %48, %59 : vector<128x128xf32>
    %c8_i32_43 = arith.constant 8 : i32
    %61 = arith.muli %arg0, %c8_i32_43 : i32
    %c0_i32_44 = arith.constant 0 : i32
    %62 = arith.addi %c0_i32_44, %61 : i32
    %c2_45 = arith.constant 2 : index
    %c0_46 = arith.constant 0 : index
    %63 = arith.index_cast %62 : i32 to index
    %c1_47 = arith.constant 1 : index
    %c0_48 = arith.constant 0 : index
    %64 = vector.load %arg1[%c2_45, %c0_46, %63, %c1_47, %c0_48] : memref<4x2x9x9x128xbf16, #tpu.memory_space<vmem>>, vector<1x2x8x8x128xbf16>
    %65 = vector.shape_cast %64 : vector<1x2x8x8x128xbf16> to vector<2x8x8x128xbf16>
    %66 = arith.extf %65 : vector<2x8x8x128xbf16> to vector<2x8x8x128xf32>
    %67 = vector.shape_cast %66 : vector<2x8x8x128xf32> to vector<128x128xf32>
    %68 = arith.truncf %67 : vector<128x128xf32> to vector<128x128xbf16>
    %c5 = arith.constant 5 : index
    %c0_49 = arith.constant 0 : index
    %c0_50 = arith.constant 0 : index
    %69 = vector.load %arg2[%c5, %c0_49, %c0_50] : memref<9x128x128xbf16, #tpu.memory_space<vmem>>, vector<1x128x128xbf16>
    %70 = vector.shape_cast %69 : vector<1x128x128xbf16> to vector<128x128xbf16>
    %cst_51 = arith.constant dense<0.000000e+00> : vector<128x128xf32>
    %71 = tpu.matmul %68, %70, %cst_51 {dimension_numbers = #tpu.dot_dimension_numbers<[1], [0], [0], [1], [0, 0, 1, 1], [], []>} : vector<128x128xbf16>, vector<128x128xbf16>, vector<128x128xf32> -> vector<128x128xf32>
    %72 = arith.addf %60, %71 : vector<128x128xf32>
    %c8_i32_52 = arith.constant 8 : i32
    %73 = arith.muli %arg0, %c8_i32_52 : i32
    %c1_i32 = arith.constant 1 : i32
    %74 = arith.addi %c1_i32, %73 : i32
    %c0_53 = arith.constant 0 : index
    %c0_54 = arith.constant 0 : index
    %75 = arith.index_cast %74 : i32 to index
    %c0_55 = arith.constant 0 : index
    %c0_56 = arith.constant 0 : index
    %76 = vector.load %arg1[%c0_53, %c0_54, %75, %c0_55, %c0_56] : memref<4x2x9x9x128xbf16, #tpu.memory_space<vmem>>, vector<1x2x8x8x128xbf16>
    %77 = vector.shape_cast %76 : vector<1x2x8x8x128xbf16> to vector<2x8x8x128xbf16>
    %78 = arith.extf %77 : vector<2x8x8x128xbf16> to vector<2x8x8x128xf32>
    %79 = vector.shape_cast %78 : vector<2x8x8x128xf32> to vector<128x128xf32>
    %80 = arith.truncf %79 : vector<128x128xf32> to vector<128x128xbf16>
    %c6 = arith.constant 6 : index
    %c0_57 = arith.constant 0 : index
    %c0_58 = arith.constant 0 : index
    %81 = vector.load %arg2[%c6, %c0_57, %c0_58] : memref<9x128x128xbf16, #tpu.memory_space<vmem>>, vector<1x128x128xbf16>
    %82 = vector.shape_cast %81 : vector<1x128x128xbf16> to vector<128x128xbf16>
    %cst_59 = arith.constant dense<0.000000e+00> : vector<128x128xf32>
    %83 = tpu.matmul %80, %82, %cst_59 {dimension_numbers = #tpu.dot_dimension_numbers<[1], [0], [0], [1], [0, 0, 1, 1], [], []>} : vector<128x128xbf16>, vector<128x128xbf16>, vector<128x128xf32> -> vector<128x128xf32>
    %84 = arith.addf %72, %83 : vector<128x128xf32>
    %c8_i32_60 = arith.constant 8 : i32
    %85 = arith.muli %arg0, %c8_i32_60 : i32
    %c1_i32_61 = arith.constant 1 : i32
    %86 = arith.addi %c1_i32_61, %85 : i32
    %c1_62 = arith.constant 1 : index
    %c0_63 = arith.constant 0 : index
    %87 = arith.index_cast %86 : i32 to index
    %c0_64 = arith.constant 0 : index
    %c0_65 = arith.constant 0 : index
    %88 = vector.load %arg1[%c1_62, %c0_63, %87, %c0_64, %c0_65] : memref<4x2x9x9x128xbf16, #tpu.memory_space<vmem>>, vector<1x2x8x8x128xbf16>
    %89 = vector.shape_cast %88 : vector<1x2x8x8x128xbf16> to vector<2x8x8x128xbf16>
    %90 = arith.extf %89 : vector<2x8x8x128xbf16> to vector<2x8x8x128xf32>
    %91 = vector.shape_cast %90 : vector<2x8x8x128xf32> to vector<128x128xf32>
    %92 = arith.truncf %91 : vector<128x128xf32> to vector<128x128xbf16>
    %c7 = arith.constant 7 : index
    %c0_66 = arith.constant 0 : index
    %c0_67 = arith.constant 0 : index
    %93 = vector.load %arg2[%c7, %c0_66, %c0_67] : memref<9x128x128xbf16, #tpu.memory_space<vmem>>, vector<1x128x128xbf16>
    %94 = vector.shape_cast %93 : vector<1x128x128xbf16> to vector<128x128xbf16>
    %cst_68 = arith.constant dense<0.000000e+00> : vector<128x128xf32>
    %95 = tpu.matmul %92, %94, %cst_68 {dimension_numbers = #tpu.dot_dimension_numbers<[1], [0], [0], [1], [0, 0, 1, 1], [], []>} : vector<128x128xbf16>, vector<128x128xbf16>, vector<128x128xf32> -> vector<128x128xf32>
    %96 = arith.addf %84, %95 : vector<128x128xf32>
    %c8_i32_69 = arith.constant 8 : i32
    %97 = arith.muli %arg0, %c8_i32_69 : i32
    %c1_i32_70 = arith.constant 1 : i32
    %98 = arith.addi %c1_i32_70, %97 : i32
    %c0_71 = arith.constant 0 : index
    %c0_72 = arith.constant 0 : index
    %99 = arith.index_cast %98 : i32 to index
    %c1_73 = arith.constant 1 : index
    %c0_74 = arith.constant 0 : index
    %100 = vector.load %arg1[%c0_71, %c0_72, %99, %c1_73, %c0_74] : memref<4x2x9x9x128xbf16, #tpu.memory_space<vmem>>, vector<1x2x8x8x128xbf16>
    %101 = vector.shape_cast %100 : vector<1x2x8x8x128xbf16> to vector<2x8x8x128xbf16>
    %102 = arith.extf %101 : vector<2x8x8x128xbf16> to vector<2x8x8x128xf32>
    %103 = vector.shape_cast %102 : vector<2x8x8x128xf32> to vector<128x128xf32>
    %104 = arith.truncf %103 : vector<128x128xf32> to vector<128x128xbf16>
    %c8 = arith.constant 8 : index
    %c0_75 = arith.constant 0 : index
    %c0_76 = arith.constant 0 : index
    %105 = vector.load %arg2[%c8, %c0_75, %c0_76] : memref<9x128x128xbf16, #tpu.memory_space<vmem>>, vector<1x128x128xbf16>
    %106 = vector.shape_cast %105 : vector<1x128x128xbf16> to vector<128x128xbf16>
    %cst_77 = arith.constant dense<0.000000e+00> : vector<128x128xf32>
    %107 = tpu.matmul %104, %106, %cst_77 {dimension_numbers = #tpu.dot_dimension_numbers<[1], [0], [0], [1], [0, 0, 1, 1], [], []>} : vector<128x128xbf16>, vector<128x128xbf16>, vector<128x128xf32> -> vector<128x128xf32>
    %108 = arith.addf %96, %107 : vector<128x128xf32>
    %c0_78 = arith.constant 0 : index
    %c0_79 = arith.constant 0 : index
    %109 = vector.load %arg3[%c0_78, %c0_79] : memref<1x128xf32, #tpu.memory_space<vmem>>, vector<1x128xf32>
    %110 = vector.broadcast %109 : vector<1x128xf32> to vector<128x128xf32>
    %111 = arith.mulf %108, %110 : vector<128x128xf32>
    %c0_80 = arith.constant 0 : index
    %c0_81 = arith.constant 0 : index
    %112 = vector.load %arg4[%c0_80, %c0_81] : memref<1x128xf32, #tpu.memory_space<vmem>>, vector<1x128xf32>
    %113 = vector.broadcast %112 : vector<1x128xf32> to vector<128x128xf32>
    %114 = arith.addf %111, %113 : vector<128x128xf32>
    %cst_82 = arith.constant 0.000000e+00 : f32
    %115 = vector.broadcast %cst_82 : f32 to vector<128x128xf32>
    %116 = arith.maximumf %114, %115 : vector<128x128xf32>
    %117 = vector.shape_cast %116 : vector<128x128xf32> to vector<2x8x8x128xf32>
    %118 = arith.truncf %117 : vector<2x8x8x128xf32> to vector<2x8x8x128xbf16>
    %c0_83 = arith.constant 0 : index
    %c0_84 = arith.constant 0 : index
    %c0_85 = arith.constant 0 : index
    %c0_86 = arith.constant 0 : index
    %119 = vector.load %arg5[%c0_83, %c0_84, %c0_85, %c0_86] : memref<2x8x8x128xbf16, #tpu.memory_space<vmem>>, vector<2x8x8x128xbf16>
    tpu.vector_store %arg5[%c0_83, %c0_84, %c0_85, %c0_86], %118 {strides = array<i32>} : memref<2x8x8x128xbf16, #tpu.memory_space<vmem>>, vector<2x8x8x128xbf16>,
    return
  }
  func.func @transform_0(%arg0: i32) -> (i32, i32, i32, i32, i32) {
    %c0_i32 = arith.constant 0 : i32
    %c0_i32_0 = arith.constant 0 : i32
    %c0_i32_1 = arith.constant 0 : i32
    %c0_i32_2 = arith.constant 0 : i32
    %c0_i32_3 = arith.constant 0 : i32
    %c0_i32_4 = arith.constant 0 : i32
    return %c0_i32, %c0_i32_0, %c0_i32_1, %c0_i32_2, %c0_i32_3 : i32, i32, i32, i32, i32
  }
  func.func @transform_1(%arg0: i32) -> (i32, i32, i32) {
    %c0_i32 = arith.constant 0 : i32
    %c0_i32_0 = arith.constant 0 : i32
    %c0_i32_1 = arith.constant 0 : i32
    %c0_i32_2 = arith.constant 0 : i32
    return %c0_i32, %c0_i32_0, %c0_i32_1 : i32, i32, i32
  }
  func.func @transform_2(%arg0: i32) -> (i32, i32) {
    %c0_i32 = arith.constant 0 : i32
    %c0_i32_0 = arith.constant 0 : i32
    %c0_i32_1 = arith.constant 0 : i32
    return %c0_i32, %c0_i32_0 : i32, i32
  }
  func.func @transform_3(%arg0: i32) -> (i32, i32) {
    %c0_i32 = arith.constant 0 : i32
    %c0_i32_0 = arith.constant 0 : i32
    %c0_i32_1 = arith.constant 0 : i32
    return %c0_i32, %c0_i32_0 : i32, i32
  }
  func.func @transform_4(%arg0: i32) -> (i32, i32, i32, i32) {
    %c0_i32 = arith.constant 0 : i32
    %c0_i32_0 = arith.constant 0 : i32
    %c0_i32_1 = arith.constant 0 : i32
    %c0_i32_2 = arith.constant 0 : i32
    return %c0_i32, %arg0, %c0_i32_0, %c0_i32_1 : i32, i32, i32, i32
  }
}

module attributes {stable_mosaic.version = 11 : i64} {
  func.func @kernel(%arg0: i32, %arg1: memref<256x128xbf16, #tpu.memory_space<vmem>>, %arg2: memref<128x128xbf16, #tpu.memory_space<vmem>>, %arg3: memref<1x128xf32, #tpu.memory_space<vmem>>, %arg4: memref<1x128xf32, #tpu.memory_space<vmem>>, %arg5: memref<256x128xbf16, #tpu.memory_space<vmem>>) attributes {dimension_semantics = [#tpu.dimension_semantics<parallel>], iteration_bounds = array<i64: 2>, scalar_prefetch = 0 : i64, scratch_operands = 0 : i64, tpu.core_type = #tpu.core_type<tc>, window_params = [{transform_indices = @transform_0, window_bounds = array<i64: 256, 128>}, {pipeline_mode = #tpu.pipeline_mode<synchronous>, transform_indices = @transform_1, window_bounds = array<i64: 128, 128>}, {pipeline_mode = #tpu.pipeline_mode<synchronous>, transform_indices = @transform_2, window_bounds = array<i64: 1, 128>}, {pipeline_mode = #tpu.pipeline_mode<synchronous>, transform_indices = @transform_3, window_bounds = array<i64: 1, 128>}, {transform_indices = @transform_4, window_bounds = array<i64: 256, 128>}]} {
    %c0 = arith.constant 0 : index
    %c0_0 = arith.constant 0 : index
    %0 = vector.load %arg1[%c0, %c0_0] : memref<256x128xbf16, #tpu.memory_space<vmem>>, vector<256x128xbf16>
    %c0_1 = arith.constant 0 : index
    %c0_2 = arith.constant 0 : index
    %1 = vector.load %arg2[%c0_1, %c0_2] : memref<128x128xbf16, #tpu.memory_space<vmem>>, vector<128x128xbf16>
    %cst = arith.constant dense<0.000000e+00> : vector<256x128xf32>
    %2 = tpu.matmul %0, %1, %cst {dimension_numbers = #tpu.dot_dimension_numbers<[1], [0], [0], [1], [0, 0, 1, 1], [], []>} : vector<256x128xbf16>, vector<128x128xbf16>, vector<256x128xf32> -> vector<256x128xf32>
    %c0_3 = arith.constant 0 : index
    %c0_4 = arith.constant 0 : index
    %3 = vector.load %arg3[%c0_3, %c0_4] : memref<1x128xf32, #tpu.memory_space<vmem>>, vector<1x128xf32>
    %4 = vector.broadcast %3 : vector<1x128xf32> to vector<256x128xf32>
    %5 = arith.mulf %2, %4 : vector<256x128xf32>
    %c0_5 = arith.constant 0 : index
    %c0_6 = arith.constant 0 : index
    %6 = vector.load %arg4[%c0_5, %c0_6] : memref<1x128xf32, #tpu.memory_space<vmem>>, vector<1x128xf32>
    %7 = vector.broadcast %6 : vector<1x128xf32> to vector<256x128xf32>
    %8 = arith.addf %5, %7 : vector<256x128xf32>
    %cst_7 = arith.constant 0.000000e+00 : f32
    %9 = vector.broadcast %cst_7 : f32 to vector<256x128xf32>
    %10 = arith.maximumf %8, %9 : vector<256x128xf32>
    %11 = arith.truncf %10 : vector<256x128xf32> to vector<256x128xbf16>
    %c0_8 = arith.constant 0 : index
    %c0_9 = arith.constant 0 : index
    %12 = vector.load %arg5[%c0_8, %c0_9] : memref<256x128xbf16, #tpu.memory_space<vmem>>, vector<256x128xbf16>
    tpu.vector_store %arg5[%c0_8, %c0_9], %11 {strides = array<i32>} : memref<256x128xbf16, #tpu.memory_space<vmem>>, vector<256x128xbf16>,
    return
  }
  func.func @transform_0(%arg0: i32) -> (i32, i32) {
    %c0_i32 = arith.constant 0 : i32
    %c0_i32_0 = arith.constant 0 : i32
    return %arg0, %c0_i32 : i32, i32
  }
  func.func @transform_1(%arg0: i32) -> (i32, i32) {
    %c0_i32 = arith.constant 0 : i32
    %c0_i32_0 = arith.constant 0 : i32
    %c0_i32_1 = arith.constant 0 : i32
    return %c0_i32, %c0_i32_0 : i32, i32
  }
  func.func @transform_2(%arg0: i32) -> (i32, i32) {
    %c0_i32 = arith.constant 0 : i32
    %c0_i32_0 = arith.constant 0 : i32
    %c0_i32_1 = arith.constant 0 : i32
    return %c0_i32, %c0_i32_0 : i32, i32
  }
  func.func @transform_3(%arg0: i32) -> (i32, i32) {
    %c0_i32 = arith.constant 0 : i32
    %c0_i32_0 = arith.constant 0 : i32
    %c0_i32_1 = arith.constant 0 : i32
    return %c0_i32, %c0_i32_0 : i32, i32
  }
  func.func @transform_4(%arg0: i32) -> (i32, i32) {
    %c0_i32 = arith.constant 0 : i32
    %c0_i32_0 = arith.constant 0 : i32
    return %arg0, %c0_i32 : i32, i32
  }
}

module attributes {stable_mosaic.version = 11 : i64} {
  func.func @kernel(%arg0: i32, %arg1: memref<1x2x18x18x128xbf16, #tpu.memory_space<vmem>>, %arg2: memref<9x128x128xbf16, #tpu.memory_space<vmem>>, %arg3: memref<1x128xf32, #tpu.memory_space<vmem>>, %arg4: memref<1x128xf32, #tpu.memory_space<vmem>>, %arg5: memref<2x8x16x128xbf16, #tpu.memory_space<vmem>>) attributes {dimension_semantics = [#tpu.dimension_semantics<parallel>], iteration_bounds = array<i64: 2>, scalar_prefetch = 0 : i64, scratch_operands = 0 : i64, tpu.core_type = #tpu.core_type<tc>, window_params = [{pipeline_mode = #tpu.pipeline_mode<synchronous>, transform_indices = @transform_0, window_bounds = array<i64: 1, 2, 18, 18, 128>}, {pipeline_mode = #tpu.pipeline_mode<synchronous>, transform_indices = @transform_1, window_bounds = array<i64: 9, 128, 128>}, {pipeline_mode = #tpu.pipeline_mode<synchronous>, transform_indices = @transform_2, window_bounds = array<i64: 1, 128>}, {pipeline_mode = #tpu.pipeline_mode<synchronous>, transform_indices = @transform_3, window_bounds = array<i64: 1, 128>}, {transform_indices = @transform_4, window_bounds = array<i64: 2, 8, 16, 128>}]} {
    %cst = arith.constant 0.000000e+00 : f32
    %0 = vector.broadcast %cst : f32 to vector<256x128xf32>
    %c8_i32 = arith.constant 8 : i32
    %1 = arith.muli %arg0, %c8_i32 : i32
    %c0_i32 = arith.constant 0 : i32
    %2 = arith.addi %c0_i32, %1 : i32
    %c0 = arith.constant 0 : index
    %c0_0 = arith.constant 0 : index
    %3 = arith.index_cast %2 : i32 to index
    %c0_1 = arith.constant 0 : index
    %c0_2 = arith.constant 0 : index
    %4 = vector.load %arg1[%c0, %c0_0, %3, %c0_1, %c0_2] : memref<1x2x18x18x128xbf16, #tpu.memory_space<vmem>>, vector<1x2x8x16x128xbf16>
    %5 = vector.shape_cast %4 : vector<1x2x8x16x128xbf16> to vector<2x8x16x128xbf16>
    %6 = arith.extf %5 : vector<2x8x16x128xbf16> to vector<2x8x16x128xf32>
    %7 = vector.shape_cast %6 : vector<2x8x16x128xf32> to vector<256x128xf32>
    %8 = arith.truncf %7 : vector<256x128xf32> to vector<256x128xbf16>
    %c0_3 = arith.constant 0 : index
    %c0_4 = arith.constant 0 : index
    %c0_5 = arith.constant 0 : index
    %9 = vector.load %arg2[%c0_3, %c0_4, %c0_5] : memref<9x128x128xbf16, #tpu.memory_space<vmem>>, vector<1x128x128xbf16>
    %10 = vector.shape_cast %9 : vector<1x128x128xbf16> to vector<128x128xbf16>
    %cst_6 = arith.constant dense<0.000000e+00> : vector<256x128xf32>
    %11 = tpu.matmul %8, %10, %cst_6 {dimension_numbers = #tpu.dot_dimension_numbers<[1], [0], [0], [1], [0, 0, 1, 1], [], []>} : vector<256x128xbf16>, vector<128x128xbf16>, vector<256x128xf32> -> vector<256x128xf32>
    %12 = arith.addf %0, %11 : vector<256x128xf32>
    %c8_i32_7 = arith.constant 8 : i32
    %13 = arith.muli %arg0, %c8_i32_7 : i32
    %c0_i32_8 = arith.constant 0 : i32
    %14 = arith.addi %c0_i32_8, %13 : i32
    %c0_9 = arith.constant 0 : index
    %c0_10 = arith.constant 0 : index
    %15 = arith.index_cast %14 : i32 to index
    %c1 = arith.constant 1 : index
    %c0_11 = arith.constant 0 : index
    %16 = vector.load %arg1[%c0_9, %c0_10, %15, %c1, %c0_11] : memref<1x2x18x18x128xbf16, #tpu.memory_space<vmem>>, vector<1x2x8x16x128xbf16>
    %17 = vector.shape_cast %16 : vector<1x2x8x16x128xbf16> to vector<2x8x16x128xbf16>
    %18 = arith.extf %17 : vector<2x8x16x128xbf16> to vector<2x8x16x128xf32>
    %19 = vector.shape_cast %18 : vector<2x8x16x128xf32> to vector<256x128xf32>
    %20 = arith.truncf %19 : vector<256x128xf32> to vector<256x128xbf16>
    %c1_12 = arith.constant 1 : index
    %c0_13 = arith.constant 0 : index
    %c0_14 = arith.constant 0 : index
    %21 = vector.load %arg2[%c1_12, %c0_13, %c0_14] : memref<9x128x128xbf16, #tpu.memory_space<vmem>>, vector<1x128x128xbf16>
    %22 = vector.shape_cast %21 : vector<1x128x128xbf16> to vector<128x128xbf16>
    %cst_15 = arith.constant dense<0.000000e+00> : vector<256x128xf32>
    %23 = tpu.matmul %20, %22, %cst_15 {dimension_numbers = #tpu.dot_dimension_numbers<[1], [0], [0], [1], [0, 0, 1, 1], [], []>} : vector<256x128xbf16>, vector<128x128xbf16>, vector<256x128xf32> -> vector<256x128xf32>
    %24 = arith.addf %12, %23 : vector<256x128xf32>
    %c8_i32_16 = arith.constant 8 : i32
    %25 = arith.muli %arg0, %c8_i32_16 : i32
    %c0_i32_17 = arith.constant 0 : i32
    %26 = arith.addi %c0_i32_17, %25 : i32
    %c0_18 = arith.constant 0 : index
    %c0_19 = arith.constant 0 : index
    %27 = arith.index_cast %26 : i32 to index
    %c2 = arith.constant 2 : index
    %c0_20 = arith.constant 0 : index
    %28 = vector.load %arg1[%c0_18, %c0_19, %27, %c2, %c0_20] : memref<1x2x18x18x128xbf16, #tpu.memory_space<vmem>>, vector<1x2x8x16x128xbf16>
    %29 = vector.shape_cast %28 : vector<1x2x8x16x128xbf16> to vector<2x8x16x128xbf16>
    %30 = arith.extf %29 : vector<2x8x16x128xbf16> to vector<2x8x16x128xf32>
    %31 = vector.shape_cast %30 : vector<2x8x16x128xf32> to vector<256x128xf32>
    %32 = arith.truncf %31 : vector<256x128xf32> to vector<256x128xbf16>
    %c2_21 = arith.constant 2 : index
    %c0_22 = arith.constant 0 : index
    %c0_23 = arith.constant 0 : index
    %33 = vector.load %arg2[%c2_21, %c0_22, %c0_23] : memref<9x128x128xbf16, #tpu.memory_space<vmem>>, vector<1x128x128xbf16>
    %34 = vector.shape_cast %33 : vector<1x128x128xbf16> to vector<128x128xbf16>
    %cst_24 = arith.constant dense<0.000000e+00> : vector<256x128xf32>
    %35 = tpu.matmul %32, %34, %cst_24 {dimension_numbers = #tpu.dot_dimension_numbers<[1], [0], [0], [1], [0, 0, 1, 1], [], []>} : vector<256x128xbf16>, vector<128x128xbf16>, vector<256x128xf32> -> vector<256x128xf32>
    %36 = arith.addf %24, %35 : vector<256x128xf32>
    %c8_i32_25 = arith.constant 8 : i32
    %37 = arith.muli %arg0, %c8_i32_25 : i32
    %c1_i32 = arith.constant 1 : i32
    %38 = arith.addi %c1_i32, %37 : i32
    %c0_26 = arith.constant 0 : index
    %c0_27 = arith.constant 0 : index
    %39 = arith.index_cast %38 : i32 to index
    %c0_28 = arith.constant 0 : index
    %c0_29 = arith.constant 0 : index
    %40 = vector.load %arg1[%c0_26, %c0_27, %39, %c0_28, %c0_29] : memref<1x2x18x18x128xbf16, #tpu.memory_space<vmem>>, vector<1x2x8x16x128xbf16>
    %41 = vector.shape_cast %40 : vector<1x2x8x16x128xbf16> to vector<2x8x16x128xbf16>
    %42 = arith.extf %41 : vector<2x8x16x128xbf16> to vector<2x8x16x128xf32>
    %43 = vector.shape_cast %42 : vector<2x8x16x128xf32> to vector<256x128xf32>
    %44 = arith.truncf %43 : vector<256x128xf32> to vector<256x128xbf16>
    %c3 = arith.constant 3 : index
    %c0_30 = arith.constant 0 : index
    %c0_31 = arith.constant 0 : index
    %45 = vector.load %arg2[%c3, %c0_30, %c0_31] : memref<9x128x128xbf16, #tpu.memory_space<vmem>>, vector<1x128x128xbf16>
    %46 = vector.shape_cast %45 : vector<1x128x128xbf16> to vector<128x128xbf16>
    %cst_32 = arith.constant dense<0.000000e+00> : vector<256x128xf32>
    %47 = tpu.matmul %44, %46, %cst_32 {dimension_numbers = #tpu.dot_dimension_numbers<[1], [0], [0], [1], [0, 0, 1, 1], [], []>} : vector<256x128xbf16>, vector<128x128xbf16>, vector<256x128xf32> -> vector<256x128xf32>
    %48 = arith.addf %36, %47 : vector<256x128xf32>
    %c8_i32_33 = arith.constant 8 : i32
    %49 = arith.muli %arg0, %c8_i32_33 : i32
    %c1_i32_34 = arith.constant 1 : i32
    %50 = arith.addi %c1_i32_34, %49 : i32
    %c0_35 = arith.constant 0 : index
    %c0_36 = arith.constant 0 : index
    %51 = arith.index_cast %50 : i32 to index
    %c1_37 = arith.constant 1 : index
    %c0_38 = arith.constant 0 : index
    %52 = vector.load %arg1[%c0_35, %c0_36, %51, %c1_37, %c0_38] : memref<1x2x18x18x128xbf16, #tpu.memory_space<vmem>>, vector<1x2x8x16x128xbf16>
    %53 = vector.shape_cast %52 : vector<1x2x8x16x128xbf16> to vector<2x8x16x128xbf16>
    %54 = arith.extf %53 : vector<2x8x16x128xbf16> to vector<2x8x16x128xf32>
    %55 = vector.shape_cast %54 : vector<2x8x16x128xf32> to vector<256x128xf32>
    %56 = arith.truncf %55 : vector<256x128xf32> to vector<256x128xbf16>
    %c4 = arith.constant 4 : index
    %c0_39 = arith.constant 0 : index
    %c0_40 = arith.constant 0 : index
    %57 = vector.load %arg2[%c4, %c0_39, %c0_40] : memref<9x128x128xbf16, #tpu.memory_space<vmem>>, vector<1x128x128xbf16>
    %58 = vector.shape_cast %57 : vector<1x128x128xbf16> to vector<128x128xbf16>
    %cst_41 = arith.constant dense<0.000000e+00> : vector<256x128xf32>
    %59 = tpu.matmul %56, %58, %cst_41 {dimension_numbers = #tpu.dot_dimension_numbers<[1], [0], [0], [1], [0, 0, 1, 1], [], []>} : vector<256x128xbf16>, vector<128x128xbf16>, vector<256x128xf32> -> vector<256x128xf32>
    %60 = arith.addf %48, %59 : vector<256x128xf32>
    %c8_i32_42 = arith.constant 8 : i32
    %61 = arith.muli %arg0, %c8_i32_42 : i32
    %c1_i32_43 = arith.constant 1 : i32
    %62 = arith.addi %c1_i32_43, %61 : i32
    %c0_44 = arith.constant 0 : index
    %c0_45 = arith.constant 0 : index
    %63 = arith.index_cast %62 : i32 to index
    %c2_46 = arith.constant 2 : index
    %c0_47 = arith.constant 0 : index
    %64 = vector.load %arg1[%c0_44, %c0_45, %63, %c2_46, %c0_47] : memref<1x2x18x18x128xbf16, #tpu.memory_space<vmem>>, vector<1x2x8x16x128xbf16>
    %65 = vector.shape_cast %64 : vector<1x2x8x16x128xbf16> to vector<2x8x16x128xbf16>
    %66 = arith.extf %65 : vector<2x8x16x128xbf16> to vector<2x8x16x128xf32>
    %67 = vector.shape_cast %66 : vector<2x8x16x128xf32> to vector<256x128xf32>
    %68 = arith.truncf %67 : vector<256x128xf32> to vector<256x128xbf16>
    %c5 = arith.constant 5 : index
    %c0_48 = arith.constant 0 : index
    %c0_49 = arith.constant 0 : index
    %69 = vector.load %arg2[%c5, %c0_48, %c0_49] : memref<9x128x128xbf16, #tpu.memory_space<vmem>>, vector<1x128x128xbf16>
    %70 = vector.shape_cast %69 : vector<1x128x128xbf16> to vector<128x128xbf16>
    %cst_50 = arith.constant dense<0.000000e+00> : vector<256x128xf32>
    %71 = tpu.matmul %68, %70, %cst_50 {dimension_numbers = #tpu.dot_dimension_numbers<[1], [0], [0], [1], [0, 0, 1, 1], [], []>} : vector<256x128xbf16>, vector<128x128xbf16>, vector<256x128xf32> -> vector<256x128xf32>
    %72 = arith.addf %60, %71 : vector<256x128xf32>
    %c8_i32_51 = arith.constant 8 : i32
    %73 = arith.muli %arg0, %c8_i32_51 : i32
    %c2_i32 = arith.constant 2 : i32
    %74 = arith.addi %c2_i32, %73 : i32
    %c0_52 = arith.constant 0 : index
    %c0_53 = arith.constant 0 : index
    %75 = arith.index_cast %74 : i32 to index
    %c0_54 = arith.constant 0 : index
    %c0_55 = arith.constant 0 : index
    %76 = vector.load %arg1[%c0_52, %c0_53, %75, %c0_54, %c0_55] : memref<1x2x18x18x128xbf16, #tpu.memory_space<vmem>>, vector<1x2x8x16x128xbf16>
    %77 = vector.shape_cast %76 : vector<1x2x8x16x128xbf16> to vector<2x8x16x128xbf16>
    %78 = arith.extf %77 : vector<2x8x16x128xbf16> to vector<2x8x16x128xf32>
    %79 = vector.shape_cast %78 : vector<2x8x16x128xf32> to vector<256x128xf32>
    %80 = arith.truncf %79 : vector<256x128xf32> to vector<256x128xbf16>
    %c6 = arith.constant 6 : index
    %c0_56 = arith.constant 0 : index
    %c0_57 = arith.constant 0 : index
    %81 = vector.load %arg2[%c6, %c0_56, %c0_57] : memref<9x128x128xbf16, #tpu.memory_space<vmem>>, vector<1x128x128xbf16>
    %82 = vector.shape_cast %81 : vector<1x128x128xbf16> to vector<128x128xbf16>
    %cst_58 = arith.constant dense<0.000000e+00> : vector<256x128xf32>
    %83 = tpu.matmul %80, %82, %cst_58 {dimension_numbers = #tpu.dot_dimension_numbers<[1], [0], [0], [1], [0, 0, 1, 1], [], []>} : vector<256x128xbf16>, vector<128x128xbf16>, vector<256x128xf32> -> vector<256x128xf32>
    %84 = arith.addf %72, %83 : vector<256x128xf32>
    %c8_i32_59 = arith.constant 8 : i32
    %85 = arith.muli %arg0, %c8_i32_59 : i32
    %c2_i32_60 = arith.constant 2 : i32
    %86 = arith.addi %c2_i32_60, %85 : i32
    %c0_61 = arith.constant 0 : index
    %c0_62 = arith.constant 0 : index
    %87 = arith.index_cast %86 : i32 to index
    %c1_63 = arith.constant 1 : index
    %c0_64 = arith.constant 0 : index
    %88 = vector.load %arg1[%c0_61, %c0_62, %87, %c1_63, %c0_64] : memref<1x2x18x18x128xbf16, #tpu.memory_space<vmem>>, vector<1x2x8x16x128xbf16>
    %89 = vector.shape_cast %88 : vector<1x2x8x16x128xbf16> to vector<2x8x16x128xbf16>
    %90 = arith.extf %89 : vector<2x8x16x128xbf16> to vector<2x8x16x128xf32>
    %91 = vector.shape_cast %90 : vector<2x8x16x128xf32> to vector<256x128xf32>
    %92 = arith.truncf %91 : vector<256x128xf32> to vector<256x128xbf16>
    %c7 = arith.constant 7 : index
    %c0_65 = arith.constant 0 : index
    %c0_66 = arith.constant 0 : index
    %93 = vector.load %arg2[%c7, %c0_65, %c0_66] : memref<9x128x128xbf16, #tpu.memory_space<vmem>>, vector<1x128x128xbf16>
    %94 = vector.shape_cast %93 : vector<1x128x128xbf16> to vector<128x128xbf16>
    %cst_67 = arith.constant dense<0.000000e+00> : vector<256x128xf32>
    %95 = tpu.matmul %92, %94, %cst_67 {dimension_numbers = #tpu.dot_dimension_numbers<[1], [0], [0], [1], [0, 0, 1, 1], [], []>} : vector<256x128xbf16>, vector<128x128xbf16>, vector<256x128xf32> -> vector<256x128xf32>
    %96 = arith.addf %84, %95 : vector<256x128xf32>
    %c8_i32_68 = arith.constant 8 : i32
    %97 = arith.muli %arg0, %c8_i32_68 : i32
    %c2_i32_69 = arith.constant 2 : i32
    %98 = arith.addi %c2_i32_69, %97 : i32
    %c0_70 = arith.constant 0 : index
    %c0_71 = arith.constant 0 : index
    %99 = arith.index_cast %98 : i32 to index
    %c2_72 = arith.constant 2 : index
    %c0_73 = arith.constant 0 : index
    %100 = vector.load %arg1[%c0_70, %c0_71, %99, %c2_72, %c0_73] : memref<1x2x18x18x128xbf16, #tpu.memory_space<vmem>>, vector<1x2x8x16x128xbf16>
    %101 = vector.shape_cast %100 : vector<1x2x8x16x128xbf16> to vector<2x8x16x128xbf16>
    %102 = arith.extf %101 : vector<2x8x16x128xbf16> to vector<2x8x16x128xf32>
    %103 = vector.shape_cast %102 : vector<2x8x16x128xf32> to vector<256x128xf32>
    %104 = arith.truncf %103 : vector<256x128xf32> to vector<256x128xbf16>
    %c8 = arith.constant 8 : index
    %c0_74 = arith.constant 0 : index
    %c0_75 = arith.constant 0 : index
    %105 = vector.load %arg2[%c8, %c0_74, %c0_75] : memref<9x128x128xbf16, #tpu.memory_space<vmem>>, vector<1x128x128xbf16>
    %106 = vector.shape_cast %105 : vector<1x128x128xbf16> to vector<128x128xbf16>
    %cst_76 = arith.constant dense<0.000000e+00> : vector<256x128xf32>
    %107 = tpu.matmul %104, %106, %cst_76 {dimension_numbers = #tpu.dot_dimension_numbers<[1], [0], [0], [1], [0, 0, 1, 1], [], []>} : vector<256x128xbf16>, vector<128x128xbf16>, vector<256x128xf32> -> vector<256x128xf32>
    %108 = arith.addf %96, %107 : vector<256x128xf32>
    %c0_77 = arith.constant 0 : index
    %c0_78 = arith.constant 0 : index
    %109 = vector.load %arg3[%c0_77, %c0_78] : memref<1x128xf32, #tpu.memory_space<vmem>>, vector<1x128xf32>
    %110 = vector.broadcast %109 : vector<1x128xf32> to vector<256x128xf32>
    %111 = arith.mulf %108, %110 : vector<256x128xf32>
    %c0_79 = arith.constant 0 : index
    %c0_80 = arith.constant 0 : index
    %112 = vector.load %arg4[%c0_79, %c0_80] : memref<1x128xf32, #tpu.memory_space<vmem>>, vector<1x128xf32>
    %113 = vector.broadcast %112 : vector<1x128xf32> to vector<256x128xf32>
    %114 = arith.addf %111, %113 : vector<256x128xf32>
    %cst_81 = arith.constant 0.000000e+00 : f32
    %115 = vector.broadcast %cst_81 : f32 to vector<256x128xf32>
    %116 = arith.maximumf %114, %115 : vector<256x128xf32>
    %117 = vector.shape_cast %116 : vector<256x128xf32> to vector<2x8x16x128xf32>
    %118 = arith.truncf %117 : vector<2x8x16x128xf32> to vector<2x8x16x128xbf16>
    %c0_82 = arith.constant 0 : index
    %c0_83 = arith.constant 0 : index
    %c0_84 = arith.constant 0 : index
    %c0_85 = arith.constant 0 : index
    %119 = vector.load %arg5[%c0_82, %c0_83, %c0_84, %c0_85] : memref<2x8x16x128xbf16, #tpu.memory_space<vmem>>, vector<2x8x16x128xbf16>
    tpu.vector_store %arg5[%c0_82, %c0_83, %c0_84, %c0_85], %118 {strides = array<i32>} : memref<2x8x16x128xbf16, #tpu.memory_space<vmem>>, vector<2x8x16x128xbf16>,
    return
  }
  func.func @transform_0(%arg0: i32) -> (i32, i32, i32, i32, i32) {
    %c0_i32 = arith.constant 0 : i32
    %c0_i32_0 = arith.constant 0 : i32
    %c0_i32_1 = arith.constant 0 : i32
    %c0_i32_2 = arith.constant 0 : i32
    %c0_i32_3 = arith.constant 0 : i32
    %c0_i32_4 = arith.constant 0 : i32
    return %c0_i32, %c0_i32_0, %c0_i32_1, %c0_i32_2, %c0_i32_3 : i32, i32, i32, i32, i32
  }
  func.func @transform_1(%arg0: i32) -> (i32, i32, i32) {
    %c0_i32 = arith.constant 0 : i32
    %c0_i32_0 = arith.constant 0 : i32
    %c0_i32_1 = arith.constant 0 : i32
    %c0_i32_2 = arith.constant 0 : i32
    return %c0_i32, %c0_i32_0, %c0_i32_1 : i32, i32, i32
  }
  func.func @transform_2(%arg0: i32) -> (i32, i32) {
    %c0_i32 = arith.constant 0 : i32
    %c0_i32_0 = arith.constant 0 : i32
    %c0_i32_1 = arith.constant 0 : i32
    return %c0_i32, %c0_i32_0 : i32, i32
  }
  func.func @transform_3(%arg0: i32) -> (i32, i32) {
    %c0_i32 = arith.constant 0 : i32
    %c0_i32_0 = arith.constant 0 : i32
    %c0_i32_1 = arith.constant 0 : i32
    return %c0_i32, %c0_i32_0 : i32, i32
  }
  func.func @transform_4(%arg0: i32) -> (i32, i32, i32, i32) {
    %c0_i32 = arith.constant 0 : i32
    %c0_i32_0 = arith.constant 0 : i32
    %c0_i32_1 = arith.constant 0 : i32
    %c0_i32_2 = arith.constant 0 : i32
    return %c0_i32, %arg0, %c0_i32_0, %c0_i32_1 : i32, i32, i32, i32
  }
}

module attributes {stable_mosaic.version = 11 : i64} {
  func.func @kernel(%arg0: i32, %arg1: memref<128x128xbf16, #tpu.memory_space<vmem>>, %arg2: memref<128x128xbf16, #tpu.memory_space<vmem>>, %arg3: memref<1x128xf32, #tpu.memory_space<vmem>>, %arg4: memref<1x128xf32, #tpu.memory_space<vmem>>, %arg5: memref<128x128xbf16, #tpu.memory_space<vmem>>) attributes {dimension_semantics = [#tpu.dimension_semantics<parallel>], iteration_bounds = array<i64: 1>, scalar_prefetch = 0 : i64, scratch_operands = 0 : i64, tpu.core_type = #tpu.core_type<tc>, window_params = [{transform_indices = @transform_0, window_bounds = array<i64: 128, 128>}, {pipeline_mode = #tpu.pipeline_mode<synchronous>, transform_indices = @transform_1, window_bounds = array<i64: 128, 128>}, {pipeline_mode = #tpu.pipeline_mode<synchronous>, transform_indices = @transform_2, window_bounds = array<i64: 1, 128>}, {pipeline_mode = #tpu.pipeline_mode<synchronous>, transform_indices = @transform_3, window_bounds = array<i64: 1, 128>}, {transform_indices = @transform_4, window_bounds = array<i64: 128, 128>}]} {
    %c0 = arith.constant 0 : index
    %c0_0 = arith.constant 0 : index
    %0 = vector.load %arg1[%c0, %c0_0] : memref<128x128xbf16, #tpu.memory_space<vmem>>, vector<128x128xbf16>
    %c0_1 = arith.constant 0 : index
    %c0_2 = arith.constant 0 : index
    %1 = vector.load %arg2[%c0_1, %c0_2] : memref<128x128xbf16, #tpu.memory_space<vmem>>, vector<128x128xbf16>
    %cst = arith.constant dense<0.000000e+00> : vector<128x128xf32>
    %2 = tpu.matmul %0, %1, %cst {dimension_numbers = #tpu.dot_dimension_numbers<[1], [0], [0], [1], [0, 0, 1, 1], [], []>} : vector<128x128xbf16>, vector<128x128xbf16>, vector<128x128xf32> -> vector<128x128xf32>
    %c0_3 = arith.constant 0 : index
    %c0_4 = arith.constant 0 : index
    %3 = vector.load %arg3[%c0_3, %c0_4] : memref<1x128xf32, #tpu.memory_space<vmem>>, vector<1x128xf32>
    %4 = vector.broadcast %3 : vector<1x128xf32> to vector<128x128xf32>
    %5 = arith.mulf %2, %4 : vector<128x128xf32>
    %c0_5 = arith.constant 0 : index
    %c0_6 = arith.constant 0 : index
    %6 = vector.load %arg4[%c0_5, %c0_6] : memref<1x128xf32, #tpu.memory_space<vmem>>, vector<1x128xf32>
    %7 = vector.broadcast %6 : vector<1x128xf32> to vector<128x128xf32>
    %8 = arith.addf %5, %7 : vector<128x128xf32>
    %9 = arith.truncf %8 : vector<128x128xf32> to vector<128x128xbf16>
    %c0_7 = arith.constant 0 : index
    %c0_8 = arith.constant 0 : index
    %10 = vector.load %arg5[%c0_7, %c0_8] : memref<128x128xbf16, #tpu.memory_space<vmem>>, vector<128x128xbf16>
    tpu.vector_store %arg5[%c0_7, %c0_8], %9 {strides = array<i32>} : memref<128x128xbf16, #tpu.memory_space<vmem>>, vector<128x128xbf16>,
    return
  }
  func.func @transform_0(%arg0: i32) -> (i32, i32) {
    %c0_i32 = arith.constant 0 : i32
    %c0_i32_0 = arith.constant 0 : i32
    return %arg0, %c0_i32 : i32, i32
  }
  func.func @transform_1(%arg0: i32) -> (i32, i32) {
    %c0_i32 = arith.constant 0 : i32
    %c0_i32_0 = arith.constant 0 : i32
    %c0_i32_1 = arith.constant 0 : i32
    return %c0_i32, %c0_i32_0 : i32, i32
  }
  func.func @transform_2(%arg0: i32) -> (i32, i32) {
    %c0_i32 = arith.constant 0 : i32
    %c0_i32_0 = arith.constant 0 : i32
    %c0_i32_1 = arith.constant 0 : i32
    return %c0_i32, %c0_i32_0 : i32, i32
  }
  func.func @transform_3(%arg0: i32) -> (i32, i32) {
    %c0_i32 = arith.constant 0 : i32
    %c0_i32_0 = arith.constant 0 : i32
    %c0_i32_1 = arith.constant 0 : i32
    return %c0_i32, %c0_i32_0 : i32, i32
  }
  func.func @transform_4(%arg0: i32) -> (i32, i32) {
    %c0_i32 = arith.constant 0 : i32
    %c0_i32_0 = arith.constant 0 : i32
    return %arg0, %c0_i32 : i32, i32
  }
}

module attributes {stable_mosaic.version = 11 : i64} {
  func.func @kernel(%arg0: i32, %arg1: memref<128x128xbf16, #tpu.memory_space<vmem>>, %arg2: memref<128x128xbf16, #tpu.memory_space<vmem>>, %arg3: memref<1x128xf32, #tpu.memory_space<vmem>>, %arg4: memref<1x128xf32, #tpu.memory_space<vmem>>, %arg5: memref<128x128xbf16, #tpu.memory_space<vmem>>, %arg6: memref<128x128xbf16, #tpu.memory_space<vmem>>) attributes {dimension_semantics = [#tpu.dimension_semantics<parallel>], iteration_bounds = array<i64: 1>, scalar_prefetch = 0 : i64, scratch_operands = 0 : i64, tpu.core_type = #tpu.core_type<tc>, window_params = [{transform_indices = @transform_0, window_bounds = array<i64: 128, 128>}, {pipeline_mode = #tpu.pipeline_mode<synchronous>, transform_indices = @transform_1, window_bounds = array<i64: 128, 128>}, {pipeline_mode = #tpu.pipeline_mode<synchronous>, transform_indices = @transform_2, window_bounds = array<i64: 1, 128>}, {pipeline_mode = #tpu.pipeline_mode<synchronous>, transform_indices = @transform_3, window_bounds = array<i64: 1, 128>}, {transform_indices = @transform_4, window_bounds = array<i64: 128, 128>}, {transform_indices = @transform_5, window_bounds = array<i64: 128, 128>}]} {
    %c0 = arith.constant 0 : index
    %c0_0 = arith.constant 0 : index
    %0 = vector.load %arg1[%c0, %c0_0] : memref<128x128xbf16, #tpu.memory_space<vmem>>, vector<128x128xbf16>
    %c0_1 = arith.constant 0 : index
    %c0_2 = arith.constant 0 : index
    %1 = vector.load %arg2[%c0_1, %c0_2] : memref<128x128xbf16, #tpu.memory_space<vmem>>, vector<128x128xbf16>
    %cst = arith.constant dense<0.000000e+00> : vector<128x128xf32>
    %2 = tpu.matmul %0, %1, %cst {dimension_numbers = #tpu.dot_dimension_numbers<[1], [0], [0], [1], [0, 0, 1, 1], [], []>} : vector<128x128xbf16>, vector<128x128xbf16>, vector<128x128xf32> -> vector<128x128xf32>
    %c0_3 = arith.constant 0 : index
    %c0_4 = arith.constant 0 : index
    %3 = vector.load %arg3[%c0_3, %c0_4] : memref<1x128xf32, #tpu.memory_space<vmem>>, vector<1x128xf32>
    %4 = vector.broadcast %3 : vector<1x128xf32> to vector<128x128xf32>
    %5 = arith.mulf %2, %4 : vector<128x128xf32>
    %c0_5 = arith.constant 0 : index
    %c0_6 = arith.constant 0 : index
    %6 = vector.load %arg4[%c0_5, %c0_6] : memref<1x128xf32, #tpu.memory_space<vmem>>, vector<1x128xf32>
    %7 = vector.broadcast %6 : vector<1x128xf32> to vector<128x128xf32>
    %8 = arith.addf %5, %7 : vector<128x128xf32>
    %c0_7 = arith.constant 0 : index
    %c0_8 = arith.constant 0 : index
    %9 = vector.load %arg5[%c0_7, %c0_8] : memref<128x128xbf16, #tpu.memory_space<vmem>>, vector<128x128xbf16>
    %10 = arith.extf %9 : vector<128x128xbf16> to vector<128x128xf32>
    %11 = arith.addf %8, %10 : vector<128x128xf32>
    %cst_9 = arith.constant 0.000000e+00 : f32
    %12 = vector.broadcast %cst_9 : f32 to vector<128x128xf32>
    %13 = arith.maximumf %11, %12 : vector<128x128xf32>
    %14 = arith.truncf %13 : vector<128x128xf32> to vector<128x128xbf16>
    %c0_10 = arith.constant 0 : index
    %c0_11 = arith.constant 0 : index
    %15 = vector.load %arg6[%c0_10, %c0_11] : memref<128x128xbf16, #tpu.memory_space<vmem>>, vector<128x128xbf16>
    tpu.vector_store %arg6[%c0_10, %c0_11], %14 {strides = array<i32>} : memref<128x128xbf16, #tpu.memory_space<vmem>>, vector<128x128xbf16>,
    return
  }
  func.func @transform_0(%arg0: i32) -> (i32, i32) {
    %c0_i32 = arith.constant 0 : i32
    %c0_i32_0 = arith.constant 0 : i32
    return %arg0, %c0_i32 : i32, i32
  }
  func.func @transform_1(%arg0: i32) -> (i32, i32) {
    %c0_i32 = arith.constant 0 : i32
    %c0_i32_0 = arith.constant 0 : i32
    %c0_i32_1 = arith.constant 0 : i32
    return %c0_i32, %c0_i32_0 : i32, i32
  }
  func.func @transform_2(%arg0: i32) -> (i32, i32) {
    %c0_i32 = arith.constant 0 : i32
    %c0_i32_0 = arith.constant 0 : i32
    %c0_i32_1 = arith.constant 0 : i32
    return %c0_i32, %c0_i32_0 : i32, i32
  }
  func.func @transform_3(%arg0: i32) -> (i32, i32) {
    %c0_i32 = arith.constant 0 : i32
    %c0_i32_0 = arith.constant 0 : i32
    %c0_i32_1 = arith.constant 0 : i32
    return %c0_i32, %c0_i32_0 : i32, i32
  }
  func.func @transform_4(%arg0: i32) -> (i32, i32) {
    %c0_i32 = arith.constant 0 : i32
    %c0_i32_0 = arith.constant 0 : i32
    return %arg0, %c0_i32 : i32, i32
  }
  func.func @transform_5(%arg0: i32) -> (i32, i32) {
    %c0_i32 = arith.constant 0 : i32
    %c0_i32_0 = arith.constant 0 : i32
    return %arg0, %c0_i32 : i32, i32
  }
}

module attributes {stable_mosaic.version = 11 : i64} {
  func.func @kernel(%arg0: i32, %arg1: memref<1x2x10x10x128xbf16, #tpu.memory_space<vmem>>, %arg2: memref<9x128x128xbf16, #tpu.memory_space<vmem>>, %arg3: memref<1x128xf32, #tpu.memory_space<vmem>>, %arg4: memref<1x128xf32, #tpu.memory_space<vmem>>, %arg5: memref<2x8x8x128xbf16, #tpu.memory_space<vmem>>) attributes {dimension_semantics = [#tpu.dimension_semantics<parallel>], iteration_bounds = array<i64: 1>, scalar_prefetch = 0 : i64, scratch_operands = 0 : i64, tpu.core_type = #tpu.core_type<tc>, window_params = [{pipeline_mode = #tpu.pipeline_mode<synchronous>, transform_indices = @transform_0, window_bounds = array<i64: 1, 2, 10, 10, 128>}, {pipeline_mode = #tpu.pipeline_mode<synchronous>, transform_indices = @transform_1, window_bounds = array<i64: 9, 128, 128>}, {pipeline_mode = #tpu.pipeline_mode<synchronous>, transform_indices = @transform_2, window_bounds = array<i64: 1, 128>}, {pipeline_mode = #tpu.pipeline_mode<synchronous>, transform_indices = @transform_3, window_bounds = array<i64: 1, 128>}, {transform_indices = @transform_4, window_bounds = array<i64: 2, 8, 8, 128>}]} {
    %cst = arith.constant 0.000000e+00 : f32
    %0 = vector.broadcast %cst : f32 to vector<128x128xf32>
    %c8_i32 = arith.constant 8 : i32
    %1 = arith.muli %arg0, %c8_i32 : i32
    %c0_i32 = arith.constant 0 : i32
    %2 = arith.addi %c0_i32, %1 : i32
    %c0 = arith.constant 0 : index
    %c0_0 = arith.constant 0 : index
    %3 = arith.index_cast %2 : i32 to index
    %c0_1 = arith.constant 0 : index
    %c0_2 = arith.constant 0 : index
    %4 = vector.load %arg1[%c0, %c0_0, %3, %c0_1, %c0_2] : memref<1x2x10x10x128xbf16, #tpu.memory_space<vmem>>, vector<1x2x8x8x128xbf16>
    %5 = vector.shape_cast %4 : vector<1x2x8x8x128xbf16> to vector<2x8x8x128xbf16>
    %6 = arith.extf %5 : vector<2x8x8x128xbf16> to vector<2x8x8x128xf32>
    %7 = vector.shape_cast %6 : vector<2x8x8x128xf32> to vector<128x128xf32>
    %8 = arith.truncf %7 : vector<128x128xf32> to vector<128x128xbf16>
    %c0_3 = arith.constant 0 : index
    %c0_4 = arith.constant 0 : index
    %c0_5 = arith.constant 0 : index
    %9 = vector.load %arg2[%c0_3, %c0_4, %c0_5] : memref<9x128x128xbf16, #tpu.memory_space<vmem>>, vector<1x128x128xbf16>
    %10 = vector.shape_cast %9 : vector<1x128x128xbf16> to vector<128x128xbf16>
    %cst_6 = arith.constant dense<0.000000e+00> : vector<128x128xf32>
    %11 = tpu.matmul %8, %10, %cst_6 {dimension_numbers = #tpu.dot_dimension_numbers<[1], [0], [0], [1], [0, 0, 1, 1], [], []>} : vector<128x128xbf16>, vector<128x128xbf16>, vector<128x128xf32> -> vector<128x128xf32>
    %12 = arith.addf %0, %11 : vector<128x128xf32>
    %c8_i32_7 = arith.constant 8 : i32
    %13 = arith.muli %arg0, %c8_i32_7 : i32
    %c0_i32_8 = arith.constant 0 : i32
    %14 = arith.addi %c0_i32_8, %13 : i32
    %c0_9 = arith.constant 0 : index
    %c0_10 = arith.constant 0 : index
    %15 = arith.index_cast %14 : i32 to index
    %c1 = arith.constant 1 : index
    %c0_11 = arith.constant 0 : index
    %16 = vector.load %arg1[%c0_9, %c0_10, %15, %c1, %c0_11] : memref<1x2x10x10x128xbf16, #tpu.memory_space<vmem>>, vector<1x2x8x8x128xbf16>
    %17 = vector.shape_cast %16 : vector<1x2x8x8x128xbf16> to vector<2x8x8x128xbf16>
    %18 = arith.extf %17 : vector<2x8x8x128xbf16> to vector<2x8x8x128xf32>
    %19 = vector.shape_cast %18 : vector<2x8x8x128xf32> to vector<128x128xf32>
    %20 = arith.truncf %19 : vector<128x128xf32> to vector<128x128xbf16>
    %c1_12 = arith.constant 1 : index
    %c0_13 = arith.constant 0 : index
    %c0_14 = arith.constant 0 : index
    %21 = vector.load %arg2[%c1_12, %c0_13, %c0_14] : memref<9x128x128xbf16, #tpu.memory_space<vmem>>, vector<1x128x128xbf16>
    %22 = vector.shape_cast %21 : vector<1x128x128xbf16> to vector<128x128xbf16>
    %cst_15 = arith.constant dense<0.000000e+00> : vector<128x128xf32>
    %23 = tpu.matmul %20, %22, %cst_15 {dimension_numbers = #tpu.dot_dimension_numbers<[1], [0], [0], [1], [0, 0, 1, 1], [], []>} : vector<128x128xbf16>, vector<128x128xbf16>, vector<128x128xf32> -> vector<128x128xf32>
    %24 = arith.addf %12, %23 : vector<128x128xf32>
    %c8_i32_16 = arith.constant 8 : i32
    %25 = arith.muli %arg0, %c8_i32_16 : i32
    %c0_i32_17 = arith.constant 0 : i32
    %26 = arith.addi %c0_i32_17, %25 : i32
    %c0_18 = arith.constant 0 : index
    %c0_19 = arith.constant 0 : index
    %27 = arith.index_cast %26 : i32 to index
    %c2 = arith.constant 2 : index
    %c0_20 = arith.constant 0 : index
    %28 = vector.load %arg1[%c0_18, %c0_19, %27, %c2, %c0_20] : memref<1x2x10x10x128xbf16, #tpu.memory_space<vmem>>, vector<1x2x8x8x128xbf16>
    %29 = vector.shape_cast %28 : vector<1x2x8x8x128xbf16> to vector<2x8x8x128xbf16>
    %30 = arith.extf %29 : vector<2x8x8x128xbf16> to vector<2x8x8x128xf32>
    %31 = vector.shape_cast %30 : vector<2x8x8x128xf32> to vector<128x128xf32>
    %32 = arith.truncf %31 : vector<128x128xf32> to vector<128x128xbf16>
    %c2_21 = arith.constant 2 : index
    %c0_22 = arith.constant 0 : index
    %c0_23 = arith.constant 0 : index
    %33 = vector.load %arg2[%c2_21, %c0_22, %c0_23] : memref<9x128x128xbf16, #tpu.memory_space<vmem>>, vector<1x128x128xbf16>
    %34 = vector.shape_cast %33 : vector<1x128x128xbf16> to vector<128x128xbf16>
    %cst_24 = arith.constant dense<0.000000e+00> : vector<128x128xf32>
    %35 = tpu.matmul %32, %34, %cst_24 {dimension_numbers = #tpu.dot_dimension_numbers<[1], [0], [0], [1], [0, 0, 1, 1], [], []>} : vector<128x128xbf16>, vector<128x128xbf16>, vector<128x128xf32> -> vector<128x128xf32>
    %36 = arith.addf %24, %35 : vector<128x128xf32>
    %c8_i32_25 = arith.constant 8 : i32
    %37 = arith.muli %arg0, %c8_i32_25 : i32
    %c1_i32 = arith.constant 1 : i32
    %38 = arith.addi %c1_i32, %37 : i32
    %c0_26 = arith.constant 0 : index
    %c0_27 = arith.constant 0 : index
    %39 = arith.index_cast %38 : i32 to index
    %c0_28 = arith.constant 0 : index
    %c0_29 = arith.constant 0 : index
    %40 = vector.load %arg1[%c0_26, %c0_27, %39, %c0_28, %c0_29] : memref<1x2x10x10x128xbf16, #tpu.memory_space<vmem>>, vector<1x2x8x8x128xbf16>
    %41 = vector.shape_cast %40 : vector<1x2x8x8x128xbf16> to vector<2x8x8x128xbf16>
    %42 = arith.extf %41 : vector<2x8x8x128xbf16> to vector<2x8x8x128xf32>
    %43 = vector.shape_cast %42 : vector<2x8x8x128xf32> to vector<128x128xf32>
    %44 = arith.truncf %43 : vector<128x128xf32> to vector<128x128xbf16>
    %c3 = arith.constant 3 : index
    %c0_30 = arith.constant 0 : index
    %c0_31 = arith.constant 0 : index
    %45 = vector.load %arg2[%c3, %c0_30, %c0_31] : memref<9x128x128xbf16, #tpu.memory_space<vmem>>, vector<1x128x128xbf16>
    %46 = vector.shape_cast %45 : vector<1x128x128xbf16> to vector<128x128xbf16>
    %cst_32 = arith.constant dense<0.000000e+00> : vector<128x128xf32>
    %47 = tpu.matmul %44, %46, %cst_32 {dimension_numbers = #tpu.dot_dimension_numbers<[1], [0], [0], [1], [0, 0, 1, 1], [], []>} : vector<128x128xbf16>, vector<128x128xbf16>, vector<128x128xf32> -> vector<128x128xf32>
    %48 = arith.addf %36, %47 : vector<128x128xf32>
    %c8_i32_33 = arith.constant 8 : i32
    %49 = arith.muli %arg0, %c8_i32_33 : i32
    %c1_i32_34 = arith.constant 1 : i32
    %50 = arith.addi %c1_i32_34, %49 : i32
    %c0_35 = arith.constant 0 : index
    %c0_36 = arith.constant 0 : index
    %51 = arith.index_cast %50 : i32 to index
    %c1_37 = arith.constant 1 : index
    %c0_38 = arith.constant 0 : index
    %52 = vector.load %arg1[%c0_35, %c0_36, %51, %c1_37, %c0_38] : memref<1x2x10x10x128xbf16, #tpu.memory_space<vmem>>, vector<1x2x8x8x128xbf16>
    %53 = vector.shape_cast %52 : vector<1x2x8x8x128xbf16> to vector<2x8x8x128xbf16>
    %54 = arith.extf %53 : vector<2x8x8x128xbf16> to vector<2x8x8x128xf32>
    %55 = vector.shape_cast %54 : vector<2x8x8x128xf32> to vector<128x128xf32>
    %56 = arith.truncf %55 : vector<128x128xf32> to vector<128x128xbf16>
    %c4 = arith.constant 4 : index
    %c0_39 = arith.constant 0 : index
    %c0_40 = arith.constant 0 : index
    %57 = vector.load %arg2[%c4, %c0_39, %c0_40] : memref<9x128x128xbf16, #tpu.memory_space<vmem>>, vector<1x128x128xbf16>
    %58 = vector.shape_cast %57 : vector<1x128x128xbf16> to vector<128x128xbf16>
    %cst_41 = arith.constant dense<0.000000e+00> : vector<128x128xf32>
    %59 = tpu.matmul %56, %58, %cst_41 {dimension_numbers = #tpu.dot_dimension_numbers<[1], [0], [0], [1], [0, 0, 1, 1], [], []>} : vector<128x128xbf16>, vector<128x128xbf16>, vector<128x128xf32> -> vector<128x128xf32>
    %60 = arith.addf %48, %59 : vector<128x128xf32>
    %c8_i32_42 = arith.constant 8 : i32
    %61 = arith.muli %arg0, %c8_i32_42 : i32
    %c1_i32_43 = arith.constant 1 : i32
    %62 = arith.addi %c1_i32_43, %61 : i32
    %c0_44 = arith.constant 0 : index
    %c0_45 = arith.constant 0 : index
    %63 = arith.index_cast %62 : i32 to index
    %c2_46 = arith.constant 2 : index
    %c0_47 = arith.constant 0 : index
    %64 = vector.load %arg1[%c0_44, %c0_45, %63, %c2_46, %c0_47] : memref<1x2x10x10x128xbf16, #tpu.memory_space<vmem>>, vector<1x2x8x8x128xbf16>
    %65 = vector.shape_cast %64 : vector<1x2x8x8x128xbf16> to vector<2x8x8x128xbf16>
    %66 = arith.extf %65 : vector<2x8x8x128xbf16> to vector<2x8x8x128xf32>
    %67 = vector.shape_cast %66 : vector<2x8x8x128xf32> to vector<128x128xf32>
    %68 = arith.truncf %67 : vector<128x128xf32> to vector<128x128xbf16>
    %c5 = arith.constant 5 : index
    %c0_48 = arith.constant 0 : index
    %c0_49 = arith.constant 0 : index
    %69 = vector.load %arg2[%c5, %c0_48, %c0_49] : memref<9x128x128xbf16, #tpu.memory_space<vmem>>, vector<1x128x128xbf16>
    %70 = vector.shape_cast %69 : vector<1x128x128xbf16> to vector<128x128xbf16>
    %cst_50 = arith.constant dense<0.000000e+00> : vector<128x128xf32>
    %71 = tpu.matmul %68, %70, %cst_50 {dimension_numbers = #tpu.dot_dimension_numbers<[1], [0], [0], [1], [0, 0, 1, 1], [], []>} : vector<128x128xbf16>, vector<128x128xbf16>, vector<128x128xf32> -> vector<128x128xf32>
    %72 = arith.addf %60, %71 : vector<128x128xf32>
    %c8_i32_51 = arith.constant 8 : i32
    %73 = arith.muli %arg0, %c8_i32_51 : i32
    %c2_i32 = arith.constant 2 : i32
    %74 = arith.addi %c2_i32, %73 : i32
    %c0_52 = arith.constant 0 : index
    %c0_53 = arith.constant 0 : index
    %75 = arith.index_cast %74 : i32 to index
    %c0_54 = arith.constant 0 : index
    %c0_55 = arith.constant 0 : index
    %76 = vector.load %arg1[%c0_52, %c0_53, %75, %c0_54, %c0_55] : memref<1x2x10x10x128xbf16, #tpu.memory_space<vmem>>, vector<1x2x8x8x128xbf16>
    %77 = vector.shape_cast %76 : vector<1x2x8x8x128xbf16> to vector<2x8x8x128xbf16>
    %78 = arith.extf %77 : vector<2x8x8x128xbf16> to vector<2x8x8x128xf32>
    %79 = vector.shape_cast %78 : vector<2x8x8x128xf32> to vector<128x128xf32>
    %80 = arith.truncf %79 : vector<128x128xf32> to vector<128x128xbf16>
    %c6 = arith.constant 6 : index
    %c0_56 = arith.constant 0 : index
    %c0_57 = arith.constant 0 : index
    %81 = vector.load %arg2[%c6, %c0_56, %c0_57] : memref<9x128x128xbf16, #tpu.memory_space<vmem>>, vector<1x128x128xbf16>
    %82 = vector.shape_cast %81 : vector<1x128x128xbf16> to vector<128x128xbf16>
    %cst_58 = arith.constant dense<0.000000e+00> : vector<128x128xf32>
    %83 = tpu.matmul %80, %82, %cst_58 {dimension_numbers = #tpu.dot_dimension_numbers<[1], [0], [0], [1], [0, 0, 1, 1], [], []>} : vector<128x128xbf16>, vector<128x128xbf16>, vector<128x128xf32> -> vector<128x128xf32>
    %84 = arith.addf %72, %83 : vector<128x128xf32>
    %c8_i32_59 = arith.constant 8 : i32
    %85 = arith.muli %arg0, %c8_i32_59 : i32
    %c2_i32_60 = arith.constant 2 : i32
    %86 = arith.addi %c2_i32_60, %85 : i32
    %c0_61 = arith.constant 0 : index
    %c0_62 = arith.constant 0 : index
    %87 = arith.index_cast %86 : i32 to index
    %c1_63 = arith.constant 1 : index
    %c0_64 = arith.constant 0 : index
    %88 = vector.load %arg1[%c0_61, %c0_62, %87, %c1_63, %c0_64] : memref<1x2x10x10x128xbf16, #tpu.memory_space<vmem>>, vector<1x2x8x8x128xbf16>
    %89 = vector.shape_cast %88 : vector<1x2x8x8x128xbf16> to vector<2x8x8x128xbf16>
    %90 = arith.extf %89 : vector<2x8x8x128xbf16> to vector<2x8x8x128xf32>
    %91 = vector.shape_cast %90 : vector<2x8x8x128xf32> to vector<128x128xf32>
    %92 = arith.truncf %91 : vector<128x128xf32> to vector<128x128xbf16>
    %c7 = arith.constant 7 : index
    %c0_65 = arith.constant 0 : index
    %c0_66 = arith.constant 0 : index
    %93 = vector.load %arg2[%c7, %c0_65, %c0_66] : memref<9x128x128xbf16, #tpu.memory_space<vmem>>, vector<1x128x128xbf16>
    %94 = vector.shape_cast %93 : vector<1x128x128xbf16> to vector<128x128xbf16>
    %cst_67 = arith.constant dense<0.000000e+00> : vector<128x128xf32>
    %95 = tpu.matmul %92, %94, %cst_67 {dimension_numbers = #tpu.dot_dimension_numbers<[1], [0], [0], [1], [0, 0, 1, 1], [], []>} : vector<128x128xbf16>, vector<128x128xbf16>, vector<128x128xf32> -> vector<128x128xf32>
    %96 = arith.addf %84, %95 : vector<128x128xf32>
    %c8_i32_68 = arith.constant 8 : i32
    %97 = arith.muli %arg0, %c8_i32_68 : i32
    %c2_i32_69 = arith.constant 2 : i32
    %98 = arith.addi %c2_i32_69, %97 : i32
    %c0_70 = arith.constant 0 : index
    %c0_71 = arith.constant 0 : index
    %99 = arith.index_cast %98 : i32 to index
    %c2_72 = arith.constant 2 : index
    %c0_73 = arith.constant 0 : index
    %100 = vector.load %arg1[%c0_70, %c0_71, %99, %c2_72, %c0_73] : memref<1x2x10x10x128xbf16, #tpu.memory_space<vmem>>, vector<1x2x8x8x128xbf16>
    %101 = vector.shape_cast %100 : vector<1x2x8x8x128xbf16> to vector<2x8x8x128xbf16>
    %102 = arith.extf %101 : vector<2x8x8x128xbf16> to vector<2x8x8x128xf32>
    %103 = vector.shape_cast %102 : vector<2x8x8x128xf32> to vector<128x128xf32>
    %104 = arith.truncf %103 : vector<128x128xf32> to vector<128x128xbf16>
    %c8 = arith.constant 8 : index
    %c0_74 = arith.constant 0 : index
    %c0_75 = arith.constant 0 : index
    %105 = vector.load %arg2[%c8, %c0_74, %c0_75] : memref<9x128x128xbf16, #tpu.memory_space<vmem>>, vector<1x128x128xbf16>
    %106 = vector.shape_cast %105 : vector<1x128x128xbf16> to vector<128x128xbf16>
    %cst_76 = arith.constant dense<0.000000e+00> : vector<128x128xf32>
    %107 = tpu.matmul %104, %106, %cst_76 {dimension_numbers = #tpu.dot_dimension_numbers<[1], [0], [0], [1], [0, 0, 1, 1], [], []>} : vector<128x128xbf16>, vector<128x128xbf16>, vector<128x128xf32> -> vector<128x128xf32>
    %108 = arith.addf %96, %107 : vector<128x128xf32>
    %c0_77 = arith.constant 0 : index
    %c0_78 = arith.constant 0 : index
    %109 = vector.load %arg3[%c0_77, %c0_78] : memref<1x128xf32, #tpu.memory_space<vmem>>, vector<1x128xf32>
    %110 = vector.broadcast %109 : vector<1x128xf32> to vector<128x128xf32>
    %111 = arith.mulf %108, %110 : vector<128x128xf32>
    %c0_79 = arith.constant 0 : index
    %c0_80 = arith.constant 0 : index
    %112 = vector.load %arg4[%c0_79, %c0_80] : memref<1x128xf32, #tpu.memory_space<vmem>>, vector<1x128xf32>
    %113 = vector.broadcast %112 : vector<1x128xf32> to vector<128x128xf32>
    %114 = arith.addf %111, %113 : vector<128x128xf32>
    %cst_81 = arith.constant 0.000000e+00 : f32
    %115 = vector.broadcast %cst_81 : f32 to vector<128x128xf32>
    %116 = arith.maximumf %114, %115 : vector<128x128xf32>
    %117 = vector.shape_cast %116 : vector<128x128xf32> to vector<2x8x8x128xf32>
    %118 = arith.truncf %117 : vector<2x8x8x128xf32> to vector<2x8x8x128xbf16>
    %c0_82 = arith.constant 0 : index
    %c0_83 = arith.constant 0 : index
    %c0_84 = arith.constant 0 : index
    %c0_85 = arith.constant 0 : index
    %119 = vector.load %arg5[%c0_82, %c0_83, %c0_84, %c0_85] : memref<2x8x8x128xbf16, #tpu.memory_space<vmem>>, vector<2x8x8x128xbf16>
    tpu.vector_store %arg5[%c0_82, %c0_83, %c0_84, %c0_85], %118 {strides = array<i32>} : memref<2x8x8x128xbf16, #tpu.memory_space<vmem>>, vector<2x8x8x128xbf16>,
    return
  }
  func.func @transform_0(%arg0: i32) -> (i32, i32, i32, i32, i32) {
    %c0_i32 = arith.constant 0 : i32
    %c0_i32_0 = arith.constant 0 : i32
    %c0_i32_1 = arith.constant 0 : i32
    %c0_i32_2 = arith.constant 0 : i32
    %c0_i32_3 = arith.constant 0 : i32
    %c0_i32_4 = arith.constant 0 : i32
    return %c0_i32, %c0_i32_0, %c0_i32_1, %c0_i32_2, %c0_i32_3 : i32, i32, i32, i32, i32
  }
  func.func @transform_1(%arg0: i32) -> (i32, i32, i32) {
    %c0_i32 = arith.constant 0 : i32
    %c0_i32_0 = arith.constant 0 : i32
    %c0_i32_1 = arith.constant 0 : i32
    %c0_i32_2 = arith.constant 0 : i32
    return %c0_i32, %c0_i32_0, %c0_i32_1 : i32, i32, i32
  }
  func.func @transform_2(%arg0: i32) -> (i32, i32) {
    %c0_i32 = arith.constant 0 : i32
    %c0_i32_0 = arith.constant 0 : i32
    %c0_i32_1 = arith.constant 0 : i32
    return %c0_i32, %c0_i32_0 : i32, i32
  }
  func.func @transform_3(%arg0: i32) -> (i32, i32) {
    %c0_i32 = arith.constant 0 : i32
    %c0_i32_0 = arith.constant 0 : i32
    %c0_i32_1 = arith.constant 0 : i32
    return %c0_i32, %c0_i32_0 : i32, i32
  }
  func.func @transform_4(%arg0: i32) -> (i32, i32, i32, i32) {
    %c0_i32 = arith.constant 0 : i32
    %c0_i32_0 = arith.constant 0 : i32
    %c0_i32_1 = arith.constant 0 : i32
    %c0_i32_2 = arith.constant 0 : i32
    return %c0_i32, %arg0, %c0_i32_0, %c0_i32_1 : i32, i32, i32, i32
  }
}

module attributes {stable_mosaic.version = 11 : i64} {
  func.func @kernel(%arg0: i32, %arg1: memref<8x128xbf16, #tpu.memory_space<vmem>>, %arg2: memref<128x128xbf16, #tpu.memory_space<vmem>>, %arg3: memref<1x128xf32, #tpu.memory_space<vmem>>, %arg4: memref<1x128xf32, #tpu.memory_space<vmem>>, %arg5: memref<8x128xbf16, #tpu.memory_space<vmem>>) attributes {dimension_semantics = [#tpu.dimension_semantics<parallel>], iteration_bounds = array<i64: 1>, scalar_prefetch = 0 : i64, scratch_operands = 0 : i64, tpu.core_type = #tpu.core_type<tc>, window_params = [{transform_indices = @transform_0, window_bounds = array<i64: 8, 128>}, {pipeline_mode = #tpu.pipeline_mode<synchronous>, transform_indices = @transform_1, window_bounds = array<i64: 128, 128>}, {pipeline_mode = #tpu.pipeline_mode<synchronous>, transform_indices = @transform_2, window_bounds = array<i64: 1, 128>}, {pipeline_mode = #tpu.pipeline_mode<synchronous>, transform_indices = @transform_3, window_bounds = array<i64: 1, 128>}, {transform_indices = @transform_4, window_bounds = array<i64: 8, 128>}]} {
    %c0 = arith.constant 0 : index
    %c0_0 = arith.constant 0 : index
    %0 = vector.load %arg1[%c0, %c0_0] : memref<8x128xbf16, #tpu.memory_space<vmem>>, vector<8x128xbf16>
    %c0_1 = arith.constant 0 : index
    %c0_2 = arith.constant 0 : index
    %1 = vector.load %arg2[%c0_1, %c0_2] : memref<128x128xbf16, #tpu.memory_space<vmem>>, vector<128x128xbf16>
    %cst = arith.constant dense<0.000000e+00> : vector<8x128xf32>
    %2 = tpu.matmul %0, %1, %cst {dimension_numbers = #tpu.dot_dimension_numbers<[1], [0], [0], [1], [0, 0, 1, 1], [], []>} : vector<8x128xbf16>, vector<128x128xbf16>, vector<8x128xf32> -> vector<8x128xf32>
    %c0_3 = arith.constant 0 : index
    %c0_4 = arith.constant 0 : index
    %3 = vector.load %arg3[%c0_3, %c0_4] : memref<1x128xf32, #tpu.memory_space<vmem>>, vector<1x128xf32>
    %4 = vector.broadcast %3 : vector<1x128xf32> to vector<8x128xf32>
    %5 = arith.mulf %2, %4 : vector<8x128xf32>
    %c0_5 = arith.constant 0 : index
    %c0_6 = arith.constant 0 : index
    %6 = vector.load %arg4[%c0_5, %c0_6] : memref<1x128xf32, #tpu.memory_space<vmem>>, vector<1x128xf32>
    %7 = vector.broadcast %6 : vector<1x128xf32> to vector<8x128xf32>
    %8 = arith.addf %5, %7 : vector<8x128xf32>
    %9 = arith.truncf %8 : vector<8x128xf32> to vector<8x128xbf16>
    %c0_7 = arith.constant 0 : index
    %c0_8 = arith.constant 0 : index
    %10 = vector.load %arg5[%c0_7, %c0_8] : memref<8x128xbf16, #tpu.memory_space<vmem>>, vector<8x128xbf16>
    tpu.vector_store %arg5[%c0_7, %c0_8], %9 {strides = array<i32>} : memref<8x128xbf16, #tpu.memory_space<vmem>>, vector<8x128xbf16>,
    return
  }
  func.func @transform_0(%arg0: i32) -> (i32, i32) {
    %c0_i32 = arith.constant 0 : i32
    %c0_i32_0 = arith.constant 0 : i32
    return %arg0, %c0_i32 : i32, i32
  }
  func.func @transform_1(%arg0: i32) -> (i32, i32) {
    %c0_i32 = arith.constant 0 : i32
    %c0_i32_0 = arith.constant 0 : i32
    %c0_i32_1 = arith.constant 0 : i32
    return %c0_i32, %c0_i32_0 : i32, i32
  }
  func.func @transform_2(%arg0: i32) -> (i32, i32) {
    %c0_i32 = arith.constant 0 : i32
    %c0_i32_0 = arith.constant 0 : i32
    %c0_i32_1 = arith.constant 0 : i32
    return %c0_i32, %c0_i32_0 : i32, i32
  }
  func.func @transform_3(%arg0: i32) -> (i32, i32) {
    %c0_i32 = arith.constant 0 : i32
    %c0_i32_0 = arith.constant 0 : i32
    %c0_i32_1 = arith.constant 0 : i32
    return %c0_i32, %c0_i32_0 : i32, i32
  }
  func.func @transform_4(%arg0: i32) -> (i32, i32) {
    %c0_i32 = arith.constant 0 : i32
    %c0_i32_0 = arith.constant 0 : i32
    return %arg0, %c0_i32 : i32, i32
  }
}

module attributes {stable_mosaic.version = 11 : i64} {
  func.func @kernel(%arg0: i32, %arg1: memref<256x128xbf16, #tpu.memory_space<vmem>>, %arg2: memref<128x128xbf16, #tpu.memory_space<vmem>>, %arg3: memref<1x128xf32, #tpu.memory_space<vmem>>, %arg4: memref<1x128xf32, #tpu.memory_space<vmem>>, %arg5: memref<256x128xbf16, #tpu.memory_space<vmem>>, %arg6: memref<256x128xbf16, #tpu.memory_space<vmem>>, %arg7: memref<256x128xbf16, #tpu.memory_space<vmem>>) attributes {dimension_semantics = [#tpu.dimension_semantics<parallel>], iteration_bounds = array<i64: 2>, scalar_prefetch = 0 : i64, scratch_operands = 0 : i64, tpu.core_type = #tpu.core_type<tc>, window_params = [{transform_indices = @transform_0, window_bounds = array<i64: 256, 128>}, {pipeline_mode = #tpu.pipeline_mode<synchronous>, transform_indices = @transform_1, window_bounds = array<i64: 128, 128>}, {pipeline_mode = #tpu.pipeline_mode<synchronous>, transform_indices = @transform_2, window_bounds = array<i64: 1, 128>}, {pipeline_mode = #tpu.pipeline_mode<synchronous>, transform_indices = @transform_3, window_bounds = array<i64: 1, 128>}, {transform_indices = @transform_4, window_bounds = array<i64: 256, 128>}, {transform_indices = @transform_5, window_bounds = array<i64: 256, 128>}, {transform_indices = @transform_6, window_bounds = array<i64: 256, 128>}]} {
    %c0 = arith.constant 0 : index
    %c0_0 = arith.constant 0 : index
    %0 = vector.load %arg1[%c0, %c0_0] : memref<256x128xbf16, #tpu.memory_space<vmem>>, vector<256x128xbf16>
    %c0_1 = arith.constant 0 : index
    %c0_2 = arith.constant 0 : index
    %1 = vector.load %arg2[%c0_1, %c0_2] : memref<128x128xbf16, #tpu.memory_space<vmem>>, vector<128x128xbf16>
    %cst = arith.constant dense<0.000000e+00> : vector<256x128xf32>
    %2 = tpu.matmul %0, %1, %cst {dimension_numbers = #tpu.dot_dimension_numbers<[1], [0], [0], [1], [0, 0, 1, 1], [], []>} : vector<256x128xbf16>, vector<128x128xbf16>, vector<256x128xf32> -> vector<256x128xf32>
    %c0_3 = arith.constant 0 : index
    %c0_4 = arith.constant 0 : index
    %3 = vector.load %arg3[%c0_3, %c0_4] : memref<1x128xf32, #tpu.memory_space<vmem>>, vector<1x128xf32>
    %4 = vector.broadcast %3 : vector<1x128xf32> to vector<256x128xf32>
    %5 = arith.mulf %2, %4 : vector<256x128xf32>
    %c0_5 = arith.constant 0 : index
    %c0_6 = arith.constant 0 : index
    %6 = vector.load %arg4[%c0_5, %c0_6] : memref<1x128xf32, #tpu.memory_space<vmem>>, vector<1x128xf32>
    %7 = vector.broadcast %6 : vector<1x128xf32> to vector<256x128xf32>
    %8 = arith.addf %5, %7 : vector<256x128xf32>
    %c0_7 = arith.constant 0 : index
    %c0_8 = arith.constant 0 : index
    %9 = vector.load %arg5[%c0_7, %c0_8] : memref<256x128xbf16, #tpu.memory_space<vmem>>, vector<256x128xbf16>
    %10 = arith.extf %9 : vector<256x128xbf16> to vector<256x128xf32>
    %11 = arith.addf %8, %10 : vector<256x128xf32>
    %cst_9 = arith.constant 0.000000e+00 : f32
    %12 = vector.broadcast %cst_9 : f32 to vector<256x128xf32>
    %13 = arith.maximumf %11, %12 : vector<256x128xf32>
    %c0_10 = arith.constant 0 : index
    %c0_11 = arith.constant 0 : index
    %14 = vector.load %arg6[%c0_10, %c0_11] : memref<256x128xbf16, #tpu.memory_space<vmem>>, vector<256x128xbf16>
    %15 = arith.extf %14 : vector<256x128xbf16> to vector<256x128xf32>
    %16 = arith.addf %13, %15 : vector<256x128xf32>
    %cst_12 = arith.constant 0.000000e+00 : f32
    %17 = vector.broadcast %cst_12 : f32 to vector<256x128xf32>
    %18 = arith.maximumf %16, %17 : vector<256x128xf32>
    %19 = arith.truncf %18 : vector<256x128xf32> to vector<256x128xbf16>
    %c0_13 = arith.constant 0 : index
    %c0_14 = arith.constant 0 : index
    %20 = vector.load %arg7[%c0_13, %c0_14] : memref<256x128xbf16, #tpu.memory_space<vmem>>, vector<256x128xbf16>
    tpu.vector_store %arg7[%c0_13, %c0_14], %19 {strides = array<i32>} : memref<256x128xbf16, #tpu.memory_space<vmem>>, vector<256x128xbf16>,
    return
  }
  func.func @transform_0(%arg0: i32) -> (i32, i32) {
    %c0_i32 = arith.constant 0 : i32
    %c0_i32_0 = arith.constant 0 : i32
    return %arg0, %c0_i32 : i32, i32
  }
  func.func @transform_1(%arg0: i32) -> (i32, i32) {
    %c0_i32 = arith.constant 0 : i32
    %c0_i32_0 = arith.constant 0 : i32
    %c0_i32_1 = arith.constant 0 : i32
    return %c0_i32, %c0_i32_0 : i32, i32
  }
  func.func @transform_2(%arg0: i32) -> (i32, i32) {
    %c0_i32 = arith.constant 0 : i32
    %c0_i32_0 = arith.constant 0 : i32
    %c0_i32_1 = arith.constant 0 : i32
    return %c0_i32, %c0_i32_0 : i32, i32
  }
  func.func @transform_3(%arg0: i32) -> (i32, i32) {
    %c0_i32 = arith.constant 0 : i32
    %c0_i32_0 = arith.constant 0 : i32
    %c0_i32_1 = arith.constant 0 : i32
    return %c0_i32, %c0_i32_0 : i32, i32
  }
  func.func @transform_4(%arg0: i32) -> (i32, i32) {
    %c0_i32 = arith.constant 0 : i32
    %c0_i32_0 = arith.constant 0 : i32
    return %arg0, %c0_i32 : i32, i32
  }
  func.func @transform_5(%arg0: i32) -> (i32, i32) {
    %c0_i32 = arith.constant 0 : i32
    %c0_i32_0 = arith.constant 0 : i32
    return %arg0, %c0_i32 : i32, i32
  }
  func.func @transform_6(%arg0: i32) -> (i32, i32) {
    %c0_i32 = arith.constant 0 : i32
    %c0_i32_0 = arith.constant 0 : i32
    return %arg0, %c0_i32 : i32, i32
  }
}

</mosaic_0001>

<bundles_post_ra>
// kernel: _lambda_.13
= control target key start
LH: loop header
LB: loop body
LE: loop exit
PB: predicated region body
PF: predicated region fallthrough
CT: control target
= control target key end

     0   :  { %9 = vsyncpa [#allocation3], 0  ;;  %s1586_s0 = inlined_call_operand.vmem [shape: bf16[512,128], index: 0, kind: input, shape index: {}]   ;;  %s1587_s1 = inlined_call_operand.hbm [shape: bf16[128,128], index: 1, kind: input, shape index: {}]   ;;  %s1588_s2 = inlined_call_operand.hbm [shape: f32[1,128], index: 2, kind: input, shape index: {}]   ;;  %s1589_s3 = inlined_call_operand.vmem [shape: f32[1,128], index: 3, kind: input, shape index: {}]   ;;  %s1590_s4 = inlined_call_operand.vmem [shape: bf16[512,128], index: 4, kind: output, shape index: {}]  }
   0x1   :  { %10 = vsyncpa [#allocation5], 0  ;;  %s1375_s15 = smov 0  }
   0x2 LB: > { %s931_s16 = sadd.s32 4294967295, %s1344_s15   ;;  %p933_p0 = scmp.ge.s32.totalorder %s1344_s15, 1  ;;  %s1344_s15 = sphi %s1375_s15, %s16_s15  }
   0x3   : > { %p136_p1 = scmp.lt.s32.totalorder %s1344_s15, 3  ;;  %s1346_s17 = smov [#allocation2]  }
   0x4   : > { %s148_s18 = sshll.u32 %s1346_s17, 4  ;;  %p1389_p3 = scmp.eq.s32.totalorder %s931_s16, 0  ;;  %s149_s18 = int_to_ptr.vmem [resolvable:$true] %s148_s18 }
   0x5   : > { %p1383_p2 = pnand %p933_p0, %p136_p1  ;;  %s1347_s21 = smov [#allocation4]  }
   0x6   : > { %s1595_s20 = scalar_select %p1389_p3, 1, 0 }
   0x7   : > { %s1594_s19 = scalar_select %p1383_p2, 1, 0 }
   0x8   : > { %p1227_p4 = pneg %p1383_p2  ;;  %s162_s22 = sshll.u32 %s1347_s21, 4  ;;  %s1401_s22 = int_to_ptr.vmem [resolvable:$true] %s162_s22 }
   0x9   : > { %s1274_s26 = scalar_lea.hbm %s1587_s1, 1024 }
   0xa   : > { %p1397_p5 = pnand %p1389_p3, %p1227_p4  ;;  %p1275_p6 = scmp.ne.s32.totalorder %s1587_s1, %s1274_s26 }
   0xb   : > { %p1281_p10 = scmp.lt.u32.totalorder %s1274_s26, %s1587_s1 }
   0xc   : > { %p1276_p7 = pneg %p1397_p5 }
   0xe   : > { %p1277_p8 = pnand %p1276_p7, %p1275_p6 }
  0x10   : > { %p1278_p9 = pneg %p1277_p8 }
  0x12   : > { %p1283_p11 = pnand %p1281_p10, %p1278_p9 }
  0x14   : > { %1286 = shalt.err (!%p1283_p11)
}
  0x15   : > { %s1287_s5 = scalar_lea.vmem %s149_s18, 1024  ;;  %p1295_p1 = scmp.lt.s32.totalorder %s149_s18, %s149_s18 }
  0x16   : > { %p1288_p12 = scmp.ne.s32.totalorder %s149_s18, %s1287_s5  ;;  %p1296_p4 = scmp.lt.s32.totalorder %s1287_s5, %s1287_s5 }
  0x18   : > { %p1290_p13 = pnand %p1288_p12, %p1276_p7  ;;  %p1297_p3 = por %p1296_p4, %p1295_p1 }
  0x1a   : > { %p1291_p0 = pneg %p1290_p13 }
  0x1c   : > { %p1298_p2 = pnand %p1297_p3, %p1291_p0 }
  0x1e   : > { %1301 = shalt.err (!%p1298_p2)
}
  0x1f   : > { %s1348_s6 = smov 64   ;;  %s1349_s7 = smov 4  }
  0x20   : > { %1230 = dma.hbm_to_vmem [thread:$0]  (!%p1397_p5), %s1587_s1, 1024, %s149_s18, [#allocation3], %s1348_s6, %s1348_s6, %s1349_s7  }
  0x21   : > { %s1302_s12 = scalar_lea.hbm %s1588_s2, 16 }
  0x22   : > { %p1303_p6 = scmp.ne.s32.totalorder %s1588_s2, %s1302_s12  ;;  %p1309_p8 = scmp.lt.u32.totalorder %s1302_s12, %s1588_s2 }
  0x24   : > { %p1305_p2 = pnand %p1303_p6, %p1276_p7 }
  0x26   : > { %p1306_p3 = pneg %p1305_p2 }
  0x28   : > { %p1311_p9 = pnand %p1309_p8, %p1306_p3 }
  0x2a   : > { %1314 = shalt.err (!%p1311_p9)
}
  0x2b   : > { %s1315_s18 = scalar_lea.vmem %s1401_s22, 16  ;;  %s1322_s24 = scalar_lea.vmem %s1401_s22, 32 }
  0x2c   : > { %p1316_p10 = scmp.ne.s32.totalorder %s1401_s22, %s1315_s18  ;;  %p1323_p13 = scmp.lt.s32.totalorder %s1401_s22, %s1401_s22 }
  0x2d   : > { %p1324_p0 = scmp.lt.s32.totalorder %s1322_s24, %s1315_s18 }
  0x2e   : > { %p1318_p11 = pnand %p1316_p10, %p1276_p7 }
  0x2f   : > { %p1325_p1 = por %p1324_p0, %p1323_p13 }
  0x30   : > { %p1319_p12 = pneg %p1318_p11 }
  0x32   : > { %p1326_p4 = pnand %p1325_p1, %p1319_p12 }
  0x34   : > { %1329 = shalt.err (!%p1326_p4)
}
  0x35   : > { %1233 = dma.hbm_to_vmem [thread:$0]  (!%p1397_p5), %s1588_s2, 16, %s1401_s22, [#allocation5]  }
  0x36   : > { %p1597_p6 = scmp.ne.s32.totalorder %s1594_s19, 0 }
  0x37   : > { %p1598_p7 = scmp.ne.s32.totalorder (!%p1597_p6), %s1595_s20, 0 }
  0x38   : > { %187 = sbr.rel (%p1597_p6) target bundleno = 348 (0x15c), region = 36 }
  0x3f   : > { %1335 = dma.done.wait (%p1598_p7), [#allocation3], 1024  }
  0x40   : > { %1337 = vsyncadd (%p1598_p7), [#allocation3], 4294966272 }
  0x41   : > { %1339 = dma.done.wait (%p1598_p7), [#allocation5], 16  }
  0x42   : > { %1341 = vsyncadd (%p1598_p7), [#allocation5], 4294967280  ;;  %s940_s23 = sshll.u32 %s931_s16, 5  ;;  %v1250_v0 = vld [vmem:[#allocation2] sm:$0xff]   ;;  %v1251_v1 = vld [vmem:[#allocation2 + $0x8] sm:$0xff]  }
  0x43   : > { %p218_p2 = scmp.lt.s32.totalorder %s940_s23, 63  ;;  %1155 = vmatprep.subr.bf16.mxu0 %v1250_v0  ;;  %1203 = vmatprep.subr.bf16.mxu1 %v1250_v0  ;;  %v1252_v2 = vld [vmem:[#allocation2 + $0x10] sm:$0xff]   ;;  %v1253_v3 = vld [vmem:[#allocation2 + $0x18] sm:$0xff]   ;;  %v1254_v6 = vld [vmem:[#allocation2 + $0x20] sm:$0xff]  }
  0x44   : > { %1156 = vmatpush3.bf16.msra.mxu0 %v1250_v0  ;;  %1211 = vmatpush3.bf16.msra.mxu1 %v1250_v0  ;;  %v1255_v7 = vld [vmem:[#allocation2 + $0x28] sm:$0xff]   ;;  %v1256_v8 = vld [vmem:[#allocation2 + $0x30] sm:$0xff]   ;;  %v1257_v9 = vld [vmem:[#allocation2 + $0x38] sm:$0xff]  }
  0x45   : > { %s1600_s23 = smov (!%p218_p2, %s940_s23), 63  ;;  %1157 = vmatprep.subr.bf16.mxu0 %v1251_v1  ;;  %1204 = vmatprep.subr.bf16.mxu1 %v1251_v1  ;;  %v1489_v24 = vld [vmem:[#allocation4] ss:$0 sm:$0xff] }
  0x46   : > { %s941_s19 = sshll.u32 %s1600_s23, 2  ;;  %v1494_v26 = vld [vmem:[%s1589_s3] ss:$0 sm:$0xff] }
  0x47   : > { %s1471_s16 = scalar_lea.vmem %s1586_s0, %s941_s19  ;;  %s1517_s5 = scalar_lea.vmem %s1590_s4, %s941_s19 }
  0x48   : > { %1158 = vmatpush3.bf16.msra.mxu0 %v1251_v1  ;;  %1212 = vmatpush3.bf16.msra.mxu1 %v1251_v1  ;;  %v1258_v4 = vld [vmem:[%s1471_s16] sm:$0xff]   ;;  %v1260_v10 = vld [vmem:[%s1471_s16 + $0x8] sm:$0xff]   ;;  %v1262_v12 = vld [vmem:[%s1471_s16 + $0x10] sm:$0xff]  }
  0x49   : > { %1159 = vmatprep.subr.bf16.mxu0 %v1252_v2  ;;  %1205 = vmatprep.subr.bf16.mxu1 %v1252_v2  ;;  %v1259_v5 = vld [vmem:[%s1471_s16 + $0x40] sm:$0xff]   ;;  %v1261_v11 = vld [vmem:[%s1471_s16 + $0x48] sm:$0xff]   ;;  %v1263_v13 = vld [vmem:[%s1471_s16 + $0x50] sm:$0xff]  }
  0x4a   : > { %1171 = vmatprep.mubr.bf16.mxu0 %v1258_v4  ;;  %1187 = vmatprep.mubr.bf16.mxu1 %v1259_v5  ;;  %v1264_v14 = vld [vmem:[%s1471_s16 + $0x18] sm:$0xff]   ;;  %v1266_v16 = vld [vmem:[%s1471_s16 + $0x20] sm:$0xff]   ;;  %v1268_v18 = vld [vmem:[%s1471_s16 + $0x28] sm:$0xff]  }
  0x4b   : > { %v1265_v15 = vld [vmem:[%s1471_s16 + $0x58] sm:$0xff]   ;;  %v1267_v17 = vld [vmem:[%s1471_s16 + $0x60] sm:$0xff]   ;;  %v1269_v19 = vld [vmem:[%s1471_s16 + $0x68] sm:$0xff]  }
  0x4c   : > { %1160 = vmatpush3.bf16.msra.mxu0 %v1252_v2  ;;  %1213 = vmatpush3.bf16.msra.mxu1 %v1252_v2  ;;  %v1270_v20 = vld [vmem:[%s1471_s16 + $0x30] sm:$0xff]   ;;  %v1272_v22 = vld [vmem:[%s1471_s16 + $0x38] sm:$0xff]  }
  0x4d   : > { %1161 = vmatprep.subr.bf16.mxu0 %v1253_v3  ;;  %1206 = vmatprep.subr.bf16.mxu1 %v1253_v3  ;;  %v1271_v21 = vld [vmem:[%s1471_s16 + $0x70] sm:$0xff]   ;;  %v1273_v23 = vld [vmem:[%s1471_s16 + $0x78] sm:$0xff]  }
  0x50   : > { %1162 = vmatpush3.bf16.msra.mxu0 %v1253_v3  ;;  %1214 = vmatpush3.bf16.msra.mxu1 %v1253_v3 }
  0x51   : > { %1163 = vmatprep.subr.bf16.mxu0 %v1254_v6  ;;  %1207 = vmatprep.subr.bf16.mxu1 %v1254_v6 }
  0x54   : > { %1164 = vmatpush3.bf16.msra.mxu0 %v1254_v6  ;;  %1215 = vmatpush3.bf16.msra.mxu1 %v1254_v6 }
  0x55   : > { %1165 = vmatprep.subr.bf16.mxu0 %v1255_v7  ;;  %1208 = vmatprep.subr.bf16.mxu1 %v1255_v7 }
  0x58   : > { %1166 = vmatpush3.bf16.msra.mxu0 %v1255_v7  ;;  %1216 = vmatpush3.bf16.msra.mxu1 %v1255_v7 }
  0x59   : > { %1167 = vmatprep.subr.bf16.mxu0 %v1256_v8  ;;  %1209 = vmatprep.subr.bf16.mxu1 %v1256_v8 }
  0x5c   : > { %1168 = vmatpush3.bf16.msra.mxu0 %v1256_v8  ;;  %1217 = vmatpush3.bf16.msra.mxu1 %v1256_v8 }
  0x5d   : > { %1169 = vmatprep.subr.bf16.mxu0 %v1257_v9  ;;  %1210 = vmatprep.subr.bf16.mxu1 %v1257_v9 }
  0x60   : > { %1170 = vmatpush3.bf16.msra.mxu0 %v1257_v9  ;;  %1218 = vmatpush3.bf16.msra.mxu1 %v1257_v9 }
  0x63   : > { %1172 = vmatmul.mubr.bf16.vlgmr.msra.gmra.mrb[0].mxu0 %v1260_v10  ;;  %1188 = vmatmul.mubr.bf16.vlgmr.msra.gmra.mrb[0].mxu1 %v1261_v11 }
  0x64   : > { %1175 = vmatprep.mubr.bf16.mxu0 %v1262_v12  ;;  %1191 = vmatprep.mubr.bf16.mxu1 %v1263_v13 }
  0x6b   : > { %1176 = vmatmul.mubr.bf16.gmra.mrb[4].mxu0 %v1264_v14  ;;  %1192 = vmatmul.mubr.bf16.gmra.mrb[4].mxu1 %v1265_v15 }
  0x6c   : > { %1179 = vmatprep.mubr.bf16.mxu0 %v1266_v16  ;;  %1195 = vmatprep.mubr.bf16.mxu1 %v1267_v17 }
  0x73   : > { %1180 = vmatmul.mubr.bf16.gmra.mrb[8].mxu0 %v1268_v18  ;;  %1196 = vmatmul.mubr.bf16.gmra.mrb[8].mxu1 %v1269_v19 }
  0x74   : > { %1183 = vmatprep.mubr.bf16.mxu0 %v1270_v20  ;;  %1199 = vmatprep.mubr.bf16.mxu1 %v1271_v21 }
  0x7b   : > { %1184 = vmatmul.mubr.bf16.gmra.mrb[12].mxu0 %v1272_v22  ;;  %1200 = vmatmul.mubr.bf16.gmra.mrb[12].mxu1 %v1273_v23 }
 0x136   : > { %v1173_v25 = vpop.f32.mrb[0].mxu0  ;;  %v1189_v27 = vpop.f32.mrb[0].mxu1 }
 0x137   : > { %v592_v28 = vmul.f32 %v1173_v25, %v1489_v24  ;;  %v608_v29 = vmul.f32 %v1189_v27, %v1489_v24  ;;  %v456_v30 = vpop.f32.mrb[1].mxu0  ;;  %v520_v31 = vpop.f32.mrb[1].mxu1 }
 0x138   : > { %v590_v32 = vmul.f32 %v1489_v24, %v456_v30  ;;  %v606_v33 = vmul.f32 %v1489_v24, %v520_v31  ;;  %v1174_v34 = vpop.f32.mrb[2].mxu0  ;;  %v1190_v35 = vpop.f32.mrb[2].mxu1 }
 0x139   : > { %v631_v36 = vadd.f32 %v1494_v26, %v592_v28  ;;  %v647_v37 = vadd.f32 %v1494_v26, %v608_v29  ;;  %v593_v38 = vmul.f32 %v1174_v34, %v1489_v24  ;;  %v609_v39 = vmul.f32 %v1190_v35, %v1489_v24  ;;  %v459_v40 = vpop.f32.mrb[3].mxu0  ;;  %v523_v41 = vpop.f32.mrb[3].mxu1 }
 0x13a   : > { %v629_v42 = vadd.f32 %v1494_v26, %v590_v32  ;;  %v645_v43 = vadd.f32 %v1494_v26, %v606_v33  ;;  %v591_v44 = vmul.f32 %v1489_v24, %v459_v40  ;;  %v607_v45 = vmul.f32 %v1489_v24, %v523_v41 }
 0x13b   : > { %v632_v46 = vadd.f32 %v1494_v26, %v593_v38  ;;  %v648_v47 = vadd.f32 %v1494_v26, %v609_v39  ;;  %v663_v50 = vmax.f32 %v631_v36, 0.0  ;;  %v679_v51 = vmax.f32 %v647_v37, 0.0 }
 0x13c   : > { %v630_v48 = vadd.f32 %v1494_v26, %v591_v44  ;;  %v646_v49 = vadd.f32 %v1494_v26, %v607_v45  ;;  %v661_v54 = vmax.f32 %v629_v42, 0.0  ;;  %v677_v55 = vmax.f32 %v645_v43, 0.0 }
 0x13d   : > { %v664_v52 = vmax.f32 %v632_v46, 0.0  ;;  %v680_v53 = vmax.f32 %v648_v47, 0.0 }
 0x13e   : > { %v662_v56 = vmax.f32 %v630_v48, 0.0  ;;  %v678_v57 = vmax.f32 %v646_v49, 0.0  ;;  %v1177_v58 = vpop.f32.mrb[4].mxu0  ;;  %v1193_v59 = vpop.f32.mrb[4].mxu1 }
 0x13f   : > { %v1044_v60 = vpack.c.bf16 %v664_v52, %v663_v50  ;;  %v1084_v61 = vpack.c.bf16 %v680_v53, %v679_v51  ;;  %v596_v62 = vmul.f32 %v1177_v58, %v1489_v24  ;;  %v612_v63 = vmul.f32 %v1193_v59, %v1489_v24  ;;  %v472_v0 = vpop.f32.mrb[5].mxu0  ;;  %v536_v1 = vpop.f32.mrb[5].mxu1 }
 0x140   : > { %v1039_v2 = vpack.c.bf16 %v662_v56, %v661_v54  ;;  %v1079_v3 = vpack.c.bf16 %v678_v57, %v677_v55  ;;  %v594_v4 = vmul.f32 %v1489_v24, %v472_v0  ;;  %v610_v5 = vmul.f32 %v1489_v24, %v536_v1  ;;  %v1178_v6 = vpop.f32.mrb[6].mxu0  ;;  %v1194_v7 = vpop.f32.mrb[6].mxu1 }
 0x141   : > { %1116 = vst [vmem:[%s1517_s5 + $0x8] sm:$0xff] %v1044_v60   ;;  %1124 = vst [vmem:[%s1517_s5 + $0x48] sm:$0xff] %v1084_v61   ;;  %v635_v8 = vadd.f32 %v1494_v26, %v596_v62  ;;  %v651_v9 = vadd.f32 %v1494_v26, %v612_v63  ;;  %v597_v10 = vmul.f32 %v1178_v6, %v1489_v24  ;;  %v475_v12 = vpop.f32.mrb[7].mxu0  ;;  %v539_v13 = vpop.f32.mrb[7].mxu1 }
 0x142   : > { %v613_v11 = vmul.f32 %v1194_v7, %v1489_v24  ;;  %1040 = vst [vmem:[%s1517_s5] sm:$0xff] %v1039_v2   ;;  %1123 = vst [vmem:[%s1517_s5 + $0x40] sm:$0xff] %v1079_v3   ;;  %v633_v14 = vadd.f32 %v1494_v26, %v594_v4  ;;  %v649_v15 = vadd.f32 %v1494_v26, %v610_v5 }
 0x143   : > { %v595_v16 = vmul.f32 %v1489_v24, %v475_v12  ;;  %v611_v17 = vmul.f32 %v1489_v24, %v539_v13  ;;  %v636_v18 = vadd.f32 %v1494_v26, %v597_v10  ;;  %v667_v22 = vmax.f32 %v635_v8, 0.0 }
 0x144   : > { %v652_v19 = vadd.f32 %v1494_v26, %v613_v11  ;;  %v683_v23 = vmax.f32 %v651_v9, 0.0  ;;  %v665_v28 = vmax.f32 %v633_v14, 0.0  ;;  %v681_v29 = vmax.f32 %v649_v15, 0.0 }
 0x145   : > { %v634_v20 = vadd.f32 %v1494_v26, %v595_v16  ;;  %v650_v21 = vadd.f32 %v1494_v26, %v611_v17  ;;  %v668_v25 = vmax.f32 %v636_v18, 0.0 }
 0x146   : > { %v684_v27 = vmax.f32 %v652_v19, 0.0  ;;  %v1181_v32 = vpop.f32.mrb[8].mxu0  ;;  %v1197_v33 = vpop.f32.mrb[8].mxu1 }
 0x147   : > { %v666_v30 = vmax.f32 %v634_v20, 0.0  ;;  %v682_v31 = vmax.f32 %v650_v21, 0.0  ;;  %v1054_v34 = vpack.c.bf16 %v668_v25, %v667_v22  ;;  %v600_v36 = vmul.f32 %v1181_v32, %v1489_v24  ;;  %v488_v38 = vpop.f32.mrb[9].mxu0  ;;  %v552_v39 = vpop.f32.mrb[9].mxu1 }
 0x148   : > { %v1094_v35 = vpack.c.bf16 %v684_v27, %v683_v23  ;;  %v616_v37 = vmul.f32 %v1197_v33, %v1489_v24  ;;  %v598_v42 = vmul.f32 %v1489_v24, %v488_v38  ;;  %v614_v43 = vmul.f32 %v1489_v24, %v552_v39  ;;  %v1182_v44 = vpop.f32.mrb[10].mxu0  ;;  %v1198_v45 = vpop.f32.mrb[10].mxu1 }
 0x149   : > { %v1049_v40 = vpack.c.bf16 %v666_v30, %v665_v28  ;;  %v1089_v41 = vpack.c.bf16 %v682_v31, %v681_v29  ;;  %1118 = vst [vmem:[%s1517_s5 + $0x18] sm:$0xff] %v1054_v34   ;;  %v639_v46 = vadd.f32 %v1494_v26, %v600_v36  ;;  %v601_v48 = vmul.f32 %v1182_v44, %v1489_v24  ;;  %v491_v50 = vpop.f32.mrb[11].mxu0  ;;  %v555_v51 = vpop.f32.mrb[11].mxu1 }
 0x14a   : > { %1126 = vst [vmem:[%s1517_s5 + $0x58] sm:$0xff] %v1094_v35   ;;  %v655_v47 = vadd.f32 %v1494_v26, %v616_v37  ;;  %v617_v49 = vmul.f32 %v1198_v45, %v1489_v24  ;;  %v637_v52 = vadd.f32 %v1494_v26, %v598_v42  ;;  %v653_v53 = vadd.f32 %v1494_v26, %v614_v43 }
 0x14b   : > { %1117 = vst [vmem:[%s1517_s5 + $0x10] sm:$0xff] %v1049_v40   ;;  %1125 = vst [vmem:[%s1517_s5 + $0x50] sm:$0xff] %v1089_v41   ;;  %v599_v54 = vmul.f32 %v1489_v24, %v491_v50  ;;  %v615_v55 = vmul.f32 %v1489_v24, %v555_v51  ;;  %v640_v56 = vadd.f32 %v1494_v26, %v601_v48  ;;  %v671_v60 = vmax.f32 %v639_v46, 0.0 }
 0x14c   : > { %v656_v57 = vadd.f32 %v1494_v26, %v617_v49  ;;  %v687_v61 = vmax.f32 %v655_v47, 0.0  ;;  %v669_v0 = vmax.f32 %v637_v52, 0.0  ;;  %v685_v1 = vmax.f32 %v653_v53, 0.0 }
 0x14d   : > { %v638_v58 = vadd.f32 %v1494_v26, %v599_v54  ;;  %v654_v59 = vadd.f32 %v1494_v26, %v615_v55  ;;  %v672_v62 = vmax.f32 %v640_v56, 0.0 }
 0x14e   : > { %v688_v63 = vmax.f32 %v656_v57, 0.0  ;;  %v1185_v4 = vpop.f32.mrb[12].mxu0  ;;  %v1201_v5 = vpop.f32.mrb[12].mxu1 }
 0x14f   : > { %v670_v2 = vmax.f32 %v638_v58, 0.0  ;;  %v686_v3 = vmax.f32 %v654_v59, 0.0  ;;  %v1064_v6 = vpack.c.bf16 %v672_v62, %v671_v60  ;;  %v604_v8 = vmul.f32 %v1185_v4, %v1489_v24  ;;  %v504_v10 = vpop.f32.mrb[13].mxu0  ;;  %v568_v11 = vpop.f32.mrb[13].mxu1 }
 0x150   : > { %v1104_v7 = vpack.c.bf16 %v688_v63, %v687_v61  ;;  %v620_v9 = vmul.f32 %v1201_v5, %v1489_v24  ;;  %v602_v14 = vmul.f32 %v1489_v24, %v504_v10  ;;  %v618_v15 = vmul.f32 %v1489_v24, %v568_v11  ;;  %v1186_v16 = vpop.f32.mrb[14].mxu0  ;;  %v1202_v17 = vpop.f32.mrb[14].mxu1 }
 0x151   : > { %v1059_v12 = vpack.c.bf16 %v670_v2, %v669_v0  ;;  %v1099_v13 = vpack.c.bf16 %v686_v3, %v685_v1  ;;  %1120 = vst [vmem:[%s1517_s5 + $0x28] sm:$0xff] %v1064_v6   ;;  %v643_v18 = vadd.f32 %v1494_v26, %v604_v8  ;;  %v605_v20 = vmul.f32 %v1186_v16, %v1489_v24  ;;  %v507_v22 = vpop.f32.mrb[15].mxu0  ;;  %v571_v23 = vpop.f32.mrb[15].mxu1 }
 0x152   : > { %1128 = vst [vmem:[%s1517_s5 + $0x68] sm:$0xff] %v1104_v7   ;;  %v659_v19 = vadd.f32 %v1494_v26, %v620_v9  ;;  %v621_v21 = vmul.f32 %v1202_v17, %v1489_v24  ;;  %v641_v25 = vadd.f32 %v1494_v26, %v602_v14  ;;  %v657_v27 = vadd.f32 %v1494_v26, %v618_v15 }
 0x153   : > { %1119 = vst [vmem:[%s1517_s5 + $0x20] sm:$0xff] %v1059_v12   ;;  %1127 = vst [vmem:[%s1517_s5 + $0x60] sm:$0xff] %v1099_v13   ;;  %v603_v28 = vmul.f32 %v1489_v24, %v507_v22  ;;  %v619_v29 = vmul.f32 %v1489_v24, %v571_v23  ;;  %v644_v30 = vadd.f32 %v1494_v26, %v605_v20  ;;  %v675_v34 = vmax.f32 %v643_v18, 0.0 }
 0x154   : > { %v660_v31 = vadd.f32 %v1494_v26, %v621_v21  ;;  %v691_v35 = vmax.f32 %v659_v19, 0.0  ;;  %v673_v38 = vmax.f32 %v641_v25, 0.0  ;;  %v689_v39 = vmax.f32 %v657_v27, 0.0 }
 0x155   : > { %v642_v32 = vadd.f32 %v1494_v26, %v603_v28  ;;  %v658_v33 = vadd.f32 %v1494_v26, %v619_v29  ;;  %v676_v36 = vmax.f32 %v644_v30, 0.0 }
 0x156   : > { %v692_v37 = vmax.f32 %v660_v31, 0.0 }
 0x157   : > { %v674_v40 = vmax.f32 %v642_v32, 0.0  ;;  %v690_v24 = vmax.f32 %v658_v33, 0.0  ;;  %v1074_v41 = vpack.c.bf16 %v676_v36, %v675_v34 }
 0x158   : > { %v1114_v42 = vpack.c.bf16 %v692_v37, %v691_v35 }
 0x159   : > { %v1069_v43 = vpack.c.bf16 %v674_v40, %v673_v38  ;;  %v1109_v44 = vpack.c.bf16 %v690_v24, %v689_v39  ;;  %1122 = vst [vmem:[%s1517_s5 + $0x38] sm:$0xff] %v1074_v41  }
 0x15a   : > { %1130 = vst [vmem:[%s1517_s5 + $0x78] sm:$0xff] %v1114_v42  }
 0x15b   : > { %1121 = vst [vmem:[%s1517_s5 + $0x30] sm:$0xff] %v1069_v43   ;;  %1129 = vst [vmem:[%s1517_s5 + $0x70] sm:$0xff] %v1109_v44  }
 0x15c PF: > { %s16_s15 = sadd.s32 1, %s1344_s15  }
 0x15d   : > { %p13_p5 = scmp.ge.s32.totalorder %s16_s15, 4  }
 0x15f   :  { %15 = sbr.rel (!%p13_p5) target bundleno = 2 (0x2), region = 75 }
 0x166   :  { %875 = vsyncpa [#allocation3], 1 }
 0x167   :  { %877 = vsyncpa [#allocation3 + $0x1], 1 }
 0x168   :  { %878 = vsyncpa [#allocation5], 1 }

// kernel: _lambda_.21
= control target key start
LH: loop header
LB: loop body
LE: loop exit
PB: predicated region body
PF: predicated region fallthrough
CT: control target
= control target key end

     0   :  { %s1198_s15 = smov 0   ;;  %s1356_s0 = inlined_call_operand.vmem [shape: bf16[512,128], index: 0, kind: input, shape index: {}]   ;;  %s1357_s1 = inlined_call_operand.vmem [shape: bf16[128,128], index: 1, kind: input, shape index: {}]   ;;  %s1358_s2 = inlined_call_operand.vmem [shape: f32[1,128], index: 2, kind: input, shape index: {}]   ;;  %s1359_s3 = inlined_call_operand.vmem [shape: f32[1,128], index: 3, kind: input, shape index: {}]   ;;  %s1360_s4 = inlined_call_operand.vmem [shape: bf16[512,128], index: 4, kind: output, shape index: {}]  }
   0x1 LB: > { %s849_s16 = sadd.s32 4294967295, %s1171_s15   ;;  %p853_p0 = scmp.ge.s32.totalorder %s1171_s15, 1  ;;  %s1171_s15 = sphi %s1198_s15, %s14_s15  }
   0x2   : > { %p163_p1 = scmp.lt.s32.totalorder %s1171_s15, 3 }
   0x4   : > { %p164_p2 = pnand %p853_p0, %p163_p1 }
   0x5   : > { %v1141_v0 = vld [vmem:[%s1357_s1] sm:$0xff] (!%p164_p2)   ;;  %s854_s19 = sshll.u32 (!%p164_p2), %s849_s16, 5  ;;  %v1142_v1 = vld [vmem:[%s1357_s1 + $0x8] sm:$0xff] (!%p164_p2)   ;;  %v1143_v2 = vld [vmem:[%s1357_s1 + $0x10] sm:$0xff] (!%p164_p2)  }
   0x6   : > { %167 = sbr.rel (%p164_p2) target bundleno = 284 (0x11c), region = 36  ;;  %p190_p3 = scmp.lt.s32.totalorder (!%p164_p2), %s854_s19, 63  ;;  %1069 = vmatprep.subr.bf16.mxu0 (!%p164_p2), %v1141_v0  ;;  %1117 = vmatprep.subr.bf16.mxu1 (!%p164_p2), %v1141_v0  ;;  %v1144_v3 = vld [vmem:[%s1357_s1 + $0x18] sm:$0xff] (!%p164_p2)   ;;  %v1145_v6 = vld [vmem:[%s1357_s1 + $0x20] sm:$0xff] (!%p164_p2)   ;;  %v1146_v7 = vld [vmem:[%s1357_s1 + $0x28] sm:$0xff] (!%p164_p2)  }
   0x7   : > { %1070 = vmatpush3.bf16.msra.mxu0 (!%p164_p2), %v1141_v0  ;;  %1125 = vmatpush3.bf16.msra.mxu1 (!%p164_p2), %v1141_v0  ;;  %v1147_v8 = vld [vmem:[%s1357_s1 + $0x30] sm:$0xff] (!%p164_p2)   ;;  %v1148_v9 = vld [vmem:[%s1357_s1 + $0x38] sm:$0xff] (!%p164_p2)   ;;  %v1259_v24 = vld [vmem:[%s1358_s2] ss:$0 sm:$0xff] (!%p164_p2) }
   0x8   : > { %1071 = vmatprep.subr.bf16.mxu0 (!%p164_p2), %v1142_v1  ;;  %1118 = vmatprep.subr.bf16.mxu1 (!%p164_p2), %v1142_v1  ;;  %v1266_v31 = vld [vmem:[%s1359_s3] ss:$0 sm:$0xff] (!%p164_p2) }
   0xb   : > { %1072 = vmatpush3.bf16.msra.mxu0 (!%p164_p2), %v1142_v1  ;;  %1126 = vmatpush3.bf16.msra.mxu1 (!%p164_p2), %v1142_v1 }
   0xc   : > { %1073 = vmatprep.subr.bf16.mxu0 (!%p164_p2), %v1143_v2  ;;  %1119 = vmatprep.subr.bf16.mxu1 (!%p164_p2), %v1143_v2 }
   0xd   : > { %s1362_s19 = smov (!%p190_p3, %s854_s19), 63 }
   0xe   : > { %s855_s24 = sshll.u32 %s1362_s19, 2 }
   0xf   : > { %s1223_s27 = scalar_lea.vmem %s1356_s0, %s855_s24  ;;  %1074 = vmatpush3.bf16.msra.mxu0 %v1143_v2  ;;  %1127 = vmatpush3.bf16.msra.mxu1 %v1143_v2  ;;  %s1285_s20 = scalar_lea.vmem %s1360_s4, %s855_s24 }
  0x10   : > { %v1149_v4 = vld [vmem:[%s1223_s27] sm:$0xff]   ;;  %1075 = vmatprep.subr.bf16.mxu0 %v1144_v3  ;;  %1120 = vmatprep.subr.bf16.mxu1 %v1144_v3  ;;  %v1151_v10 = vld [vmem:[%s1223_s27 + $0x8] sm:$0xff]   ;;  %v1153_v12 = vld [vmem:[%s1223_s27 + $0x10] sm:$0xff]  }
  0x11   : > { %v1150_v5 = vld [vmem:[%s1223_s27 + $0x40] sm:$0xff]   ;;  %1085 = vmatprep.mubr.bf16.mxu0 %v1149_v4  ;;  %v1152_v11 = vld [vmem:[%s1223_s27 + $0x48] sm:$0xff]   ;;  %v1154_v13 = vld [vmem:[%s1223_s27 + $0x50] sm:$0xff]  }
  0x12   : > { %1101 = vmatprep.mubr.bf16.mxu1 %v1150_v5  ;;  %v1155_v14 = vld [vmem:[%s1223_s27 + $0x18] sm:$0xff]   ;;  %v1157_v16 = vld [vmem:[%s1223_s27 + $0x20] sm:$0xff]   ;;  %v1159_v18 = vld [vmem:[%s1223_s27 + $0x28] sm:$0xff]  }
  0x13   : > { %1076 = vmatpush3.bf16.msra.mxu0 %v1144_v3  ;;  %1128 = vmatpush3.bf16.msra.mxu1 %v1144_v3  ;;  %v1156_v15 = vld [vmem:[%s1223_s27 + $0x58] sm:$0xff]   ;;  %v1158_v17 = vld [vmem:[%s1223_s27 + $0x60] sm:$0xff]   ;;  %v1160_v19 = vld [vmem:[%s1223_s27 + $0x68] sm:$0xff]  }
  0x14   : > { %1077 = vmatprep.subr.bf16.mxu0 %v1145_v6  ;;  %1121 = vmatprep.subr.bf16.mxu1 %v1145_v6  ;;  %v1161_v20 = vld [vmem:[%s1223_s27 + $0x30] sm:$0xff]   ;;  %v1163_v22 = vld [vmem:[%s1223_s27 + $0x38] sm:$0xff]  }
  0x15   : > { %v1162_v21 = vld [vmem:[%s1223_s27 + $0x70] sm:$0xff]   ;;  %v1164_v23 = vld [vmem:[%s1223_s27 + $0x78] sm:$0xff]  }
  0x17   : > { %1078 = vmatpush3.bf16.msra.mxu0 %v1145_v6  ;;  %1129 = vmatpush3.bf16.msra.mxu1 %v1145_v6 }
  0x18   : > { %1079 = vmatprep.subr.bf16.mxu0 %v1146_v7  ;;  %1122 = vmatprep.subr.bf16.mxu1 %v1146_v7 }
  0x1b   : > { %1080 = vmatpush3.bf16.msra.mxu0 %v1146_v7  ;;  %1130 = vmatpush3.bf16.msra.mxu1 %v1146_v7 }
  0x1c   : > { %1081 = vmatprep.subr.bf16.mxu0 %v1147_v8  ;;  %1123 = vmatprep.subr.bf16.mxu1 %v1147_v8 }
  0x1f   : > { %1082 = vmatpush3.bf16.msra.mxu0 %v1147_v8  ;;  %1131 = vmatpush3.bf16.msra.mxu1 %v1147_v8 }
  0x20   : > { %1083 = vmatprep.subr.bf16.mxu0 %v1148_v9  ;;  %1124 = vmatprep.subr.bf16.mxu1 %v1148_v9 }
  0x23   : > { %1084 = vmatpush3.bf16.msra.mxu0 %v1148_v9  ;;  %1132 = vmatpush3.bf16.msra.mxu1 %v1148_v9 }
  0x26   : > { %1086 = vmatmul.mubr.bf16.vlgmr.msra.gmra.mrb[0].mxu0 %v1151_v10  ;;  %1102 = vmatmul.mubr.bf16.vlgmr.msra.gmra.mrb[0].mxu1 %v1152_v11 }
  0x27   : > { %1089 = vmatprep.mubr.bf16.mxu0 %v1153_v12  ;;  %1105 = vmatprep.mubr.bf16.mxu1 %v1154_v13 }
  0x2e   : > { %1090 = vmatmul.mubr.bf16.gmra.mrb[4].mxu0 %v1155_v14  ;;  %1106 = vmatmul.mubr.bf16.gmra.mrb[4].mxu1 %v1156_v15 }
  0x2f   : > { %1093 = vmatprep.mubr.bf16.mxu0 %v1157_v16  ;;  %1109 = vmatprep.mubr.bf16.mxu1 %v1158_v17 }
  0x36   : > { %1094 = vmatmul.mubr.bf16.gmra.mrb[8].mxu0 %v1159_v18  ;;  %1110 = vmatmul.mubr.bf16.gmra.mrb[8].mxu1 %v1160_v19 }
  0x37   : > { %1097 = vmatprep.mubr.bf16.mxu0 %v1161_v20  ;;  %1113 = vmatprep.mubr.bf16.mxu1 %v1162_v21 }
  0x3e   : > { %1098 = vmatmul.mubr.bf16.gmra.mrb[12].mxu0 %v1163_v22  ;;  %1114 = vmatmul.mubr.bf16.gmra.mrb[12].mxu1 %v1164_v23 }
  0xf9   : > { %v1087_v25 = vpop.f32.mrb[0].mxu0  ;;  %v1103_v26 = vpop.f32.mrb[0].mxu1 }
  0xfa   : > { %v564_v27 = vmul.f32 %v1087_v25, %v1259_v24  ;;  %v580_v28 = vmul.f32 %v1103_v26, %v1259_v24  ;;  %v428_v29 = vpop.f32.mrb[1].mxu0  ;;  %v492_v30 = vpop.f32.mrb[1].mxu1 }
  0xfb   : > { %v562_v32 = vmul.f32 %v1259_v24, %v428_v29  ;;  %v578_v33 = vmul.f32 %v1259_v24, %v492_v30  ;;  %v1088_v34 = vpop.f32.mrb[2].mxu0  ;;  %v1104_v35 = vpop.f32.mrb[2].mxu1 }
  0xfc   : > { %v565_v36 = vmul.f32 %v1088_v34, %v1259_v24  ;;  %v581_v37 = vmul.f32 %v1104_v35, %v1259_v24  ;;  %v431_v38 = vpop.f32.mrb[3].mxu0  ;;  %v495_v39 = vpop.f32.mrb[3].mxu1  ;;  %v603_v42 = vadd.f32 %v1266_v31, %v564_v27  ;;  %v619_v43 = vadd.f32 %v1266_v31, %v580_v28 }
  0xfd   : > { %v563_v40 = vmul.f32 %v1259_v24, %v431_v38  ;;  %v579_v41 = vmul.f32 %v1259_v24, %v495_v39  ;;  %v601_v46 = vadd.f32 %v1266_v31, %v562_v32  ;;  %v617_v47 = vadd.f32 %v1266_v31, %v578_v33 }
  0xfe   : > { %v604_v44 = vadd.f32 %v1266_v31, %v565_v36  ;;  %v620_v45 = vadd.f32 %v1266_v31, %v581_v37 }
  0xff   : > { %v602_v48 = vadd.f32 %v1266_v31, %v563_v40  ;;  %v618_v49 = vadd.f32 %v1266_v31, %v579_v41 }
 0x100   : > { %v958_v50 = vpack.c.bf16 %v604_v44, %v603_v42  ;;  %v998_v51 = vpack.c.bf16 %v620_v45, %v619_v43 }
 0x101   : > { %v953_v52 = vpack.c.bf16 %v602_v48, %v601_v46  ;;  %v993_v53 = vpack.c.bf16 %v618_v49, %v617_v47  ;;  %v1091_v54 = vpop.f32.mrb[4].mxu0  ;;  %v1107_v55 = vpop.f32.mrb[4].mxu1 }
 0x102   : > { %1030 = vst [vmem:[%s1285_s20 + $0x8] sm:$0xff] %v958_v50   ;;  %1038 = vst [vmem:[%s1285_s20 + $0x48] sm:$0xff] %v998_v51   ;;  %v568_v56 = vmul.f32 %v1091_v54, %v1259_v24  ;;  %v584_v57 = vmul.f32 %v1107_v55, %v1259_v24  ;;  %v444_v58 = vpop.f32.mrb[5].mxu0  ;;  %v508_v59 = vpop.f32.mrb[5].mxu1 }
 0x103   : > { %954 = vst [vmem:[%s1285_s20] sm:$0xff] %v953_v52   ;;  %1037 = vst [vmem:[%s1285_s20 + $0x40] sm:$0xff] %v993_v53   ;;  %v566_v60 = vmul.f32 %v1259_v24, %v444_v58  ;;  %v582_v61 = vmul.f32 %v1259_v24, %v508_v59  ;;  %v1092_v62 = vpop.f32.mrb[6].mxu0  ;;  %v1108_v63 = vpop.f32.mrb[6].mxu1 }
 0x104   : > { %v569_v0 = vmul.f32 %v1092_v62, %v1259_v24  ;;  %v585_v1 = vmul.f32 %v1108_v63, %v1259_v24  ;;  %v447_v2 = vpop.f32.mrb[7].mxu0  ;;  %v511_v3 = vpop.f32.mrb[7].mxu1  ;;  %v607_v6 = vadd.f32 %v1266_v31, %v568_v56  ;;  %v623_v7 = vadd.f32 %v1266_v31, %v584_v57 }
 0x105   : > { %v567_v4 = vmul.f32 %v1259_v24, %v447_v2  ;;  %v583_v5 = vmul.f32 %v1259_v24, %v511_v3  ;;  %v605_v10 = vadd.f32 %v1266_v31, %v566_v60  ;;  %v621_v11 = vadd.f32 %v1266_v31, %v582_v61 }
 0x106   : > { %v608_v8 = vadd.f32 %v1266_v31, %v569_v0  ;;  %v624_v9 = vadd.f32 %v1266_v31, %v585_v1 }
 0x107   : > { %v606_v12 = vadd.f32 %v1266_v31, %v567_v4  ;;  %v622_v13 = vadd.f32 %v1266_v31, %v583_v5 }
 0x108   : > { %v968_v14 = vpack.c.bf16 %v608_v8, %v607_v6  ;;  %v1008_v15 = vpack.c.bf16 %v624_v9, %v623_v7 }
 0x109   : > { %v963_v16 = vpack.c.bf16 %v606_v12, %v605_v10  ;;  %v1003_v17 = vpack.c.bf16 %v622_v13, %v621_v11  ;;  %v1095_v18 = vpop.f32.mrb[8].mxu0  ;;  %v1111_v19 = vpop.f32.mrb[8].mxu1 }
 0x10a   : > { %1032 = vst [vmem:[%s1285_s20 + $0x18] sm:$0xff] %v968_v14   ;;  %1040 = vst [vmem:[%s1285_s20 + $0x58] sm:$0xff] %v1008_v15   ;;  %v572_v20 = vmul.f32 %v1095_v18, %v1259_v24  ;;  %v588_v21 = vmul.f32 %v1111_v19, %v1259_v24  ;;  %v460_v22 = vpop.f32.mrb[9].mxu0  ;;  %v524_v23 = vpop.f32.mrb[9].mxu1 }
 0x10b   : > { %1031 = vst [vmem:[%s1285_s20 + $0x10] sm:$0xff] %v963_v16   ;;  %1039 = vst [vmem:[%s1285_s20 + $0x50] sm:$0xff] %v1003_v17   ;;  %v570_v25 = vmul.f32 %v1259_v24, %v460_v22  ;;  %v586_v26 = vmul.f32 %v1259_v24, %v524_v23  ;;  %v1096_v27 = vpop.f32.mrb[10].mxu0  ;;  %v1112_v28 = vpop.f32.mrb[10].mxu1 }
 0x10c   : > { %v573_v29 = vmul.f32 %v1096_v27, %v1259_v24  ;;  %v589_v30 = vmul.f32 %v1112_v28, %v1259_v24  ;;  %v463_v32 = vpop.f32.mrb[11].mxu0  ;;  %v527_v33 = vpop.f32.mrb[11].mxu1  ;;  %v611_v36 = vadd.f32 %v1266_v31, %v572_v20  ;;  %v627_v37 = vadd.f32 %v1266_v31, %v588_v21 }
 0x10d   : > { %v571_v34 = vmul.f32 %v1259_v24, %v463_v32  ;;  %v587_v35 = vmul.f32 %v1259_v24, %v527_v33  ;;  %v609_v40 = vadd.f32 %v1266_v31, %v570_v25  ;;  %v625_v41 = vadd.f32 %v1266_v31, %v586_v26 }
 0x10e   : > { %v612_v38 = vadd.f32 %v1266_v31, %v573_v29  ;;  %v628_v39 = vadd.f32 %v1266_v31, %v589_v30 }
 0x10f   : > { %v610_v42 = vadd.f32 %v1266_v31, %v571_v34  ;;  %v626_v43 = vadd.f32 %v1266_v31, %v587_v35 }
 0x110   : > { %v978_v44 = vpack.c.bf16 %v612_v38, %v611_v36  ;;  %v1018_v45 = vpack.c.bf16 %v628_v39, %v627_v37 }
 0x111   : > { %v973_v46 = vpack.c.bf16 %v610_v42, %v609_v40  ;;  %v1013_v47 = vpack.c.bf16 %v626_v43, %v625_v41  ;;  %v1099_v48 = vpop.f32.mrb[12].mxu0  ;;  %v1115_v49 = vpop.f32.mrb[12].mxu1 }
 0x112   : > { %1034 = vst [vmem:[%s1285_s20 + $0x28] sm:$0xff] %v978_v44   ;;  %1042 = vst [vmem:[%s1285_s20 + $0x68] sm:$0xff] %v1018_v45   ;;  %v576_v50 = vmul.f32 %v1099_v48, %v1259_v24  ;;  %v592_v51 = vmul.f32 %v1115_v49, %v1259_v24  ;;  %v476_v52 = vpop.f32.mrb[13].mxu0  ;;  %v540_v53 = vpop.f32.mrb[13].mxu1 }
 0x113   : > { %1033 = vst [vmem:[%s1285_s20 + $0x20] sm:$0xff] %v973_v46   ;;  %1041 = vst [vmem:[%s1285_s20 + $0x60] sm:$0xff] %v1013_v47   ;;  %v574_v54 = vmul.f32 %v1259_v24, %v476_v52  ;;  %v590_v55 = vmul.f32 %v1259_v24, %v540_v53  ;;  %v1100_v56 = vpop.f32.mrb[14].mxu0  ;;  %v1116_v57 = vpop.f32.mrb[14].mxu1 }
 0x114   : > { %v577_v58 = vmul.f32 %v1100_v56, %v1259_v24  ;;  %v593_v59 = vmul.f32 %v1116_v57, %v1259_v24  ;;  %v479_v60 = vpop.f32.mrb[15].mxu0  ;;  %v543_v61 = vpop.f32.mrb[15].mxu1  ;;  %v615_v0 = vadd.f32 %v1266_v31, %v576_v50  ;;  %v631_v1 = vadd.f32 %v1266_v31, %v592_v51 }
 0x115   : > { %v575_v62 = vmul.f32 %v1259_v24, %v479_v60  ;;  %v591_v63 = vmul.f32 %v1259_v24, %v543_v61  ;;  %v613_v4 = vadd.f32 %v1266_v31, %v574_v54  ;;  %v629_v5 = vadd.f32 %v1266_v31, %v590_v55 }
 0x116   : > { %v616_v2 = vadd.f32 %v1266_v31, %v577_v58  ;;  %v632_v3 = vadd.f32 %v1266_v31, %v593_v59 }
 0x117   : > { %v614_v6 = vadd.f32 %v1266_v31, %v575_v62  ;;  %v630_v7 = vadd.f32 %v1266_v31, %v591_v63 }
 0x118   : > { %v988_v8 = vpack.c.bf16 %v616_v2, %v615_v0  ;;  %v1028_v9 = vpack.c.bf16 %v632_v3, %v631_v1 }
 0x119   : > { %v983_v24 = vpack.c.bf16 %v614_v6, %v613_v4  ;;  %v1023_v10 = vpack.c.bf16 %v630_v7, %v629_v5 }
 0x11a   : > { %1036 = vst [vmem:[%s1285_s20 + $0x38] sm:$0xff] %v988_v8   ;;  %1044 = vst [vmem:[%s1285_s20 + $0x78] sm:$0xff] %v1028_v9  }
 0x11b   : > { %1035 = vst [vmem:[%s1285_s20 + $0x30] sm:$0xff] %v983_v24   ;;  %1043 = vst [vmem:[%s1285_s20 + $0x70] sm:$0xff] %v1023_v10  }
 0x11c PF: > { %s14_s15 = sadd.s32 1, %s1171_s15  }
 0x11d   : > { %p11_p4 = scmp.ge.s32.totalorder %s14_s15, 4  }
 0x11f   :  { %13 = sbr.rel (!%p11_p4) target bundleno = 1 (0x1), region = 66 }

// kernel: _lambda_.19
= control target key start
LH: loop header
LB: loop body
LE: loop exit
PB: predicated region body
PF: predicated region fallthrough
CT: control target
= control target key end

     0   :  { %s1230_s15 = smov 0   ;;  %s1388_s0 = inlined_call_operand.vmem [shape: bf16[512,128], index: 0, kind: input, shape index: {}]   ;;  %s1389_s1 = inlined_call_operand.vmem [shape: bf16[128,128], index: 1, kind: input, shape index: {}]   ;;  %s1390_s2 = inlined_call_operand.vmem [shape: f32[1,128], index: 2, kind: input, shape index: {}]   ;;  %s1391_s3 = inlined_call_operand.vmem [shape: f32[1,128], index: 3, kind: input, shape index: {}]   ;;  %s1392_s4 = inlined_call_operand.vmem [shape: bf16[512,128], index: 4, kind: output, shape index: {}]  }
   0x1 LB: > { %s881_s16 = sadd.s32 4294967295, %s1203_s15   ;;  %p885_p0 = scmp.ge.s32.totalorder %s1203_s15, 1  ;;  %s1203_s15 = sphi %s1230_s15, %s14_s15  }
   0x2   : > { %p163_p1 = scmp.lt.s32.totalorder %s1203_s15, 3 }
   0x4   : > { %p164_p2 = pnand %p885_p0, %p163_p1 }
   0x5   : > { %v1173_v0 = vld [vmem:[%s1389_s1] sm:$0xff] (!%p164_p2)   ;;  %s886_s19 = sshll.u32 (!%p164_p2), %s881_s16, 5  ;;  %v1174_v1 = vld [vmem:[%s1389_s1 + $0x8] sm:$0xff] (!%p164_p2)   ;;  %v1175_v2 = vld [vmem:[%s1389_s1 + $0x10] sm:$0xff] (!%p164_p2)  }
   0x6   : > { %167 = sbr.rel (%p164_p2) target bundleno = 287 (0x11f), region = 36  ;;  %p190_p3 = scmp.lt.s32.totalorder (!%p164_p2), %s886_s19, 63  ;;  %1101 = vmatprep.subr.bf16.mxu0 (!%p164_p2), %v1173_v0  ;;  %1149 = vmatprep.subr.bf16.mxu1 (!%p164_p2), %v1173_v0  ;;  %v1176_v3 = vld [vmem:[%s1389_s1 + $0x18] sm:$0xff] (!%p164_p2)   ;;  %v1177_v6 = vld [vmem:[%s1389_s1 + $0x20] sm:$0xff] (!%p164_p2)   ;;  %v1178_v7 = vld [vmem:[%s1389_s1 + $0x28] sm:$0xff] (!%p164_p2)  }
   0x7   : > { %1102 = vmatpush3.bf16.msra.mxu0 (!%p164_p2), %v1173_v0  ;;  %1157 = vmatpush3.bf16.msra.mxu1 (!%p164_p2), %v1173_v0  ;;  %v1179_v8 = vld [vmem:[%s1389_s1 + $0x30] sm:$0xff] (!%p164_p2)   ;;  %v1180_v9 = vld [vmem:[%s1389_s1 + $0x38] sm:$0xff] (!%p164_p2)   ;;  %v1291_v24 = vld [vmem:[%s1390_s2] ss:$0 sm:$0xff] (!%p164_p2) }
   0x8   : > { %1103 = vmatprep.subr.bf16.mxu0 (!%p164_p2), %v1174_v1  ;;  %1150 = vmatprep.subr.bf16.mxu1 (!%p164_p2), %v1174_v1  ;;  %v1296_v26 = vld [vmem:[%s1391_s3] ss:$0 sm:$0xff] (!%p164_p2) }
   0xb   : > { %1104 = vmatpush3.bf16.msra.mxu0 (!%p164_p2), %v1174_v1  ;;  %1158 = vmatpush3.bf16.msra.mxu1 (!%p164_p2), %v1174_v1 }
   0xc   : > { %1105 = vmatprep.subr.bf16.mxu0 (!%p164_p2), %v1175_v2  ;;  %1151 = vmatprep.subr.bf16.mxu1 (!%p164_p2), %v1175_v2 }
   0xd   : > { %s1394_s19 = smov (!%p190_p3, %s886_s19), 63 }
   0xe   : > { %s887_s24 = sshll.u32 %s1394_s19, 2 }
   0xf   : > { %s1255_s27 = scalar_lea.vmem %s1388_s0, %s887_s24  ;;  %1106 = vmatpush3.bf16.msra.mxu0 %v1175_v2  ;;  %1159 = vmatpush3.bf16.msra.mxu1 %v1175_v2  ;;  %s1319_s20 = scalar_lea.vmem %s1392_s4, %s887_s24 }
  0x10   : > { %v1181_v4 = vld [vmem:[%s1255_s27] sm:$0xff]   ;;  %1107 = vmatprep.subr.bf16.mxu0 %v1176_v3  ;;  %1152 = vmatprep.subr.bf16.mxu1 %v1176_v3  ;;  %v1183_v10 = vld [vmem:[%s1255_s27 + $0x8] sm:$0xff]   ;;  %v1185_v12 = vld [vmem:[%s1255_s27 + $0x10] sm:$0xff]  }
  0x11   : > { %v1182_v5 = vld [vmem:[%s1255_s27 + $0x40] sm:$0xff]   ;;  %1117 = vmatprep.mubr.bf16.mxu0 %v1181_v4  ;;  %v1184_v11 = vld [vmem:[%s1255_s27 + $0x48] sm:$0xff]   ;;  %v1186_v13 = vld [vmem:[%s1255_s27 + $0x50] sm:$0xff]  }
  0x12   : > { %1133 = vmatprep.mubr.bf16.mxu1 %v1182_v5  ;;  %v1187_v14 = vld [vmem:[%s1255_s27 + $0x18] sm:$0xff]   ;;  %v1189_v16 = vld [vmem:[%s1255_s27 + $0x20] sm:$0xff]   ;;  %v1191_v18 = vld [vmem:[%s1255_s27 + $0x28] sm:$0xff]  }
  0x13   : > { %1108 = vmatpush3.bf16.msra.mxu0 %v1176_v3  ;;  %1160 = vmatpush3.bf16.msra.mxu1 %v1176_v3  ;;  %v1188_v15 = vld [vmem:[%s1255_s27 + $0x58] sm:$0xff]   ;;  %v1190_v17 = vld [vmem:[%s1255_s27 + $0x60] sm:$0xff]   ;;  %v1192_v19 = vld [vmem:[%s1255_s27 + $0x68] sm:$0xff]  }
  0x14   : > { %1109 = vmatprep.subr.bf16.mxu0 %v1177_v6  ;;  %1153 = vmatprep.subr.bf16.mxu1 %v1177_v6  ;;  %v1193_v20 = vld [vmem:[%s1255_s27 + $0x30] sm:$0xff]   ;;  %v1195_v22 = vld [vmem:[%s1255_s27 + $0x38] sm:$0xff]  }
  0x15   : > { %v1194_v21 = vld [vmem:[%s1255_s27 + $0x70] sm:$0xff]   ;;  %v1196_v23 = vld [vmem:[%s1255_s27 + $0x78] sm:$0xff]  }
  0x17   : > { %1110 = vmatpush3.bf16.msra.mxu0 %v1177_v6  ;;  %1161 = vmatpush3.bf16.msra.mxu1 %v1177_v6 }
  0x18   : > { %1111 = vmatprep.subr.bf16.mxu0 %v1178_v7  ;;  %1154 = vmatprep.subr.bf16.mxu1 %v1178_v7 }
  0x1b   : > { %1112 = vmatpush3.bf16.msra.mxu0 %v1178_v7  ;;  %1162 = vmatpush3.bf16.msra.mxu1 %v1178_v7 }
  0x1c   : > { %1113 = vmatprep.subr.bf16.mxu0 %v1179_v8  ;;  %1155 = vmatprep.subr.bf16.mxu1 %v1179_v8 }
  0x1f   : > { %1114 = vmatpush3.bf16.msra.mxu0 %v1179_v8  ;;  %1163 = vmatpush3.bf16.msra.mxu1 %v1179_v8 }
  0x20   : > { %1115 = vmatprep.subr.bf16.mxu0 %v1180_v9  ;;  %1156 = vmatprep.subr.bf16.mxu1 %v1180_v9 }
  0x23   : > { %1116 = vmatpush3.bf16.msra.mxu0 %v1180_v9  ;;  %1164 = vmatpush3.bf16.msra.mxu1 %v1180_v9 }
  0x26   : > { %1118 = vmatmul.mubr.bf16.vlgmr.msra.gmra.mrb[0].mxu0 %v1183_v10  ;;  %1134 = vmatmul.mubr.bf16.vlgmr.msra.gmra.mrb[0].mxu1 %v1184_v11 }
  0x27   : > { %1121 = vmatprep.mubr.bf16.mxu0 %v1185_v12  ;;  %1137 = vmatprep.mubr.bf16.mxu1 %v1186_v13 }
  0x2e   : > { %1122 = vmatmul.mubr.bf16.gmra.mrb[4].mxu0 %v1187_v14  ;;  %1138 = vmatmul.mubr.bf16.gmra.mrb[4].mxu1 %v1188_v15 }
  0x2f   : > { %1125 = vmatprep.mubr.bf16.mxu0 %v1189_v16  ;;  %1141 = vmatprep.mubr.bf16.mxu1 %v1190_v17 }
  0x36   : > { %1126 = vmatmul.mubr.bf16.gmra.mrb[8].mxu0 %v1191_v18  ;;  %1142 = vmatmul.mubr.bf16.gmra.mrb[8].mxu1 %v1192_v19 }
  0x37   : > { %1129 = vmatprep.mubr.bf16.mxu0 %v1193_v20  ;;  %1145 = vmatprep.mubr.bf16.mxu1 %v1194_v21 }
  0x3e   : > { %1130 = vmatmul.mubr.bf16.gmra.mrb[12].mxu0 %v1195_v22  ;;  %1146 = vmatmul.mubr.bf16.gmra.mrb[12].mxu1 %v1196_v23 }
  0xf9   : > { %v1119_v25 = vpop.f32.mrb[0].mxu0  ;;  %v1135_v27 = vpop.f32.mrb[0].mxu1 }
  0xfa   : > { %v564_v28 = vmul.f32 %v1119_v25, %v1291_v24  ;;  %v580_v29 = vmul.f32 %v1135_v27, %v1291_v24  ;;  %v428_v30 = vpop.f32.mrb[1].mxu0  ;;  %v492_v31 = vpop.f32.mrb[1].mxu1 }
  0xfb   : > { %v562_v32 = vmul.f32 %v1291_v24, %v428_v30  ;;  %v578_v33 = vmul.f32 %v1291_v24, %v492_v31  ;;  %v1120_v34 = vpop.f32.mrb[2].mxu0  ;;  %v1136_v35 = vpop.f32.mrb[2].mxu1 }
  0xfc   : > { %v603_v36 = vadd.f32 %v1296_v26, %v564_v28  ;;  %v619_v37 = vadd.f32 %v1296_v26, %v580_v29  ;;  %v565_v38 = vmul.f32 %v1120_v34, %v1291_v24  ;;  %v581_v39 = vmul.f32 %v1136_v35, %v1291_v24  ;;  %v431_v40 = vpop.f32.mrb[3].mxu0  ;;  %v495_v41 = vpop.f32.mrb[3].mxu1 }
  0xfd   : > { %v601_v42 = vadd.f32 %v1296_v26, %v562_v32  ;;  %v617_v43 = vadd.f32 %v1296_v26, %v578_v33  ;;  %v563_v44 = vmul.f32 %v1291_v24, %v431_v40  ;;  %v579_v45 = vmul.f32 %v1291_v24, %v495_v41 }
  0xfe   : > { %v604_v46 = vadd.f32 %v1296_v26, %v565_v38  ;;  %v620_v47 = vadd.f32 %v1296_v26, %v581_v39  ;;  %v635_v50 = vmax.f32 %v603_v36, 0.0  ;;  %v651_v51 = vmax.f32 %v619_v37, 0.0 }
  0xff   : > { %v602_v48 = vadd.f32 %v1296_v26, %v563_v44  ;;  %v618_v49 = vadd.f32 %v1296_v26, %v579_v45  ;;  %v633_v54 = vmax.f32 %v601_v42, 0.0  ;;  %v649_v55 = vmax.f32 %v617_v43, 0.0 }
 0x100   : > { %v636_v52 = vmax.f32 %v604_v46, 0.0  ;;  %v652_v53 = vmax.f32 %v620_v47, 0.0 }
 0x101   : > { %v634_v56 = vmax.f32 %v602_v48, 0.0  ;;  %v650_v57 = vmax.f32 %v618_v49, 0.0  ;;  %v1123_v58 = vpop.f32.mrb[4].mxu0  ;;  %v1139_v59 = vpop.f32.mrb[4].mxu1 }
 0x102   : > { %v990_v60 = vpack.c.bf16 %v636_v52, %v635_v50  ;;  %v1030_v61 = vpack.c.bf16 %v652_v53, %v651_v51  ;;  %v568_v62 = vmul.f32 %v1123_v58, %v1291_v24  ;;  %v584_v63 = vmul.f32 %v1139_v59, %v1291_v24  ;;  %v444_v0 = vpop.f32.mrb[5].mxu0  ;;  %v508_v1 = vpop.f32.mrb[5].mxu1 }
 0x103   : > { %v985_v2 = vpack.c.bf16 %v634_v56, %v633_v54  ;;  %v1025_v3 = vpack.c.bf16 %v650_v57, %v649_v55  ;;  %v566_v4 = vmul.f32 %v1291_v24, %v444_v0  ;;  %v582_v5 = vmul.f32 %v1291_v24, %v508_v1  ;;  %v1124_v6 = vpop.f32.mrb[6].mxu0  ;;  %v1140_v7 = vpop.f32.mrb[6].mxu1 }
 0x104   : > { %1062 = vst [vmem:[%s1319_s20 + $0x8] sm:$0xff] %v990_v60   ;;  %1070 = vst [vmem:[%s1319_s20 + $0x48] sm:$0xff] %v1030_v61   ;;  %v607_v8 = vadd.f32 %v1296_v26, %v568_v62  ;;  %v623_v9 = vadd.f32 %v1296_v26, %v584_v63  ;;  %v569_v10 = vmul.f32 %v1124_v6, %v1291_v24  ;;  %v447_v12 = vpop.f32.mrb[7].mxu0  ;;  %v511_v13 = vpop.f32.mrb[7].mxu1 }
 0x105   : > { %v585_v11 = vmul.f32 %v1140_v7, %v1291_v24  ;;  %986 = vst [vmem:[%s1319_s20] sm:$0xff] %v985_v2   ;;  %1069 = vst [vmem:[%s1319_s20 + $0x40] sm:$0xff] %v1025_v3   ;;  %v605_v14 = vadd.f32 %v1296_v26, %v566_v4  ;;  %v621_v15 = vadd.f32 %v1296_v26, %v582_v5 }
 0x106   : > { %v567_v16 = vmul.f32 %v1291_v24, %v447_v12  ;;  %v583_v17 = vmul.f32 %v1291_v24, %v511_v13  ;;  %v608_v18 = vadd.f32 %v1296_v26, %v569_v10  ;;  %v639_v22 = vmax.f32 %v607_v8, 0.0 }
 0x107   : > { %v624_v19 = vadd.f32 %v1296_v26, %v585_v11  ;;  %v655_v23 = vmax.f32 %v623_v9, 0.0  ;;  %v637_v28 = vmax.f32 %v605_v14, 0.0  ;;  %v653_v29 = vmax.f32 %v621_v15, 0.0 }
 0x108   : > { %v606_v20 = vadd.f32 %v1296_v26, %v567_v16  ;;  %v622_v21 = vadd.f32 %v1296_v26, %v583_v17  ;;  %v640_v25 = vmax.f32 %v608_v18, 0.0 }
 0x109   : > { %v656_v27 = vmax.f32 %v624_v19, 0.0  ;;  %v1127_v32 = vpop.f32.mrb[8].mxu0  ;;  %v1143_v33 = vpop.f32.mrb[8].mxu1 }
 0x10a   : > { %v638_v30 = vmax.f32 %v606_v20, 0.0  ;;  %v654_v31 = vmax.f32 %v622_v21, 0.0  ;;  %v1000_v34 = vpack.c.bf16 %v640_v25, %v639_v22  ;;  %v572_v36 = vmul.f32 %v1127_v32, %v1291_v24  ;;  %v460_v38 = vpop.f32.mrb[9].mxu0  ;;  %v524_v39 = vpop.f32.mrb[9].mxu1 }
 0x10b   : > { %v1040_v35 = vpack.c.bf16 %v656_v27, %v655_v23  ;;  %v588_v37 = vmul.f32 %v1143_v33, %v1291_v24  ;;  %v570_v42 = vmul.f32 %v1291_v24, %v460_v38  ;;  %v586_v43 = vmul.f32 %v1291_v24, %v524_v39  ;;  %v1128_v44 = vpop.f32.mrb[10].mxu0  ;;  %v1144_v45 = vpop.f32.mrb[10].mxu1 }
 0x10c   : > { %v995_v40 = vpack.c.bf16 %v638_v30, %v637_v28  ;;  %v1035_v41 = vpack.c.bf16 %v654_v31, %v653_v29  ;;  %1064 = vst [vmem:[%s1319_s20 + $0x18] sm:$0xff] %v1000_v34   ;;  %v611_v46 = vadd.f32 %v1296_v26, %v572_v36  ;;  %v573_v48 = vmul.f32 %v1128_v44, %v1291_v24  ;;  %v463_v50 = vpop.f32.mrb[11].mxu0  ;;  %v527_v51 = vpop.f32.mrb[11].mxu1 }
 0x10d   : > { %1072 = vst [vmem:[%s1319_s20 + $0x58] sm:$0xff] %v1040_v35   ;;  %v627_v47 = vadd.f32 %v1296_v26, %v588_v37  ;;  %v589_v49 = vmul.f32 %v1144_v45, %v1291_v24  ;;  %v609_v52 = vadd.f32 %v1296_v26, %v570_v42  ;;  %v625_v53 = vadd.f32 %v1296_v26, %v586_v43 }
 0x10e   : > { %1063 = vst [vmem:[%s1319_s20 + $0x10] sm:$0xff] %v995_v40   ;;  %1071 = vst [vmem:[%s1319_s20 + $0x50] sm:$0xff] %v1035_v41   ;;  %v571_v54 = vmul.f32 %v1291_v24, %v463_v50  ;;  %v587_v55 = vmul.f32 %v1291_v24, %v527_v51  ;;  %v612_v56 = vadd.f32 %v1296_v26, %v573_v48  ;;  %v643_v60 = vmax.f32 %v611_v46, 0.0 }
 0x10f   : > { %v628_v57 = vadd.f32 %v1296_v26, %v589_v49  ;;  %v659_v61 = vmax.f32 %v627_v47, 0.0  ;;  %v641_v0 = vmax.f32 %v609_v52, 0.0  ;;  %v657_v1 = vmax.f32 %v625_v53, 0.0 }
 0x110   : > { %v610_v58 = vadd.f32 %v1296_v26, %v571_v54  ;;  %v626_v59 = vadd.f32 %v1296_v26, %v587_v55  ;;  %v644_v62 = vmax.f32 %v612_v56, 0.0 }
 0x111   : > { %v660_v63 = vmax.f32 %v628_v57, 0.0  ;;  %v1131_v4 = vpop.f32.mrb[12].mxu0  ;;  %v1147_v5 = vpop.f32.mrb[12].mxu1 }
 0x112   : > { %v642_v2 = vmax.f32 %v610_v58, 0.0  ;;  %v658_v3 = vmax.f32 %v626_v59, 0.0  ;;  %v1010_v6 = vpack.c.bf16 %v644_v62, %v643_v60  ;;  %v576_v8 = vmul.f32 %v1131_v4, %v1291_v24  ;;  %v476_v10 = vpop.f32.mrb[13].mxu0  ;;  %v540_v11 = vpop.f32.mrb[13].mxu1 }
 0x113   : > { %v1050_v7 = vpack.c.bf16 %v660_v63, %v659_v61  ;;  %v592_v9 = vmul.f32 %v1147_v5, %v1291_v24  ;;  %v574_v14 = vmul.f32 %v1291_v24, %v476_v10  ;;  %v590_v15 = vmul.f32 %v1291_v24, %v540_v11  ;;  %v1132_v16 = vpop.f32.mrb[14].mxu0  ;;  %v1148_v17 = vpop.f32.mrb[14].mxu1 }
 0x114   : > { %v1005_v12 = vpack.c.bf16 %v642_v2, %v641_v0  ;;  %v1045_v13 = vpack.c.bf16 %v658_v3, %v657_v1  ;;  %1066 = vst [vmem:[%s1319_s20 + $0x28] sm:$0xff] %v1010_v6   ;;  %v615_v18 = vadd.f32 %v1296_v26, %v576_v8  ;;  %v577_v20 = vmul.f32 %v1132_v16, %v1291_v24  ;;  %v479_v22 = vpop.f32.mrb[15].mxu0  ;;  %v543_v23 = vpop.f32.mrb[15].mxu1 }
 0x115   : > { %1074 = vst [vmem:[%s1319_s20 + $0x68] sm:$0xff] %v1050_v7   ;;  %v631_v19 = vadd.f32 %v1296_v26, %v592_v9  ;;  %v593_v21 = vmul.f32 %v1148_v17, %v1291_v24  ;;  %v613_v25 = vadd.f32 %v1296_v26, %v574_v14  ;;  %v629_v27 = vadd.f32 %v1296_v26, %v590_v15 }
 0x116   : > { %1065 = vst [vmem:[%s1319_s20 + $0x20] sm:$0xff] %v1005_v12   ;;  %1073 = vst [vmem:[%s1319_s20 + $0x60] sm:$0xff] %v1045_v13   ;;  %v575_v28 = vmul.f32 %v1291_v24, %v479_v22  ;;  %v591_v29 = vmul.f32 %v1291_v24, %v543_v23  ;;  %v616_v30 = vadd.f32 %v1296_v26, %v577_v20  ;;  %v647_v34 = vmax.f32 %v615_v18, 0.0 }
 0x117   : > { %v632_v31 = vadd.f32 %v1296_v26, %v593_v21  ;;  %v663_v35 = vmax.f32 %v631_v19, 0.0  ;;  %v645_v38 = vmax.f32 %v613_v25, 0.0  ;;  %v661_v39 = vmax.f32 %v629_v27, 0.0 }
 0x118   : > { %v614_v32 = vadd.f32 %v1296_v26, %v575_v28  ;;  %v630_v33 = vadd.f32 %v1296_v26, %v591_v29  ;;  %v648_v36 = vmax.f32 %v616_v30, 0.0 }
 0x119   : > { %v664_v37 = vmax.f32 %v632_v31, 0.0 }
 0x11a   : > { %v646_v40 = vmax.f32 %v614_v32, 0.0  ;;  %v662_v24 = vmax.f32 %v630_v33, 0.0  ;;  %v1020_v41 = vpack.c.bf16 %v648_v36, %v647_v34 }
 0x11b   : > { %v1060_v42 = vpack.c.bf16 %v664_v37, %v663_v35 }
 0x11c   : > { %v1015_v43 = vpack.c.bf16 %v646_v40, %v645_v38  ;;  %v1055_v44 = vpack.c.bf16 %v662_v24, %v661_v39  ;;  %1068 = vst [vmem:[%s1319_s20 + $0x38] sm:$0xff] %v1020_v41  }
 0x11d   : > { %1076 = vst [vmem:[%s1319_s20 + $0x78] sm:$0xff] %v1060_v42  }
 0x11e   : > { %1067 = vst [vmem:[%s1319_s20 + $0x30] sm:$0xff] %v1015_v43   ;;  %1075 = vst [vmem:[%s1319_s20 + $0x70] sm:$0xff] %v1055_v44  }
 0x11f PF: > { %s14_s15 = sadd.s32 1, %s1203_s15  }
 0x120   : > { %p11_p4 = scmp.ge.s32.totalorder %s14_s15, 4  }
 0x122   :  { %13 = sbr.rel (!%p11_p4) target bundleno = 1 (0x1), region = 66 }

// kernel: _lambda_.14
= control target key start
LH: loop header
LB: loop body
LE: loop exit
PB: predicated region body
PF: predicated region fallthrough
CT: control target
= control target key end

     0   :  { %vm524_vm0 = vcmask 1046528   ;;  %s4340_s1 = inlined_call_operand.vmem [shape: bf16[9,128,128], index: 1, kind: input, shape index: {}]   ;;  %s4341_s0 = inlined_call_operand.vmem [shape: bf16[4,2,9,9,128], index: 0, kind: input, shape index: {}]   ;;  %s4342_s2 = inlined_call_operand.vmem [shape: f32[1,128], index: 2, kind: input, shape index: {}]   ;;  %s4343_s3 = inlined_call_operand.vmem [shape: f32[1,128], index: 3, kind: input, shape index: {}]   ;;  %s4344_s4 = inlined_call_operand.vmem [shape: bf16[2,8,8,128], index: 4, kind: output, shape index: {}]  }
   0x1   :  { %v3472_v0 = vld [vmem:[%s4340_s1 + $0x40] sm:$0xff]   ;;  %v3474_v2 = vld [vmem:[%s4340_s1 + $0x48] sm:$0xff]   ;;  %v3476_v4 = vld [vmem:[%s4340_s1 + $0x50] sm:$0xff]  }
   0x2   :  { %v3473_v1 = vld [vmem:[%s4340_s1 + $0x100] sm:$0xff]   ;;  %3040 = vmatprep.subr.bf16.mxu1 %v3472_v0  ;;  %v3475_v3 = vld [vmem:[%s4340_s1 + $0x108] sm:$0xff]   ;;  %v3477_v5 = vld [vmem:[%s4340_s1 + $0x110] sm:$0xff]  }
   0x3   :  { %3168 = vmatprep.subr.bf16.mxu0 %v3473_v1  ;;  %3041 = vmatpush3.bf16.msra.mxu1 %v3472_v0  ;;  %v3478_v6 = vld [vmem:[%s4340_s1 + $0x58] sm:$0xff]   ;;  %v3480_v8 = vld [vmem:[%s4340_s1 + $0x60] sm:$0xff]   ;;  %v3482_v10 = vld [vmem:[%s4340_s1 + $0x68] sm:$0xff]  }
   0x4   :  { %3169 = vmatpush3.bf16.msra.mxu0 %v3473_v1  ;;  %3042 = vmatprep.subr.bf16.mxu1 %v3474_v2  ;;  %v3479_v7 = vld [vmem:[%s4340_s1 + $0x118] sm:$0xff]   ;;  %v3481_v9 = vld [vmem:[%s4340_s1 + $0x120] sm:$0xff]   ;;  %v3483_v11 = vld [vmem:[%s4340_s1 + $0x128] sm:$0xff]  }
   0x5   :  { %3170 = vmatprep.subr.bf16.mxu0 %v3475_v3  ;;  %v3488_v12 = vld [vmem:[%s4341_s0 + $0x90] ss:$8 sps:$4 sm:$0xff]   ;;  %v3490_v18 = vld [vmem:[%s4341_s0 + $0xa0] ss:$8 sps:$4 sm:$0xff]   ;;  %v2640_v43 = vld [vmem:[%s4341_s0 + $0x124] sm:$0x1] }
   0x6   :  { %v3489_v13 = vld [vmem:[%s4341_s0 + $0x1b0] ss:$8 sps:$4 sm:$0xff]   ;;  %3056 = vmatprep.mubr.bf16.mxu1 %v3488_v12  ;;  %v3491_v19 = vld [vmem:[%s4340_s1] sm:$0xff]   ;;  %v3494_v22 = vld [vmem:[%s4340_s1 + $0x8] sm:$0xff]   ;;  %v1250_v47 = vunpack.c.l.bf16 %v2640_v43 }
   0x7   :  { %3043 = vmatpush3.bf16.msra.mxu1 %v3474_v2  ;;  %3184 = vmatprep.mubr.bf16.mxu0 %v3489_v13  ;;  %v3484_v14 = vld [vmem:[%s4340_s1 + $0x70] sm:$0xff]   ;;  %v3486_v16 = vld [vmem:[%s4340_s1 + $0x78] sm:$0xff]   ;;  %v3493_v20 = vld [vmem:[%s4340_s1 + $0x140] sm:$0xff]  }
   0x8   :  { %3171 = vmatpush3.bf16.msra.mxu0 %v3475_v3  ;;  %3044 = vmatprep.subr.bf16.mxu1 %v3476_v4  ;;  %v3485_v15 = vld [vmem:[%s4340_s1 + $0x130] sm:$0xff]   ;;  %v3487_v17 = vld [vmem:[%s4340_s1 + $0x138] sm:$0xff]   ;;  %v3492_v21 = vld [vmem:[%s4341_s0 + $0x1c0] ss:$8 sps:$4 sm:$0xff]   ;;  %v1314_v53 = vrot.slane %v1250_v47, 1 }
   0x9   :  { %3172 = vmatprep.subr.bf16.mxu0 %v3477_v5  ;;  %v3495_v23 = vld [vmem:[%s4340_s1 + $0x148] sm:$0xff]   ;;  %v3496_v24 = vld [vmem:[%s4341_s0 + $0xb0] ss:$8 sps:$4 sm:$0xff]   ;;  %v3507_v35 = vld [vmem:[%s4340_s1 + $0x20] sm:$0xff]  }
   0xa   :  { %v3497_v25 = vld [vmem:[%s4341_s0 + $0x1d0] ss:$8 sps:$4 sm:$0xff]   ;;  %v3498_v26 = vld [vmem:[%s4341_s0 + $0xc0] ss:$8 sps:$4 sm:$0xff]   ;;  %v2642_v44 = vld [vmem:[%s4341_s0 + $0x12c] sm:$0x1] }
   0xb   :  { %3045 = vmatpush3.bf16.msra.mxu1 %v3476_v4  ;;  %v3499_v27 = vld [vmem:[%s4340_s1 + $0x10] sm:$0xff]   ;;  %v3500_v29 = vld [vmem:[%s4341_s0 + $0x1e0] ss:$8 sps:$4 sm:$0xff]   ;;  %v3502_v30 = vld [vmem:[%s4340_s1 + $0x18] sm:$0xff]   ;;  %v1252_v49 = vunpack.c.l.bf16 %v2642_v44 }
   0xc   :  { %3173 = vmatpush3.bf16.msra.mxu0 %v3477_v5  ;;  %3046 = vmatprep.subr.bf16.mxu1 %v3478_v6  ;;  %v3501_v28 = vld [vmem:[%s4340_s1 + $0x150] sm:$0xff]   ;;  %v3503_v31 = vld [vmem:[%s4340_s1 + $0x158] sm:$0xff]   ;;  %v3509_v37 = vld [vmem:[%s4340_s1 + $0x160] sm:$0xff]  }
   0xd   :  { %3174 = vmatprep.subr.bf16.mxu0 %v3479_v7  ;;  %v3504_v32 = vld [vmem:[%s4341_s0 + $0xd8] ss:$8 sps:$4 sm:$0xff]   ;;  %v3506_v34 = vld [vmem:[%s4341_s0 + $0xe8] ss:$8 sps:$4 sm:$0xff]   ;;  %v1317_v55 = vrot.slane %v1252_v49, 1 }
   0xe   :  { %v3505_v33 = vld [vmem:[%s4341_s0 + $0x1f8] ss:$8 sps:$4 sm:$0xff]   ;;  %v3508_v36 = vld [vmem:[%s4341_s0 + $0x208] ss:$8 sps:$4 sm:$0xff]   ;;  %v2644_v57 = vld [vmem:[%s4341_s0 + $0x134] sm:$0x1] }
   0xf   :  { %3047 = vmatpush3.bf16.msra.mxu1 %v3478_v6  ;;  %v3510_v38 = vld [vmem:[%s4340_s1 + $0x28] sm:$0xff]   ;;  %v3512_v40 = vld [vmem:[%s4341_s0 + $0xf8] ss:$8 sps:$4 sm:$0xff]   ;;  %v3515_v45 = vld [vmem:[%s4340_s1 + $0x30] sm:$0xff]   ;;  %v1254_v62 = vunpack.c.l.bf16 %v2644_v57 }
  0x10   :  { %3175 = vmatpush3.bf16.msra.mxu0 %v3479_v7  ;;  %3048 = vmatprep.subr.bf16.mxu1 %v3480_v8  ;;  %v3511_v39 = vld [vmem:[%s4340_s1 + $0x168] sm:$0xff]   ;;  %v3513_v41 = vld [vmem:[%s4341_s0 + $0x218] ss:$8 sps:$4 sm:$0xff]   ;;  %v3517_v50 = vld [vmem:[%s4340_s1 + $0x170] sm:$0xff]  }
  0x11   :  { %3176 = vmatprep.subr.bf16.mxu0 %v3481_v9  ;;  %v2639_v42 = vld [vmem:[%s4341_s0 + $0x120] ss:$8 sps:$4 sm:$0xff]   ;;  %v2643_v56 = vld [vmem:[%s4341_s0 + $0x130] ss:$8 sps:$4 sm:$0xff]   ;;  %v2646_v58 = vld [vmem:[%s4341_s0 + $0x13c] sm:$0x1] }
  0x12   :  { %v1249_v46 = vunpack.c.l.bf16 %v2639_v42  ;;  %v1251_v48 = vunpack.c.h.bf16 %v2639_v42  ;;  %v3514_v51 = vld [vmem:[%s4341_s0 + $0x108] ss:$8 sps:$4 sm:$0xff]   ;;  %v1253_v59 = vunpack.c.l.bf16 %v2643_v56  ;;  %v1255_v60 = vunpack.c.h.bf16 %v2643_v56  ;;  %v3518_v0 = vld [vmem:[%s4340_s1 + $0x38] sm:$0xff]   ;;  %v2650_v12 = vld [vmem:[%s4341_s0 + $0x14c] sm:$0x1] }
  0x13   :  { %3049 = vmatpush3.bf16.msra.mxu1 %v3480_v8  ;;  %v3516_v61 = vld [vmem:[%s4341_s0 + $0x228] ss:$8 sps:$4 sm:$0xff]   ;;  %v1256_v63 = vunpack.c.l.bf16 %v2646_v58  ;;  %v3519_v1 = vld [vmem:[%s4340_s1 + $0x178] sm:$0xff]   ;;  %v1320_v6 = vrot.slane %v1254_v62, 1  ;;  %v2656_v47 = vld [vmem:[%s4341_s0 + $0x16c] sm:$0x1] }
  0x14   :  { %3177 = vmatpush3.bf16.msra.mxu0 %v3481_v9  ;;  %3050 = vmatprep.subr.bf16.mxu1 %v3482_v10  ;;  %v1313_v52 = vrot.slane %v1249_v46, 1  ;;  %v1316_v54 = vrot.slane %v1251_v48, 1  ;;  %v1319_v4 = vrot.slane %v1253_v59, 1  ;;  %v1322_v5 = vrot.slane %v1255_v60, 1  ;;  %v3520_v8 = vld [vmem:[%s4341_s0] ss:$8 sps:$4 sm:$0xff]  }
  0x15   :  { %3178 = vmatprep.subr.bf16.mxu0 %v3483_v11  ;;  %v1323_v7 = vrot.slane %v1256_v63, 1  ;;  %v3528_v44 = vld [vmem:[%s4340_s1 + $0x90] sm:$0xff]   ;;  %v2659_v56 = vld [vmem:[%s4341_s0 + $0x178] ss:$8 sps:$4 sm:$0xff]   ;;  %v2660_v60 = vld [vmem:[%s4341_s0 + $0x17c] sm:$0x1] }
  0x16   :  { %v1315_v2 = vsel %vm524_vm0, %v1313_v52, %v1314_v53  ;;  %v1318_v3 = vsel %vm524_vm0, %v1316_v54, %v1317_v55  ;;  %v2655_v46 = vld [vmem:[%s4341_s0 + $0x168] ss:$8 sps:$4 sm:$0xff]   ;;  %v2658_v48 = vld [vmem:[%s4341_s0 + $0x174] sm:$0x1]  ;;  %v1266_v53 = vunpack.c.l.bf16 %v2656_v47  ;;  %v3530_v63 = vld [vmem:[%s4340_s1 + $0x98] sm:$0xff]  }
  0x17   :  { %3051 = vmatpush3.bf16.msra.mxu1 %v3482_v10  ;;  %v1377_v9 = vpack.c.bf16 %v1318_v3, %v1315_v2  ;;  %v2647_v10 = vld [vmem:[%s4341_s0 + $0x140] ss:$8 sps:$4 sm:$0xff]   ;;  %v3527_v49 = vld [vmem:[%s4341_s0 + $0x30] ss:$8 sps:$4 sm:$0xff]   ;;  %v1265_v52 = vunpack.c.l.bf16 %v2655_v46  ;;  %v1267_v54 = vunpack.c.h.bf16 %v2655_v46  ;;  %v1268_v55 = vunpack.c.l.bf16 %v2658_v48  ;;  %v2662_v2 = vld [vmem:[%s4341_s0 + $0x184] sm:$0x1] }
  0x18   :  { %3179 = vmatpush3.bf16.msra.mxu0 %v3483_v11  ;;  %3052 = vmatprep.subr.bf16.mxu1 %v3484_v14  ;;  %v2648_v11 = vld [vmem:[%s4341_s0 + $0x144] sm:$0x1]  ;;  %v1257_v13 = vunpack.c.l.bf16 %v2647_v10  ;;  %v1338_v58 = vrot.slane %v1266_v53, 1  ;;  %v1270_v3 = vunpack.c.l.bf16 %v2660_v60  ;;  %v3540_v46 = vld [vmem:[%s4340_s1 + $0xb0] sm:$0xff]  }
  0x19   :  { %3180 = vmatprep.subr.bf16.mxu0 %v3485_v15  ;;  %v1337_v57 = vrot.slane %v1265_v52, 1  ;;  %v1340_v59 = vrot.slane %v1267_v54, 1  ;;  %v431_v54 = vld [vmem:[%s4341_s0 + $0xc] sm:$0x1] }
  0x1a   :  { %v463_v60 = vunpack.c.l.bf16 %v431_v54 }
  0x1b   :  { %3053 = vmatpush3.bf16.msra.mxu1 %v3484_v14  ;;  %v1258_v14 = vunpack.c.l.bf16 %v2648_v11 }
  0x1c   :  { %3181 = vmatpush3.bf16.msra.mxu0 %v3485_v15  ;;  %3054 = vmatprep.subr.bf16.mxu1 %v3486_v16  ;;  %v1259_v15 = vunpack.c.h.bf16 %v2647_v10  ;;  %v1344_v10 = vrot.slane %v1270_v3, 1 }
  0x1d   :  { %3182 = vmatprep.subr.bf16.mxu0 %v3487_v17 }
  0x1f   :  { %3055 = vmatpush3.bf16.msra.mxu1 %v3486_v16  ;;  %v3521_v16 = vld [vmem:[%s4341_s0 + $0x10] ss:$8 sps:$4 sm:$0xff]  }
  0x20   :  { %3183 = vmatpush3.bf16.msra.mxu0 %v3487_v17  ;;  %3072 = vmatprep.subr.bf16.mxu1 %v3491_v19  ;;  %v3522_v17 = vld [vmem:[%s4340_s1 + $0x80] sm:$0xff]  }
  0x21   :  { %3200 = vmatprep.subr.bf16.mxu0 %v3493_v20 }
  0x22   :  { %3057 = vmatmul.mubr.bf16.vlgmr.msra.gmra.mrb[0].mxu1 %v3490_v18  ;;  %v1321_v18 = vsel %vm524_vm0, %v1319_v4, %v1320_v6  ;;  %v1271_v4 = vunpack.c.h.bf16 %v2659_v56  ;;  %v1339_v6 = vsel %vm524_vm0, %v1337_v57, %v1338_v58  ;;  %v3541_v58 = vld [vmem:[%s4340_s1 + $0x1b0] sm:$0xff]  }
  0x23   :  { %3185 = vmatmul.mubr.bf16.vlgmr.msra.gmra.mrb[0].mxu0 %v3492_v21  ;;  %3073 = vmatpush3.bf16.msra.mxu1 %v3491_v19  ;;  %v1324_v19 = vsel %vm524_vm0, %v1322_v5, %v1323_v7  ;;  %v3523_v21 = vld [vmem:[%s4340_s1 + $0x180] sm:$0xff]   ;;  %v3531_v5 = vld [vmem:[%s4340_s1 + $0x198] sm:$0xff]   ;;  %v1272_v7 = vunpack.c.l.bf16 %v2662_v2 }
  0x24   :  { %3201 = vmatpush3.bf16.msra.mxu0 %v3493_v20  ;;  %3074 = vmatprep.subr.bf16.mxu1 %v3494_v22  ;;  %v1260_v20 = vunpack.c.l.bf16 %v2650_v12  ;;  %v1346_v11 = vrot.slane %v1271_v4, 1  ;;  %v3542_v4 = vld [vmem:[%s4340_s1 + $0xb8] sm:$0xff]  }
  0x25   :  { %3202 = vmatprep.subr.bf16.mxu0 %v3495_v23  ;;  %3060 = vmatprep.mubr.bf16.mxu1 %v3496_v24  ;;  %v1328_v24 = vrot.slane %v1259_v15, 1 }
  0x26   :  { %3188 = vmatprep.mubr.bf16.mxu0 %v3497_v25  ;;  %v2651_v25 = vld [vmem:[%s4341_s0 + $0x150] ss:$8 sps:$4 sm:$0xff]  }
  0x27   :  { %3075 = vmatpush3.bf16.msra.mxu1 %v3494_v22  ;;  %v1325_v22 = vrot.slane %v1257_v13, 1  ;;  %v1347_v13 = vrot.slane %v1272_v7, 1  ;;  %v529_v7 = vrot.slane %v463_v60, 1  ;;  %v3552_v60 = vld [vmem:[%s4341_s0 + $0x38] ss:$8 sps:$4 sm:$0xff]  }
  0x28   :  { %3203 = vmatpush3.bf16.msra.mxu0 %v3495_v23  ;;  %3076 = vmatprep.subr.bf16.mxu1 %v3499_v27  ;;  %v1326_v23 = vrot.slane %v1258_v14, 1  ;;  %v3534_v14 = vld [vmem:[%s4340_s1 + $0xa0] sm:$0xff]  }
  0x29   :  { %3204 = vmatprep.subr.bf16.mxu0 %v3501_v28 }
  0x2a   :  { %3061 = vmatmul.mubr.bf16.gmra.mrb[4].mxu1 %v3498_v26  ;;  %v3524_v26 = vld [vmem:[%s4340_s1 + $0x88] sm:$0xff]  }
  0x2b   :  { %3189 = vmatmul.mubr.bf16.gmra.mrb[4].mxu0 %v3500_v29  ;;  %3077 = vmatpush3.bf16.msra.mxu1 %v3499_v27  ;;  %v1329_v27 = vrot.slane %v1260_v20, 1  ;;  %v2654_v29 = vld [vmem:[%s4341_s0 + $0x15c] sm:$0x1]  ;;  %v2666_v20 = vld [vmem:[%s4341_s0 + $0x194] sm:$0x1] }
  0x2c   :  { %3205 = vmatpush3.bf16.msra.mxu0 %v3501_v28  ;;  %3078 = vmatprep.subr.bf16.mxu1 %v3502_v30  ;;  %v2652_v28 = vld [vmem:[%s4341_s0 + $0x154] sm:$0x1] }
  0x2d   :  { %3206 = vmatprep.subr.bf16.mxu0 %v3503_v31  ;;  %3064 = vmatprep.mubr.bf16.mxu1 %v3504_v32  ;;  %v1378_v32 = vpack.c.bf16 %v1324_v19, %v1321_v18  ;;  %v1348_v18 = vsel %vm524_vm0, %v1346_v11, %v1347_v13  ;;  %v2664_v19 = vld [vmem:[%s4341_s0 + $0x18c] sm:$0x1] }
  0x2e   :  { %3192 = vmatprep.mubr.bf16.mxu0 %v3505_v33  ;;  %v3525_v33 = vld [vmem:[%s4340_s1 + $0x188] sm:$0xff]  }
  0x2f   :  { %3079 = vmatpush3.bf16.msra.mxu1 %v3502_v30  ;;  %v1261_v30 = vunpack.c.l.bf16 %v2651_v25 }
  0x30   :  { %3207 = vmatpush3.bf16.msra.mxu0 %v3503_v31  ;;  %3080 = vmatprep.subr.bf16.mxu1 %v3507_v35  ;;  %v1263_v31 = vunpack.c.h.bf16 %v2651_v25  ;;  %v1276_v25 = vunpack.c.l.bf16 %v2666_v20  ;;  %v3545_v20 = vld [vmem:[%s4340_s1 + $0xc0] sm:$0xff]  }
  0x31   :  { %3208 = vmatprep.subr.bf16.mxu0 %v3509_v37 }
  0x32   :  { %3065 = vmatmul.mubr.bf16.gmra.mrb[8].mxu1 %v3506_v34  ;;  %v1327_v34 = vsel %vm524_vm0, %v1325_v22, %v1326_v23  ;;  %v3535_v23 = vld [vmem:[%s4340_s1 + $0x1a0] sm:$0xff]  }
  0x33   :  { %3193 = vmatmul.mubr.bf16.gmra.mrb[8].mxu0 %v3508_v36  ;;  %3081 = vmatpush3.bf16.msra.mxu1 %v3507_v35  ;;  %v1262_v35 = vunpack.c.l.bf16 %v2652_v28  ;;  %v1264_v36 = vunpack.c.l.bf16 %v2654_v29 }
  0x34   :  { %3209 = vmatpush3.bf16.msra.mxu0 %v3509_v37  ;;  %3082 = vmatprep.subr.bf16.mxu1 %v3510_v38  ;;  %v1330_v37 = vsel %vm524_vm0, %v1328_v24, %v1329_v27  ;;  %v1274_v24 = vunpack.c.l.bf16 %v2664_v19  ;;  %v3536_v27 = vld [vmem:[%s4340_s1 + $0xa8] sm:$0xff]  }
  0x35   :  { %3210 = vmatprep.subr.bf16.mxu0 %v3511_v39  ;;  %3068 = vmatprep.mubr.bf16.mxu1 %v3512_v40  ;;  %v3526_v40 = vld [vmem:[%s4341_s0 + $0x20] ss:$8 sps:$4 sm:$0xff]   ;;  %v1335_v42 = vrot.slane %v1264_v36, 1  ;;  %v1379_v43 = vpack.c.bf16 %v1330_v37, %v1327_v34  ;;  %v2668_v34 = vld [vmem:[%s4341_s0 + $0x19c] sm:$0x1] }
  0x36   :  { %3196 = vmatprep.mubr.bf16.mxu0 %v3513_v41  ;;  %v1332_v41 = vrot.slane %v1262_v35, 1  ;;  %v2670_v35 = vld [vmem:[%s4341_s0 + $0x1a4] sm:$0x1] }
  0x37   :  { %3083 = vmatpush3.bf16.msra.mxu1 %v3510_v38  ;;  %v1331_v38 = vrot.slane %v1261_v30, 1  ;;  %v2667_v30 = vld [vmem:[%s4341_s0 + $0x198] ss:$8 sps:$4 sm:$0xff]  }
  0x38   :  { %3211 = vmatpush3.bf16.msra.mxu0 %v3511_v39  ;;  %3084 = vmatprep.subr.bf16.mxu1 %v3515_v45  ;;  %v1334_v39 = vrot.slane %v1263_v31, 1  ;;  %v3537_v31 = vld [vmem:[%s4340_s1 + $0x1a8] sm:$0xff]   ;;  %v1277_v36 = vunpack.c.l.bf16 %v2667_v30  ;;  %v1279_v37 = vunpack.c.h.bf16 %v2667_v30 }
  0x39   :  { %3212 = vmatprep.subr.bf16.mxu0 %v3517_v50 }
  0x3a   :  { %3069 = vmatmul.mubr.bf16.gmra.mrb[12].mxu1 %v3514_v51  ;;  %v3529_v51 = vld [vmem:[%s4340_s1 + $0x190] sm:$0xff]  }
  0x3b   :  { %3197 = vmatmul.mubr.bf16.gmra.mrb[12].mxu0 %v3516_v61  ;;  %3085 = vmatpush3.bf16.msra.mxu1 %v3515_v45  ;;  %v1333_v45 = vsel %vm524_vm0, %v1331_v38, %v1332_v41  ;;  %v1269_v61 = vunpack.c.l.bf16 %v2659_v56  ;;  %v3538_v38 = vld [vmem:[%s4341_s0 + $0x68] ss:$8 sps:$4 sm:$0xff]  }
  0x3c   :  { %3213 = vmatpush3.bf16.msra.mxu0 %v3517_v50  ;;  %3086 = vmatprep.subr.bf16.mxu1 %v3518_v0  ;;  %v1336_v50 = vsel %vm524_vm0, %v1334_v39, %v1335_v42  ;;  %v1278_v39 = vunpack.c.l.bf16 %v2668_v34 }
  0x3d   :  { %3214 = vmatprep.subr.bf16.mxu0 %v3519_v1  ;;  %3088 = vmatprep.mubr.bf16.mxu1 %v3520_v8  ;;  %v1380_v62 = vpack.c.bf16 %v1336_v50, %v1333_v45  ;;  %v1343_v8 = vrot.slane %v1269_v61, 1  ;;  %v429_v50 = vld [vmem:[%s4341_s0 + $0x4] sm:$0x1]  ;;  %v432_v61 = vld [vmem:[%s4341_s0 + $0x10] ss:$8 sps:$4 sm:$0xff]  }
  0x3e   :  { %3216 = vmatprep.mubr.bf16.mxu0 %v1377_v9  ;;  %v1356_v47 = vrot.slane %v1278_v39, 1  ;;  %v461_v56 = vunpack.c.l.bf16 %v429_v50  ;;  %v464_v2 = vunpack.c.l.bf16 %v432_v61 }
  0x3f   :  { %3087 = vmatpush3.bf16.msra.mxu1 %v3518_v0  ;;  %v3532_v0 = vld [vmem:[%s4341_s0 + $0x48] ss:$8 sps:$4 sm:$0xff]   ;;  %v1345_v15 = vsel %vm524_vm0, %v1343_v8, %v1344_v10  ;;  %v466_v8 = vunpack.c.h.bf16 %v432_v61  ;;  %v3554_v61 = vld [vmem:[%s4340_s1 + $0xd8] sm:$0xff]  }
  0x40   :  { %3215 = vmatpush3.bf16.msra.mxu0 %v3519_v1  ;;  %3104 = vmatprep.subr.bf16.mxu1 %v3522_v17  ;;  %v1341_v1 = vrot.slane %v1268_v55, 1  ;;  %v531_v11 = vrot.slane %v464_v2, 1  ;;  %v448_v2 = vld [vmem:[%s4341_s0 + $0x58] ss:$8 sps:$4 sm:$0xff]  }
  0x41   :  { %3232 = vmatprep.subr.bf16.mxu0 %v3523_v21 }
  0x42   :  { %3089 = vmatmul.mubr.bf16.vlgmr.msra.gmra.mrb[0].mxu1 %v3521_v16  ;;  %v1342_v9 = vsel %vm524_vm0, %v1340_v59, %v1341_v1  ;;  %v2663_v16 = vld [vmem:[%s4341_s0 + $0x188] ss:$8 sps:$4 sm:$0xff]   ;;  %v435_v1 = vld [vmem:[%s4341_s0 + $0x1c] sm:$0x1] }
  0x43   :  { %3217 = vmatmul.mubr.bf16.vlgmr.msra.gmra.mrb[0].mxu0 %v1378_v32  ;;  %3105 = vmatpush3.bf16.msra.mxu1 %v3522_v17  ;;  %v1381_v12 = vpack.c.bf16 %v1342_v9, %v1339_v6  ;;  %v3533_v17 = vld [vmem:[%s4341_s0 + $0x58] ss:$8 sps:$4 sm:$0xff]   ;;  %v1275_v22 = vunpack.c.h.bf16 %v2663_v16  ;;  %v1350_v32 = vrot.slane %v1274_v24, 1  ;;  %v467_v9 = vunpack.c.l.bf16 %v435_v1  ;;  %v439_v24 = vld [vmem:[%s4341_s0 + $0x2c] sm:$0x1] }
  0x44   :  { %3233 = vmatpush3.bf16.msra.mxu0 %v3523_v21  ;;  %3106 = vmatprep.subr.bf16.mxu1 %v3524_v26  ;;  %v1273_v21 = vunpack.c.l.bf16 %v2663_v16  ;;  %v471_v30 = vunpack.c.l.bf16 %v439_v24  ;;  %v3558_v24 = vld [vmem:[%s4341_s0 + $0x60] ss:$8 sps:$4 sm:$0xff]  }
  0x45   :  { %3234 = vmatprep.subr.bf16.mxu0 %v3525_v33  ;;  %3092 = vmatprep.mubr.bf16.mxu1 %v3526_v40  ;;  %v1352_v29 = vrot.slane %v1275_v22, 1  ;;  %v1280_v40 = vunpack.c.l.bf16 %v2670_v35  ;;  %v535_v16 = vrot.slane %v467_v9, 1  ;;  %v436_v22 = vld [vmem:[%s4341_s0 + $0x20] ss:$8 sps:$4 sm:$0xff]   ;;  %v3555_v9 = vld [vmem:[%s4340_s1 + $0x1d8] sm:$0xff]  }
  0x46   :  { %3220 = vmatprep.mubr.bf16.mxu0 %v1379_v43  ;;  %v1349_v28 = vrot.slane %v1273_v21, 1  ;;  %v1355_v43 = vrot.slane %v1277_v36, 1  ;;  %v3547_v21 = vld [vmem:[%s4340_s1 + $0x1c0] sm:$0xff]   ;;  %v443_v36 = vld [vmem:[%s4341_s0 + $0x3c] sm:$0x1]  ;;  %v541_v39 = vrot.slane %v471_v30, 1 }
  0x47   :  { %3107 = vmatpush3.bf16.msra.mxu1 %v3524_v26  ;;  %v1382_v26 = vpack.c.bf16 %v1348_v18, %v1345_v15  ;;  %v1359_v48 = vrot.slane %v1280_v40, 1  ;;  %v534_v15 = vrot.slane %v466_v8, 1  ;;  %v455_v30 = vld [vmem:[%s4341_s0 + $0x74] sm:$0x1] }
  0x48   :  { %3235 = vmatpush3.bf16.msra.mxu0 %v3525_v33  ;;  %3108 = vmatprep.subr.bf16.mxu1 %v3528_v44  ;;  %v1353_v33 = vrot.slane %v1276_v25, 1  ;;  %v1351_v41 = vsel %vm524_vm0, %v1349_v28, %v1350_v32  ;;  %v1357_v52 = vsel %vm524_vm0, %v1355_v43, %v1356_v47  ;;  %v468_v25 = vunpack.c.l.bf16 %v436_v22  ;;  %v441_v32 = vld [vmem:[%s4341_s0 + $0x34] sm:$0x1]  ;;  %v3549_v43 = vld [vmem:[%s4340_s1 + $0x1c8] sm:$0xff]  }
  0x49   :  { %3236 = vmatprep.subr.bf16.mxu0 %v3529_v51  ;;  %v536_v19 = vsel %vm524_vm0, %v534_v15, %v535_v16  ;;  %v473_v40 = vunpack.c.l.bf16 %v441_v32  ;;  %v3550_v47 = vld [vmem:[%s4341_s0 + $0x28] ss:$8 sps:$4 sm:$0xff]  }
  0x4a   :  { %3093 = vmatmul.mubr.bf16.gmra.mrb[4].mxu1 %v3527_v49  ;;  %v1354_v42 = vsel %vm524_vm0, %v1352_v29, %v1353_v33  ;;  %v428_v49 = vld [vmem:[%s4341_s0] ss:$8 sps:$4 sm:$0xff]   ;;  %v537_v33 = vrot.slane %v468_v25, 1  ;;  %v3556_v16 = vld [vmem:[%s4341_s0 + $0x50] ss:$8 sps:$4 sm:$0xff]  }
  0x4b   :  { %3221 = vmatmul.mubr.bf16.gmra.mrb[4].mxu0 %v1380_v62  ;;  %3109 = vmatpush3.bf16.msra.mxu1 %v3528_v44  ;;  %v1358_v44 = vrot.slane %v1279_v37, 1  ;;  %v1383_v45 = vpack.c.bf16 %v1354_v42, %v1351_v41  ;;  %v460_v55 = vunpack.c.l.bf16 %v428_v49  ;;  %v462_v59 = vunpack.c.h.bf16 %v428_v49  ;;  %v433_v62 = vld [vmem:[%s4341_s0 + $0x14] sm:$0x1]  ;;  %v3546_v29 = vld [vmem:[%s4341_s0 + $0x18] ss:$8 sps:$4 sm:$0xff]  }
  0x4c   :  { %3237 = vmatpush3.bf16.msra.mxu0 %v3529_v51  ;;  %3110 = vmatprep.subr.bf16.mxu1 %v3530_v63  ;;  %v3539_v51 = vld [vmem:[%s4341_s0 + $0x78] ss:$8 sps:$4 sm:$0xff]   ;;  %v465_v3 = vunpack.c.l.bf16 %v433_v62  ;;  %v475_v42 = vunpack.c.l.bf16 %v443_v36  ;;  %v487_v36 = vunpack.c.l.bf16 %v455_v30 }
  0x4d   :  { %3238 = vmatprep.subr.bf16.mxu0 %v3531_v5  ;;  %3096 = vmatprep.mubr.bf16.mxu1 %v3532_v0  ;;  %v1360_v53 = vsel %vm524_vm0, %v1358_v44, %v1359_v48  ;;  %v526_v0 = vrot.slane %v461_v56, 1  ;;  %v528_v6 = vrot.slane %v462_v59, 1  ;;  %v544_v48 = vrot.slane %v473_v40, 1  ;;  %v447_v59 = vld [vmem:[%s4341_s0 + $0x54] sm:$0x1]  ;;  %v3559_v25 = vld [vmem:[%s4340_s1 + $0x1e0] sm:$0xff]  }
  0x4e   :  { %3224 = vmatprep.mubr.bf16.mxu0 %v1381_v12  ;;  %v1384_v57 = vpack.c.bf16 %v1360_v53, %v1357_v52  ;;  %v532_v12 = vrot.slane %v465_v3, 1  ;;  %v547_v50 = vrot.slane %v475_v42, 1  ;;  %v3553_v53 = vld [vmem:[%s4340_s1 + $0x1d0] sm:$0xff]   ;;  %v479_v1 = vunpack.c.l.bf16 %v447_v59  ;;  %v449_v3 = vld [vmem:[%s4341_s0 + $0x5c] sm:$0x1]  ;;  %v3561_v40 = vld [vmem:[%s4340_s1 + $0x1e8] sm:$0xff]  }
  0x4f   :  { %3111 = vmatpush3.bf16.msra.mxu1 %v3530_v63  ;;  %v525_v63 = vrot.slane %v460_v55, 1  ;;  %v530_v13 = vsel %vm524_vm0, %v528_v6, %v529_v7 }
  0x50   :  { %3239 = vmatpush3.bf16.msra.mxu0 %v3531_v5  ;;  %3112 = vmatprep.subr.bf16.mxu1 %v3534_v14  ;;  %v3543_v5 = vld [vmem:[%s4340_s1 + $0x1b8] sm:$0xff]   ;;  %v533_v18 = vsel %vm524_vm0, %v531_v11, %v532_v12  ;;  %v553_v8 = vrot.slane %v479_v1, 1  ;;  %v481_v11 = vunpack.c.l.bf16 %v449_v3  ;;  %v482_v12 = vunpack.c.h.bf16 %v448_v2 }
  0x51   :  { %3240 = vmatprep.subr.bf16.mxu0 %v3535_v23  ;;  %v527_v10 = vsel %vm524_vm0, %v525_v63, %v526_v0  ;;  %v590_v28 = vpack.c.bf16 %v536_v19, %v533_v18  ;;  %v3569_v1 = vld [vmem:[%s4341_s0 + $0x98] ss:$8 sps:$4 sm:$0xff]  }
  0x52   :  { %3097 = vmatmul.mubr.bf16.gmra.mrb[8].mxu1 %v3533_v17  ;;  %v589_v17 = vpack.c.bf16 %v530_v13, %v527_v10  ;;  %v480_v10 = vunpack.c.l.bf16 %v448_v2  ;;  %v556_v19 = vrot.slane %v481_v11, 1  ;;  %v3572_v2 = vld [vmem:[%s4340_s1 + $0x200] sm:$0xff]   ;;  %v3570_v3 = vld [vmem:[%s4341_s0 + $0x130] ss:$8 sps:$4 sm:$0xff]  }
  0x53   :  { %3225 = vmatmul.mubr.bf16.gmra.mrb[8].mxu0 %v1382_v26  ;;  %3113 = vmatpush3.bf16.msra.mxu1 %v3534_v14  ;;  %v3544_v14 = vld [vmem:[%s4341_s0 + $0x8] ss:$8 sps:$4 sm:$0xff]   ;;  %v3579_v11 = vld [vmem:[%s4340_s1 + $0x218] sm:$0xff]  }
  0x54   :  { %3241 = vmatpush3.bf16.msra.mxu0 %v3535_v23  ;;  %3114 = vmatprep.subr.bf16.mxu1 %v3536_v27  ;;  %v437_v23 = vld [vmem:[%s4341_s0 + $0x24] sm:$0x1]  ;;  %v555_v18 = vrot.slane %v480_v10, 1  ;;  %v3577_v10 = vld [vmem:[%s4341_s0 + $0xc8] ss:$8 sps:$4 sm:$0xff]  }
  0x55   :  { %3242 = vmatprep.subr.bf16.mxu0 %v3537_v31  ;;  %3100 = vmatprep.mubr.bf16.mxu1 %v3538_v38  ;;  %v469_v26 = vunpack.c.l.bf16 %v437_v23  ;;  %v3548_v38 = vld [vmem:[%s4340_s1 + $0xc8] sm:$0xff]  }
  0x56   :  { %3228 = vmatprep.mubr.bf16.mxu0 %v1383_v45  ;;  %v557_v23 = vsel %vm524_vm0, %v555_v18, %v556_v19  ;;  %v2791_v18 = vld [vmem:[%s4341_s0 + $0x8] ss:$8 sps:$4 sm:$0xff]  }
  0x57   :  { %3115 = vmatpush3.bf16.msra.mxu1 %v3536_v27  ;;  %v470_v27 = vunpack.c.h.bf16 %v436_v22  ;;  %v538_v34 = vrot.slane %v469_v26, 1  ;;  %v3557_v22 = vld [vmem:[%s4340_s1 + $0xe0] sm:$0xff]   ;;  %v3586_v19 = vld [vmem:[%s4341_s0 + $0x188] ss:$8 sps:$4 sm:$0xff]  }
  0x58   :  { %3243 = vmatpush3.bf16.msra.mxu0 %v3537_v31  ;;  %3116 = vmatprep.subr.bf16.mxu1 %v3540_v46  ;;  %v440_v31 = vld [vmem:[%s4341_s0 + $0x30] ss:$8 sps:$4 sm:$0xff]  }
  0x59   :  { %3244 = vmatprep.subr.bf16.mxu0 %v3541_v58  ;;  %v540_v35 = vrot.slane %v470_v27, 1  ;;  %v472_v37 = vunpack.c.l.bf16 %v440_v31  ;;  %v474_v41 = vunpack.c.h.bf16 %v440_v31  ;;  %v539_v44 = vsel %vm524_vm0, %v537_v33, %v538_v34  ;;  %v3560_v27 = vld [vmem:[%s4340_s1 + $0xe8] sm:$0xff]  }
  0x5a   :  { %3101 = vmatmul.mubr.bf16.gmra.mrb[12].mxu1 %v3539_v51  ;;  %v3551_v51 = vld [vmem:[%s4340_s1 + $0xd0] sm:$0xff]  }
  0x5b   :  { %3229 = vmatmul.mubr.bf16.gmra.mrb[12].mxu0 %v1384_v57  ;;  %3117 = vmatpush3.bf16.msra.mxu1 %v3540_v46  ;;  %v543_v45 = vrot.slane %v472_v37, 1  ;;  %v542_v46 = vsel %vm524_vm0, %v540_v35, %v541_v39  ;;  %v546_v49 = vrot.slane %v474_v41, 1  ;;  %v444_v57 = vld [vmem:[%s4341_s0 + $0x48] ss:$8 sps:$4 sm:$0xff]   ;;  %v456_v37 = vld [vmem:[%s4341_s0 + $0x78] ss:$8 sps:$4 sm:$0xff]  }
  0x5c   :  { %3245 = vmatpush3.bf16.msra.mxu0 %v3541_v58  ;;  %3118 = vmatprep.subr.bf16.mxu1 %v3542_v4  ;;  %v591_v52 = vpack.c.bf16 %v542_v46, %v539_v44  ;;  %v445_v58 = vld [vmem:[%s4341_s0 + $0x4c] sm:$0x1]  ;;  %v476_v62 = vunpack.c.l.bf16 %v444_v57  ;;  %v478_v0 = vunpack.c.h.bf16 %v444_v57  ;;  %v3562_v35 = vld [vmem:[%s4341_s0 + $0x70] ss:$8 sps:$4 sm:$0xff]   ;;  %v459_v39 = vld [vmem:[%s4341_s0 + $0x84] sm:$0x1]  ;;  %v488_v44 = vunpack.c.l.bf16 %v456_v37 }
  0x5d   :  { %3246 = vmatprep.subr.bf16.mxu0 %v3543_v5  ;;  %3120 = vmatprep.mubr.bf16.mxu1 %v589_v17  ;;  %v545_v54 = vsel %vm524_vm0, %v543_v45, %v544_v48  ;;  %v548_v55 = vsel %vm524_vm0, %v546_v49, %v547_v50  ;;  %v477_v63 = vunpack.c.l.bf16 %v445_v58  ;;  %v565_v45 = vrot.slane %v487_v36, 1  ;;  %v3564_v58 = vld [vmem:[%s4341_s0 + $0x80] ss:$8 sps:$4 sm:$0xff]   ;;  %v2796_v36 = vld [vmem:[%s4341_s0 + $0x1c] sm:$0x1] }
  0x5e   :  { %3248 = vmatprep.mubr.bf16.mxu0 %v3544_v14  ;;  %v592_v56 = vpack.c.bf16 %v548_v55, %v545_v54  ;;  %v552_v7 = vrot.slane %v478_v0, 1  ;;  %v491_v48 = vunpack.c.l.bf16 %v459_v39  ;;  %v567_v50 = vrot.slane %v488_v44, 1  ;;  %v3568_v0 = vld [vmem:[%s4341_s0 + $0x120] ss:$8 sps:$4 sm:$0xff]  }
  0x5f   :  { %3119 = vmatpush3.bf16.msra.mxu1 %v3542_v4  ;;  %v451_v4 = vld [vmem:[%s4341_s0 + $0x64] sm:$0x1]  ;;  %v550_v6 = vrot.slane %v477_v63, 1  ;;  %v3567_v63 = vld [vmem:[%s4340_s1 + $0x1f8] sm:$0xff]  }
  0x60   :  { %3247 = vmatpush3.bf16.msra.mxu0 %v3543_v5  ;;  %3136 = vmatprep.subr.bf16.mxu1 %v3545_v20  ;;  %v549_v5 = vrot.slane %v476_v62, 1  ;;  %v483_v13 = vunpack.c.l.bf16 %v451_v4  ;;  %v554_v15 = vsel %vm524_vm0, %v552_v7, %v553_v8  ;;  %v571_v55 = vrot.slane %v491_v48, 1  ;;  %v3566_v62 = vld [vmem:[%s4340_s1 + $0xf8] sm:$0xff]   ;;  %v3571_v4 = vld [vmem:[%s4341_s0 + $0xa8] ss:$8 sps:$4 sm:$0xff]  }
  0x61   :  { %3264 = vmatprep.subr.bf16.mxu0 %v3547_v21  ;;  %v3575_v7 = vld [vmem:[%s4341_s0 + $0xb8] ss:$8 sps:$4 sm:$0xff]   ;;  %v3578_v8 = vld [vmem:[%s4340_s1 + $0x210] sm:$0xff]  }
  0x62   :  { %3121 = vmatmul.mubr.bf16.vlgmr.msra.gmra.mrb[0].mxu1 %v590_v28  ;;  %v551_v14 = vsel %vm524_vm0, %v549_v5, %v550_v6  ;;  %v452_v28 = vld [vmem:[%s4341_s0 + $0x68] ss:$8 sps:$4 sm:$0xff]  }
  0x63   :  { %3249 = vmatmul.mubr.bf16.vlgmr.msra.gmra.mrb[0].mxu0 %v3546_v29  ;;  %3137 = vmatpush3.bf16.msra.mxu1 %v3545_v20  ;;  %v593_v17 = vpack.c.bf16 %v554_v15, %v551_v14  ;;  %v558_v20 = vrot.slane %v482_v12, 1  ;;  %v453_v29 = vld [vmem:[%s4341_s0 + $0x6c] sm:$0x1]  ;;  %v484_v32 = vunpack.c.l.bf16 %v452_v28  ;;  %v486_v34 = vunpack.c.h.bf16 %v452_v28  ;;  %v3574_v6 = vld [vmem:[%s4341_s0 + $0x140] ss:$8 sps:$4 sm:$0xff]  }
  0x64   :  { %3265 = vmatpush3.bf16.msra.mxu0 %v3547_v21  ;;  %3138 = vmatprep.subr.bf16.mxu1 %v3548_v38  ;;  %v559_v21 = vrot.slane %v483_v13, 1  ;;  %v485_v33 = vunpack.c.l.bf16 %v453_v29  ;;  %v3573_v5 = vld [vmem:[%s4340_s1 + $0x208] sm:$0xff]   ;;  %v3582_v14 = vld [vmem:[%s4341_s0 + $0x178] ss:$8 sps:$4 sm:$0xff]   ;;  %v2810_v28 = vld [vmem:[%s4341_s0 + $0x5c] sm:$0x1] }
  0x65   :  { %3266 = vmatprep.subr.bf16.mxu0 %v3549_v43  ;;  %3124 = vmatprep.mubr.bf16.mxu1 %v591_v52  ;;  %v561_v41 = vrot.slane %v484_v32, 1  ;;  %v3580_v12 = vld [vmem:[%s4341_s0 + $0x168] ss:$8 sps:$4 sm:$0xff]   ;;  %v3584_v15 = vld [vmem:[%s4340_s1 + $0x220] sm:$0xff]  }
  0x66   :  { %3252 = vmatprep.mubr.bf16.mxu0 %v3550_v47  ;;  %v560_v26 = vsel %vm524_vm0, %v558_v20, %v559_v21  ;;  %v562_v42 = vrot.slane %v485_v33, 1  ;;  %v490_v47 = vunpack.c.h.bf16 %v456_v37  ;;  %v3581_v13 = vld [vmem:[%s4341_s0 + $0xe0] ss:$8 sps:$4 sm:$0xff]   ;;  %v2792_v20 = vld [vmem:[%s4341_s0 + $0xc] sm:$0x1] }
  0x67   :  { %3139 = vmatpush3.bf16.msra.mxu1 %v3548_v38  ;;  %v594_v31 = vpack.c.bf16 %v560_v26, %v557_v23  ;;  %v457_v38 = vld [vmem:[%s4341_s0 + $0x7c] sm:$0x1]  ;;  %v2794_v21 = vld [vmem:[%s4341_s0 + $0x14] sm:$0x1]  ;;  %v2040_v23 = vunpack.c.h.bf16 %v2791_v18  ;;  %v2798_v37 = vld [vmem:[%s4341_s0 + $0x24] sm:$0x1] }
  0x68   :  { %3267 = vmatpush3.bf16.msra.mxu0 %v3549_v43  ;;  %3140 = vmatprep.subr.bf16.mxu1 %v3551_v51  ;;  %v564_v43 = vrot.slane %v486_v34, 1  ;;  %v489_v46 = vunpack.c.l.bf16 %v457_v38  ;;  %v563_v49 = vsel %vm524_vm0, %v561_v41, %v562_v42  ;;  %v570_v54 = vrot.slane %v490_v47, 1  ;;  %v3587_v38 = vld [vmem:[%s4341_s0 + $0x100] ss:$8 sps:$4 sm:$0xff]  }
  0x69   :  { %3268 = vmatprep.subr.bf16.mxu0 %v3553_v53  ;;  %v2041_v26 = vunpack.c.l.bf16 %v2794_v21  ;;  %v2105_v33 = vrot.slane %v2040_v23, 1  ;;  %v2043_v47 = vunpack.c.l.bf16 %v2796_v36  ;;  %v2818_v23 = vld [vmem:[%s4341_s0 + $0x7c] sm:$0x1] }
  0x6a   :  { %3125 = vmatmul.mubr.bf16.gmra.mrb[4].mxu1 %v592_v56  ;;  %v566_v52 = vsel %vm524_vm0, %v564_v43, %v565_v45  ;;  %v3565_v56 = vld [vmem:[%s4340_s1 + $0x1f0] sm:$0xff]   ;;  %v2065_v36 = vunpack.c.l.bf16 %v2818_v23 }
  0x6b   :  { %3253 = vmatmul.mubr.bf16.gmra.mrb[4].mxu0 %v3552_v60  ;;  %3141 = vmatpush3.bf16.msra.mxu1 %v3551_v51  ;;  %v3563_v51 = vld [vmem:[%s4340_s1 + $0xf0] sm:$0xff]   ;;  %v595_v57 = vpack.c.bf16 %v566_v52, %v563_v49  ;;  %v572_v60 = vsel %vm524_vm0, %v570_v54, %v571_v55  ;;  %v2811_v52 = vld [vmem:[%s4341_s0 + $0x60] ss:$8 sps:$4 sm:$0xff]   ;;  %v2814_v54 = vld [vmem:[%s4341_s0 + $0x6c] sm:$0x1] }
  0x6c   :  { %3269 = vmatpush3.bf16.msra.mxu0 %v3553_v53  ;;  %3142 = vmatprep.subr.bf16.mxu1 %v3554_v61  ;;  %v568_v53 = vrot.slane %v489_v46, 1  ;;  %v3590_v43 = vld [vmem:[%s4340_s1 + $0x230] sm:$0xff]  }
  0x6d   :  { %3270 = vmatprep.subr.bf16.mxu0 %v3555_v9  ;;  %3128 = vmatprep.mubr.bf16.mxu1 %v593_v17  ;;  %v4135_v17 = vld [vmem:[%s4340_s1 + $0x228] sm:$0xff]  }
  0x6e   :  { %3256 = vmatprep.mubr.bf16.mxu0 %v3556_v16  ;;  %v569_v59 = vsel %vm524_vm0, %v567_v50, %v568_v53  ;;  %v3583_v16 = vld [vmem:[%s4341_s0 + $0xf0] ss:$8 sps:$4 sm:$0xff]   ;;  %v2812_v53 = vld [vmem:[%s4341_s0 + $0x64] sm:$0x1] }
  0x6f   :  { %3143 = vmatpush3.bf16.msra.mxu1 %v3554_v61  ;;  %v596_v61 = vpack.c.bf16 %v572_v60, %v569_v59  ;;  %v2799_v59 = vld [vmem:[%s4341_s0 + $0x28] ss:$8 sps:$4 sm:$0xff]   ;;  %v2800_v60 = vld [vmem:[%s4341_s0 + $0x2c] sm:$0x1] }
  0x70   :  { %3271 = vmatpush3.bf16.msra.mxu0 %v3555_v9  ;;  %3144 = vmatprep.subr.bf16.mxu1 %v3557_v22  ;;  %v3576_v9 = vld [vmem:[%s4341_s0 + $0x150] ss:$8 sps:$4 sm:$0xff]  }
  0x71   :  { %3272 = vmatprep.subr.bf16.mxu0 %v3559_v25 }
  0x72   :  { %3129 = vmatmul.mubr.bf16.gmra.mrb[8].mxu1 %v594_v31  ;;  %v2795_v31 = vld [vmem:[%s4341_s0 + $0x18] ss:$8 sps:$4 sm:$0xff]  }
  0x73   :  { %3257 = vmatmul.mubr.bf16.gmra.mrb[8].mxu0 %v3558_v24  ;;  %3145 = vmatpush3.bf16.msra.mxu1 %v3557_v22  ;;  %v2038_v22 = vunpack.c.l.bf16 %v2791_v18  ;;  %v2807_v24 = vld [vmem:[%s4341_s0 + $0x50] ss:$8 sps:$4 sm:$0xff]   ;;  %v2042_v46 = vunpack.c.l.bf16 %v2795_v31  ;;  %v2044_v50 = vunpack.c.h.bf16 %v2795_v31 }
  0x74   :  { %3273 = vmatpush3.bf16.msra.mxu0 %v3559_v25  ;;  %3146 = vmatprep.subr.bf16.mxu1 %v3560_v27  ;;  %v2039_v25 = vunpack.c.l.bf16 %v2792_v20  ;;  %v2054_v29 = vunpack.c.l.bf16 %v2807_v24  ;;  %v2056_v30 = vunpack.c.h.bf16 %v2807_v24  ;;  %v2048_v20 = vunpack.c.h.bf16 %v2799_v59 }
  0x75   :  { %3274 = vmatprep.subr.bf16.mxu0 %v3561_v40  ;;  %3260 = vmatprep.mubr.bf16.mxu0 %v3562_v35  ;;  %v2102_v32 = vrot.slane %v2038_v22, 1  ;;  %v2057_v35 = vunpack.c.l.bf16 %v2810_v28  ;;  %v2803_v28 = vld [vmem:[%s4341_s0 + $0x38] ss:$8 sps:$4 sm:$0xff]  }
  0x76   :  { %3132 = vmatprep.mubr.bf16.mxu1 %v595_v57  ;;  %v2103_v39 = vrot.slane %v2039_v25, 1  ;;  %v2126_v41 = vrot.slane %v2054_v29, 1  ;;  %v2129_v42 = vrot.slane %v2056_v30, 1  ;;  %v2117_v30 = vrot.slane %v2048_v20, 1 }
  0x77   :  { %3147 = vmatpush3.bf16.msra.mxu1 %v3560_v27  ;;  %v2808_v27 = vld [vmem:[%s4341_s0 + $0x54] sm:$0x1]  ;;  %v2130_v45 = vrot.slane %v2057_v35, 1 }
  0x78   :  { %3275 = vmatpush3.bf16.msra.mxu0 %v3561_v40  ;;  %3148 = vmatprep.subr.bf16.mxu1 %v3563_v51  ;;  %v2055_v34 = vunpack.c.l.bf16 %v2808_v27  ;;  %v2106_v40 = vrot.slane %v2041_v26, 1  ;;  %v4175_v48 = vsel %vm524_vm0, %v2102_v32, %v2103_v39  ;;  %v2819_v39 = vld [vmem:[%s4341_s0 + $0x80] ss:$8 sps:$4 sm:$0xff]  }
  0x79   :  { %3276 = vmatprep.subr.bf16.mxu0 %v3565_v56  ;;  %v2131_v57 = vsel %vm524_vm0, %v2129_v42, %v2130_v45 }
  0x7a   :  { %3133 = vmatmul.mubr.bf16.gmra.mrb[12].mxu1 %v596_v61  ;;  %v2127_v44 = vrot.slane %v2055_v34, 1  ;;  %v2107_v49 = vsel %vm524_vm0, %v2105_v33, %v2106_v40  ;;  %v3588_v61 = vld [vmem:[%s4341_s0 + $0x198] ss:$8 sps:$4 sm:$0xff]   ;;  %v2804_v33 = vld [vmem:[%s4341_s0 + $0x3c] sm:$0x1] }
  0x7b   :  { %3261 = vmatmul.mubr.bf16.gmra.mrb[12].mxu0 %v3564_v58  ;;  %3149 = vmatpush3.bf16.msra.mxu1 %v3563_v51  ;;  %v2045_v51 = vunpack.c.l.bf16 %v2798_v37  ;;  %v2166_v55 = vpack.c.bf16 %v2107_v49, %v4175_v48  ;;  %v2108_v58 = vrot.slane %v2042_v46, 1  ;;  %v2142_v46 = vrot.slane %v2065_v36, 1  ;;  %v2822_v49 = vld [vmem:[%s4341_s0 + $0x8c] sm:$0x1] }
  0x7c   :  { %3277 = vmatpush3.bf16.msra.mxu0 %v3565_v56  ;;  %3150 = vmatprep.subr.bf16.mxu1 %v3566_v62  ;;  %v2128_v56 = vsel %vm524_vm0, %v2126_v41, %v2127_v44  ;;  %v2820_v44 = vld [vmem:[%s4341_s0 + $0x84] sm:$0x1]  ;;  %v2052_v48 = vunpack.c.h.bf16 %v2803_v28 }
  0x7d   :  { %3278 = vmatprep.subr.bf16.mxu0 %v3567_v63  ;;  %3152 = vmatprep.mubr.bf16.mxu1 %v3568_v0  ;;  %v2111_v0 = vrot.slane %v2044_v50, 1 }
  0x7e   :  { %3280 = vmatprep.mubr.bf16.mxu0 %v3569_v1  ;;  %v2112_v1 = vrot.slane %v2045_v51, 1 }
  0x7f   :  { %3151 = vmatpush3.bf16.msra.mxu1 %v3566_v62  ;;  %v2170_v62 = vpack.c.bf16 %v2131_v57, %v2128_v56  ;;  %v2123_v56 = vrot.slane %v2052_v48, 1  ;;  %v2067_v57 = vunpack.c.l.bf16 %v2820_v44 }
  0x80   :  { %3279 = vmatpush3.bf16.msra.mxu0 %v3567_v63  ;;  %3328 = vmatprep.subr.bf16.mxu1 %v3572_v2  ;;  %v2109_v63 = vrot.slane %v2043_v47, 1  ;;  %v2051_v47 = vunpack.c.l.bf16 %v2804_v33 }
  0x81   :  { %3296 = vmatprep.subr.bf16.mxu0 %v3572_v2 }
  0x82   :  { %3153 = vmatmul.mubr.bf16.vlgmr.msra.gmra.mrb[0].mxu1 %v3570_v3  ;;  %v2058_v3 = vunpack.c.l.bf16 %v2811_v52 }
  0x83   :  { %3281 = vmatmul.mubr.bf16.vlgmr.msra.gmra.mrb[0].mxu0 %v3571_v4  ;;  %3336 = vmatpush3.bf16.msra.mxu1 %v3572_v2  ;;  %v2059_v4 = vunpack.c.l.bf16 %v2812_v53  ;;  %v2066_v53 = vunpack.c.l.bf16 %v2819_v39 }
  0x84   :  { %3297 = vmatpush3.bf16.msra.mxu0 %v3572_v2  ;;  %3329 = vmatprep.subr.bf16.mxu1 %v3573_v5  ;;  %v3589_v2 = vld [vmem:[%s4341_s0 + $0x110] ss:$8 sps:$4 sm:$0xff]  }
  0x85   :  { %3298 = vmatprep.subr.bf16.mxu0 %v3573_v5  ;;  %3156 = vmatprep.mubr.bf16.mxu1 %v3574_v6  ;;  %v2061_v6 = vunpack.c.l.bf16 %v2814_v54 }
  0x86   :  { %3284 = vmatprep.mubr.bf16.mxu0 %v3575_v7  ;;  %v2802_v7 = vld [vmem:[%s4341_s0 + $0x34] sm:$0x1] }
  0x87   :  { %3337 = vmatpush3.bf16.msra.mxu1 %v3573_v5  ;;  %v2049_v21 = vunpack.c.l.bf16 %v2802_v7 }
  0x88   :  { %3299 = vmatpush3.bf16.msra.mxu0 %v3573_v5  ;;  %3330 = vmatprep.subr.bf16.mxu1 %v3578_v8  ;;  %v2060_v5 = vunpack.c.h.bf16 %v2811_v52 }
  0x89   :  { %3300 = vmatprep.subr.bf16.mxu0 %v3578_v8  ;;  %v2118_v31 = vrot.slane %v2049_v21, 1 }
  0x8a   :  { %3157 = vmatmul.mubr.bf16.gmra.mrb[4].mxu1 %v3576_v9  ;;  %v4212_v9 = vsel %vm524_vm0, %v2108_v58, %v2109_v63  ;;  %v2135_v18 = vrot.slane %v2060_v5, 1  ;;  %v2145_v63 = vrot.slane %v2067_v57, 1 }
  0x8b   :  { %3285 = vmatmul.mubr.bf16.gmra.mrb[4].mxu0 %v3577_v10  ;;  %3338 = vmatpush3.bf16.msra.mxu1 %v3578_v8  ;;  %v4215_v10 = vsel %vm524_vm0, %v2111_v0, %v2112_v1  ;;  %v2119_v40 = vsel %vm524_vm0, %v2117_v30, %v2118_v31 }
  0x8c   :  { %3301 = vmatpush3.bf16.msra.mxu0 %v3578_v8  ;;  %3331 = vmatprep.subr.bf16.mxu1 %v3579_v11  ;;  %v3591_v8 = vld [vmem:[%s4340_s1 + $0x238] sm:$0xff]  }
  0x8d   :  { %3302 = vmatprep.subr.bf16.mxu0 %v3579_v11  ;;  %3160 = vmatprep.mubr.bf16.mxu1 %v3580_v12  ;;  %v2047_v12 = vunpack.c.l.bf16 %v2800_v60  ;;  %v2068_v60 = vunpack.c.h.bf16 %v2819_v39 }
  0x8e   :  { %3288 = vmatprep.mubr.bf16.mxu0 %v3581_v13  ;;  %v2815_v13 = vld [vmem:[%s4341_s0 + $0x70] ss:$8 sps:$4 sm:$0xff]  }
  0x8f   :  { %3339 = vmatpush3.bf16.msra.mxu1 %v3579_v11  ;;  %v2115_v25 = vrot.slane %v2047_v12, 1  ;;  %v2062_v26 = vunpack.c.l.bf16 %v2815_v13  ;;  %v2064_v32 = vunpack.c.h.bf16 %v2815_v13 }
  0x90   :  { %3303 = vmatpush3.bf16.msra.mxu0 %v3579_v11  ;;  %3332 = vmatprep.subr.bf16.mxu1 %v3584_v15  ;;  %v2046_v11 = vunpack.c.l.bf16 %v2799_v59 }
  0x91   :  { %3304 = vmatprep.subr.bf16.mxu0 %v3584_v15  ;;  %v2138_v37 = vrot.slane %v2062_v26, 1  ;;  %v2141_v42 = vrot.slane %v2064_v32, 1 }
  0x92   :  { %3161 = vmatmul.mubr.bf16.gmra.mrb[8].mxu1 %v3582_v14  ;;  %v2816_v14 = vld [vmem:[%s4341_s0 + $0x74] sm:$0x1]  ;;  %v2114_v22 = vrot.slane %v2046_v11, 1 }
  0x93   :  { %3289 = vmatmul.mubr.bf16.gmra.mrb[8].mxu0 %v3583_v16  ;;  %3340 = vmatpush3.bf16.msra.mxu1 %v3584_v15  ;;  %v2132_v16 = vrot.slane %v2058_v3, 1  ;;  %v2063_v27 = vunpack.c.l.bf16 %v2816_v14  ;;  %v2143_v54 = vsel %vm524_vm0, %v2141_v42, %v2142_v46  ;;  %v4276_v46 = vld [vmem:[%s4343_s3] ss:$0 sm:$0xff] }
  0x94   :  { %3305 = vmatpush3.bf16.msra.mxu0 %v3584_v15  ;;  %3333 = vmatprep.subr.bf16.mxu1 %v4135_v17  ;;  %v2167_v15 = vpack.c.bf16 %v4215_v10, %v4212_v9  ;;  %v2116_v35 = vsel %vm524_vm0, %v2114_v22, %v2115_v25 }
  0x95   :  { %3306 = vmatprep.subr.bf16.mxu0 %v4135_v17  ;;  %3164 = vmatprep.mubr.bf16.mxu1 %v3586_v19  ;;  %v2136_v19 = vrot.slane %v2061_v6, 1  ;;  %v2139_v41 = vrot.slane %v2063_v27, 1  ;;  %v2168_v45 = vpack.c.bf16 %v2119_v40, %v2116_v35  ;;  %v4271_v40 = vld [vmem:[%s4342_s2] ss:$0 sm:$0xff] }
  0x96   :  { %3292 = vmatprep.mubr.bf16.mxu0 %v3587_v38  ;;  %v2806_v38 = vld [vmem:[%s4341_s0 + $0x44] sm:$0x1] }
  0x97   :  { %3341 = vmatpush3.bf16.msra.mxu1 %v4135_v17  ;;  %v2137_v29 = vsel %vm524_vm0, %v2135_v18, %v2136_v19  ;;  %v2140_v50 = vsel %vm524_vm0, %v2138_v37, %v2139_v41  ;;  %v2053_v51 = vunpack.c.l.bf16 %v2806_v38 }
  0x98   :  { %3307 = vmatpush3.bf16.msra.mxu0 %v4135_v17  ;;  %3334 = vmatprep.subr.bf16.mxu1 %v3590_v43  ;;  %v2133_v17 = vrot.slane %v2059_v4, 1  ;;  %v2172_v58 = vpack.c.bf16 %v2143_v54, %v2140_v50 }
  0x99   :  { %3308 = vmatprep.subr.bf16.mxu0 %v3590_v43  ;;  %v2124_v59 = vrot.slane %v2053_v51, 1 }
  0x9a   :  { %3165 = vmatmul.mubr.bf16.gmra.mrb[12].mxu1 %v3588_v61  ;;  %v2134_v24 = vsel %vm524_vm0, %v2132_v16, %v2133_v17  ;;  %v2069_v61 = vunpack.c.l.bf16 %v2822_v49 }
  0x9b   :  { %3293 = vmatmul.mubr.bf16.gmra.mrb[12].mxu0 %v3589_v2  ;;  %3342 = vmatpush3.bf16.msra.mxu1 %v3590_v43  ;;  %v2171_v34 = vpack.c.bf16 %v2137_v29, %v2134_v24  ;;  %v2125_v1 = vsel %vm524_vm0, %v2123_v56, %v2124_v59  ;;  %v2147_v2 = vrot.slane %v2068_v60, 1 }
  0x9c   :  { %3309 = vmatpush3.bf16.msra.mxu0 %v3590_v43  ;;  %3335 = vmatprep.subr.bf16.mxu1 %v3591_v8  ;;  %v2050_v43 = vunpack.c.l.bf16 %v2803_v28  ;;  %v2148_v3 = vrot.slane %v2069_v61, 1 }
  0x9d   :  { %3310 = vmatprep.subr.bf16.mxu0 %v3591_v8  ;;  %3312 = vmatprep.mubr.bf16.mxu0 %v2166_v55  ;;  %v2121_v55 = vrot.slane %v2051_v47, 1 }
  0x9e   :  { %3320 = vmatprep.mubr.bf16.mxu1 %v2170_v62  ;;  %v2120_v52 = vrot.slane %v2050_v43, 1  ;;  %v2144_v62 = vrot.slane %v2066_v53, 1  ;;  %v2149_v5 = vsel %vm524_vm0, %v2147_v2, %v2148_v3 }
  0x9f   :  { %3343 = vmatpush3.bf16.msra.mxu1 %v3591_v8 }
  0xa0   :  { %3311 = vmatpush3.bf16.msra.mxu0 %v3591_v8  ;;  %v2122_v0 = vsel %vm524_vm0, %v2120_v52, %v2121_v55  ;;  %v2146_v4 = vsel %vm524_vm0, %v2144_v62, %v2145_v63 }
  0xa1   :  { %v2169_v6 = vpack.c.bf16 %v2125_v1, %v2122_v0  ;;  %v2173_v7 = vpack.c.bf16 %v2149_v5, %v2146_v4 }
  0xa2   :  { %3321 = vmatmul.mubr.bf16.vlgmr.msra.gmra.mrb[16].mxu1 %v2171_v34 }
  0xa3   :  { %3313 = vmatmul.mubr.bf16.vlgmr.msra.gmra.mrb[0].mxu0 %v2167_v15  ;;  %3324 = vmatprep.mubr.bf16.mxu1 %v2172_v58 }
  0xa4   :  { %3316 = vmatprep.mubr.bf16.mxu0 %v2168_v45 }
  0xaa   :  { %3325 = vmatmul.mubr.bf16.gmra.mrb[20].mxu1 %v2173_v7 }
  0xab   :  { %3317 = vmatmul.mubr.bf16.gmra.mrb[4].mxu0 %v2169_v6 }
 0x155   :  { %v3154_v8 = vpop.f32.mrb[0].mxu1 }
 0x156   :  { %v917_v9 = vpop.f32.mrb[1].mxu1 }
 0x157   :  { %v3155_v10 = vpop.f32.mrb[2].mxu1 }
 0x158   :  { %v920_v11 = vpop.f32.mrb[3].mxu1 }
 0x15d   :  { %v4256_v12 = vpop.f32.mrb[4].mxu1 }
 0x15e   :  { %v4258_v13 = vpop.f32.mrb[5].mxu1 }
 0x15f   :  { %v4260_v14 = vpop.f32.mrb[6].mxu1 }
 0x160   :  { %v4262_v15 = vpop.f32.mrb[7].mxu1 }
 0x165   :  { %v3162_v16 = vpop.f32.mrb[8].mxu1 }
 0x166   :  { %v3290_v17 = vpop.f32.mrb[8].mxu0  ;;  %v949_v18 = vpop.f32.mrb[9].mxu1 }
 0x167   :  { %v3352_v19 = vadd.f32 %v3290_v17, %v3162_v16  ;;  %v1959_v20 = vpop.f32.mrb[9].mxu0  ;;  %v3163_v21 = vpop.f32.mrb[10].mxu1 }
 0x168   :  { %v3354_v22 = vadd.f32 %v1959_v20, %v949_v18  ;;  %v3291_v23 = vpop.f32.mrb[10].mxu0  ;;  %v952_v24 = vpop.f32.mrb[11].mxu1 }
 0x169   :  { %v3356_v25 = vadd.f32 %v3291_v23, %v3163_v21  ;;  %v1962_v26 = vpop.f32.mrb[11].mxu0 }
 0x16a   :  { %v3358_v27 = vadd.f32 %v1962_v26, %v952_v24 }
 0x16d   :  { %v3166_v28 = vpop.f32.mrb[12].mxu1 }
 0x16e   :  { %v3294_v29 = vpop.f32.mrb[12].mxu0  ;;  %v965_v30 = vpop.f32.mrb[13].mxu1 }
 0x16f   :  { %v3360_v31 = vadd.f32 %v3294_v29, %v3166_v28  ;;  %v1975_v32 = vpop.f32.mrb[13].mxu0  ;;  %v3167_v33 = vpop.f32.mrb[14].mxu1 }
 0x170   :  { %v3362_v34 = vadd.f32 %v1975_v32, %v965_v30  ;;  %v3295_v35 = vpop.f32.mrb[14].mxu0  ;;  %v968_v36 = vpop.f32.mrb[15].mxu1 }
 0x171   :  { %v4264_v37 = vadd.f32 %v3295_v35, %v3167_v33  ;;  %v1978_v38 = vpop.f32.mrb[15].mxu0 }
 0x172   :  { %v4266_v39 = vadd.f32 %v1978_v38, %v968_v36 }
 0x175   :  { %v3322_v41 = vpop.f32.mrb[16].mxu1 }
 0x176   :  { %v3314_v42 = vpop.f32.mrb[0].mxu0  ;;  %v3353_v43 = vadd.f32 %v3352_v19, %v3322_v41  ;;  %v2305_v44 = vpop.f32.mrb[17].mxu1 }
 0x177   :  { %v3344_v45 = vadd.f32 %v3314_v42, %v3154_v8  ;;  %v2273_v47 = vpop.f32.mrb[1].mxu0  ;;  %v3355_v48 = vadd.f32 %v3354_v22, %v2305_v44  ;;  %v3323_v49 = vpop.f32.mrb[18].mxu1 }
 0x178   :  { %v2369_v50 = vmul.f32 %v3353_v43, %v4271_v40  ;;  %v3345_v51 = vadd.f32 %v2273_v47, %v917_v9  ;;  %v3315_v52 = vpop.f32.mrb[2].mxu0  ;;  %v3357_v53 = vadd.f32 %v3356_v25, %v3323_v49  ;;  %v2308_v54 = vpop.f32.mrb[19].mxu1 }
 0x179   :  { %v2361_v55 = vmul.f32 %v3344_v45, %v4271_v40  ;;  %v2367_v56 = vmul.f32 %v3355_v48, %v4271_v40  ;;  %v3346_v57 = vadd.f32 %v3315_v52, %v3155_v10  ;;  %v2276_v58 = vpop.f32.mrb[3].mxu0  ;;  %v3359_v59 = vadd.f32 %v3358_v27, %v2308_v54 }
 0x17a   :  { %v2392_v60 = vadd.f32 %v4276_v46, %v2369_v50  ;;  %v2359_v61 = vmul.f32 %v3345_v51, %v4271_v40  ;;  %v2370_v62 = vmul.f32 %v3357_v53, %v4271_v40  ;;  %v3347_v63 = vadd.f32 %v2276_v58, %v920_v11 }
 0x17b   :  { %v2384_v0 = vadd.f32 %v4276_v46, %v2361_v55  ;;  %v2390_v1 = vadd.f32 %v4276_v46, %v2367_v56  ;;  %v2362_v2 = vmul.f32 %v3346_v57, %v4271_v40  ;;  %v2368_v3 = vmul.f32 %v3359_v59, %v4271_v40 }
 0x17c   :  { %v2382_v4 = vadd.f32 %v4276_v46, %v2359_v61  ;;  %v2393_v5 = vadd.f32 %v4276_v46, %v2370_v62  ;;  %v2360_v6 = vmul.f32 %v3347_v63, %v4271_v40  ;;  %v2408_v8 = vmax.f32 %v2392_v60, 0.0 }
 0x17d   :  { %v2400_v7 = vmax.f32 %v2384_v0, 0.0  ;;  %v2385_v9 = vadd.f32 %v4276_v46, %v2362_v2  ;;  %v2391_v10 = vadd.f32 %v4276_v46, %v2368_v3  ;;  %v3326_v11 = vpop.f32.mrb[20].mxu1  ;;  %v2406_v16 = vmax.f32 %v2390_v1, 0.0 }
 0x17e   :  { %v2409_v17 = vmax.f32 %v2393_v5, 0.0  ;;  %v2383_v18 = vadd.f32 %v4276_v46, %v2360_v6  ;;  %v3318_v19 = vpop.f32.mrb[4].mxu0  ;;  %v3361_v20 = vadd.f32 %v3360_v31, %v3326_v11  ;;  %v2321_v21 = vpop.f32.mrb[21].mxu1  ;;  %v2398_v28 = vmax.f32 %v2382_v4, 0.0 }
 0x17f   :  { %v2401_v22 = vmax.f32 %v2385_v9, 0.0  ;;  %v2407_v23 = vmax.f32 %v2391_v10, 0.0  ;;  %v3348_v24 = vadd.f32 %v3318_v19, %v4256_v12  ;;  %v2289_v25 = vpop.f32.mrb[5].mxu0  ;;  %v3363_v26 = vadd.f32 %v3362_v34, %v2321_v21  ;;  %v3327_v27 = vpop.f32.mrb[22].mxu1 }
 0x180   :  { %v2877_v29 = vpack.c.bf16 %v2409_v17, %v2408_v8  ;;  %v2399_v30 = vmax.f32 %v2383_v18, 0.0  ;;  %v3349_v32 = vadd.f32 %v2289_v25, %v4258_v13  ;;  %v3319_v33 = vpop.f32.mrb[6].mxu0  ;;  %v2324_v35 = vpop.f32.mrb[23].mxu1  ;;  %v2373_v31 = vmul.f32 %v3361_v20, %v4271_v40 }
 0x181   :  { %v2857_v36 = vpack.c.bf16 %v2401_v22, %v2400_v7  ;;  %v2872_v38 = vpack.c.bf16 %v2407_v23, %v2406_v16  ;;  %v2365_v41 = vmul.f32 %v3348_v24, %v4271_v40  ;;  %v2292_v42 = vpop.f32.mrb[7].mxu0  ;;  %v2371_v43 = vmul.f32 %v3363_v26, %v4271_v40 }
 0x182   :  { %2893 = vst [vmem:[%s4344_s4 + $0x28] sm:$0xff] %v2877_v29   ;;  %v2852_v12 = vpack.c.bf16 %v2399_v30, %v2398_v28  ;;  %v2363_v34 = vmul.f32 %v3349_v32, %v4271_v40  ;;  %v3350_v13 = vadd.f32 %v3319_v33, %v4260_v14  ;;  %v3365_v44 = vadd.f32 %v4264_v37, %v3327_v27 }
 0x183   :  { %2889 = vst [vmem:[%s4344_s4 + $0x8] sm:$0xff] %v2857_v36   ;;  %2892 = vst [vmem:[%s4344_s4 + $0x20] sm:$0xff] %v2872_v38   ;;  %v3351_v45 = vadd.f32 %v2292_v42, %v4262_v15  ;;  %v2388_v47 = vadd.f32 %v4276_v46, %v2365_v41  ;;  %v3367_v48 = vadd.f32 %v4266_v39, %v2324_v35 }
 0x184   :  { %2853 = vst [vmem:[%s4344_s4] sm:$0xff] %v2852_v12   ;;  %v2366_v14 = vmul.f32 %v3350_v13, %v4271_v40  ;;  %v2396_v49 = vadd.f32 %v4276_v46, %v2373_v31  ;;  %v2386_v50 = vadd.f32 %v4276_v46, %v2363_v34  ;;  %v2374_v51 = vmul.f32 %v3365_v44, %v4271_v40 }
 0x185   :  { %v2364_v37 = vmul.f32 %v3351_v45, %v4271_v40  ;;  %v2394_v15 = vadd.f32 %v4276_v46, %v2371_v43  ;;  %v2372_v53 = vmul.f32 %v3367_v48, %v4271_v40  ;;  %v2404_v56 = vmax.f32 %v2388_v47, 0.0 }
 0x186   :  { %v2389_v52 = vadd.f32 %v4276_v46, %v2366_v14  ;;  %v2397_v54 = vadd.f32 %v4276_v46, %v2374_v51  ;;  %v2412_v58 = vmax.f32 %v2396_v49, 0.0  ;;  %v2402_v59 = vmax.f32 %v2386_v50, 0.0 }
 0x187   :  { %v2387_v55 = vadd.f32 %v4276_v46, %v2364_v37  ;;  %v2395_v57 = vadd.f32 %v4276_v46, %v2372_v53  ;;  %v2410_v62 = vmax.f32 %v2394_v15, 0.0 }
 0x188   :  { %v2405_v39 = vmax.f32 %v2389_v52, 0.0  ;;  %v2413_v60 = vmax.f32 %v2397_v54, 0.0 }
 0x189   :  { %v2403_v61 = vmax.f32 %v2387_v55, 0.0  ;;  %v2411_v0 = vmax.f32 %v2395_v57, 0.0 }
 0x18a   :  { %v2867_v63 = vpack.c.bf16 %v2405_v39, %v2404_v56  ;;  %v2887_v1 = vpack.c.bf16 %v2413_v60, %v2412_v58 }
 0x18b   :  { %v2862_v2 = vpack.c.bf16 %v2403_v61, %v2402_v59  ;;  %v2882_v40 = vpack.c.bf16 %v2411_v0, %v2410_v62 }
 0x18c   :  { %2891 = vst [vmem:[%s4344_s4 + $0x18] sm:$0xff] %v2867_v63   ;;  %2895 = vst [vmem:[%s4344_s4 + $0x38] sm:$0xff] %v2887_v1  }
 0x18d   :  { %2890 = vst [vmem:[%s4344_s4 + $0x10] sm:$0xff] %v2862_v2   ;;  %2894 = vst [vmem:[%s4344_s4 + $0x30] sm:$0xff] %v2882_v40  }

// kernel: _lambda_.15
= control target key start
LH: loop header
LB: loop body
LE: loop exit
PB: predicated region body
PF: predicated region fallthrough
CT: control target
= control target key end

     0   :  { %s653_s1 = inlined_call_operand.vmem [shape: bf16[128,128], index: 1, kind: input, shape index: {}]   ;;  %s654_s0 = inlined_call_operand.vmem [shape: bf16[128,128], index: 0, kind: input, shape index: {}]   ;;  %s655_s2 = inlined_call_operand.vmem [shape: f32[1,128], index: 2, kind: input, shape index: {}]   ;;  %s656_s3 = inlined_call_operand.vmem [shape: f32[1,128], index: 3, kind: input, shape index: {}]   ;;  %s657_s4 = inlined_call_operand.vmem [shape: bf16[128,128], index: 4, kind: output, shape index: {}]  }
   0x1   :  { %v534_v0 = vld [vmem:[%s653_s1] sm:$0xff]   ;;  %v535_v1 = vld [vmem:[%s653_s1 + $0x8] sm:$0xff]   ;;  %v536_v2 = vld [vmem:[%s653_s1 + $0x10] sm:$0xff]  }
   0x2   :  { %486 = vmatprep.subr.bf16.mxu0 %v534_v0  ;;  %518 = vmatprep.subr.bf16.mxu1 %v534_v0  ;;  %v537_v3 = vld [vmem:[%s653_s1 + $0x18] sm:$0xff]   ;;  %v542_v4 = vld [vmem:[%s654_s0] sm:$0xff]   ;;  %v539_v7 = vld [vmem:[%s653_s1 + $0x28] sm:$0xff]  }
   0x3   :  { %487 = vmatpush3.bf16.msra.mxu0 %v534_v0  ;;  %526 = vmatpush3.bf16.msra.mxu1 %v534_v0  ;;  %v543_v5 = vld [vmem:[%s654_s0 + $0x20] sm:$0xff]   ;;  %v540_v8 = vld [vmem:[%s653_s1 + $0x30] sm:$0xff]   ;;  %v541_v9 = vld [vmem:[%s653_s1 + $0x38] sm:$0xff]  }
   0x4   :  { %488 = vmatprep.subr.bf16.mxu0 %v535_v1  ;;  %519 = vmatprep.subr.bf16.mxu1 %v535_v1  ;;  %v538_v6 = vld [vmem:[%s653_s1 + $0x20] sm:$0xff]   ;;  %v544_v10 = vld [vmem:[%s654_s0 + $0x8] sm:$0xff]   ;;  %v546_v12 = vld [vmem:[%s654_s0 + $0x10] sm:$0xff]  }
   0x5   :  { %502 = vmatprep.mubr.bf16.mxu0 %v542_v4  ;;  %510 = vmatprep.mubr.bf16.mxu1 %v543_v5  ;;  %v545_v11 = vld [vmem:[%s654_s0 + $0x28] sm:$0xff]   ;;  %v547_v13 = vld [vmem:[%s654_s0 + $0x30] sm:$0xff]   ;;  %v548_v14 = vld [vmem:[%s654_s0 + $0x18] sm:$0xff]  }
   0x6   :  { %v549_v15 = vld [vmem:[%s654_s0 + $0x38] sm:$0xff]   ;;  %v389_v16 = vld [vmem:[%s655_s2] ss:$0 sm:$0xff] }
   0x7   :  { %489 = vmatpush3.bf16.msra.mxu0 %v535_v1  ;;  %527 = vmatpush3.bf16.msra.mxu1 %v535_v1  ;;  %v390_v23 = vld [vmem:[%s656_s3] ss:$0 sm:$0xff] }
   0x8   :  { %490 = vmatprep.subr.bf16.mxu0 %v536_v2  ;;  %520 = vmatprep.subr.bf16.mxu1 %v536_v2 }
   0xb   :  { %491 = vmatpush3.bf16.msra.mxu0 %v536_v2  ;;  %528 = vmatpush3.bf16.msra.mxu1 %v536_v2 }
   0xc   :  { %492 = vmatprep.subr.bf16.mxu0 %v537_v3  ;;  %521 = vmatprep.subr.bf16.mxu1 %v537_v3 }
   0xf   :  { %493 = vmatpush3.bf16.msra.mxu0 %v537_v3  ;;  %529 = vmatpush3.bf16.msra.mxu1 %v537_v3 }
  0x10   :  { %494 = vmatprep.subr.bf16.mxu0 %v538_v6  ;;  %522 = vmatprep.subr.bf16.mxu1 %v538_v6 }
  0x13   :  { %495 = vmatpush3.bf16.msra.mxu0 %v538_v6  ;;  %530 = vmatpush3.bf16.msra.mxu1 %v538_v6 }
  0x14   :  { %496 = vmatprep.subr.bf16.mxu0 %v539_v7  ;;  %523 = vmatprep.subr.bf16.mxu1 %v539_v7 }
  0x17   :  { %497 = vmatpush3.bf16.msra.mxu0 %v539_v7  ;;  %531 = vmatpush3.bf16.msra.mxu1 %v539_v7 }
  0x18   :  { %498 = vmatprep.subr.bf16.mxu0 %v540_v8  ;;  %524 = vmatprep.subr.bf16.mxu1 %v540_v8 }
  0x1b   :  { %499 = vmatpush3.bf16.msra.mxu0 %v540_v8  ;;  %532 = vmatpush3.bf16.msra.mxu1 %v540_v8 }
  0x1c   :  { %500 = vmatprep.subr.bf16.mxu0 %v541_v9  ;;  %525 = vmatprep.subr.bf16.mxu1 %v541_v9 }
  0x1f   :  { %501 = vmatpush3.bf16.msra.mxu0 %v541_v9  ;;  %533 = vmatpush3.bf16.msra.mxu1 %v541_v9 }
  0x22   :  { %503 = vmatmul.mubr.bf16.vlgmr.msra.gmra.mrb[0].mxu0 %v544_v10  ;;  %511 = vmatmul.mubr.bf16.vlgmr.msra.gmra.mrb[0].mxu1 %v545_v11 }
  0x23   :  { %506 = vmatprep.mubr.bf16.mxu0 %v546_v12  ;;  %514 = vmatprep.mubr.bf16.mxu1 %v547_v13 }
  0x2a   :  { %507 = vmatmul.mubr.bf16.gmra.mrb[4].mxu0 %v548_v14  ;;  %515 = vmatmul.mubr.bf16.gmra.mrb[4].mxu1 %v549_v15 }
  0xf5   :  { %v504_v17 = vpop.f32.mrb[0].mxu0  ;;  %v512_v18 = vpop.f32.mrb[0].mxu1 }
  0xf6   :  { %v252_v19 = vmul.f32 %v504_v17, %v389_v16  ;;  %v260_v20 = vmul.f32 %v512_v18, %v389_v16  ;;  %v180_v21 = vpop.f32.mrb[1].mxu0  ;;  %v212_v22 = vpop.f32.mrb[1].mxu1 }
  0xf7   :  { %v250_v24 = vmul.f32 %v389_v16, %v180_v21  ;;  %v258_v25 = vmul.f32 %v389_v16, %v212_v22  ;;  %v505_v26 = vpop.f32.mrb[2].mxu0  ;;  %v513_v27 = vpop.f32.mrb[2].mxu1 }
  0xf8   :  { %v253_v28 = vmul.f32 %v505_v26, %v389_v16  ;;  %v261_v29 = vmul.f32 %v513_v27, %v389_v16  ;;  %v183_v30 = vpop.f32.mrb[3].mxu0  ;;  %v215_v31 = vpop.f32.mrb[3].mxu1  ;;  %v275_v34 = vadd.f32 %v390_v23, %v252_v19  ;;  %v283_v35 = vadd.f32 %v390_v23, %v260_v20 }
  0xf9   :  { %v251_v32 = vmul.f32 %v389_v16, %v183_v30  ;;  %v259_v33 = vmul.f32 %v389_v16, %v215_v31  ;;  %v273_v38 = vadd.f32 %v390_v23, %v250_v24  ;;  %v281_v39 = vadd.f32 %v390_v23, %v258_v25 }
  0xfa   :  { %v276_v36 = vadd.f32 %v390_v23, %v253_v28  ;;  %v284_v37 = vadd.f32 %v390_v23, %v261_v29 }
  0xfb   :  { %v274_v40 = vadd.f32 %v390_v23, %v251_v32  ;;  %v282_v41 = vadd.f32 %v390_v23, %v259_v33 }
  0xfc   :  { %v431_v42 = vpack.c.bf16 %v276_v36, %v275_v34  ;;  %v451_v43 = vpack.c.bf16 %v284_v37, %v283_v35 }
  0xfd   :  { %v426_v44 = vpack.c.bf16 %v274_v40, %v273_v38  ;;  %v446_v45 = vpack.c.bf16 %v282_v41, %v281_v39  ;;  %v508_v46 = vpop.f32.mrb[4].mxu0  ;;  %v516_v47 = vpop.f32.mrb[4].mxu1 }
  0xfe   :  { %463 = vst [vmem:[%s657_s4 + $0x8] sm:$0xff] %v431_v42   ;;  %467 = vst [vmem:[%s657_s4 + $0x28] sm:$0xff] %v451_v43   ;;  %v256_v48 = vmul.f32 %v508_v46, %v389_v16  ;;  %v264_v49 = vmul.f32 %v516_v47, %v389_v16  ;;  %v196_v50 = vpop.f32.mrb[5].mxu0  ;;  %v228_v51 = vpop.f32.mrb[5].mxu1 }
  0xff   :  { %427 = vst [vmem:[%s657_s4] sm:$0xff] %v426_v44   ;;  %466 = vst [vmem:[%s657_s4 + $0x20] sm:$0xff] %v446_v45   ;;  %v254_v52 = vmul.f32 %v389_v16, %v196_v50  ;;  %v262_v53 = vmul.f32 %v389_v16, %v228_v51  ;;  %v509_v54 = vpop.f32.mrb[6].mxu0  ;;  %v517_v55 = vpop.f32.mrb[6].mxu1 }
 0x100   :  { %v257_v56 = vmul.f32 %v509_v54, %v389_v16  ;;  %v265_v57 = vmul.f32 %v517_v55, %v389_v16  ;;  %v199_v58 = vpop.f32.mrb[7].mxu0  ;;  %v231_v59 = vpop.f32.mrb[7].mxu1  ;;  %v279_v62 = vadd.f32 %v390_v23, %v256_v48  ;;  %v287_v63 = vadd.f32 %v390_v23, %v264_v49 }
 0x101   :  { %v255_v60 = vmul.f32 %v389_v16, %v199_v58  ;;  %v263_v61 = vmul.f32 %v389_v16, %v231_v59  ;;  %v277_v2 = vadd.f32 %v390_v23, %v254_v52  ;;  %v285_v3 = vadd.f32 %v390_v23, %v262_v53 }
 0x102   :  { %v280_v0 = vadd.f32 %v390_v23, %v257_v56  ;;  %v288_v1 = vadd.f32 %v390_v23, %v265_v57 }
 0x103   :  { %v278_v4 = vadd.f32 %v390_v23, %v255_v60  ;;  %v286_v5 = vadd.f32 %v390_v23, %v263_v61 }
 0x104   :  { %v441_v6 = vpack.c.bf16 %v280_v0, %v279_v62  ;;  %v461_v7 = vpack.c.bf16 %v288_v1, %v287_v63 }
 0x105   :  { %v436_v8 = vpack.c.bf16 %v278_v4, %v277_v2  ;;  %v456_v9 = vpack.c.bf16 %v286_v5, %v285_v3 }
 0x106   :  { %465 = vst [vmem:[%s657_s4 + $0x18] sm:$0xff] %v441_v6   ;;  %469 = vst [vmem:[%s657_s4 + $0x38] sm:$0xff] %v461_v7  }
 0x107   :  { %464 = vst [vmem:[%s657_s4 + $0x10] sm:$0xff] %v436_v8   ;;  %468 = vst [vmem:[%s657_s4 + $0x30] sm:$0xff] %v456_v9  }

// kernel: _lambda_.16
= control target key start
LH: loop header
LB: loop body
LE: loop exit
PB: predicated region body
PF: predicated region fallthrough
CT: control target
= control target key end

     0   :  { %s848_s1 = inlined_call_operand.vmem [shape: bf16[128,128], index: 1, kind: input, shape index: {}]   ;;  %s849_s0 = inlined_call_operand.vmem [shape: bf16[128,128], index: 0, kind: input, shape index: {}]   ;;  %s850_s4 = inlined_call_operand.vmem [shape: bf16[128,128], index: 4, kind: input, shape index: {}]   ;;  %s851_s2 = inlined_call_operand.vmem [shape: f32[1,128], index: 2, kind: input, shape index: {}, may-alias: {2,3}]   ;;  %s852_s3 = inlined_call_operand.vmem [shape: f32[1,128], index: 3, kind: input, shape index: {}, may-alias: {2,3}]   ;;  %s853_s5 = inlined_call_operand.vmem [shape: bf16[128,128], index: 5, kind: output, shape index: {}]  }
   0x1   :  { %v640_v0 = vld [vmem:[%s848_s1] sm:$0xff]   ;;  %v641_v1 = vld [vmem:[%s848_s1 + $0x8] sm:$0xff]   ;;  %v642_v2 = vld [vmem:[%s848_s1 + $0x10] sm:$0xff]  }
   0x2   :  { %592 = vmatprep.subr.bf16.mxu0 %v640_v0  ;;  %624 = vmatprep.subr.bf16.mxu1 %v640_v0  ;;  %v643_v3 = vld [vmem:[%s848_s1 + $0x18] sm:$0xff]   ;;  %v648_v4 = vld [vmem:[%s849_s0] sm:$0xff]   ;;  %v645_v7 = vld [vmem:[%s848_s1 + $0x28] sm:$0xff]  }
   0x3   :  { %593 = vmatpush3.bf16.msra.mxu0 %v640_v0  ;;  %632 = vmatpush3.bf16.msra.mxu1 %v640_v0  ;;  %v649_v5 = vld [vmem:[%s849_s0 + $0x20] sm:$0xff]   ;;  %v646_v8 = vld [vmem:[%s848_s1 + $0x30] sm:$0xff]   ;;  %v647_v9 = vld [vmem:[%s848_s1 + $0x38] sm:$0xff]  }
   0x4   :  { %594 = vmatprep.subr.bf16.mxu0 %v641_v1  ;;  %625 = vmatprep.subr.bf16.mxu1 %v641_v1  ;;  %v644_v6 = vld [vmem:[%s848_s1 + $0x20] sm:$0xff]   ;;  %v650_v10 = vld [vmem:[%s849_s0 + $0x8] sm:$0xff]   ;;  %v652_v12 = vld [vmem:[%s849_s0 + $0x10] sm:$0xff]  }
   0x5   :  { %608 = vmatprep.mubr.bf16.mxu0 %v648_v4  ;;  %616 = vmatprep.mubr.bf16.mxu1 %v649_v5  ;;  %v651_v11 = vld [vmem:[%s849_s0 + $0x28] sm:$0xff]   ;;  %v653_v13 = vld [vmem:[%s849_s0 + $0x30] sm:$0xff]   ;;  %v654_v14 = vld [vmem:[%s849_s0 + $0x18] sm:$0xff]  }
   0x6   :  { %v655_v15 = vld [vmem:[%s849_s0 + $0x38] sm:$0xff]   ;;  %v562_v16 = vld [vmem:[%s850_s4 + $0x8] sm:$0xff]   ;;  %v491_v18 = vld [vmem:[%s850_s4] sm:$0xff]  }
   0x7   :  { %595 = vmatpush3.bf16.msra.mxu0 %v641_v1  ;;  %633 = vmatpush3.bf16.msra.mxu1 %v641_v1  ;;  %v566_v17 = vld [vmem:[%s850_s4 + $0x28] sm:$0xff]   ;;  %v565_v19 = vld [vmem:[%s850_s4 + $0x20] sm:$0xff]   ;;  %v754_v21 = vld [vmem:[%s850_s4 + $0x18] sm:$0xff]   ;;  %v496_v23 = vunpack.c.l.bf16 %v562_v16  ;;  %v492_v25 = vunpack.c.l.bf16 %v491_v18  ;;  %v497_v32 = vunpack.c.h.bf16 %v562_v16  ;;  %v493_v34 = vunpack.c.h.bf16 %v491_v18 }
   0x8   :  { %596 = vmatprep.subr.bf16.mxu0 %v642_v2  ;;  %626 = vmatprep.subr.bf16.mxu1 %v642_v2  ;;  %v749_v20 = vld [vmem:[%s851_s2] ss:$0 sm:$0xff]  ;;  %v759_v22 = vld [vmem:[%s850_s4 + $0x38] sm:$0xff]   ;;  %v512_v24 = vunpack.c.l.bf16 %v566_v17  ;;  %v508_v26 = vunpack.c.l.bf16 %v565_v19  ;;  %v764_v27 = vld [vmem:[%s850_s4 + $0x10] sm:$0xff]   ;;  %v513_v33 = vunpack.c.h.bf16 %v566_v17  ;;  %v509_v35 = vunpack.c.h.bf16 %v565_v19 }
   0x9   :  { %v769_v28 = vld [vmem:[%s850_s4 + $0x30] sm:$0xff]   ;;  %v774_v30 = vld [vmem:[%s852_s3] ss:$0 sm:$0xff]  ;;  %v504_v40 = vunpack.c.l.bf16 %v754_v21  ;;  %v520_v41 = vunpack.c.l.bf16 %v759_v22  ;;  %v500_v46 = vunpack.c.l.bf16 %v764_v27 }
   0xa   :  { %v516_v47 = vunpack.c.l.bf16 %v769_v28 }
   0xb   :  { %597 = vmatpush3.bf16.msra.mxu0 %v642_v2  ;;  %634 = vmatpush3.bf16.msra.mxu1 %v642_v2 }
   0xc   :  { %598 = vmatprep.subr.bf16.mxu0 %v643_v3  ;;  %627 = vmatprep.subr.bf16.mxu1 %v643_v3 }
   0xf   :  { %599 = vmatpush3.bf16.msra.mxu0 %v643_v3  ;;  %635 = vmatpush3.bf16.msra.mxu1 %v643_v3 }
  0x10   :  { %600 = vmatprep.subr.bf16.mxu0 %v644_v6  ;;  %628 = vmatprep.subr.bf16.mxu1 %v644_v6 }
  0x13   :  { %601 = vmatpush3.bf16.msra.mxu0 %v644_v6  ;;  %636 = vmatpush3.bf16.msra.mxu1 %v644_v6 }
  0x14   :  { %602 = vmatprep.subr.bf16.mxu0 %v645_v7  ;;  %629 = vmatprep.subr.bf16.mxu1 %v645_v7 }
  0x17   :  { %603 = vmatpush3.bf16.msra.mxu0 %v645_v7  ;;  %637 = vmatpush3.bf16.msra.mxu1 %v645_v7 }
  0x18   :  { %604 = vmatprep.subr.bf16.mxu0 %v646_v8  ;;  %630 = vmatprep.subr.bf16.mxu1 %v646_v8 }
  0x1b   :  { %605 = vmatpush3.bf16.msra.mxu0 %v646_v8  ;;  %638 = vmatpush3.bf16.msra.mxu1 %v646_v8 }
  0x1c   :  { %606 = vmatprep.subr.bf16.mxu0 %v647_v9  ;;  %631 = vmatprep.subr.bf16.mxu1 %v647_v9 }
  0x1f   :  { %607 = vmatpush3.bf16.msra.mxu0 %v647_v9  ;;  %639 = vmatpush3.bf16.msra.mxu1 %v647_v9 }
  0x22   :  { %609 = vmatmul.mubr.bf16.vlgmr.msra.gmra.mrb[0].mxu0 %v650_v10  ;;  %617 = vmatmul.mubr.bf16.vlgmr.msra.gmra.mrb[0].mxu1 %v651_v11 }
  0x23   :  { %612 = vmatprep.mubr.bf16.mxu0 %v652_v12  ;;  %620 = vmatprep.mubr.bf16.mxu1 %v653_v13 }
  0x2a   :  { %613 = vmatmul.mubr.bf16.gmra.mrb[4].mxu0 %v654_v14  ;;  %621 = vmatmul.mubr.bf16.gmra.mrb[4].mxu1 %v655_v15 }
  0xf5   :  { %v610_v29 = vpop.f32.mrb[0].mxu0  ;;  %v618_v31 = vpop.f32.mrb[0].mxu1 }
  0xf6   :  { %v255_v36 = vmul.f32 %v610_v29, %v749_v20  ;;  %v263_v37 = vmul.f32 %v618_v31, %v749_v20  ;;  %v183_v38 = vpop.f32.mrb[1].mxu0  ;;  %v215_v39 = vpop.f32.mrb[1].mxu1 }
  0xf7   :  { %v253_v42 = vmul.f32 %v749_v20, %v183_v38  ;;  %v261_v43 = vmul.f32 %v749_v20, %v215_v39  ;;  %v611_v44 = vpop.f32.mrb[2].mxu0  ;;  %v619_v45 = vpop.f32.mrb[2].mxu1 }
  0xf8   :  { %v278_v48 = vadd.f32 %v774_v30, %v255_v36  ;;  %v286_v49 = vadd.f32 %v774_v30, %v263_v37  ;;  %v256_v50 = vmul.f32 %v611_v44, %v749_v20  ;;  %v264_v51 = vmul.f32 %v619_v45, %v749_v20  ;;  %v186_v52 = vpop.f32.mrb[3].mxu0  ;;  %v218_v53 = vpop.f32.mrb[3].mxu1 }
  0xf9   :  { %v276_v54 = vadd.f32 %v774_v30, %v253_v42  ;;  %v284_v55 = vadd.f32 %v774_v30, %v261_v43  ;;  %v254_v56 = vmul.f32 %v749_v20, %v186_v52  ;;  %v262_v57 = vmul.f32 %v749_v20, %v218_v53 }
  0xfa   :  { %v326_v58 = vadd.f32 %v496_v23, %v278_v48  ;;  %v334_v59 = vadd.f32 %v512_v24, %v286_v49  ;;  %v279_v60 = vadd.f32 %v774_v30, %v256_v50  ;;  %v287_v61 = vadd.f32 %v774_v30, %v264_v51 }
  0xfb   :  { %v324_v62 = vadd.f32 %v492_v25, %v276_v54  ;;  %v332_v63 = vadd.f32 %v508_v26, %v284_v55  ;;  %v277_v0 = vadd.f32 %v774_v30, %v254_v56  ;;  %v285_v1 = vadd.f32 %v774_v30, %v262_v57 }
  0xfc   :  { %v342_v2 = vmax.f32 %v326_v58, 0.0  ;;  %v350_v3 = vmax.f32 %v334_v59, 0.0  ;;  %v327_v4 = vadd.f32 %v497_v32, %v279_v60  ;;  %v335_v5 = vadd.f32 %v513_v33, %v287_v61 }
  0xfd   :  { %v340_v6 = vmax.f32 %v324_v62, 0.0  ;;  %v348_v7 = vmax.f32 %v332_v63, 0.0  ;;  %v325_v8 = vadd.f32 %v493_v34, %v277_v0  ;;  %v333_v9 = vadd.f32 %v509_v35, %v285_v1  ;;  %v614_v10 = vpop.f32.mrb[4].mxu0  ;;  %v622_v11 = vpop.f32.mrb[4].mxu1 }
  0xfe   :  { %v343_v12 = vmax.f32 %v327_v4, 0.0  ;;  %v351_v13 = vmax.f32 %v335_v5, 0.0  ;;  %v259_v14 = vmul.f32 %v614_v10, %v749_v20  ;;  %v267_v15 = vmul.f32 %v622_v11, %v749_v20  ;;  %v199_v16 = vpop.f32.mrb[5].mxu0  ;;  %v231_v17 = vpop.f32.mrb[5].mxu1 }
  0xff   :  { %v341_v18 = vmax.f32 %v325_v8, 0.0  ;;  %v349_v19 = vmax.f32 %v333_v9, 0.0  ;;  %v257_v23 = vmul.f32 %v749_v20, %v199_v16  ;;  %v265_v24 = vmul.f32 %v749_v20, %v231_v17  ;;  %v615_v25 = vpop.f32.mrb[6].mxu0  ;;  %v623_v26 = vpop.f32.mrb[6].mxu1 }
 0x100   :  { %v530_v29 = vpack.c.bf16 %v343_v12, %v342_v2  ;;  %v550_v31 = vpack.c.bf16 %v351_v13, %v350_v3  ;;  %v282_v32 = vadd.f32 %v774_v30, %v259_v14  ;;  %v290_v33 = vadd.f32 %v774_v30, %v267_v15  ;;  %v202_v34 = vpop.f32.mrb[7].mxu0  ;;  %v234_v35 = vpop.f32.mrb[7].mxu1 }
 0x101   :  { %v525_v36 = vpack.c.bf16 %v341_v18, %v340_v6  ;;  %v545_v37 = vpack.c.bf16 %v349_v19, %v348_v7  ;;  %v280_v38 = vadd.f32 %v774_v30, %v257_v23  ;;  %v288_v39 = vadd.f32 %v774_v30, %v265_v24 }
 0x102   :  { %569 = vst [vmem:[%s853_s5 + $0x8] sm:$0xff] %v530_v29   ;;  %573 = vst [vmem:[%s853_s5 + $0x28] sm:$0xff] %v550_v31   ;;  %v260_v42 = vmul.f32 %v615_v25, %v749_v20  ;;  %v505_v43 = vunpack.c.h.bf16 %v754_v21  ;;  %v268_v44 = vmul.f32 %v623_v26, %v749_v20  ;;  %v521_v45 = vunpack.c.h.bf16 %v759_v22 }
 0x103   :  { %526 = vst [vmem:[%s853_s5] sm:$0xff] %v525_v36   ;;  %572 = vst [vmem:[%s853_s5 + $0x20] sm:$0xff] %v545_v37   ;;  %v258_v48 = vmul.f32 %v749_v20, %v202_v34  ;;  %v501_v49 = vunpack.c.h.bf16 %v764_v27  ;;  %v266_v50 = vmul.f32 %v749_v20, %v234_v35  ;;  %v517_v51 = vunpack.c.h.bf16 %v769_v28 }
 0x104   :  { %v330_v52 = vadd.f32 %v504_v40, %v282_v32  ;;  %v338_v53 = vadd.f32 %v520_v41, %v290_v33  ;;  %v283_v54 = vadd.f32 %v774_v30, %v260_v42  ;;  %v291_v55 = vadd.f32 %v774_v30, %v268_v44 }
 0x105   :  { %v328_v56 = vadd.f32 %v500_v46, %v280_v38  ;;  %v336_v57 = vadd.f32 %v516_v47, %v288_v39  ;;  %v281_v20 = vadd.f32 %v774_v30, %v258_v48  ;;  %v289_v58 = vadd.f32 %v774_v30, %v266_v50 }
 0x106   :  { %v331_v59 = vadd.f32 %v505_v43, %v283_v54  ;;  %v339_v21 = vadd.f32 %v521_v45, %v291_v55  ;;  %v346_v22 = vmax.f32 %v330_v52, 0.0  ;;  %v354_v41 = vmax.f32 %v338_v53, 0.0 }
 0x107   :  { %v329_v40 = vadd.f32 %v501_v49, %v281_v20  ;;  %v337_v60 = vadd.f32 %v517_v51, %v289_v58  ;;  %v344_v63 = vmax.f32 %v328_v56, 0.0  ;;  %v352_v0 = vmax.f32 %v336_v57, 0.0 }
 0x108   :  { %v347_v61 = vmax.f32 %v331_v59, 0.0  ;;  %v355_v62 = vmax.f32 %v339_v21, 0.0 }
 0x109   :  { %v345_v1 = vmax.f32 %v329_v40, 0.0  ;;  %v353_v27 = vmax.f32 %v337_v60, 0.0 }
 0x10a   :  { %v540_v46 = vpack.c.bf16 %v347_v61, %v346_v22  ;;  %v560_v2 = vpack.c.bf16 %v355_v62, %v354_v41 }
 0x10b   :  { %v535_v28 = vpack.c.bf16 %v345_v1, %v344_v63  ;;  %v555_v47 = vpack.c.bf16 %v353_v27, %v352_v0 }
 0x10c   :  { %571 = vst [vmem:[%s853_s5 + $0x18] sm:$0xff] %v540_v46   ;;  %575 = vst [vmem:[%s853_s5 + $0x38] sm:$0xff] %v560_v2  }
 0x10d   :  { %570 = vst [vmem:[%s853_s5 + $0x10] sm:$0xff] %v535_v28   ;;  %574 = vst [vmem:[%s853_s5 + $0x30] sm:$0xff] %v555_v47  }

// kernel: _lambda_.20
= control target key start
LH: loop header
LB: loop body
LE: loop exit
PB: predicated region body
PF: predicated region fallthrough
CT: control target
= control target key end

     0   :  { %s6306_s15 = smov 0   ;;  %s6308_s16 = smov 0   ;;  %s8209_s0 = inlined_call_operand.vmem [shape: bf16[1,2,18,18,128], index: 0, kind: input, shape index: {}]   ;;  %s8210_s1 = inlined_call_operand.vmem [shape: bf16[9,128,128], index: 1, kind: input, shape index: {}]   ;;  %s8211_s2 = inlined_call_operand.vmem [shape: f32[1,128], index: 2, kind: input, shape index: {}]   ;;  %s8212_s3 = inlined_call_operand.vmem [shape: f32[1,128], index: 3, kind: input, shape index: {}]   ;;  %s8213_s4 = inlined_call_operand.vmem [shape: bf16[2,16,16,128], index: 4, kind: output, shape index: {}]  }
   0x1   :  { %s6310_s17 = smov 0  }
   0x2 LB: > { %s6319_s18 = sadd.s32 4294967295, %s6279_s17   ;;  %s6321_s19 = sadd.s32 1, %s6279_s17   ;;  %s6279_s17 = sphi %s6310_s17, %s8532_s17   ;;  %s6275_s16 = sphi %s6308_s16, %s8531_s16   ;;  %s6271_s15 = sphi %s6306_s15, %s8530_s15  }
   0x3   : > { %s102_s20 = ssub.s32 %s6279_s17, %s6321_s19  ;;  %s105_s21 = sadd.s32 1, %s6275_s16 }
   0x4   : > { %p103_p0 = scmp.eq.s32.totalorder %s102_s20, 0  ;;  %p115_p1 = scmp.ne.s32.totalorder %s6275_s16, %s6271_s15 }
   0x5   : > { %p116_p2 = scmp.eq.s32.totalorder %s6319_s18, 1  ;;  %p4460_p3 = scmp.ge.s32.totalorder %s6279_s17, 1 }
   0x6   : > { %s6329_s22 = scalar_select %p103_p0, %s6275_s16, %s105_s21  }
   0x7   : > { %p6331_p4 = por %p116_p2, %p115_p1  ;;  %p152_p5 = scmp.lt.s32.totalorder %s6279_s17, 3 }
   0x9   : > { %p153_p6 = pnand %p4460_p3, %p152_p5 }
   0xb   : > { %156 = sbr.rel (%p153_p6) target bundleno = 571 (0x23b), region = 36 }
  0x12   : > { %v6103_v0 = vld [vmem:[%s8210_s1 + $0x40] sm:$0xff]   ;;  %v6105_v2 = vld [vmem:[%s8210_s1 + $0x48] sm:$0xff]   ;;  %v6107_v4 = vld [vmem:[%s8210_s1 + $0x50] sm:$0xff]   ;;  %s4949_s14 = smul.u32 96, %s6319_s18  ;;  %vm354_vm0 = vcmask 1046528   ;;  %vm966_vm1 = vcmask 1045504  }
  0x13   : > { %v6104_v1 = vld [vmem:[%s8210_s1 + $0x100] sm:$0xff]   ;;  %5375 = vmatprep.subr.bf16.mxu1 %v6103_v0  ;;  %v6106_v3 = vld [vmem:[%s8210_s1 + $0x108] sm:$0xff]   ;;  %v6108_v5 = vld [vmem:[%s8210_s1 + $0x110] sm:$0xff]   ;;  %s169_s12 = sand.u32 1, %s6271_s15  }
  0x14   : > { %5567 = vmatprep.subr.bf16.mxu0 %v6104_v1  ;;  %5376 = vmatpush3.bf16.msra.mxu1 %v6103_v0  ;;  %v6109_v6 = vld [vmem:[%s8210_s1 + $0x58] sm:$0xff]   ;;  %v6111_v8 = vld [vmem:[%s8210_s1 + $0x60] sm:$0xff]   ;;  %s6369_s27 = scalar_lea.vmem %s8209_s0, %s4949_s14  ;;  %v6113_v10 = vld [vmem:[%s8210_s1 + $0x68] sm:$0xff]   ;;  %s4461_s13 = sshll.u32 %s169_s12, 7 }
  0x15   : > { %5568 = vmatpush3.bf16.msra.mxu0 %v6104_v1  ;;  %5377 = vmatprep.subr.bf16.mxu1 %v6105_v2  ;;  %v6110_v7 = vld [vmem:[%s8210_s1 + $0x118] sm:$0xff]   ;;  %v6112_v9 = vld [vmem:[%s8210_s1 + $0x120] sm:$0xff]   ;;  %v6114_v11 = vld [vmem:[%s8210_s1 + $0x128] sm:$0xff]   ;;  %s8100_s15 = scalar_lea.vmem [#allocation2], %s4461_s13  ;;  %s4983_s14 = sshll.u32 (%p6331_p4), %s6319_s18, 6 }
  0x16   : > { %5569 = vmatprep.subr.bf16.mxu0 %v6106_v3  ;;  %v6378_v12 = vld [vmem:[%s6369_s27] sm:$0xff]   ;;  %v6381_v13 = vld [vmem:[%s6369_s27 + $0x8] sm:$0x1]  ;;  %v6384_v14 = vld [vmem:[%s6369_s27 + $0xc] sm:$0xff]   ;;  %s4245_s21 = scalar_lea.vmem (%p6331_p4), %s8213_s4, %s4983_s14 }
  0x17   : > { %v210_v15 = vunpack.c.l.bf16 %v6378_v12  ;;  %v8225_v16 = vunpack.c.h.bf16 %v6378_v12  ;;  %v8224_v17 = vunpack.c.l.bf16 %v6381_v13  ;;  %v6390_v18 = vld [vmem:[%s6369_s27 + $0x14] sm:$0x1]  ;;  %v1743_v19 = vunpack.c.l.bf16 %v6384_v14  ;;  %v6394_v20 = vld [vmem:[%s6369_s27 + $0xc] sm:$0xff]   ;;  %v5128_v35 = vld [vmem:[%s6369_s27 + $0x18] sm:$0xff]  }
  0x18   : > { %5378 = vmatpush3.bf16.msra.mxu1 %v6105_v2  ;;  %v6397_v21 = vld [vmem:[%s6369_s27 + $0x14] sm:$0x1]  ;;  %v1744_v22 = vunpack.c.h.bf16 %v6384_v14  ;;  %v1745_v23 = vunpack.c.l.bf16 %v6390_v18  ;;  %v212_v24 = vunpack.c.l.bf16 %v6394_v20  ;;  %v8227_v25 = vunpack.c.h.bf16 %v6394_v20  ;;  %v4616_v36 = vld [vmem:[%s6369_s27 + $0x20] sm:$0x1]  ;;  %v6429_v45 = vld [vmem:[%s6369_s27 + $0x18] sm:$0xff]  }
  0x19   : > { %5570 = vmatpush3.bf16.msra.mxu0 %v6106_v3  ;;  %5379 = vmatprep.subr.bf16.mxu1 %v6107_v4  ;;  %v6115_v26 = vld [vmem:[%s8210_s1 + $0x70] sm:$0xff]   ;;  %v355_v27 = vrot.slane %v210_v15, 1  ;;  %v356_v28 = vrot.slane %v8225_v16, 1  ;;  %v358_v29 = vrot.slane %v8224_v17, 1  ;;  %v1839_v30 = vrot.slane %v1743_v19, 1  ;;  %v6117_v46 = vld [vmem:[%s8210_s1 + $0x78] sm:$0xff]  }
  0x1a   : > { %5571 = vmatprep.subr.bf16.mxu0 %v6108_v5  ;;  %v1840_v31 = vrot.slane %v1744_v22, 1  ;;  %v1842_v32 = vrot.slane %v1745_v23, 1  ;;  %v8226_v33 = vunpack.c.l.bf16 %v6397_v21  ;;  %v360_v34 = vrot.slane %v212_v24, 1  ;;  %v6116_v37 = vld [vmem:[%s8210_s1 + $0x130] sm:$0xff]   ;;  %v6438_v50 = vld [vmem:[%s6369_s27 + $0x20] sm:$0x1] }
  0x1b   : > { %v357_v38 = vsel %vm354_vm0, %v355_v27, %v356_v28  ;;  %v359_v39 = vsel %vm354_vm0, %v356_v28, %v358_v29  ;;  %v361_v40 = vrot.slane %v8227_v25, 1  ;;  %v4986_v49 = vunpack.c.l.bf16 %v5128_v35  ;;  %v6118_v51 = vld [vmem:[%s8210_s1 + $0x138] sm:$0xff]   ;;  %v6448_v56 = vld [vmem:[%s6369_s27 + $0x24] sm:$0xff]   ;;  %v6455_v61 = vld [vmem:[%s6369_s27 + $0x2c] sm:$0x1] }
  0x1c   : > { %5380 = vmatpush3.bf16.msra.mxu1 %v6107_v4  ;;  %v467_v41 = vpack.c.bf16 %v359_v39, %v357_v38  ;;  %v1841_v42 = vsel %vm354_vm0, %v1839_v30, %v1840_v31  ;;  %v1843_v43 = vsel %vm354_vm0, %v1840_v31, %v1842_v32  ;;  %v363_v44 = vrot.slane %v8226_v33, 1  ;;  %v6458_v62 = vld [vmem:[%s6369_s27 + $0x24] sm:$0xff]   ;;  %v6468_v4 = vld [vmem:[%s6369_s27 + $0x2c] sm:$0x1]  ;;  %v6488_v30 = vld [vmem:[%s6369_s27 + $0x38] sm:$0x1] }
  0x1d   : > { %5572 = vmatpush3.bf16.msra.mxu0 %v6108_v5  ;;  %5381 = vmatprep.subr.bf16.mxu1 %v6109_v6  ;;  %v1951_v47 = vpack.c.bf16 %v1843_v43, %v1841_v42  ;;  %v6435_v48 = vsel %vm354_vm0, %v360_v34, %v361_v40  ;;  %v4987_v53 = vunpack.c.h.bf16 %v5128_v35  ;;  %v1748_v54 = vunpack.c.l.bf16 %v4616_v36  ;;  %v6119_v63 = vld [vmem:[%s8210_s1] sm:$0xff]   ;;  %v6704_v14 = vld [vmem:[%s6369_s27 + $0xf8] sm:$0x1] }
  0x1e   : > { %5573 = vmatprep.subr.bf16.mxu0 %v6110_v7  ;;  %v6444_v52 = vsel %vm354_vm0, %v361_v40, %v363_v44  ;;  %v214_v55 = vunpack.c.l.bf16 %v6429_v45  ;;  %5391 = vmatprep.mubr.bf16.mxu1 %v467_v41  ;;  %v1844_v58 = vrot.slane %v4986_v49, 1  ;;  %v8221_v59 = vunpack.c.h.bf16 %v6429_v45  ;;  %v6500_v40 = vld [vmem:[%s6369_s27 + $0x30] sm:$0xff]   ;;  %v6121_v41 = vld [vmem:[%s8210_s1 + $0x148] sm:$0xff]  }
  0x1f   : > { %v468_v57 = vpack.c.bf16 %v6444_v52, %v6435_v48  ;;  %v8220_v60 = vunpack.c.l.bf16 %v6438_v50  ;;  %5583 = vmatprep.mubr.bf16.mxu0 %v1951_v47  ;;  %v1845_v0 = vrot.slane %v4987_v53, 1  ;;  %v1847_v1 = vrot.slane %v1748_v54, 1  ;;  %v6509_v47 = vld [vmem:[%s6369_s27 + $0x38] sm:$0x1]  ;;  %v6512_v48 = vld [vmem:[%s6369_s27 + $0x3c] sm:$0xff]  }
  0x20   : > { %5382 = vmatpush3.bf16.msra.mxu1 %v6109_v6  ;;  %v6463_v2 = vrot.slane %v4987_v53, 2  ;;  %v6465_v3 = vrot.slane %v1748_v54, 2  ;;  %v365_v5 = vrot.slane %v214_v55, 1  ;;  %v366_v6 = vrot.slane %v8221_v59, 1  ;;  %v6122_v53 = vld [vmem:[%s8210_s1 + $0x8] sm:$0xff]  }
  0x21   : > { %5574 = vmatpush3.bf16.msra.mxu0 %v6110_v7  ;;  %5383 = vmatprep.subr.bf16.mxu1 %v6111_v8  ;;  %v368_v7 = vrot.slane %v8220_v60, 1  ;;  %v1750_v15 = vunpack.c.h.bf16 %v6448_v56  ;;  %v1751_v19 = vunpack.c.l.bf16 %v6455_v61  ;;  %v216_v35 = vunpack.c.l.bf16 %v6458_v62 }
  0x22   : > { %5575 = vmatprep.subr.bf16.mxu0 %v6112_v9  ;;  %v367_v27 = vsel %vm354_vm0, %v365_v5, %v366_v6  ;;  %v8219_v36 = vunpack.c.h.bf16 %v6458_v62 }
  0x23   : > { %v369_v28 = vsel %vm354_vm0, %v366_v6, %v368_v7  ;;  %v1850_v32 = vrot.slane %v1750_v15, 1  ;;  %v1852_v34 = vrot.slane %v1751_v19, 1  ;;  %v370_v44 = vrot.slane %v216_v35, 1 }
  0x24   : > { %5384 = vmatpush3.bf16.msra.mxu1 %v6111_v8  ;;  %v1749_v8 = vunpack.c.l.bf16 %v6448_v56  ;;  %v469_v31 = vpack.c.bf16 %v369_v28, %v367_v27  ;;  %v8215_v7 = vunpack.c.l.bf16 %v6509_v47  ;;  %v6540_v28 = vld [vmem:[%s6369_s27 + $0x44] sm:$0x1]  ;;  %v8239_v35 = vunpack.c.h.bf16 %v6512_v48 }
  0x25   : > { %5576 = vmatpush3.bf16.msra.mxu0 %v6112_v9  ;;  %5385 = vmatprep.subr.bf16.mxu1 %v6113_v10  ;;  %v6476_v9 = vld [vmem:[%s6369_s27 + $0x30] sm:$0xff]   ;;  %v1853_v43 = vsel %vm354_vm0, %v1850_v32, %v1852_v34 }
  0x26   : > { %5577 = vmatprep.subr.bf16.mxu0 %v6114_v11  ;;  %v1849_v29 = vrot.slane %v1749_v8, 1  ;;  %v4990_v38 = vunpack.c.l.bf16 %v6476_v9  ;;  %v4991_v39 = vunpack.c.h.bf16 %v6476_v9  ;;  %v1755_v8 = vunpack.c.l.bf16 %v6512_v48 }
  0x27   : > { %v378_v34 = vrot.slane %v8215_v7, 1  ;;  %v6590_v7 = vld [vmem:[%s6369_s27 + $0x54] sm:$0xff]  }
  0x28   : > { %5386 = vmatpush3.bf16.msra.mxu1 %v6113_v10  ;;  %v1846_v10 = vsel %vm354_vm0, %v1844_v58, %v1845_v0  ;;  %v1851_v42 = vsel %vm354_vm0, %v1849_v29, %v1850_v32  ;;  %v1854_v54 = vrot.slane %v4990_v38, 1  ;;  %v1855_v55 = vrot.slane %v4991_v39, 1  ;;  %v6125_v29 = vld [vmem:[%s8210_s1 + $0x10] sm:$0xff]  }
  0x29   : > { %5578 = vmatpush3.bf16.msra.mxu0 %v6114_v11  ;;  %5387 = vmatprep.subr.bf16.mxu1 %v6115_v26  ;;  %v1848_v11 = vsel %vm354_vm0, %v1845_v0, %v1847_v1  ;;  %v1953_v49 = vpack.c.bf16 %v1853_v43, %v1851_v42  ;;  %v218_v0 = vunpack.c.l.bf16 %v6500_v40  ;;  %v8217_v1 = vunpack.c.h.bf16 %v6500_v40  ;;  %v6554_v38 = vld [vmem:[%s6369_s27 + $0x50] sm:$0x1] }
  0x2a   : > { %5579 = vmatprep.subr.bf16.mxu0 %v6116_v37  ;;  %v1952_v24 = vpack.c.bf16 %v1848_v11, %v1846_v10  ;;  %v6535_v10 = vld [vmem:[%s6369_s27 + $0x3c] sm:$0xff]   ;;  %v1856_v27 = vsel %vm354_vm0, %v1854_v54, %v1855_v55  ;;  %v1859_v43 = vrot.slane %v1755_v8, 1 }
  0x2c   : > { %5388 = vmatpush3.bf16.msra.mxu1 %v6115_v26  ;;  %v6120_v26 = vld [vmem:[%s8210_s1 + $0x140] sm:$0xff]  }
  0x2d   : > { %5580 = vmatpush3.bf16.msra.mxu0 %v6116_v37  ;;  %5389 = vmatprep.subr.bf16.mxu1 %v6117_v46  ;;  %v8218_v37 = vunpack.c.l.bf16 %v6468_v4 }
  0x2e   : > { %5581 = vmatprep.subr.bf16.mxu0 %v6118_v51 }
  0x2f   : > { %v373_v52 = vrot.slane %v8218_v37, 1 }
  0x30   : > { %5390 = vmatpush3.bf16.msra.mxu1 %v6117_v46  ;;  %v1754_v46 = vunpack.c.l.bf16 %v6488_v30 }
  0x31   : > { %5582 = vmatpush3.bf16.msra.mxu0 %v6118_v51  ;;  %5423 = vmatprep.subr.bf16.mxu1 %v6119_v63  ;;  %v371_v51 = vrot.slane %v8219_v36, 1  ;;  %v6126_v36 = vld [vmem:[%s8210_s1 + $0x160] sm:$0xff]  }
  0x32   : > { %5615 = vmatprep.subr.bf16.mxu0 %v6120_v26  ;;  %v1857_v58 = vrot.slane %v1754_v46, 1 }
  0x33   : > { %5392 = vmatmul.mubr.bf16.vlgmr.msra.gmra.mrb[0].mxu1 %v468_v57  ;;  %v372_v5 = vsel %vm354_vm0, %v370_v44, %v371_v51  ;;  %v374_v6 = vsel %vm354_vm0, %v371_v51, %v373_v52  ;;  %v6531_v57 = vld [vmem:[%s6369_s27 + $0x44] sm:$0x1]  ;;  %v220_v44 = vunpack.c.l.bf16 %v6535_v10  ;;  %v6560_v51 = vld [vmem:[%s6369_s27 + $0x48] sm:$0xff]  }
  0x34   : > { %5584 = vmatmul.mubr.bf16.vlgmr.msra.gmra.mrb[0].mxu0 %v1952_v24  ;;  %5424 = vmatpush3.bf16.msra.mxu1 %v6119_v63  ;;  %v470_v11 = vpack.c.bf16 %v374_v6, %v372_v5  ;;  %v1858_v63 = vsel %vm354_vm0, %v1855_v55, %v1857_v58  ;;  %v375_v24 = vrot.slane %v218_v0, 1  ;;  %v8238_v42 = vunpack.c.l.bf16 %v6531_v57  ;;  %v6568_v0 = vld [vmem:[%s6369_s27 + $0x48] sm:$0xff]   ;;  %v6571_v5 = vld [vmem:[%s6369_s27 + $0x50] sm:$0x1] }
  0x35   : > { %5616 = vmatpush3.bf16.msra.mxu0 %v6120_v26  ;;  %5395 = vmatprep.mubr.bf16.mxu1 %v469_v31  ;;  %v1954_v32 = vpack.c.bf16 %v1858_v63, %v1856_v27  ;;  %v6123_v26 = vld [vmem:[%s8210_s1 + $0x150] sm:$0xff]   ;;  %v376_v31 = vrot.slane %v8217_v1, 1  ;;  %v1860_v55 = vrot.slane %v8239_v35, 1  ;;  %v8216_v58 = vunpack.c.l.bf16 %v6540_v28  ;;  %v6124_v63 = vld [vmem:[%s8210_s1 + $0x158] sm:$0xff]  }
  0x36   : > { %5617 = vmatprep.subr.bf16.mxu0 %v6121_v41  ;;  %5587 = vmatprep.mubr.bf16.mxu0 %v1953_v49  ;;  %v8214_v49 = vunpack.c.h.bf16 %v6535_v10  ;;  %v1862_v8 = vrot.slane %v8238_v42, 1 }
  0x37   : > { %5425 = vmatprep.subr.bf16.mxu1 %v6122_v53  ;;  %v377_v52 = vsel %vm354_vm0, %v375_v24, %v376_v31  ;;  %v379_v54 = vsel %vm354_vm0, %v376_v31, %v378_v34  ;;  %v1861_v24 = vsel %vm354_vm0, %v1859_v43, %v1860_v55  ;;  %v4994_v31 = vunpack.c.l.bf16 %v6560_v51  ;;  %v6128_v43 = vld [vmem:[%s8210_s1 + $0x18] sm:$0xff]  }
  0x38   : > { %5426 = vmatpush3.bf16.msra.mxu1 %v6122_v53  ;;  %v471_v6 = vpack.c.bf16 %v379_v54, %v377_v52  ;;  %v380_v53 = vrot.slane %v220_v44, 1  ;;  %v381_v27 = vrot.slane %v8214_v49, 1  ;;  %v8233_v34 = vunpack.c.h.bf16 %v6560_v51 }
  0x39   : > { %5618 = vmatpush3.bf16.msra.mxu0 %v6121_v41  ;;  %5427 = vmatprep.subr.bf16.mxu1 %v6125_v29  ;;  %v383_v41 = vrot.slane %v8216_v58, 1  ;;  %v1863_v44 = vsel %vm354_vm0, %v1860_v55, %v1862_v8  ;;  %v8232_v54 = vunpack.c.l.bf16 %v6554_v38  ;;  %v222_v49 = vunpack.c.l.bf16 %v6568_v0  ;;  %v6599_v8 = vld [vmem:[%s6369_s27 + $0x5c] sm:$0x1] }
  0x3a   : > { %5619 = vmatprep.subr.bf16.mxu0 %v6123_v26  ;;  %v382_v52 = vsel %vm354_vm0, %v380_v53, %v381_v27  ;;  %v1955_v58 = vpack.c.bf16 %v1863_v44, %v1861_v24  ;;  %v1864_v1 = vrot.slane %v4994_v31, 1  ;;  %v1865_v55 = vrot.slane %v8233_v34, 1  ;;  %v6676_v34 = vld [vmem:[%s6369_s27 + $0xe4] sm:$0xff]  }
  0x3b   : > { %5396 = vmatmul.mubr.bf16.gmra.mrb[4].mxu1 %v470_v11  ;;  %v384_v11 = vsel %vm354_vm0, %v381_v27, %v383_v41  ;;  %v1867_v37 = vrot.slane %v8232_v54, 1  ;;  %v6609_v27 = vld [vmem:[%s6369_s27 + $0x54] sm:$0xff]   ;;  %v385_v24 = vrot.slane %v222_v49, 1  ;;  %v1761_v41 = vunpack.c.l.bf16 %v6590_v7  ;;  %v6624_v49 = vld [vmem:[%s6369_s27 + $0x5c] sm:$0x1] }
  0x3c   : > { %5588 = vmatmul.mubr.bf16.gmra.mrb[4].mxu0 %v1954_v32  ;;  %5399 = vmatprep.mubr.bf16.mxu1 %v471_v6  ;;  %v472_v53 = vpack.c.bf16 %v384_v11, %v382_v52  ;;  %v8222_v32 = vunpack.c.h.bf16 %v6568_v0  ;;  %v8223_v6 = vunpack.c.l.bf16 %v6571_v5  ;;  %v8229_v31 = vunpack.c.h.bf16 %v6590_v7 }
  0x3d   : > { %5620 = vmatpush3.bf16.msra.mxu0 %v6123_v26  ;;  %5428 = vmatpush3.bf16.msra.mxu1 %v6125_v29  ;;  %v1866_v26 = vsel %vm354_vm0, %v1864_v1, %v1865_v55  ;;  %v6131_v29 = vld [vmem:[%s8210_s1 + $0x20] sm:$0xff]   ;;  %v1868_v44 = vsel %vm354_vm0, %v1865_v55, %v1867_v37  ;;  %v8228_v1 = vunpack.c.l.bf16 %v6599_v8  ;;  %v1869_v60 = vrot.slane %v1761_v41, 1  ;;  %v6641_v41 = vld [vmem:[%s6369_s27 + $0xd8] sm:$0xff]  }
  0x3e   : > { %5621 = vmatprep.subr.bf16.mxu0 %v6124_v63  ;;  %5591 = vmatprep.mubr.bf16.mxu0 %v1955_v58  ;;  %v386_v52 = vrot.slane %v8222_v32, 1  ;;  %v388_v58 = vrot.slane %v8223_v6, 1  ;;  %v1956_v11 = vpack.c.bf16 %v1868_v44, %v1866_v26  ;;  %v1870_v59 = vrot.slane %v8229_v31, 1  ;;  %v6630_v55 = vld [vmem:[%s6369_s27 + $0x60] sm:$0xff]   ;;  %v6633_v32 = vld [vmem:[%s6369_s27 + $0x68] sm:$0x1] }
  0x3f   : > { %5429 = vmatprep.subr.bf16.mxu1 %v6128_v43  ;;  %v224_v37 = vunpack.c.l.bf16 %v6609_v27  ;;  %v1872_v16 = vrot.slane %v8228_v1, 1  ;;  %v8230_v26 = vunpack.c.h.bf16 %v6609_v27  ;;  %v6127_v44 = vld [vmem:[%s8210_s1 + $0x168] sm:$0xff]   ;;  %v4998_v25 = vunpack.c.l.bf16 %v6630_v55  ;;  %v6654_v31 = vld [vmem:[%s6369_s27 + $0xe0] sm:$0x1] }
  0x40   : > { %v387_v6 = vsel %vm354_vm0, %v385_v24, %v386_v52  ;;  %v389_v17 = vsel %vm354_vm0, %v386_v52, %v388_v58  ;;  %v8231_v24 = vunpack.c.l.bf16 %v6624_v49  ;;  %v8235_v1 = vunpack.c.h.bf16 %v6630_v55 }
  0x41   : > { %5622 = vmatpush3.bf16.msra.mxu0 %v6124_v63  ;;  %5430 = vmatpush3.bf16.msra.mxu1 %v6128_v43  ;;  %v473_v33 = vpack.c.bf16 %v389_v17, %v387_v6  ;;  %v1871_v63 = vsel %vm354_vm0, %v1869_v60, %v1870_v59  ;;  %v390_v52 = vrot.slane %v224_v37, 1  ;;  %v1873_v58 = vsel %vm354_vm0, %v1870_v59, %v1872_v16  ;;  %v6133_v17 = vld [vmem:[%s8210_s1 + $0x28] sm:$0xff]   ;;  %v6129_v59 = vld [vmem:[%s8210_s1 + $0x170] sm:$0xff]  }
  0x42   : > { %5623 = vmatprep.subr.bf16.mxu0 %v6126_v36  ;;  %5431 = vmatprep.subr.bf16.mxu1 %v6131_v29  ;;  %v391_v43 = vrot.slane %v8230_v26, 1  ;;  %v1957_v60 = vpack.c.bf16 %v1873_v58, %v1871_v63  ;;  %v8234_v16 = vunpack.c.l.bf16 %v6633_v32  ;;  %v226_v6 = vunpack.c.l.bf16 %v6641_v41  ;;  %v4683_v37 = vld [vmem:[%s6369_s27 + $0xc] sm:$0xe] }
  0x43   : > { %5400 = vmatmul.mubr.bf16.gmra.mrb[8].mxu1 %v472_v53  ;;  %v393_v53 = vrot.slane %v8231_v24, 1  ;;  %v8236_v63 = vunpack.c.h.bf16 %v6641_v41  ;;  %v8237_v54 = vunpack.c.l.bf16 %v6654_v31 }
  0x44   : > { %5592 = vmatmul.mubr.bf16.gmra.mrb[8].mxu0 %v1956_v11  ;;  %5403 = vmatprep.mubr.bf16.mxu1 %v473_v33  ;;  %v392_v26 = vsel %vm354_vm0, %v390_v52, %v391_v43  ;;  %v1874_v11 = vrot.slane %v4998_v25, 1  ;;  %v1875_v33 = vrot.slane %v8235_v1, 1  ;;  %v1877_v24 = vrot.slane %v8234_v16, 1  ;;  %v6679_v25 = vld [vmem:[%s6369_s27 + $0xec] sm:$0x1]  ;;  %v6135_v52 = vld [vmem:[%s8210_s1 + $0x30] sm:$0xff]  }
  0x45   : > { %5624 = vmatpush3.bf16.msra.mxu0 %v6126_v36  ;;  %5432 = vmatpush3.bf16.msra.mxu1 %v6131_v29  ;;  %v394_v58 = vsel %vm354_vm0, %v391_v43, %v393_v53  ;;  %v395_v36 = vrot.slane %v226_v6, 1  ;;  %v396_v43 = vrot.slane %v8236_v63, 1  ;;  %v2241_v53 = vunpack.c.l.bf16 %v4683_v37  ;;  %v6130_v37 = vld [vmem:[%s8210_s1 + $0x178] sm:$0xff]  }
  0x46   : > { %5625 = vmatprep.subr.bf16.mxu0 %v6127_v44  ;;  %5595 = vmatprep.mubr.bf16.mxu0 %v1957_v60  ;;  %v474_v29 = vpack.c.bf16 %v394_v58, %v392_v26  ;;  %v1876_v60 = vsel %vm354_vm0, %v1874_v11, %v1875_v33  ;;  %v1878_v6 = vsel %vm354_vm0, %v1875_v33, %v1877_v24  ;;  %v398_v16 = vrot.slane %v8237_v54, 1  ;;  %v4684_v58 = vld [vmem:[%s6369_s27 + $0x18] sm:$0xe]  ;;  %v6701_v54 = vld [vmem:[%s6369_s27 + $0xf0] sm:$0xff]  }
  0x47   : > { %5433 = vmatprep.subr.bf16.mxu1 %v6133_v17  ;;  %v2274_v1 = vrot.slane %v1744_v22, 2  ;;  %v2276_v26 = vrot.slane %v1745_v23, 2  ;;  %v1958_v11 = vpack.c.bf16 %v1878_v6, %v1876_v60  ;;  %v397_v63 = vsel %vm354_vm0, %v395_v36, %v396_v43  ;;  %v4685_v60 = vld [vmem:[%s6369_s27 + $0x24] sm:$0xe] }
  0x48   : > { %v2273_v24 = vrot.slane %v2241_v53, 2  ;;  %v228_v33 = vunpack.c.l.bf16 %v6676_v34  ;;  %v399_v18 = vsel %vm354_vm0, %v396_v43, %v398_v16  ;;  %v8259_v23 = vunpack.c.h.bf16 %v6676_v34 }
  0x49   : > { %5626 = vmatpush3.bf16.msra.mxu0 %v6127_v44  ;;  %5434 = vmatpush3.bf16.msra.mxu1 %v6133_v17  ;;  %v2277_v22 = vsel %vm966_vm1, %v2274_v1, %v2276_v26  ;;  %v8240_v44 = vunpack.c.l.bf16 %v6679_v25  ;;  %v475_v36 = vpack.c.bf16 %v399_v18, %v397_v63  ;;  %v2242_v42 = vunpack.c.l.bf16 %v4684_v58  ;;  %v6736_v18 = vld [vmem:[%s6369_s27 + $0x104] sm:$0x1] }
  0x4a   : > { %5627 = vmatprep.subr.bf16.mxu0 %v6129_v59  ;;  %5435 = vmatprep.subr.bf16.mxu1 %v6135_v52  ;;  %v2275_v53 = vsel %vm966_vm1, %v2273_v24, %v2274_v1  ;;  %v400_v6 = vrot.slane %v228_v33, 1  ;;  %v401_v17 = vrot.slane %v8259_v23, 1  ;;  %v2282_v43 = vsel %vm966_vm1, %v6463_v2, %v6465_v3  ;;  %v6137_v1 = vld [vmem:[%s8210_s1 + $0x38] sm:$0xff]  }
  0x4b   : > { %5404 = vmatmul.mubr.bf16.gmra.mrb[12].mxu1 %v474_v29  ;;  %v2385_v35 = vpack.c.bf16 %v2277_v22, %v2275_v53  ;;  %v403_v16 = vrot.slane %v8240_v44, 1  ;;  %v2278_v63 = vrot.slane %v2242_v42, 2  ;;  %v6132_v29 = vld [vmem:[%s8210_s1 + $0x180] sm:$0xff]   ;;  %v230_v26 = vunpack.c.l.bf16 %v6701_v54  ;;  %v4686_v44 = vld [vmem:[%s6369_s27 + $0x30] sm:$0xe] }
  0x4c   : > { %5596 = vmatmul.mubr.bf16.gmra.mrb[12].mxu0 %v1958_v11  ;;  %5407 = vmatprep.mubr.bf16.mxu1 %v475_v36  ;;  %v8255_v58 = vunpack.c.h.bf16 %v6701_v54  ;;  %v8241_v11 = vunpack.c.l.bf16 %v6704_v14  ;;  %v402_v3 = vsel %vm354_vm0, %v400_v6, %v401_v17  ;;  %v2284_v42 = vrot.slane %v1750_v15, 2  ;;  %v6733_v33 = vld [vmem:[%s6369_s27 + $0xfc] sm:$0xff]  }
  0x4d   : > { %5628 = vmatpush3.bf16.msra.mxu0 %v6129_v59  ;;  %5631 = vmatprep.mubr.bf16.mxu0 %v2385_v35  ;;  %v404_v24 = vsel %vm354_vm0, %v401_v17, %v403_v16  ;;  %v2243_v59 = vunpack.c.l.bf16 %v4685_v60  ;;  %v2280_v36 = vsel %vm966_vm1, %v2278_v63, %v6463_v2  ;;  %v405_v53 = vrot.slane %v230_v26, 1  ;;  %v6758_v26 = vld [vmem:[%s6369_s27 + $0x108] sm:$0xff]  }
  0x4e   : > { %5629 = vmatprep.subr.bf16.mxu0 %v6130_v37  ;;  %v476_v22 = vpack.c.bf16 %v404_v24, %v402_v3  ;;  %v406_v35 = vrot.slane %v8255_v58, 1  ;;  %5436 = vmatpush3.bf16.msra.mxu1 %v6135_v52  ;;  %v2386_v6 = vpack.c.bf16 %v2282_v43, %v2280_v36  ;;  %v408_v56 = vrot.slane %v8241_v11, 1  ;;  %v6134_v43 = vld [vmem:[%s8210_s1 + $0x188] sm:$0xff]   ;;  %v6761_v3 = vld [vmem:[%s6369_s27 + $0x110] sm:$0x1] }
  0x4f   : > { %v2283_v15 = vrot.slane %v2243_v59, 2  ;;  %v2286_v60 = vrot.slane %v1751_v19, 2  ;;  %5437 = vmatprep.subr.bf16.mxu1 %v6137_v1  ;;  %v232_v17 = vunpack.c.l.bf16 %v6733_v33  ;;  %v8254_v16 = vunpack.c.h.bf16 %v6733_v33  ;;  %v4687_v11 = vld [vmem:[%s6369_s27 + $0x3c] sm:$0xe] }
  0x50   : > { %v407_v2 = vsel %vm354_vm0, %v405_v53, %v406_v35  ;;  %v8248_v52 = vunpack.c.l.bf16 %v6736_v18  ;;  %v409_v63 = vsel %vm354_vm0, %v406_v35, %v408_v56  ;;  %v6769_v35 = vld [vmem:[%s8210_s1 + $0x80] sm:$0xff]   ;;  %v2291_v56 = vrot.slane %v1754_v46, 2 }
  0x51   : > { %5630 = vmatpush3.bf16.msra.mxu0 %v6130_v37  ;;  %v2285_v61 = vsel %vm966_vm1, %v2283_v15, %v2284_v42  ;;  %v2287_v19 = vsel %vm966_vm1, %v2284_v42, %v2286_v60  ;;  %v2244_v37 = vunpack.c.l.bf16 %v4686_v44  ;;  %v477_v24 = vpack.c.bf16 %v409_v63, %v407_v2 }
  0x52   : > { %5663 = vmatprep.subr.bf16.mxu0 %v6132_v29  ;;  %v2387_v59 = vpack.c.bf16 %v2287_v19, %v2285_v61  ;;  %v410_v36 = vrot.slane %v232_v17, 1  ;;  %v411_v53 = vrot.slane %v8254_v16, 1  ;;  %v413_v44 = vrot.slane %v8248_v52, 1  ;;  %5438 = vmatpush3.bf16.msra.mxu1 %v6137_v1  ;;  %v6782_v17 = vld [vmem:[%s6369_s27 + $0x114] sm:$0xff]   ;;  %v6788_v1 = vld [vmem:[%s6369_s27 + $0x11c] sm:$0x1] }
  0x53   : > { %5408 = vmatmul.mubr.bf16.gmra.mrb[16].mxu1 %v476_v22  ;;  %v2288_v42 = vrot.slane %v2244_v37, 2  ;;  %v2289_v22 = vrot.slane %v4991_v39, 2  ;;  %v234_v60 = vunpack.c.l.bf16 %v6758_v26  ;;  %v8242_v2 = vunpack.c.l.bf16 %v6761_v3  ;;  %5471 = vmatprep.subr.bf16.mxu1 %v6769_v35  ;;  %v6870_v52 = vld [vmem:[%s6369_s27 + $0xf0] sm:$0xff]  }
  0x54   : > { %5632 = vmatmul.mubr.bf16.vlgmr.msra.gmra.mrb[0].mxu0 %v2386_v6  ;;  %5411 = vmatprep.mubr.bf16.mxu1 %v477_v24  ;;  %v412_v15 = vsel %vm354_vm0, %v410_v36, %v411_v53  ;;  %v8247_v6 = vunpack.c.h.bf16 %v6758_v26  ;;  %v414_v9 = vsel %vm354_vm0, %v411_v53, %v413_v44  ;;  %v2245_v46 = vunpack.c.l.bf16 %v4687_v11  ;;  %v4688_v24 = vld [vmem:[%s6369_s27 + $0x48] sm:$0xe] }
  0x55   : > { %5664 = vmatpush3.bf16.msra.mxu0 %v6132_v29  ;;  %5635 = vmatprep.mubr.bf16.mxu0 %v2387_v59  ;;  %v2290_v30 = vsel %vm966_vm1, %v2288_v42, %v2289_v22  ;;  %v2292_v39 = vsel %vm966_vm1, %v2289_v22, %v2291_v56  ;;  %v6136_v29 = vld [vmem:[%s8210_s1 + $0x190] sm:$0xff]   ;;  %v478_v63 = vpack.c.bf16 %v414_v9, %v412_v15  ;;  %v415_v19 = vrot.slane %v234_v60, 1  ;;  %v6808_v9 = vld [vmem:[%s6369_s27 + $0x120] sm:$0xff]  }
  0x56   : > { %5665 = vmatprep.subr.bf16.mxu0 %v6134_v43  ;;  %v2388_v61 = vpack.c.bf16 %v2292_v39, %v2290_v30  ;;  %v416_v37 = vrot.slane %v8247_v6, 1  ;;  %v418_v11 = vrot.slane %v8242_v2, 1  ;;  %v2293_v59 = vrot.slane %v2245_v46, 2  ;;  %8316 = vst [vmem:[#allocation3_spill] sm:$0xff] %v6808_v9 }
  0x57   : > { %v8314_v36 = vunpack.c.h.bf16 %v6512_v48  ;;  %v8315_v44 = vunpack.c.l.bf16 %v6531_v57  ;;  %v236_v56 = vunpack.c.l.bf16 %v6782_v17  ;;  %v8246_v15 = vunpack.c.h.bf16 %v6782_v17  ;;  %v6814_v57 = vld [vmem:[%s6369_s27 + $0x128] sm:$0x1] }
  0x58   : > { %v417_v22 = vsel %vm354_vm0, %v415_v19, %v416_v37  ;;  %v8243_v60 = vunpack.c.l.bf16 %v6788_v1  ;;  %v419_v30 = vsel %vm354_vm0, %v416_v37, %v418_v11  ;;  %v2246_v46 = vunpack.c.l.bf16 %v4688_v24  ;;  %8317 = vst [vmem:[#allocation4_spill] sm:$0xff] %v6814_v57  ;;  %v6138_v19 = vld [vmem:[%s8210_s1 + $0x198] sm:$0xff]  }
  0x59   : > { %v2294_v53 = vrot.slane %v8314_v36, 2  ;;  %v2296_v42 = vrot.slane %v8315_v44, 2  ;;  %5666 = vmatpush3.bf16.msra.mxu0 %v6134_v43  ;;  %v4689_v43 = vld [vmem:[%s6369_s27 + $0x54] sm:$0xe]  ;;  %v479_v36 = vpack.c.bf16 %v419_v30, %v417_v22  ;;  %v420_v2 = vrot.slane %v236_v56, 1 }
  0x5a   : > { %5667 = vmatprep.subr.bf16.mxu0 %v6136_v29  ;;  %v421_v37 = vrot.slane %v8246_v15, 1  ;;  %v423_v24 = vrot.slane %v8243_v60, 1  ;;  %v2298_v11 = vrot.slane %v2246_v46, 2  ;;  %v238_v56 = vunpack.c.l.bf16 %v6808_v9 }
  0x5b   : > { %v2295_v39 = vsel %vm966_vm1, %v2293_v59, %v2294_v53  ;;  %v2297_v48 = vsel %vm966_vm1, %v2294_v53, %v2296_v42  ;;  %5412 = vmatmul.mubr.bf16.gmra.mrb[20].mxu1 %v478_v63  ;;  %v8318_v59 = vunpack.c.h.bf16 %v6560_v51  ;;  %v8319_v42 = vunpack.c.l.bf16 %v6554_v38 }
  0x5c   : > { %v2389_v44 = vpack.c.bf16 %v2297_v48, %v2295_v39  ;;  %5636 = vmatmul.mubr.bf16.gmra.mrb[4].mxu0 %v2388_v61  ;;  %5415 = vmatprep.mubr.bf16.mxu1 %v479_v36  ;;  %v422_v22 = vsel %vm354_vm0, %v420_v2, %v421_v37  ;;  %v8245_v30 = vunpack.c.h.bf16 %v6808_v9  ;;  %v8244_v61 = vunpack.c.l.bf16 %v6814_v57  ;;  %v6833_v39 = vld [vmem:[%s6369_s27 + $0x12c] sm:$0xff]   ;;  %v6836_v48 = vld [vmem:[%s6369_s27 + $0x134] sm:$0x1]  ;;  %v4690_v36 = vld [vmem:[%s6369_s27 + $0x60] sm:$0xe] }
  0x5d   : > { %v2299_v53 = vrot.slane %v8318_v59, 2  ;;  %v2301_v63 = vrot.slane %v8319_v42, 2  ;;  %8320 = vst [vmem:[#allocation5_spill] sm:$0xff] %v6833_v39  ;;  %8321 = vst [vmem:[#allocation6_spill] sm:$0xff] %v6836_v48  ;;  %v424_v51 = vsel %vm354_vm0, %v421_v37, %v423_v24  ;;  %5668 = vmatpush3.bf16.msra.mxu0 %v6136_v29  ;;  %v2247_v2 = vunpack.c.l.bf16 %v4689_v43  ;;  %v6142_v37 = vld [vmem:[%s8210_s1 + $0x1a0] sm:$0xff]  }
  0x5e   : > { %5639 = vmatprep.mubr.bf16.mxu0 %v2389_v44  ;;  %v480_v44 = vpack.c.bf16 %v424_v51, %v422_v22  ;;  %v425_v42 = vrot.slane %v238_v56, 1  ;;  %v426_v60 = vrot.slane %v8245_v30, 1  ;;  %5669 = vmatprep.subr.bf16.mxu0 %v6138_v19  ;;  %v428_v24 = vrot.slane %v8244_v61, 1  ;;  %v6854_v22 = vld [vmem:[%s6369_s27 + $0xe8] ss:$24 sps:$4 sm:$0xff]  }
  0x5f   : > { %v2300_v38 = vsel %vm966_vm1, %v2298_v11, %v2299_v53  ;;  %v2302_v46 = vsel %vm966_vm1, %v2299_v53, %v2301_v63  ;;  %v2303_v11 = vrot.slane %v2247_v2, 2  ;;  %v8322_v29 = vunpack.c.h.bf16 %v6590_v7  ;;  %8324 = vst [vmem:[#allocation7_spill] sm:$0xff] %v6854_v22  ;;  %v6857_v56 = vld [vmem:[%s6369_s27 + $0xec] sm:$0x1]  ;;  %v7262_v57 = vld [vmem:[%s6369_s27 + $0x50] sm:$0x1] }
  0x60   : > { %v2390_v59 = vpack.c.bf16 %v2302_v46, %v2300_v38  ;;  %v8323_v53 = vunpack.c.l.bf16 %v6599_v8  ;;  %8325 = vst [vmem:[#allocation8_spill] sm:$0xff] %v6857_v56  ;;  %v427_v51 = vsel %vm354_vm0, %v425_v42, %v426_v60  ;;  %v240_v38 = vunpack.c.l.bf16 %v6833_v39 }
  0x61   : > { %v2304_v43 = vrot.slane %v8322_v29, 2  ;;  %v8252_v46 = vunpack.c.h.bf16 %v6833_v39  ;;  %v8251_v61 = vunpack.c.l.bf16 %v6836_v48  ;;  %v429_v2 = vsel %vm354_vm0, %v426_v60, %v428_v24  ;;  %5670 = vmatpush3.bf16.msra.mxu0 %v6138_v19  ;;  %v6146_v60 = vld [vmem:[%s8210_s1 + $0x1a8] sm:$0xff]   ;;  %v6181_v48 = vld [vmem:[%s6369_s27 + $0xfc] sm:$0xff]  }
  0x62   : > { %v2306_v63 = vrot.slane %v8323_v53, 2  ;;  %v2248_v29 = vunpack.c.l.bf16 %v4690_v36  ;;  %v4691_v53 = vld [vmem:[%s6369_s27 + $0xe4] sm:$0xe]  ;;  %v481_v30 = vpack.c.bf16 %v429_v2, %v427_v51  ;;  %v430_v42 = vrot.slane %v240_v38, 1  ;;  %5671 = vmatprep.subr.bf16.mxu0 %v6142_v37  ;;  %v4692_v2 = vld [vmem:[%s6369_s27 + $0xf0] sm:$0xe] }
  0x63   : > { %v2305_v7 = vsel %vm966_vm1, %v2303_v11, %v2304_v43  ;;  %5416 = vmatmul.mubr.bf16.gmra.mrb[24].mxu1 %v480_v44  ;;  %v431_v6 = vrot.slane %v8252_v46, 1  ;;  %v433_v19 = vrot.slane %v8251_v61, 1  ;;  %v8326_v44 = vunpack.c.h.bf16 %v6630_v55 }
  0x64   : > { %v2307_v8 = vsel %vm966_vm1, %v2304_v43, %v2306_v63  ;;  %5640 = vmatmul.mubr.bf16.gmra.mrb[8].mxu0 %v2390_v59  ;;  %v2308_v36 = vrot.slane %v2248_v29, 2  ;;  %v8327_v11 = vunpack.c.l.bf16 %v6633_v32  ;;  %v6882_v63 = vld [vmem:[%s6369_s27 + $0xf8] sm:$0x1]  ;;  %5419 = vmatprep.mubr.bf16.mxu1 %v481_v30  ;;  %v8250_v59 = vunpack.c.l.bf16 %v6854_v22 }
  0x65   : > { %v2391_v15 = vpack.c.bf16 %v2307_v8, %v2305_v7  ;;  %v2309_v24 = vrot.slane %v8326_v44, 2  ;;  %v432_v51 = vsel %vm354_vm0, %v430_v42, %v431_v6  ;;  %v8249_v38 = vunpack.c.l.bf16 %v6857_v56  ;;  %5672 = vmatpush3.bf16.msra.mxu0 %v6142_v37  ;;  %v6899_v42 = vld [vmem:[%s6369_s27 + $0x104] sm:$0x1] }
  0x66   : > { %v2311_v43 = vrot.slane %v8327_v11, 2  ;;  %v434_v55 = vsel %vm354_vm0, %v431_v6, %v433_v19  ;;  %v2249_v8 = vunpack.c.l.bf16 %v4691_v53  ;;  %v2314_v29 = vrot.slane %v8250_v59, 2  ;;  %8328 = vst [vmem:[#allocation9_spill] sm:$0xff] %v6899_v42  ;;  %v4693_v19 = vld [vmem:[%s6369_s27 + $0xfc] sm:$0xe]  ;;  %5673 = vmatprep.subr.bf16.mxu0 %v6146_v60  ;;  %v6913_v59 = vld [vmem:[%s6369_s27 + $0x108] sm:$0xff]  }
  0x67   : > { %5643 = vmatprep.mubr.bf16.mxu0 %v2391_v15  ;;  %v2310_v7 = vsel %vm966_vm1, %v2308_v36, %v2309_v24  ;;  %v6150_v15 = vld [vmem:[%s8210_s1 + $0x1b0] sm:$0xff]   ;;  %v482_v30 = vpack.c.bf16 %v434_v55, %v432_v51  ;;  %v2316_v6 = vrot.slane %v8249_v38, 2  ;;  %v6239_v36 = vld [vmem:[%s6369_s27] sm:$0xff]   ;;  %v8260_v44 = vunpack.c.h.bf16 %v6870_v52  ;;  %8330 = vst [vmem:[#allocation11_spill] sm:$0xff] %v6913_v59 }
  0x68   : > { %v2312_v32 = vsel %vm966_vm1, %v2309_v24, %v2311_v43  ;;  %v2313_v37 = vrot.slane %v2249_v8, 2  ;;  %v8253_v11 = vunpack.c.l.bf16 %v6882_v63  ;;  %v2250_v43 = vunpack.c.l.bf16 %v4692_v2  ;;  %v6907_v51 = vld [vmem:[%s6369_s27 + $0x110] sm:$0x1] }
  0x69   : > { %v2392_v53 = vpack.c.bf16 %v2312_v32, %v2310_v7  ;;  %v2317_v24 = vsel %vm966_vm1, %v2314_v29, %v2316_v6  ;;  %8329 = vst [vmem:[#allocation10_spill] sm:$0xff] %v6907_v51  ;;  %v2319_v38 = vrot.slane %v8260_v44, 2  ;;  %v4694_v7 = vld [vmem:[%s6369_s27 + $0x108] sm:$0xe]  ;;  %5674 = vmatpush3.bf16.msra.mxu0 %v6146_v60  ;;  %v6919_v2 = vld [vmem:[%s6369_s27 + $0x118] ss:$24 sps:$4 sm:$0xff]   ;;  %v8257_v60 = vunpack.c.l.bf16 %v6899_v42 }
  0x6a   : > { %v2315_v55 = vsel %vm966_vm1, %v2313_v37, %v2314_v29  ;;  %v2318_v8 = vrot.slane %v2250_v43, 2  ;;  %v2321_v6 = vrot.slane %v8253_v11, 2  ;;  %8331 = vst [vmem:[#allocation12_spill] sm:$0xff] %v6919_v2  ;;  %5675 = vmatprep.subr.bf16.mxu0 %v6150_v15  ;;  %v6154_v29 = vld [vmem:[%s8210_s1 + $0x1b8] sm:$0xff]   ;;  %v8256_v37 = vunpack.c.h.bf16 %v6854_v22  ;;  %v6964_v42 = vld [vmem:[%s6369_s27 + $0x134] sm:$0x1] }
  0x6b   : > { %5420 = vmatmul.mubr.bf16.gmra.mrb[28].mxu1 %v482_v30  ;;  %v2393_v32 = vpack.c.bf16 %v2317_v24, %v2315_v55  ;;  %v2251_v30 = vunpack.c.l.bf16 %v4693_v19  ;;  %v6927_v24 = vld [vmem:[%s6369_s27 + $0x11c] sm:$0x1]  ;;  %v8258_v61 = vunpack.c.h.bf16 %v6913_v59  ;;  %v8268_v46 = vunpack.c.l.bf16 %v6907_v51  ;;  %8335 = vst [vmem:[#allocation16_spill] sm:$0xff] %v6964_v42  ;;  %v4697_v22 = vld [vmem:[%s6369_s27 + $0x12c] sm:$0xe] }
  0x6c   : > { %5644 = vmatmul.mubr.bf16.gmra.mrb[12].mxu0 %v2392_v53  ;;  %5439 = vmatprep.mubr.bf16.mxu1 %v6239_v36  ;;  %8332 = vst [vmem:[#allocation13_spill] sm:$0xff] %v6927_v24  ;;  %v2320_v43 = vsel %vm966_vm1, %v2318_v8, %v2319_v38  ;;  %v2322_v55 = vsel %vm966_vm1, %v2319_v38, %v2321_v6  ;;  %v4695_v53 = vld [vmem:[%s6369_s27 + $0x114] sm:$0xe]  ;;  %v6240_v36 = vld [vmem:[%s6369_s27 + $0xc] sm:$0xff]   ;;  %v2324_v16 = vrot.slane %v8256_v37, 2  ;;  %v2326_v19 = vrot.slane %v8257_v60, 2 }
  0x6d   : > { %5647 = vmatprep.mubr.bf16.mxu0 %v2393_v32  ;;  %v2323_v11 = vrot.slane %v2251_v30, 2  ;;  %5676 = vmatpush3.bf16.msra.mxu0 %v6150_v15  ;;  %v2394_v32 = vpack.c.bf16 %v2322_v55, %v2320_v43  ;;  %v6241_v8 = vld [vmem:[%s6369_s27 + $0x18] sm:$0xff]   ;;  %v2252_v58 = vunpack.c.l.bf16 %v4694_v7  ;;  %v2329_v38 = vrot.slane %v8258_v61, 2  ;;  %v6943_v6 = vld [vmem:[%s6369_s27 + $0x120] sm:$0xff]   ;;  %v6145_v15 = vld [vmem:[%s8210_s1 + $0x88] sm:$0xff]  }
  0x6e   : > { %8333 = vst [vmem:[#allocation14_spill] sm:$0xff] %v6943_v6  ;;  %5677 = vmatprep.subr.bf16.mxu0 %v6154_v29  ;;  %v6948_v30 = vld [vmem:[%s8210_s1 + $0x1c0] sm:$0xff]   ;;  %v2327_v60 = vsel %vm966_vm1, %v2324_v16, %v2326_v19  ;;  %v8267_v7 = vunpack.c.l.bf16 %v6919_v2  ;;  %v8266_v43 = vunpack.c.l.bf16 %v6927_v24  ;;  %v6958_v55 = vld [vmem:[%s6369_s27 + $0x128] sm:$0x1]  ;;  %v2331_v59 = vrot.slane %v8268_v46, 2  ;;  %v6243_v46 = vld [vmem:[%s6369_s27 + $0x30] sm:$0xff]  }
  0x6f   : > { %v2325_v37 = vsel %vm966_vm1, %v2323_v11, %v2324_v16  ;;  %8334 = vst [vmem:[#allocation15_spill] sm:$0xff] %v6958_v55  ;;  %v4696_v61 = vld [vmem:[%s6369_s27 + $0x120] sm:$0xe]  ;;  %v2328_v44 = vrot.slane %v2252_v58, 2  ;;  %v2253_v11 = vunpack.c.l.bf16 %v4695_v53  ;;  %v8269_v58 = vunpack.c.h.bf16 %v6943_v6 }
  0x70   : > { %v2395_v23 = vpack.c.bf16 %v2327_v60, %v2325_v37  ;;  %v2334_v16 = vrot.slane %v8267_v7, 2  ;;  %v2336_v19 = vrot.slane %v8266_v43, 2  ;;  %v2254_v37 = vunpack.c.l.bf16 %v4696_v61  ;;  %v6242_v43 = vld [vmem:[%s6369_s27 + $0x24] sm:$0xff]   ;;  %v7241_v24 = vld [vmem:[%s6369_s27 + $0x3c] sm:$0xff]  }
  0x71   : > { %5678 = vmatpush3.bf16.msra.mxu0 %v6154_v29  ;;  %v2333_v56 = vrot.slane %v2253_v11, 2  ;;  %v2330_v60 = vsel %vm966_vm1, %v2328_v44, %v2329_v38  ;;  %v2332_v53 = vsel %vm966_vm1, %v2329_v38, %v2331_v59  ;;  %v6149_v29 = vld [vmem:[%s8210_s1 + $0x90] sm:$0xff]   ;;  %v8271_v44 = vunpack.c.l.bf16 %v6964_v42  ;;  %v6174_v42 = vld [vmem:[%s6369_s27 + $0x60] sm:$0xff]  }
  0x72   : > { %5711 = vmatprep.subr.bf16.mxu0 %v6948_v30  ;;  %v8336_v59 = vunpack.c.h.bf16 %v6394_v20  ;;  %v8337_v38 = vunpack.c.l.bf16 %v6397_v21  ;;  %v2396_v7 = vpack.c.bf16 %v2332_v53, %v2330_v60  ;;  %v6999_v20 = vld [vmem:[%s6369_s27 + $0x140] sm:$0x1] }
  0x73   : > { %5440 = vmatmul.mubr.bf16.vlgmr.msra.gmra.mrb[0].mxu1 %v6240_v36  ;;  %v8270_v36 = vunpack.c.l.bf16 %v6958_v55  ;;  %v2335_v61 = vsel %vm966_vm1, %v2333_v56, %v2334_v16  ;;  %v2339_v56 = vrot.slane %v8269_v58, 2  ;;  %8339 = vst [vmem:[#allocation18_spill] sm:$0xff] %v6999_v20  ;;  %v8364_v55 = vunpack.c.l.bf16 %v6679_v25  ;;  %v7244_v25 = vld [vmem:[%s6369_s27 + $0x44] sm:$0x1] }
  0x74   : > { %5648 = vmatmul.mubr.bf16.gmra.mrb[16].mxu0 %v2394_v32  ;;  %5472 = vmatpush3.bf16.msra.mxu1 %v6769_v35  ;;  %v2255_v32 = vunpack.c.l.bf16 %v4697_v22  ;;  %v975_v11 = vrot.slane %v8337_v38, 2  ;;  %v2338_v35 = vrot.slane %v2254_v37, 2  ;;  %v6996_v22 = vld [vmem:[%s6369_s27 + $0x138] sm:$0xff]   ;;  %v919_v38 = vld [vmem:[%s6369_s27 + $0xc] sm:$0xe] }
  0x75   : > { %5443 = vmatprep.mubr.bf16.mxu1 %v6241_v8  ;;  %5651 = vmatprep.mubr.bf16.mxu0 %v2395_v23  ;;  %v2337_v23 = vsel %vm966_vm1, %v2334_v16, %v2336_v19  ;;  %v973_v8 = vrot.slane %v8336_v59, 2  ;;  %v6153_v16 = vld [vmem:[%s8210_s1 + $0x98] sm:$0xff]   ;;  %8338 = vst [vmem:[#allocation17_spill] sm:$0xff] %v6996_v22  ;;  %v2341_v60 = vrot.slane %v8270_v36, 2  ;;  %v2346_v59 = vrot.slane %v8271_v44, 2 }
  0x76   : > { %5473 = vmatprep.subr.bf16.mxu1 %v6145_v15  ;;  %v4698_v19 = vld [vmem:[%s6369_s27 + $0x138] sm:$0xe]  ;;  %v2397_v21 = vpack.c.bf16 %v2337_v23, %v2335_v61  ;;  %v2343_v53 = vrot.slane %v2255_v32, 2  ;;  %v2340_v58 = vsel %vm966_vm1, %v2338_v35, %v2339_v56  ;;  %v8272_v23 = vunpack.c.h.bf16 %v6996_v22 }
  0x77   : > { %v2342_v61 = vsel %vm966_vm1, %v2339_v56, %v2341_v60  ;;  %v2256_v32 = vunpack.c.l.bf16 %v4698_v19  ;;  %v7019_v35 = vsel %vm966_vm1, %v973_v8, %v975_v11  ;;  %v6244_v56 = vld [vmem:[%s6369_s27 + $0x3c] sm:$0xff]   ;;  %v6164_v11 = vld [vmem:[%s8210_s1 + $0xa8] sm:$0xff]  }
  0x78   : > { %5474 = vmatpush3.bf16.msra.mxu1 %v6145_v15  ;;  %v8340_v15 = vunpack.c.h.bf16 %v6919_v2  ;;  %v2349_v19 = vrot.slane %v8272_v23, 2 }
  0x79   : > { %5475 = vmatprep.subr.bf16.mxu1 %v6149_v29 }
  0x7a   : > { %v2344_v37 = vrot.slane %v8340_v15, 2  ;;  %v2348_v15 = vrot.slane %v2256_v32, 2  ;;  %v918_v32 = vld [vmem:[%s6369_s27] sm:$0xe] }
  0x7b   : > { %5444 = vmatmul.mubr.bf16.gmra.mrb[4].mxu1 %v6242_v43 }
  0x7c   : > { %5652 = vmatmul.mubr.bf16.gmra.mrb[20].mxu0 %v2396_v7  ;;  %5447 = vmatprep.mubr.bf16.mxu1 %v6243_v46  ;;  %v2345_v36 = vsel %vm966_vm1, %v2343_v53, %v2344_v37  ;;  %v2347_v43 = vsel %vm966_vm1, %v2344_v37, %v2346_v59  ;;  %v6158_v46 = vld [vmem:[%s8210_s1 + $0xa0] sm:$0xff]   ;;  %v935_v7 = vunpack.c.l.bf16 %v919_v38  ;;  %v8341_v37 = vunpack.c.l.bf16 %v6999_v20  ;;  %v924_v20 = vld [vmem:[%s6369_s27 + $0x48] sm:$0xe] }
  0x7d   : > { %5655 = vmatprep.mubr.bf16.mxu0 %v2397_v21  ;;  %5476 = vmatpush3.bf16.msra.mxu1 %v6149_v29  ;;  %v2398_v29 = vpack.c.bf16 %v2342_v61, %v2340_v58  ;;  %v6245_v21 = vld [vmem:[%s6369_s27 + $0x48] sm:$0xff]   ;;  %v2399_v44 = vpack.c.bf16 %v2347_v43, %v2345_v36  ;;  %v2350_v36 = vsel %vm966_vm1, %v2348_v15, %v2349_v19  ;;  %v6156_v61 = vld [vmem:[%s6369_s27 + $0x18] sm:$0xff]   ;;  %v7049_v15 = vld [vmem:[%s8210_s1 + $0xc0] sm:$0xff]  }
  0x7e   : > { %5477 = vmatprep.subr.bf16.mxu1 %v6153_v16  ;;  %v972_v60 = vrot.slane %v935_v7, 2  ;;  %v2351_v53 = vrot.slane %v8341_v37, 2  ;;  %v6159_v43 = vld [vmem:[%s6369_s27 + $0x24] sm:$0xff]   ;;  %v6162_v7 = vld [vmem:[%s6369_s27 + $0x30] sm:$0xff]  }
  0x7f   : > { %v922_v37 = vld [vmem:[%s6369_s27 + $0x30] sm:$0xe] }
  0x80   : > { %v7031_v59 = vsel %vm966_vm1, %v972_v60, %v973_v8  ;;  %v2352_v38 = vsel %vm966_vm1, %v2349_v19, %v2351_v53  ;;  %v6170_v8 = vld [vmem:[%s8210_s1 + $0xb0] sm:$0xff]   ;;  %v921_v19 = vld [vmem:[%s6369_s27 + $0x24] sm:$0xe]  ;;  %v938_v58 = vunpack.c.l.bf16 %v922_v37 }
  0x81   : > { %5478 = vmatpush3.bf16.msra.mxu1 %v6153_v16  ;;  %v2400_v16 = vpack.c.bf16 %v2352_v38, %v2350_v36  ;;  %v8343_v36 = vunpack.c.h.bf16 %v6378_v12  ;;  %v937_v23 = vunpack.c.l.bf16 %v921_v19  ;;  %v8347_v12 = vunpack.c.h.bf16 %v6870_v52 }
  0x82   : > { %5479 = vmatprep.subr.bf16.mxu1 %v6158_v46  ;;  %v8349_v19 = vunpack.c.h.bf16 %v6458_v62  ;;  %v6182_v62 = vld [vmem:[%s8210_s1 + $0x1e0] sm:$0xff]  }
  0x83   : > { %5448 = vmatmul.mubr.bf16.gmra.mrb[8].mxu1 %v6244_v56  ;;  %v920_v56 = vld [vmem:[%s6369_s27 + $0x18] sm:$0xe]  ;;  %v968_v38 = vrot.slane %v8343_v36, 2  ;;  %v7084_v36 = vrot.slane %v8347_v12, 1  ;;  %v987_v12 = vrot.slane %v938_v58, 2 }
  0x84   : > { %5656 = vmatmul.mubr.bf16.gmra.mrb[24].mxu0 %v2398_v29  ;;  %5451 = vmatprep.mubr.bf16.mxu1 %v6245_v21  ;;  %v6166_v29 = vld [vmem:[%s8210_s1 + $0x1c8] sm:$0xff]   ;;  %v934_v21 = vunpack.c.l.bf16 %v918_v32  ;;  %v936_v60 = vunpack.c.l.bf16 %v920_v56  ;;  %v8345_v32 = vunpack.c.h.bf16 %v6429_v45  ;;  %v6178_v45 = vld [vmem:[%s8210_s1 + $0x1d8] sm:$0xff]   ;;  %v983_v37 = vrot.slane %v8349_v19, 2 }
  0x85   : > { %5659 = vmatprep.mubr.bf16.mxu0 %v2399_v44  ;;  %5480 = vmatpush3.bf16.msra.mxu1 %v6158_v46  ;;  %v6176_v44 = vld [vmem:[%s8210_s1 + $0xb8] sm:$0xff]   ;;  %v5002_v46 = vunpack.c.l.bf16 %v6870_v52  ;;  %v6168_v56 = vld [vmem:[%s6369_s27 + $0x48] sm:$0xff]   ;;  %8348 = vst [vmem:[#allocation20_spill] sm:$0xff] %v7084_v36  ;;  %v8350_v52 = vunpack.c.l.bf16 %v6468_v4 }
  0x86   : > { %5481 = vmatprep.subr.bf16.mxu1 %v6164_v11 }
  0x87   : > { %v7064_v53 = vrot.slane %v5002_v46, 1 }
  0x89   : > { %5482 = vmatpush3.bf16.msra.mxu1 %v6164_v11  ;;  %8342 = vst [vmem:[#allocation19_spill] sm:$0xff] %v7064_v53  ;;  %v6172_v11 = vld [vmem:[%s8210_s1 + $0x1d0] sm:$0xff]  }
  0x8a   : > { %5483 = vmatprep.subr.bf16.mxu1 %v6170_v8 }
  0x8b   : > { %5452 = vmatmul.mubr.bf16.gmra.mrb[12].mxu1 %v6609_v27 }
  0x8c   : > { %5660 = vmatmul.mubr.bf16.gmra.mrb[28].mxu0 %v2400_v16  ;;  %5455 = vmatprep.mubr.bf16.mxu1 %v6641_v41  ;;  %v967_v16 = vrot.slane %v934_v21, 2  ;;  %v977_v21 = vrot.slane %v936_v60, 2 }
  0x8d   : > { %5679 = vmatprep.mubr.bf16.mxu0 %v6156_v61  ;;  %5484 = vmatpush3.bf16.msra.mxu1 %v6170_v8  ;;  %v6165_v8 = vld [vmem:[%s6369_s27 + $0x3c] sm:$0xff]   ;;  %v8344_v61 = vunpack.c.l.bf16 %v6381_v13 }
  0x8e   : > { %5485 = vmatprep.subr.bf16.mxu1 %v6176_v44 }
  0x91   : > { %5486 = vmatpush3.bf16.msra.mxu1 %v6176_v44  ;;  %v970_v44 = vrot.slane %v8344_v61, 2  ;;  %v925_v61 = vld [vmem:[%s6369_s27 + $0x54] sm:$0xe] }
  0x92   : > { %5519 = vmatprep.subr.bf16.mxu1 %v7049_v15  ;;  %v941_v58 = vunpack.c.l.bf16 %v925_v61 }
  0x93   : > { %5456 = vmatmul.mubr.bf16.gmra.mrb[16].mxu1 %v6676_v34 }
  0x94   : > { %5680 = vmatmul.mubr.bf16.vlgmr.msra.gmra.mrb[0].mxu0 %v6159_v43  ;;  %5459 = vmatprep.mubr.bf16.mxu1 %v6701_v54  ;;  %v978_v43 = vrot.slane %v8345_v32, 2  ;;  %v985_v32 = vrot.slane %v8350_v52, 2  ;;  %v8354_v52 = vunpack.c.l.bf16 %v6540_v28  ;;  %v8356_v28 = vunpack.c.l.bf16 %v6571_v5 }
  0x95   : > { %5712 = vmatpush3.bf16.msra.mxu0 %v6948_v30  ;;  %5683 = vmatprep.mubr.bf16.mxu0 %v6162_v7  ;;  %v8346_v30 = vunpack.c.l.bf16 %v6438_v50  ;;  %v923_v7 = vld [vmem:[%s6369_s27 + $0x3c] sm:$0xe]  ;;  %v7091_v50 = vsel %vm966_vm1, %v968_v38, %v970_v44  ;;  %v926_v44 = vld [vmem:[%s6369_s27 + $0xd8] sm:$0xe] }
  0x96   : > { %5713 = vmatprep.subr.bf16.mxu0 %v6166_v29  ;;  %v939_v13 = vunpack.c.l.bf16 %v923_v7  ;;  %v982_v7 = vrot.slane %v937_v23, 2  ;;  %v7110_v4 = vsel %vm966_vm1, %v977_v21, %v978_v43  ;;  %v8352_v23 = vunpack.c.l.bf16 %v6509_v47 }
  0x97   : > { %v980_v46 = vrot.slane %v8346_v30, 2  ;;  %v940_v30 = vunpack.c.l.bf16 %v924_v20  ;;  %v8351_v20 = vunpack.c.h.bf16 %v6500_v40  ;;  %v995_v22 = vrot.slane %v8354_v52, 2  ;;  %v6171_v40 = vld [vmem:[%s6369_s27 + $0x54] sm:$0xff]  }
  0x98   : > { %v942_v47 = vunpack.c.l.bf16 %v926_v44  ;;  %v7142_v44 = vsel %vm966_vm1, %v983_v37, %v985_v32  ;;  %v1002_v52 = vrot.slane %v941_v58, 2  ;;  %v8359_v32 = vunpack.c.h.bf16 %v6641_v41 }
  0x99   : > { %5714 = vmatpush3.bf16.msra.mxu0 %v6166_v29  ;;  %v7099_v29 = vsel %vm966_vm1, %v967_v16, %v968_v38  ;;  %v7102_v60 = vsel %vm966_vm1, %v978_v43, %v980_v46  ;;  %v988_v38 = vrot.slane %v8351_v20, 2  ;;  %v990_v16 = vrot.slane %v8352_v23, 2  ;;  %v7124_v23 = vld [vmem:[%s6369_s27 + $0x18] sm:$0xff]  }
  0x9a   : > { %5715 = vmatprep.subr.bf16.mxu0 %v6172_v11  ;;  %v8353_v46 = vunpack.c.h.bf16 %v6535_v10  ;;  %v8355_v43 = vunpack.c.h.bf16 %v6568_v0  ;;  %v997_v20 = vrot.slane %v940_v30, 2  ;;  %v8357_v0 = vunpack.c.h.bf16 %v6609_v27 }
  0x9b   : > { %5460 = vmatmul.mubr.bf16.gmra.mrb[20].mxu1 %v6733_v33  ;;  %v7139_v30 = vsel %vm966_vm1, %v982_v7, %v983_v37  ;;  %v7148_v5 = vsel %vm966_vm1, %v987_v12, %v988_v38  ;;  %v5018_v27 = vunpack.c.l.bf16 %v7124_v23  ;;  %v6186_v37 = vld [vmem:[%s8210_s1 + $0x1e8] sm:$0xff]   ;;  %v8360_v12 = vunpack.c.l.bf16 %v6654_v31 }
  0x9c   : > { %5684 = vmatmul.mubr.bf16.gmra.mrb[4].mxu0 %v6165_v8  ;;  %5463 = vmatprep.mubr.bf16.mxu1 %v6758_v26  ;;  %v992_v8 = vrot.slane %v939_v13, 2  ;;  %v993_v19 = vrot.slane %v8353_v46, 2  ;;  %v998_v21 = vrot.slane %v8355_v43, 2  ;;  %v1000_v13 = vrot.slane %v8356_v28, 2  ;;  %v927_v46 = vld [vmem:[%s6369_s27 + $0xe4] sm:$0xe] }
  0x9d   : > { %5687 = vmatprep.mubr.bf16.mxu0 %v6168_v56  ;;  %5716 = vmatpush3.bf16.msra.mxu0 %v6172_v11  ;;  %v7127_v56 = vld [vmem:[%s6369_s27 + $0x20] sm:$0x1]  ;;  %v1003_v61 = vrot.slane %v8357_v0, 2  ;;  %v8358_v43 = vunpack.c.l.bf16 %v6624_v49  ;;  %v8276_v28 = vunpack.c.h.bf16 %v7124_v23  ;;  %v1007_v49 = vrot.slane %v942_v47, 2  ;;  %v7174_v47 = vld [vmem:[%s6369_s27 + $0x24] sm:$0xff]  }
  0x9e   : > { %5717 = vmatprep.subr.bf16.mxu0 %v6178_v45  ;;  %v1010_v58 = vrot.slane %v8360_v12, 2  ;;  %v943_v0 = vunpack.c.l.bf16 %v927_v46  ;;  %v7165_v10 = vsel %vm966_vm1, %v992_v8, %v993_v19  ;;  %v7168_v7 = vsel %vm966_vm1, %v993_v19, %v995_v22  ;;  %v7187_v22 = vld [vmem:[%s6369_s27 + $0x2c] sm:$0x1]  ;;  %v928_v8 = vld [vmem:[%s6369_s27 + $0xf0] sm:$0xe] }
  0x9f   : > { %v1005_v11 = vrot.slane %v8358_v43, 2  ;;  %v7162_v43 = vsel %vm966_vm1, %v988_v38, %v990_v16  ;;  %v7171_v41 = vsel %vm966_vm1, %v997_v20, %v998_v21  ;;  %v7178_v31 = vsel %vm966_vm1, %v998_v21, %v1000_v13  ;;  %v6190_v46 = vld [vmem:[%s8210_s1 + $0x1f0] sm:$0xff]  }
  0xa0   : > { %v7181_v38 = vsel %vm966_vm1, %v1002_v52, %v1003_v61  ;;  %v3145_v19 = vrot.slane %v5018_v27, 1  ;;  %v8361_v21 = vunpack.c.l.bf16 %v7127_v56  ;;  %v8362_v13 = vunpack.c.h.bf16 %v6676_v34  ;;  %v7211_v34 = vld [vmem:[%s6369_s27 + $0x38] sm:$0x1]  ;;  %v6179_v12 = vld [vmem:[%s6369_s27 + $0xf0] sm:$0xff]  }
  0xa1   : > { %5718 = vmatpush3.bf16.msra.mxu0 %v6178_v45  ;;  %v1008_v45 = vrot.slane %v8359_v32, 2  ;;  %v7184_v16 = vsel %vm966_vm1, %v1003_v61, %v1005_v11  ;;  %v6177_v61 = vld [vmem:[%s6369_s27 + $0x6c] sm:$0xff]   ;;  %v1012_v52 = vrot.slane %v943_v0, 2  ;;  %v3052_v27 = vunpack.c.l.bf16 %v7174_v47  ;;  %v931_v0 = vld [vmem:[%s6369_s27 + $0x114] sm:$0xe] }
  0xa2   : > { %5719 = vmatprep.subr.bf16.mxu0 %v6182_v62  ;;  %v3148_v20 = vrot.slane %v8361_v21, 1  ;;  %v1013_v11 = vrot.slane %v8362_v13, 2  ;;  %v7208_v32 = vld [vmem:[%s6369_s27 + $0x30] sm:$0xff]   ;;  %v6194_v21 = vld [vmem:[%s8210_s1 + $0x1f8] sm:$0xff]   ;;  %v944_v6 = vunpack.c.l.bf16 %v928_v8  ;;  %v8368_v2 = vunpack.c.l.bf16 %v7187_v22 }
  0xa3   : > { %5464 = vmatmul.mubr.bf16.gmra.mrb[24].mxu1 %v6782_v17  ;;  %v5022_v8 = vunpack.c.l.bf16 %v7208_v32 }
  0xa4   : > { %5688 = vmatmul.mubr.bf16.gmra.mrb[8].mxu0 %v6171_v40  ;;  %5467 = vmatprep.mubr.bf16.mxu1 %v6808_v9  ;;  %v3146_v40 = vrot.slane %v8276_v28, 1  ;;  %v3153_v51 = vrot.slane %v8368_v2, 1  ;;  %v8370_v2 = vunpack.c.h.bf16 %v6701_v54  ;;  %v6183_v9 = vld [vmem:[%s6369_s27 + $0x108] sm:$0xff]  }
  0xa5   : > { %5691 = vmatprep.mubr.bf16.mxu0 %v6174_v42  ;;  %5720 = vmatpush3.bf16.msra.mxu0 %v6182_v62  ;;  %v7201_v42 = vsel %vm966_vm1, %v1007_v49, %v1008_v45  ;;  %v7204_v62 = vsel %vm966_vm1, %v1008_v45, %v1010_v58  ;;  %v929_v58 = vld [vmem:[%s6369_s27 + $0xfc] sm:$0xe]  ;;  %v1015_v49 = vrot.slane %v8364_v55, 2  ;;  %v7247_v55 = vsel %vm966_vm1, %v1012_v52, %v1013_v11  ;;  %v930_v45 = vld [vmem:[%s6369_s27 + $0x108] sm:$0xe] }
  0xa6   : > { %5721 = vmatprep.subr.bf16.mxu0 %v6186_v37  ;;  %8363 = vst [vmem:[#allocation21_spill] sm:$0xff] %v7201_v42  ;;  %v7235_v13 = vsel %vm354_vm0, %v3145_v19, %v3146_v40  ;;  %v7238_v28 = vsel %vm354_vm0, %v3146_v40, %v3148_v20  ;;  %v7253_v19 = vld [vmem:[%s6369_s27 + $0x48] sm:$0xff]   ;;  %v8367_v40 = vunpack.c.h.bf16 %v7174_v47  ;;  %v945_v52 = vunpack.c.l.bf16 %v929_v58 }
  0xa7   : > { %8365 = vst [vmem:[#allocation22_spill] sm:$0xff] %v7235_v13  ;;  %8366 = vst [vmem:[#allocation23_spill] sm:$0xff] %v7238_v28  ;;  %v1018_v58 = vrot.slane %v8370_v2, 2  ;;  %v3155_v54 = vrot.slane %v5022_v8, 1  ;;  %v5026_v2 = vunpack.c.l.bf16 %v7253_v19  ;;  %v8375_v13 = vunpack.c.l.bf16 %v6736_v18 }
  0xa8   : > { %v3151_v20 = vrot.slane %v8367_v40, 1  ;;  %v1017_v40 = vrot.slane %v944_v6, 2  ;;  %v1022_v53 = vrot.slane %v945_v52, 2  ;;  %v6184_v52 = vld [vmem:[%s8210_s1 + $0xc8] sm:$0xff]   ;;  %v8378_v18 = vunpack.c.h.bf16 %v6758_v26 }
  0xa9   : > { %5722 = vmatpush3.bf16.msra.mxu0 %v6186_v37  ;;  %v3150_v37 = vrot.slane %v3052_v27, 1  ;;  %v8369_v27 = vpack.c.bf16 %v7091_v50, %v7099_v29  ;;  %v7277_v50 = vld [vmem:[%s8210_s1 + $0x200] sm:$0xff]   ;;  %v8371_v29 = vunpack.c.l.bf16 %v6704_v14  ;;  %v8373_v14 = vunpack.c.l.bf16 %v7211_v34 }
  0xaa   : > { %5723 = vmatprep.subr.bf16.mxu0 %v6190_v46  ;;  %v7298_v8 = vsel %vm354_vm0, %v3151_v20, %v3153_v51  ;;  %v1025_v28 = vrot.slane %v8375_v13, 2  ;;  %v947_v51 = vunpack.c.l.bf16 %v931_v0  ;;  %v1028_v13 = vrot.slane %v8378_v18, 2 }
  0xab   : > { %5468 = vmatmul.mubr.bf16.gmra.mrb[28].mxu1 %v6833_v39  ;;  %v7270_v39 = vsel %vm966_vm1, %v1013_v11, %v1015_v49  ;;  %v8372_v49 = vunpack.c.h.bf16 %v7208_v32  ;;  %v7295_v6 = vsel %vm354_vm0, %v3150_v37, %v3151_v20  ;;  %v8376_v11 = vunpack.c.h.bf16 %v7241_v24 }
  0xac   : > { %5692 = vmatmul.mubr.bf16.gmra.mrb[12].mxu0 %v6177_v61  ;;  %5487 = vmatprep.mubr.bf16.mxu1 %v8369_v27  ;;  %v1020_v61 = vrot.slane %v8371_v29, 2  ;;  %v3058_v27 = vunpack.c.l.bf16 %v7241_v24  ;;  %v3158_v29 = vrot.slane %v8373_v14, 1  ;;  %v8377_v37 = vunpack.c.l.bf16 %v7244_v25 }
  0xad   : > { %5695 = vmatprep.mubr.bf16.mxu0 %v6179_v12  ;;  %5724 = vmatpush3.bf16.msra.mxu0 %v6190_v46  ;;  %v3156_v12 = vrot.slane %v8372_v49, 1  ;;  %v946_v46 = vunpack.c.l.bf16 %v930_v45  ;;  %v8374_v45 = vunpack.c.h.bf16 %v6733_v33  ;;  %v3161_v36 = vrot.slane %v8376_v11, 1 }
  0xae   : > { %5725 = vmatprep.subr.bf16.mxu0 %v6194_v21  ;;  %v3160_v14 = vrot.slane %v3058_v27, 1  ;;  %v3163_v42 = vrot.slane %v8377_v37, 1  ;;  %v8379_v20 = vunpack.c.l.bf16 %v6761_v3  ;;  %v8380_v27 = vpack.c.bf16 %v7019_v35, %v7031_v59 }
  0xaf   : > { %v1023_v49 = vrot.slane %v8374_v45, 2  ;;  %v1027_v33 = vrot.slane %v946_v46, 2  ;;  %v7320_v11 = vsel %vm966_vm1, %v1017_v40, %v1018_v58  ;;  %v7323_v0 = vsel %vm966_vm1, %v1018_v58, %v1020_v61  ;;  %v7344_v58 = vld [vmem:[%s6369_s27 + $0x54] sm:$0xff]   ;;  %v7347_v61 = vld [vmem:[%s6369_s27 + $0x5c] sm:$0x1] }
  0xb0   : > { %v1030_v45 = vrot.slane %v8379_v20, 2  ;;  %v8381_v46 = vunpack.c.h.bf16 %v7253_v19  ;;  %v8382_v26 = vunpack.c.l.bf16 %v7262_v57  ;;  %v8383_v3 = vunpack.c.l.bf16 %v6882_v63 }
  0xb1   : > { %5726 = vmatpush3.bf16.msra.mxu0 %v6194_v21  ;;  %v3165_v21 = vrot.slane %v5026_v2, 1  ;;  %v7335_v35 = vsel %vm354_vm0, %v3155_v54, %v3156_v12  ;;  %v7338_v59 = vsel %vm354_vm0, %v3156_v12, %v3158_v29  ;;  %v7341_v40 = vsel %vm966_vm1, %v1022_v53, %v1023_v49 }
  0xb2   : > { %5759 = vmatprep.subr.bf16.mxu0 %v7277_v50  ;;  %v3166_v37 = vrot.slane %v8381_v46, 1  ;;  %v3168_v18 = vrot.slane %v8382_v26, 1  ;;  %v7331_v20 = vrot.slane %v8383_v3, 1  ;;  %v8384_v63 = vpack.c.bf16 %v7102_v60, %v7110_v4  ;;  %v6192_v3 = vld [vmem:[%s8210_s1 + $0xd8] sm:$0xff]  }
  0xb3   : > { %5488 = vmatmul.mubr.bf16.vlgmr.msra.gmra.mrb[0].mxu1 %v8380_v27  ;;  %v1032_v53 = vrot.slane %v947_v51, 2  ;;  %v8385_v54 = vunpack.c.h.bf16 %v6782_v17  ;;  %v8386_v2 = vunpack.c.l.bf16 %v6788_v1  ;;  %v7363_v60 = vsel %vm354_vm0, %v3160_v14, %v3161_v36  ;;  %v7383_v51 = vld [vmem:[%s6369_s27 + $0x120] sm:$0xe] }
  0xb4   : > { %5696 = vmatmul.mubr.bf16.gmra.mrb[16].mxu0 %v6181_v48  ;;  %5520 = vmatpush3.bf16.msra.mxu1 %v7049_v15  ;;  %v6188_v48 = vld [vmem:[%s8210_s1 + $0xd0] sm:$0xff]   ;;  %v7356_v15 = vsel %vm966_vm1, %v1023_v49, %v1025_v28  ;;  %v7369_v4 = vsel %vm966_vm1, %v1027_v33, %v1028_v13  ;;  %v7372_v28 = vsel %vm966_vm1, %v1028_v13, %v1030_v45  ;;  %v3064_v49 = vunpack.c.l.bf16 %v7344_v58  ;;  %v6187_v27 = vld [vmem:[%s6369_s27 + $0x120] sm:$0xff]  }
  0xb5   : > { %5491 = vmatprep.mubr.bf16.mxu1 %v8384_v63  ;;  %5699 = vmatprep.mubr.bf16.mxu0 %v6183_v9  ;;  %v1033_v12 = vrot.slane %v8385_v54, 2  ;;  %v1035_v29 = vrot.slane %v8386_v2, 2  ;;  %v7366_v9 = vsel %vm354_vm0, %v3161_v36, %v3163_v42  ;;  %v7375_v17 = vsel %vm354_vm0, %v3165_v21, %v3166_v37  ;;  %v6185_v36 = vld [vmem:[%s6369_s27 + $0x114] sm:$0xff]   ;;  %v7432_v54 = vld [vmem:[%s6369_s27 + $0x6c] sm:$0xff]  }
  0xb6   : > { %5521 = vmatprep.subr.bf16.mxu1 %v6184_v52  ;;  %v7378_v1 = vsel %vm354_vm0, %v3166_v37, %v3168_v18  ;;  %v8292_v14 = vunpack.c.h.bf16 %v7344_v58  ;;  %v8291_v45 = vunpack.c.l.bf16 %v7347_v61  ;;  %v4869_v21 = vld [vmem:[%s6369_s27 + $0x18] sm:$0xe]  ;;  %v4870_v18 = vld [vmem:[%s6369_s27 + $0x24] sm:$0xe]  ;;  %v8387_v46 = vpack.c.bf16 %v7142_v44, %v7139_v30 }
  0xb7   : > { %v7400_v37 = vsel %vm966_vm1, %v1032_v53, %v1033_v12  ;;  %v7403_v26 = vsel %vm966_vm1, %v1033_v12, %v1035_v29  ;;  %v7417_v12 = vld [vmem:[%s6369_s27 + $0x60] sm:$0xff]   ;;  %v7420_v29 = vld [vmem:[%s6369_s27 + $0x68] sm:$0x1]  ;;  %v3547_v2 = vunpack.c.l.bf16 %v4869_v21  ;;  %v8388_v13 = vunpack.c.h.bf16 %v7124_v23 }
  0xb8   : > { %5522 = vmatpush3.bf16.msra.mxu1 %v6184_v52  ;;  %v7425_v52 = vrot.slane %v3064_v49, 1  ;;  %v7429_v63 = vrot.slane %v8292_v14, 1  ;;  %v8389_v42 = vpack.c.bf16 %v7162_v43, %v7148_v5  ;;  %v7443_v44 = vrot.slane %v8291_v45, 1  ;;  %v7446_v49 = vld [vmem:[%s6369_s27 + $0x74] sm:$0x1] }
  0xb9   : > { %5523 = vmatprep.subr.bf16.mxu1 %v6188_v48  ;;  %v3580_v33 = vrot.slane %v8388_v13, 2  ;;  %v3548_v23 = vunpack.c.l.bf16 %v4870_v18  ;;  %v4871_v13 = vld [vmem:[%s6369_s27 + $0x30] sm:$0xe]  ;;  %v8394_v5 = vunpack.c.h.bf16 %v7208_v32  ;;  %v4873_v14 = vld [vmem:[%s6369_s27 + $0x48] sm:$0xe] }
  0xba   : > { %v3549_v43 = vunpack.c.l.bf16 %v4871_v13  ;;  %v6189_v18 = vld [vmem:[%s6369_s27 + $0x12c] sm:$0xff]  }
  0xbb   : > { %5492 = vmatmul.mubr.bf16.gmra.mrb[4].mxu1 %v8387_v46  ;;  %v8390_v46 = vunpack.c.l.bf16 %v7127_v56  ;;  %v6195_v56 = vld [vmem:[%s8210_s1 + $0xe0] sm:$0xff]   ;;  %v3590_v45 = vrot.slane %v8394_v5, 2 }
  0xbc   : > { %5700 = vmatmul.mubr.bf16.gmra.mrb[20].mxu0 %v6185_v36  ;;  %5495 = vmatprep.mubr.bf16.mxu1 %v8389_v42  ;;  %v3579_v36 = vrot.slane %v3547_v2, 2  ;;  %v8391_v42 = vunpack.c.h.bf16 %v7174_v47  ;;  %v4872_v2 = vld [vmem:[%s6369_s27 + $0x3c] sm:$0xe]  ;;  %v3589_v13 = vrot.slane %v3549_v43, 2  ;;  %v8401_v43 = vpack.c.bf16 %v7168_v7, %v7165_v10  ;;  %v7591_v10 = vld [vmem:[%s6369_s27 + $0x110] sm:$0x1] }
  0xbd   : > { %v3582_v21 = vrot.slane %v8390_v46, 2  ;;  %5703 = vmatprep.mubr.bf16.mxu0 %v6187_v27  ;;  %5524 = vmatpush3.bf16.msra.mxu1 %v6188_v48  ;;  %v3584_v27 = vrot.slane %v3548_v23, 2  ;;  %v8392_v46 = vunpack.c.l.bf16 %v7187_v22  ;;  %v3550_v5 = vunpack.c.l.bf16 %v4872_v2 }
  0xbe   : > { %v3585_v30 = vrot.slane %v8391_v42, 2  ;;  %5525 = vmatprep.subr.bf16.mxu1 %v6192_v3  ;;  %v7467_v42 = vsel %vm966_vm1, %v3579_v36, %v3580_v33  ;;  %v6191_v36 = vld [vmem:[%s6369_s27 + $0x138] sm:$0xff]  }
  0xbf   : > { %v7460_v48 = vsel %vm966_vm1, %v3580_v33, %v3582_v21  ;;  %v3587_v53 = vrot.slane %v8392_v46, 2  ;;  %8393 = vst [vmem:[#allocation24_spill] sm:$0xff] %v7467_v42  ;;  %v8397_v46 = vunpack.c.l.bf16 %v7211_v34  ;;  %v4874_v33 = vld [vmem:[%s6369_s27 + $0x54] sm:$0xe]  ;;  %v8398_v21 = vunpack.c.h.bf16 %v7241_v24 }
  0xc0   : > { %v7476_v23 = vsel %vm966_vm1, %v3584_v27, %v3585_v30  ;;  %v3551_v27 = vunpack.c.l.bf16 %v4873_v14  ;;  %v7503_v24 = vsel %vm966_vm1, %v3589_v13, %v3590_v45  ;;  %v3594_v2 = vrot.slane %v3550_v5, 2  ;;  %v4876_v13 = vld [vmem:[%s6369_s27 + $0x6c] sm:$0xe] }
  0xc1   : > { %8395 = vst [vmem:[#allocation25_spill] sm:$0xff] %v7476_v23  ;;  %v7479_v22 = vsel %vm966_vm1, %v3585_v30, %v3587_v53  ;;  %v3592_v47 = vrot.slane %v8397_v46, 2  ;;  %5526 = vmatpush3.bf16.msra.mxu1 %v6192_v3  ;;  %v3595_v42 = vrot.slane %v8398_v21, 2  ;;  %v6197_v53 = vld [vmem:[%s8210_s1 + $0xe8] sm:$0xff]   ;;  %v8399_v30 = vunpack.c.l.bf16 %v7244_v25 }
  0xc2   : > { %8396 = vst [vmem:[#allocation26_spill] sm:$0xff] %v7479_v22  ;;  %5527 = vmatprep.subr.bf16.mxu1 %v6195_v56  ;;  %v8400_v46 = vunpack.c.h.bf16 %v7253_v19  ;;  %v8402_v21 = vunpack.c.l.bf16 %v7262_v57  ;;  %v3552_v23 = vunpack.c.l.bf16 %v4874_v33  ;;  %v4875_v22 = vld [vmem:[%s6369_s27 + $0x60] sm:$0xe]  ;;  %v8403_v25 = vpack.c.bf16 %v7178_v31, %v7171_v41 }
  0xc3   : > { %v7493_v34 = vsel %vm966_vm1, %v3590_v45, %v3592_v47  ;;  %v3597_v3 = vrot.slane %v8399_v30, 2  ;;  %5496 = vmatmul.mubr.bf16.gmra.mrb[8].mxu1 %v8401_v43  ;;  %v3599_v19 = vrot.slane %v3551_v27, 2  ;;  %v8404_v14 = vunpack.c.h.bf16 %v7344_v58  ;;  %v6199_v58 = vld [vmem:[%s8210_s1 + $0xf0] sm:$0xff]   ;;  %v7541_v30 = vld [vmem:[%s6369_s27 + $0xf8] sm:$0x1] }
  0xc4   : > { %v3600_v32 = vrot.slane %v8400_v46, 2  ;;  %v3602_v47 = vrot.slane %v8402_v21, 2  ;;  %5704 = vmatmul.mubr.bf16.gmra.mrb[24].mxu0 %v6189_v18  ;;  %5499 = vmatprep.mubr.bf16.mxu1 %v8403_v25  ;;  %v7519_v45 = vsel %vm966_vm1, %v3594_v2, %v3595_v42  ;;  %v3604_v41 = vrot.slane %v3552_v23, 2  ;;  %v4877_v2 = vld [vmem:[%s6369_s27 + $0xf0] sm:$0xe]  ;;  %v7556_v21 = vld [vmem:[%s6369_s27 + $0xfc] sm:$0xff]  }
  0xc5   : > { %v7514_v7 = vsel %vm966_vm1, %v3595_v42, %v3597_v3  ;;  %v3605_v57 = vrot.slane %v8404_v14, 2  ;;  %5707 = vmatprep.mubr.bf16.mxu0 %v6191_v36  ;;  %5528 = vmatpush3.bf16.msra.mxu1 %v6195_v56  ;;  %v8405_v31 = vunpack.c.l.bf16 %v7347_v61  ;;  %v7531_v56 = vld [vmem:[%s6369_s27 + $0xf0] sm:$0xff]   ;;  %v3553_v23 = vunpack.c.l.bf16 %v4875_v22  ;;  %v6193_v22 = vld [vmem:[%s6369_s27 + $0x144] sm:$0xff]   ;;  %v4878_v42 = vld [vmem:[%s6369_s27 + $0xfc] sm:$0xe] }
  0xc6   : > { %v7522_v18 = vsel %vm966_vm1, %v3600_v32, %v3602_v47  ;;  %5529 = vmatprep.subr.bf16.mxu1 %v6197_v53  ;;  %v7536_v36 = vsel %vm966_vm1, %v3599_v19, %v3600_v32  ;;  %v8406_v61 = vunpack.c.h.bf16 %v7417_v12  ;;  %v8407_v43 = vunpack.c.l.bf16 %v7420_v29 }
  0xc7   : > { %v3607_v33 = vrot.slane %v8405_v31, 2  ;;  %v7546_v27 = vsel %vm966_vm1, %v3604_v41, %v3605_v57  ;;  %v3609_v25 = vrot.slane %v3553_v23, 2  ;;  %v3554_v19 = vunpack.c.l.bf16 %v4876_v13  ;;  %v7580_v13 = vld [vmem:[%s6369_s27 + $0x108] sm:$0xff]  }
  0xc8   : > { %v3610_v5 = vrot.slane %v8406_v61, 2  ;;  %v3612_v32 = vrot.slane %v8407_v43, 2  ;;  %v8408_v14 = vunpack.c.h.bf16 %v7432_v54  ;;  %v7568_v61 = vld [vmem:[%s6369_s27 + $0x104] sm:$0x1]  ;;  %v8411_v23 = vunpack.c.l.bf16 %v7446_v49 }
  0xc9   : > { %v7549_v46 = vsel %vm966_vm1, %v3605_v57, %v3607_v33  ;;  %5530 = vmatpush3.bf16.msra.mxu1 %v6197_v53  ;;  %v8409_v57 = vunpack.c.l.bf16 %v7383_v51  ;;  %v6201_v53 = vld [vmem:[%s8210_s1 + $0xf8] sm:$0xff]   ;;  %v3555_v3 = vunpack.c.l.bf16 %v4877_v2  ;;  %v8416_v2 = vld [vmem:[#allocation21_spill] sm:$0xff]  ;;  %v8419_v33 = vunpack.c.l.bf16 %v7541_v30 }
  0xca   : > { %v3615_v41 = vrot.slane %v8408_v14, 2  ;;  %v7571_v43 = vsel %vm966_vm1, %v3610_v5, %v3612_v32  ;;  %v3617_v47 = vrot.slane %v8411_v23, 2  ;;  %5531 = vmatprep.subr.bf16.mxu1 %v6199_v58  ;;  %v7583_v14 = vsel %vm966_vm1, %v3609_v25, %v3610_v5  ;;  %v8420_v23 = vld [vmem:[#allocation23_spill] sm:$0xff] }
  0xcb   : > { %v7564_v31 = vrot.slane %v8409_v57, 2  ;;  %8410 = vst [vmem:[#allocation27_spill] sm:$0xff] %v7571_v43  ;;  %8412 = vst [vmem:[#allocation28_spill] sm:$0xff] %v7583_v14  ;;  %v3614_v57 = vrot.slane %v3554_v19, 2  ;;  %v8413_v32 = vpack.c.bf16 %v7184_v16, %v7181_v38  ;;  %v8415_v5 = vunpack.c.h.bf16 %v7531_v56  ;;  %v8421_v14 = vld [vmem:[#allocation22_spill] sm:$0xff] }
  0xcc   : > { %v7596_v51 = vsel %vm966_vm1, %v3615_v41, %v3617_v47  ;;  %5708 = vmatmul.mubr.bf16.gmra.mrb[28].mxu0 %v6193_v22  ;;  %v8417_v19 = vpack.c.bf16 %v7204_v62, %v8416_v2  ;;  %v3622_v47 = vrot.slane %v8419_v33, 2  ;;  %v8422_v43 = vpack.c.bf16 %v8420_v23, %v8421_v14  ;;  %v8424_v2 = vld [vmem:[#allocation19_spill] sm:$0xff]  ;;  %v4879_v14 = vld [vmem:[%s6369_s27 + $0x108] sm:$0xe]  ;;  %v4880_v23 = vld [vmem:[%s6369_s27 + $0x114] sm:$0xe] }
  0xcd   : > { %5500 = vmatmul.mubr.bf16.gmra.mrb[12].mxu1 %v8413_v32  ;;  %8414 = vst [vmem:[#allocation29_spill] sm:$0xff] %v7596_v51  ;;  %v3620_v25 = vrot.slane %v8415_v5, 2  ;;  %v7605_v16 = vsel %vm966_vm1, %v3614_v57, %v3615_v41  ;;  %v3619_v32 = vrot.slane %v3555_v3, 2  ;;  %v8423_v5 = vld [vmem:[#allocation20_spill] sm:$0xff]  ;;  %v3556_v3 = vunpack.c.l.bf16 %v4878_v42  ;;  %v7634_v57 = vld [vmem:[%s6369_s27 + $0x114] sm:$0xff]  }
  0xce   : > { %5503 = vmatprep.mubr.bf16.mxu1 %v8417_v19  ;;  %8418 = vst [vmem:[#allocation21_spill] sm:$0xff] %v7605_v16  ;;  %5727 = vmatprep.mubr.bf16.mxu0 %v8422_v43  ;;  %v7618_v19 = vsel %vm354_vm0, %v8424_v2, %v8423_v5  ;;  %v7630_v43 = vsel %vm354_vm0, %v8423_v5, %v7331_v20  ;;  %v8429_v2 = vunpack.c.h.bf16 %v7556_v21  ;;  %v8432_v22 = vld [vmem:[#allocation4_spill] sm:$0xff]  ;;  %v5030_v38 = vunpack.c.l.bf16 %v7417_v12  ;;  %v7648_v16 = vld [vmem:[%s6369_s27 + $0x11c] sm:$0x1] }
  0xcf   : > { %5532 = vmatpush3.bf16.msra.mxu1 %v6199_v58  ;;  %8425 = vst [vmem:[#allocation23_spill] sm:$0xff] %v7618_v19  ;;  %v7622_v33 = vsel %vm966_vm1, %v3619_v32, %v3620_v25  ;;  %v7625_v58 = vsel %vm966_vm1, %v3620_v25, %v3622_v47  ;;  %8428 = vst [vmem:[#allocation19_spill] sm:$0xff] %v7630_v43  ;;  %v3624_v32 = vrot.slane %v3556_v3, 2  ;;  %v8430_v47 = vld [vmem:[#allocation3_spill] sm:$0xff]  ;;  %v8433_v20 = vunpack.c.l.bf16 %v8432_v22  ;;  %v6198_v19 = vld [vmem:[%s8210_s1 + $0x208] sm:$0xff]  }
  0xd0   : > { %5533 = vmatprep.subr.bf16.mxu1 %v6201_v53  ;;  %8426 = vst [vmem:[#allocation22_spill] sm:$0xff] %v7622_v33  ;;  %8427 = vst [vmem:[#allocation20_spill] sm:$0xff] %v7625_v58  ;;  %v3625_v25 = vrot.slane %v8429_v2, 2  ;;  %v8431_v62 = vunpack.c.h.bf16 %v8430_v47  ;;  %v8434_v51 = vunpack.c.l.bf16 %v7568_v61  ;;  %v933_v33 = vld [vmem:[%s6369_s27 + $0x12c] sm:$0xe]  ;;  %v3557_v2 = vunpack.c.l.bf16 %v4879_v14  ;;  %v7677_v14 = vld [vmem:[%s8210_s1 + $0x100] sm:$0xff]  }
  0xd1   : > { %v1040_v5 = vrot.slane %v8433_v20, 2  ;;  %v8435_v47 = vunpack.c.h.bf16 %v7580_v13  ;;  %v8436_v22 = vunpack.c.l.bf16 %v7591_v10 }
  0xd2   : > { %v1038_v41 = vrot.slane %v8431_v62, 2  ;;  %v3627_v42 = vrot.slane %v8434_v51, 2  ;;  %v7654_v3 = vsel %vm966_vm1, %v3624_v32, %v3625_v25  ;;  %v7667_v51 = vsel %vm354_vm0, %v7425_v52, %v7429_v63 }
  0xd3   : > { %5534 = vmatpush3.bf16.msra.mxu1 %v6201_v53  ;;  %v3630_v62 = vrot.slane %v8435_v47, 2  ;;  %v3632_v20 = vrot.slane %v8436_v22, 2  ;;  %v7672_v53 = vsel %vm354_vm0, %v7429_v63, %v7443_v44  ;;  %v8305_v32 = vunpack.c.h.bf16 %v7634_v57  ;;  %v7689_v44 = vld [vmem:[%s6369_s27 + $0x120] sm:$0xff]  }
  0xd4   : > { %5807 = vmatprep.subr.bf16.mxu1 %v7677_v14  ;;  %v7682_v47 = vsel %vm966_vm1, %v3625_v25, %v3627_v42  ;;  %v8437_v52 = vpack.c.bf16 %v7270_v39, %v7247_v55  ;;  %v8304_v63 = vunpack.c.l.bf16 %v7648_v16  ;;  %v3629_v43 = vrot.slane %v3557_v2, 2  ;;  %v7710_v2 = vld [vmem:[%s6369_s27 + $0x128] sm:$0x1] }
  0xd5   : > { %v7694_v58 = vsel %vm966_vm1, %v3630_v62, %v3632_v20  ;;  %v8438_v42 = vpack.c.bf16 %v7298_v8, %v7295_v6  ;;  %v8439_v39 = vpack.c.bf16 %v7323_v0, %v7320_v11  ;;  %v7704_v55 = vsel %vm966_vm1, %v7564_v31, %v1038_v41 }
  0xd6   : > { %5504 = vmatmul.mubr.bf16.gmra.mrb[16].mxu1 %v8437_v52  ;;  %v7707_v25 = vsel %vm966_vm1, %v1038_v41, %v1040_v5  ;;  %v949_v52 = vunpack.c.l.bf16 %v933_v33  ;;  %v3558_v20 = vunpack.c.l.bf16 %v4880_v23  ;;  %v8440_v6 = vpack.c.bf16 %v7338_v59, %v7335_v35  ;;  %v4881_v41 = vld [vmem:[%s6369_s27 + $0x120] sm:$0xe] }
  0xd7   : > { %5728 = vmatmul.mubr.bf16.vlgmr.msra.gmra.mrb[0].mxu0 %v8438_v42  ;;  %5507 = vmatprep.mubr.bf16.mxu1 %v8439_v39  ;;  %v3175_v8 = vrot.slane %v5030_v38, 1  ;;  %v7717_v11 = vsel %vm966_vm1, %v3629_v43, %v3630_v62  ;;  %v3635_v0 = vrot.slane %v8305_v32, 2  ;;  %v3637_v31 = vrot.slane %v8304_v63, 2  ;;  %v7738_v39 = vld [vmem:[%s6369_s27 + $0x12c] sm:$0xff]  }
  0xd8   : > { %5760 = vmatpush3.bf16.msra.mxu0 %v7277_v50  ;;  %5731 = vmatprep.mubr.bf16.mxu0 %v8440_v6  ;;  %v6200_v50 = vld [vmem:[%s8210_s1 + $0x210] sm:$0xff]   ;;  %v8441_v35 = vunpack.c.h.bf16 %v7417_v12  ;;  %v8307_v38 = vunpack.c.h.bf16 %v7689_v44  ;;  %v3634_v43 = vrot.slane %v3558_v20, 2  ;;  %v8442_v5 = vunpack.c.l.bf16 %v7420_v29 }
  0xd9   : > { %5761 = vmatprep.subr.bf16.mxu0 %v6198_v19  ;;  %v8306_v42 = vunpack.c.l.bf16 %v7710_v2  ;;  %v7741_v6 = vsel %vm966_vm1, %v3635_v0, %v3637_v31  ;;  %v3559_v33 = vunpack.c.l.bf16 %v4881_v41  ;;  %v1042_v22 = vrot.slane %v949_v52, 2  ;;  %v8444_v63 = vld [vmem:[#allocation5_spill] sm:$0xff]  ;;  %v7769_v52 = vld [vmem:[%s6369_s27 + $0x138] sm:$0xff]  }
  0xda   : > { %v3176_v59 = vrot.slane %v8441_v35, 1  ;;  %v3178_v62 = vrot.slane %v8442_v5, 1  ;;  %v7746_v35 = vld [vmem:[%s6369_s27 + $0x134] sm:$0x1]  ;;  %v7749_v20 = vsel %vm966_vm1, %v3634_v43, %v3635_v0  ;;  %v3640_v29 = vrot.slane %v8307_v38, 2 }
  0xdb   : > { %8443 = vst [vmem:[#allocation3_spill] sm:$0xff] %v7749_v20  ;;  %v4882_v5 = vld [vmem:[%s6369_s27 + $0x12c] sm:$0xe]  ;;  %v8445_v31 = vunpack.c.h.bf16 %v8444_v63  ;;  %v3642_v23 = vrot.slane %v8306_v42, 2  ;;  %v3070_v41 = vunpack.c.l.bf16 %v7432_v54  ;;  %v3639_v43 = vrot.slane %v3559_v33, 2 }
  0xdc   : > { %5762 = vmatpush3.bf16.msra.mxu0 %v6198_v19  ;;  %v3177_v0 = vsel %vm354_vm0, %v3175_v8, %v3176_v59  ;;  %v6202_v19 = vld [vmem:[%s8210_s1 + $0x218] sm:$0xff]   ;;  %v3179_v12 = vsel %vm354_vm0, %v3176_v59, %v3178_v62  ;;  %v7777_v42 = vld [vmem:[%s6369_s27 + $0x140] sm:$0x1]  ;;  %v3560_v20 = vunpack.c.l.bf16 %v4882_v5  ;;  %v8448_v63 = vpack.c.bf16 %v7366_v9, %v7363_v60 }
  0xdd   : > { %v7756_v32 = vrot.slane %v8445_v31, 2  ;;  %5763 = vmatprep.subr.bf16.mxu0 %v6200_v50  ;;  %v8446_v31 = vpack.c.bf16 %v7356_v15, %v7341_v40  ;;  %v7780_v38 = vsel %vm966_vm1, %v3640_v29, %v3642_v23  ;;  %v8449_v33 = vpack.c.bf16 %v7372_v28, %v7369_v4  ;;  %v8450_v40 = vld [vmem:[#allocation6_spill] sm:$0xff]  ;;  %v7802_v4 = vld [vmem:[%s6369_s27 + $0x144] sm:$0xff]  }
  0xde   : > { %8447 = vst [vmem:[#allocation4_spill] sm:$0xff] %v7780_v38  ;;  %v8451_v15 = vunpack.c.l.bf16 %v8450_v40  ;;  %v5034_v59 = vunpack.c.l.bf16 %v7531_v56  ;;  %v7792_v62 = vsel %vm966_vm1, %v3639_v43, %v3640_v29  ;;  %v8453_v23 = vunpack.c.h.bf16 %v7738_v39  ;;  %v4883_v8 = vld [vmem:[%s6369_s27 + $0x138] sm:$0xe] }
  0xdf   : > { %5508 = vmatmul.mubr.bf16.gmra.mrb[20].mxu1 %v8446_v31  ;;  %5732 = vmatmul.mubr.bf16.gmra.mrb[4].mxu0 %v8448_v63  ;;  %8452 = vst [vmem:[#allocation5_spill] sm:$0xff] %v7792_v62  ;;  %v8454_v60 = vpack.c.bf16 %v7378_v1, %v7375_v17  ;;  %v8310_v9 = vunpack.c.h.bf16 %v7769_v52  ;;  %v3644_v29 = vrot.slane %v3560_v20, 2  ;;  %v8455_v63 = vunpack.c.l.bf16 %v7746_v35  ;;  %v6205_v17 = vld [vmem:[%s8210_s1 + $0x220] sm:$0xff]  }
  0xe0   : > { %5511 = vmatprep.mubr.bf16.mxu1 %v8449_v33  ;;  %v1045_v31 = vrot.slane %v8451_v15, 2  ;;  %v3645_v5 = vrot.slane %v8453_v23, 2  ;;  %5764 = vmatpush3.bf16.msra.mxu0 %v6200_v50  ;;  %v3263_v33 = vpack.c.bf16 %v3179_v12, %v3177_v0  ;;  %v3180_v40 = vrot.slane %v3070_v41, 1  ;;  %v7815_v50 = vld [vmem:[%s6369_s27 + $0x14c] sm:$0x1] }
  0xe1   : > { %5735 = vmatprep.mubr.bf16.mxu0 %v8454_v60  ;;  %v3647_v43 = vrot.slane %v8455_v63, 2  ;;  %v8456_v15 = vunpack.c.h.bf16 %v7432_v54  ;;  %5765 = vmatprep.subr.bf16.mxu0 %v6202_v19  ;;  %v8312_v1 = vunpack.c.l.bf16 %v7777_v42  ;;  %v3561_v12 = vunpack.c.l.bf16 %v4883_v8  ;;  %v4884_v0 = vld [vmem:[%s6369_s27 + $0x144] sm:$0xe] }
  0xe2   : > { %v7818_v60 = vsel %vm966_vm1, %v3644_v29, %v3645_v5  ;;  %v3650_v54 = vrot.slane %v8310_v9, 2  ;;  %v8457_v41 = vunpack.c.l.bf16 %v7446_v49  ;;  %v3185_v62 = vrot.slane %v5034_v59, 1  ;;  %v6208_v49 = vld [vmem:[%s8210_s1 + $0x228] sm:$0xff]  }
  0xe3   : > { %v3181_v23 = vrot.slane %v8456_v15, 1  ;;  %v7821_v20 = vsel %vm966_vm1, %v3645_v5, %v3647_v43  ;;  %v3095_v15 = vunpack.c.h.bf16 %v7802_v4  ;;  %v3652_v29 = vrot.slane %v8312_v1, 2 }
  0xe4   : > { %v3183_v63 = vrot.slane %v8457_v41, 1  ;;  %5766 = vmatpush3.bf16.msra.mxu0 %v6202_v19  ;;  %v8458_v5 = vunpack.c.h.bf16 %v7531_v56  ;;  %v8459_v43 = vunpack.c.l.bf16 %v7541_v30  ;;  %v3649_v38 = vrot.slane %v3561_v12, 2 }
  0xe5   : > { %5767 = vmatprep.subr.bf16.mxu0 %v6205_v17  ;;  %v3096_v41 = vunpack.c.l.bf16 %v7815_v50  ;;  %v7842_v28 = vsel %vm966_vm1, %v3650_v54, %v3652_v29  ;;  %v3562_v1 = vunpack.c.l.bf16 %v4884_v0  ;;  %v3655_v19 = vrot.slane %v3095_v15, 2  ;;  %v6213_v50 = vld [vmem:[%s6369_s27 + $0x60] sm:$0xff]  }
  0xe6   : > { %v3186_v8 = vrot.slane %v8458_v5, 1  ;;  %v3188_v9 = vrot.slane %v8459_v43, 1  ;;  %v8460_v56 = vpack.c.bf16 %v7403_v26, %v7400_v37  ;;  %v1044_v30 = vsel %vm966_vm1, %v1042_v22, %v7756_v32 }
  0xe7   : > { %v7852_v59 = vsel %vm966_vm1, %v3649_v38, %v3650_v54  ;;  %v8461_v12 = vpack.c.bf16 %v7672_v53, %v7667_v51  ;;  %v8462_v0 = vpack.c.bf16 %v7707_v25, %v7704_v55  ;;  %v1046_v29 = vsel %vm966_vm1, %v7756_v32, %v1045_v31  ;;  %v6211_v31 = vld [vmem:[%s8210_s1 + $0x230] sm:$0xff]  }
  0xe8   : > { %5512 = vmatmul.mubr.bf16.gmra.mrb[24].mxu1 %v8460_v56  ;;  %v3705_v37 = vpack.c.bf16 %v7842_v28, %v7852_v59  ;;  %v3654_v26 = vrot.slane %v3562_v1, 2  ;;  %v3657_v22 = vrot.slane %v3096_v41, 2  ;;  %v3182_v38 = vsel %vm354_vm0, %v3180_v40, %v3181_v23  ;;  %5768 = vmatpush3.bf16.msra.mxu0 %v6205_v17  ;;  %v6203_v54 = vld [vmem:[%s6369_s27 + $0xc] sm:$0xff]  }
  0xe9   : > { %5736 = vmatmul.mubr.bf16.gmra.mrb[8].mxu0 %v8461_v12  ;;  %5515 = vmatprep.mubr.bf16.mxu1 %v8462_v0  ;;  %v3184_v51 = vsel %vm354_vm0, %v3181_v23, %v3183_v63  ;;  %v3076_v53 = vunpack.c.l.bf16 %v7556_v21  ;;  %v5038_v55 = vunpack.c.l.bf16 %v7580_v13  ;;  %v3187_v32 = vsel %vm354_vm0, %v3185_v62, %v3186_v8 }
  0xea   : > { %5739 = vmatprep.mubr.bf16.mxu0 %v3263_v33  ;;  %v3189_v25 = vsel %vm354_vm0, %v3186_v8, %v3188_v9  ;;  %5769 = vmatprep.subr.bf16.mxu0 %v6208_v49  ;;  %v7876_v33 = vsel %vm966_vm1, %v3654_v26, %v3655_v19  ;;  %v7879_v40 = vsel %vm966_vm1, %v3655_v19, %v3657_v22  ;;  %v8463_v9 = vunpack.c.h.bf16 %v7556_v21  ;;  %v6204_v22 = vld [vmem:[%s6369_s27 + $0x18] sm:$0xff]  }
  0xeb   : > { %v1094_v23 = vpack.c.bf16 %v1046_v29, %v1044_v30  ;;  %v3706_v17 = vpack.c.bf16 %v7879_v40, %v7876_v33  ;;  %v3264_v1 = vpack.c.bf16 %v3184_v51, %v3182_v38  ;;  %v3265_v62 = vpack.c.bf16 %v3189_v25, %v3187_v32  ;;  %v6214_v29 = vld [vmem:[%s8210_s1 + $0x238] sm:$0xff]   ;;  %v6206_v51 = vld [vmem:[%s6369_s27 + $0x24] sm:$0xff]  }
  0xec   : > { %v3190_v63 = vrot.slane %v3076_v53, 1  ;;  %v3191_v5 = vrot.slane %v8463_v9, 1  ;;  %v8464_v8 = vunpack.c.l.bf16 %v7568_v61  ;;  %5770 = vmatpush3.bf16.msra.mxu0 %v6208_v49  ;;  %v3195_v56 = vrot.slane %v5038_v55, 1 }
  0xed   : > { %v8465_v12 = vunpack.c.h.bf16 %v7580_v13  ;;  %v8466_v30 = vunpack.c.l.bf16 %v7591_v10  ;;  %5771 = vmatprep.subr.bf16.mxu0 %v6211_v31  ;;  %v3082_v13 = vunpack.c.l.bf16 %v7634_v57  ;;  %v5042_v26 = vunpack.c.l.bf16 %v7689_v44 }
  0xee   : > { %v3193_v43 = vrot.slane %v8464_v8, 1  ;;  %v3192_v21 = vsel %vm354_vm0, %v3190_v63, %v3191_v5  ;;  %v8467_v32 = vunpack.c.h.bf16 %v7634_v57  ;;  %v8470_v63 = vunpack.c.l.bf16 %v7710_v2 }
  0xef   : > { %v3196_v19 = vrot.slane %v8465_v12, 1  ;;  %v3198_v0 = vrot.slane %v8466_v30, 1  ;;  %v3200_v55 = vrot.slane %v3082_v13, 1  ;;  %v6209_v12 = vld [vmem:[%s6369_s27 + $0x3c] sm:$0xff]   ;;  %v6248_v30 = vld [vmem:[%s8210_s1 + $0x110] sm:$0xff]  }
  0xf0   : > { %5516 = vmatmul.mubr.bf16.gmra.mrb[28].mxu1 %v1094_v23  ;;  %v3194_v61 = vsel %vm354_vm0, %v3191_v5, %v3193_v43  ;;  %5772 = vmatpush3.bf16.msra.mxu0 %v6211_v31  ;;  %v3201_v25 = vrot.slane %v8467_v32, 1  ;;  %v8468_v23 = vunpack.c.l.bf16 %v7648_v16  ;;  %v3205_v31 = vrot.slane %v5042_v26, 1 }
  0xf1   : > { %5740 = vmatmul.mubr.bf16.gmra.mrb[12].mxu0 %v3264_v1  ;;  %5535 = vmatprep.mubr.bf16.mxu1 %v6203_v54  ;;  %v3197_v10 = vsel %vm354_vm0, %v3195_v56, %v3196_v19  ;;  %v3199_v49 = vsel %vm354_vm0, %v3196_v19, %v3198_v0  ;;  %v3266_v38 = vpack.c.bf16 %v3194_v61, %v3192_v21  ;;  %v8469_v54 = vunpack.c.h.bf16 %v7689_v44  ;;  %v6247_v44 = vld [vmem:[%s8210_s1 + $0x108] sm:$0xff]  }
  0xf2   : > { %5743 = vmatprep.mubr.bf16.mxu0 %v3265_v62  ;;  %5773 = vmatprep.subr.bf16.mxu0 %v6214_v29  ;;  %v3267_v53 = vpack.c.bf16 %v3199_v49, %v3197_v10  ;;  %v3203_v1 = vrot.slane %v8468_v23, 1  ;;  %v3208_v9 = vrot.slane %v8470_v63, 1  ;;  %v3202_v57 = vsel %vm354_vm0, %v3200_v55, %v3201_v25  ;;  %v6210_v55 = vld [vmem:[%s6369_s27 + $0x48] sm:$0xff]  }
  0xf3   : > { %v3206_v62 = vrot.slane %v8469_v54, 1  ;;  %v3088_v5 = vunpack.c.l.bf16 %v7738_v39  ;;  %v5046_v43 = vunpack.c.l.bf16 %v7769_v52  ;;  %v8472_v61 = vunpack.c.l.bf16 %v7746_v35 }
  0xf4   : > { %5774 = vmatpush3.bf16.msra.mxu0 %v6214_v29  ;;  %v3204_v16 = vsel %vm354_vm0, %v3201_v25, %v3203_v1  ;;  %v8471_v29 = vunpack.c.h.bf16 %v7738_v39  ;;  %v8473_v49 = vunpack.c.h.bf16 %v7769_v52  ;;  %v3094_v35 = vunpack.c.l.bf16 %v7802_v4  ;;  %v6212_v25 = vld [vmem:[%s6369_s27 + $0x54] sm:$0xff]   ;;  %v6251_v4 = vld [vmem:[%s8210_s1 + $0x128] sm:$0xff]  }
  0xf5   : > { %v3207_v2 = vsel %vm354_vm0, %v3205_v31, %v3206_v62  ;;  %v3209_v8 = vsel %vm354_vm0, %v3206_v62, %v3208_v9  ;;  %v3268_v56 = vpack.c.bf16 %v3204_v16, %v3202_v57  ;;  %v3210_v0 = vrot.slane %v3088_v5, 1  ;;  %v6250_v62 = vld [vmem:[%s8210_s1 + $0x120] sm:$0xff]   ;;  %v6252_v57 = vld [vmem:[%s8210_s1 + $0x130] sm:$0xff]   ;;  %v8475_v16 = vld [vmem:[#allocation24_spill] sm:$0xff] }
  0xf6   : > { %v3269_v19 = vpack.c.bf16 %v3209_v8, %v3207_v2  ;;  %v3211_v21 = vrot.slane %v8471_v29, 1  ;;  %v3213_v13 = vrot.slane %v8472_v61, 1  ;;  %v3215_v10 = vrot.slane %v5046_v43, 1  ;;  %v6216_v2 = vld [vmem:[%s6369_s27 + $0xf0] sm:$0xff]   ;;  %v6217_v8 = vld [vmem:[%s6369_s27 + $0xfc] sm:$0xff]  }
  0xf7   : > { %v3216_v26 = vrot.slane %v8473_v49, 1  ;;  %v3220_v1 = vrot.slane %v3094_v35, 1  ;;  %v3221_v31 = vrot.slane %v3095_v15, 1  ;;  %v3223_v54 = vrot.slane %v3096_v41, 1  ;;  %v6215_v41 = vld [vmem:[%s6369_s27 + $0xe4] sm:$0xff]   ;;  %v8477_v43 = vld [vmem:[#allocation26_spill] sm:$0xff] }
  0xf8   : > { %5536 = vmatmul.mubr.bf16.vlgmr.msra.gmra.mrb[0].mxu1 %v6204_v22  ;;  %v8474_v22 = vunpack.c.l.bf16 %v7777_v42  ;;  %v3214_v39 = vsel %vm354_vm0, %v3211_v21, %v3213_v13  ;;  %v6249_v42 = vld [vmem:[%s8210_s1 + $0x118] sm:$0xff]   ;;  %v8476_v5 = vpack.c.bf16 %v7460_v48, %v8475_v16  ;;  %v8480_v48 = vpack.c.bf16 %v7493_v34, %v7503_v24  ;;  %v6220_v61 = vld [vmem:[%s6369_s27 + $0x120] sm:$0xff]   ;;  %v6221_v13 = vld [vmem:[%s6369_s27 + $0x12c] sm:$0xff]  }
  0xf9   : > { %5744 = vmatmul.mubr.bf16.gmra.mrb[16].mxu0 %v3266_v38  ;;  %5815 = vmatpush3.bf16.msra.mxu1 %v7677_v14  ;;  %v6207_v14 = vld [vmem:[%s6369_s27 + $0x30] sm:$0xff]   ;;  %v3222_v63 = vsel %vm354_vm0, %v3220_v1, %v3221_v31  ;;  %v3224_v9 = vsel %vm354_vm0, %v3221_v31, %v3223_v54  ;;  %v8482_v29 = vpack.c.bf16 %v7522_v18, %v7536_v36  ;;  %v8483_v24 = vld [vmem:[#allocation7_spill] sm:$0xff]  ;;  %v8489_v18 = vld [vmem:[#allocation28_spill] sm:$0xff] }
  0xfa   : > { %5539 = vmatprep.mubr.bf16.mxu1 %v6206_v51  ;;  %5747 = vmatprep.mubr.bf16.mxu0 %v3267_v53  ;;  %v3218_v38 = vrot.slane %v8474_v22, 1  ;;  %v3212_v51 = vsel %vm354_vm0, %v3210_v0, %v3211_v21  ;;  %v3217_v53 = vsel %vm354_vm0, %v3215_v10, %v3216_v26  ;;  %v3272_v15 = vpack.c.bf16 %v3224_v9, %v3222_v63  ;;  %v8494_v1 = vld [vmem:[#allocation29_spill] sm:$0xff]  ;;  %v8497_v9 = vld [vmem:[#allocation20_spill] sm:$0xff] }
  0xfb   : > { %5808 = vmatprep.subr.bf16.mxu1 %v6247_v44  ;;  %v3270_v32 = vpack.c.bf16 %v3214_v39, %v3212_v51  ;;  %v8481_v0 = vpack.c.bf16 %v7514_v7, %v7519_v45  ;;  %v8484_v10 = vunpack.c.l.bf16 %v8483_v24  ;;  %v8487_v7 = vpack.c.bf16 %v7549_v46, %v7546_v27  ;;  %v8488_v45 = vld [vmem:[#allocation27_spill] sm:$0xff]  ;;  %v8495_v31 = vld [vmem:[#allocation21_spill] sm:$0xff] }
  0xfc   : > { %v3219_v52 = vsel %vm354_vm0, %v3216_v26, %v3218_v38  ;;  %v8485_v26 = vld [vmem:[#allocation8_spill] sm:$0xff]  ;;  %v8490_v36 = vpack.c.bf16 %v8488_v45, %v8489_v18  ;;  %v8496_v54 = vpack.c.bf16 %v8494_v1, %v8495_v31 }
  0xfd   : > { %5816 = vmatpush3.bf16.msra.mxu1 %v6247_v44  ;;  %v3271_v23 = vpack.c.bf16 %v3219_v52, %v3217_v53  ;;  %v6253_v44 = vld [vmem:[%s8210_s1 + $0x138] sm:$0xff]   ;;  %v1880_v49 = vrot.slane %v8484_v10, 1  ;;  %v8486_v22 = vunpack.c.l.bf16 %v8485_v26  ;;  %v6255_v26 = vld [vmem:[%s6369_s27 + $0x120] sm:$0xff]  }
  0xfe   : > { %5809 = vmatprep.subr.bf16.mxu1 %v6248_v30  ;;  %v6222_v53 = vld [vmem:[%s6369_s27 + $0x138] sm:$0xff]  }
  0xff   : > { %v1882_v38 = vrot.slane %v8486_v22, 1  ;;  %v5010_v22 = vunpack.c.l.bf16 %v6255_v26 }
 0x100   : > { %5540 = vmatmul.mubr.bf16.gmra.mrb[4].mxu1 %v6207_v14  ;;  %v8478_v14 = vld [vmem:[#allocation25_spill] sm:$0xff] }
 0x101   : > { %5748 = vmatmul.mubr.bf16.gmra.mrb[20].mxu0 %v3268_v56  ;;  %5543 = vmatprep.mubr.bf16.mxu1 %v6209_v12  ;;  %v8479_v56 = vpack.c.bf16 %v8477_v43, %v8478_v14  ;;  %v6218_v12 = vld [vmem:[%s6369_s27 + $0x108] sm:$0xff]   ;;  %v1883_v39 = vsel %vm354_vm0, %v1880_v49, %v1882_v38  ;;  %v8502_v43 = vld [vmem:[#allocation10_spill] sm:$0xff]  ;;  %v8512_v38 = vpack.c.bf16 %v7694_v58, %v7717_v11 }
 0x102   : > { %5751 = vmatprep.mubr.bf16.mxu0 %v3269_v19  ;;  %5817 = vmatpush3.bf16.msra.mxu1 %v6248_v30  ;;  %v6219_v19 = vld [vmem:[%s6369_s27 + $0x114] sm:$0xff]   ;;  %v4635_v30 = vld [vmem:[%s6369_s27 + $0xe4] ss:$24 sps:$4 sm:$0xff]   ;;  %v8503_v14 = vunpack.c.l.bf16 %v8502_v43  ;;  %v8518_v11 = vld [vmem:[#allocation16_spill] sm:$0xff] }
 0x103   : > { %5810 = vmatprep.subr.bf16.mxu1 %v6249_v42  ;;  %v1767_v21 = vunpack.c.l.bf16 %v4635_v30  ;;  %v1773_v35 = vunpack.c.h.bf16 %v4635_v30 }
 0x105   : > { %v1879_v34 = vrot.slane %v1767_v21, 1 }
 0x106   : > { %5818 = vmatpush3.bf16.msra.mxu1 %v6249_v42  ;;  %v1889_v42 = vrot.slane %v1773_v35, 1 }
 0x107   : > { %5811 = vmatprep.subr.bf16.mxu1 %v6250_v62  ;;  %v1881_v51 = vsel %vm354_vm0, %v1879_v34, %v1880_v49 }
 0x108   : > { %5544 = vmatmul.mubr.bf16.gmra.mrb[8].mxu1 %v6210_v55  ;;  %v1959_v52 = vpack.c.bf16 %v1883_v39, %v1881_v51  ;;  %v8491_v55 = vunpack.c.h.bf16 %v8483_v24  ;;  %v8511_v24 = vpack.c.bf16 %v7682_v47, %v7654_v3  ;;  %v1904_v47 = vrot.slane %v5010_v22, 1  ;;  %v8513_v51 = vld [vmem:[#allocation14_spill] sm:$0xff]  ;;  %v8087_v22 = vld [vmem:[%s8212_s3] ss:$0 sm:$0xff] }
 0x109   : > { %5752 = vmatmul.mubr.bf16.gmra.mrb[24].mxu0 %v3270_v32  ;;  %5547 = vmatprep.mubr.bf16.mxu1 %v6212_v25  ;;  %v8492_v25 = vld [vmem:[#allocation9_spill] sm:$0xff]  ;;  %v8514_v39 = vunpack.c.h.bf16 %v8513_v51 }
 0x10a   : > { %5755 = vmatprep.mubr.bf16.mxu0 %v3271_v23  ;;  %5819 = vmatpush3.bf16.msra.mxu1 %v6250_v62  ;;  %v1890_v32 = vrot.slane %v8491_v55, 1  ;;  %v8493_v27 = vunpack.c.l.bf16 %v8492_v25  ;;  %v4647_v23 = vld [vmem:[%s6369_s27 + $0x114] ss:$24 sps:$4 sm:$0xff]   ;;  %v8519_v25 = vunpack.c.l.bf16 %v8518_v11 }
 0x10b   : > { %5812 = vmatprep.subr.bf16.mxu1 %v6251_v4  ;;  %v6254_v62 = vld [vmem:[%s6369_s27 + $0x108] sm:$0xff]   ;;  %v1785_v18 = vunpack.c.h.bf16 %v4647_v23  ;;  %v1905_v35 = vrot.slane %v8514_v39, 1 }
 0x10c   : > { %v1892_v46 = vrot.slane %v8493_v27, 1  ;;  %v5006_v63 = vunpack.c.l.bf16 %v6254_v62  ;;  %v1912_v27 = vrot.slane %v8519_v25, 1 }
 0x10d   : > { %v1909_v55 = vrot.slane %v1785_v18, 1  ;;  %v1906_v1 = vsel %vm354_vm0, %v1904_v47, %v1905_v35 }
 0x10e   : > { %5820 = vmatpush3.bf16.msra.mxu1 %v6251_v4  ;;  %v8498_v4 = vld [vmem:[#allocation22_spill] sm:$0xff] }
 0x10f   : > { %5813 = vmatprep.subr.bf16.mxu1 %v6252_v57 }
 0x110   : > { %5548 = vmatmul.mubr.bf16.gmra.mrb[12].mxu1 %v6213_v50  ;;  %v8499_v50 = vpack.c.bf16 %v8497_v9, %v8498_v4  ;;  %v8523_v9 = vld [vmem:[#allocation5_spill] sm:$0xff] }
 0x111   : > { %5756 = vmatmul.mubr.bf16.gmra.mrb[28].mxu0 %v3272_v15  ;;  %5551 = vmatprep.mubr.bf16.mxu1 %v6215_v41  ;;  %v1891_v15 = vsel %vm354_vm0, %v1889_v42, %v1890_v32  ;;  %v1893_v41 = vsel %vm354_vm0, %v1890_v32, %v1892_v46  ;;  %v8520_v46 = vld [vmem:[#allocation3_spill] sm:$0xff] }
 0x112   : > { %5775 = vmatprep.mubr.bf16.mxu0 %v8476_v5  ;;  %5821 = vmatpush3.bf16.msra.mxu1 %v6252_v57  ;;  %v1779_v57 = vunpack.c.l.bf16 %v4647_v23  ;;  %v1961_v16 = vpack.c.bf16 %v1893_v41, %v1891_v15  ;;  %v1894_v5 = vrot.slane %v5006_v63, 1  ;;  %v8521_v23 = vpack.c.bf16 %v7741_v6, %v8520_v46  ;;  %v8522_v63 = vld [vmem:[#allocation4_spill] sm:$0xff]  ;;  %v8525_v6 = vld [vmem:[#allocation17_spill] sm:$0xff] }
 0x113   : > { %5814 = vmatprep.subr.bf16.mxu1 %v6253_v44  ;;  %v8524_v4 = vpack.c.bf16 %v8522_v63, %v8523_v9 }
 0x116   : > { %5822 = vmatpush3.bf16.msra.mxu1 %v6253_v44  ;;  %v8500_v44 = vld [vmem:[#allocation11_spill] sm:$0xff] }
 0x118   : > { %5552 = vmatmul.mubr.bf16.gmra.mrb[16].mxu1 %v6216_v2  ;;  %v8501_v2 = vunpack.c.h.bf16 %v8500_v44 }
 0x119   : > { %5776 = vmatmul.mubr.bf16.vlgmr.msra.gmra.mrb[0].mxu0 %v8479_v56  ;;  %5555 = vmatprep.mubr.bf16.mxu1 %v6217_v8  ;;  %v1897_v56 = vrot.slane %v8503_v14, 1  ;;  %v8529_v14 = vpack.c.bf16 %v7821_v20, %v7818_v60 }
 0x11a   : > { %5779 = vmatprep.mubr.bf16.mxu0 %v8480_v48  ;;  %v1895_v8 = vrot.slane %v8501_v2, 1  ;;  %v1899_v48 = vrot.slane %v1779_v57, 1  ;;  %v8527_v2 = vld [vmem:[#allocation18_spill] sm:$0xff] }
 0x11c   : > { %v1896_v10 = vsel %vm354_vm0, %v1894_v5, %v1895_v8  ;;  %v1898_v49 = vsel %vm354_vm0, %v1895_v8, %v1897_v56  ;;  %v8526_v5 = vunpack.c.h.bf16 %v8525_v6  ;;  %v8528_v8 = vunpack.c.l.bf16 %v8527_v2 }
 0x11e   : > { %v1915_v44 = vrot.slane %v8526_v5, 1  ;;  %v1917_v43 = vrot.slane %v8528_v8, 1 }
 0x120   : > { %5556 = vmatmul.mubr.bf16.gmra.mrb[20].mxu1 %v6218_v12  ;;  %v8504_v12 = vld [vmem:[#allocation12_spill] sm:$0xff] }
 0x121   : > { %5780 = vmatmul.mubr.bf16.gmra.mrb[4].mxu0 %v8481_v0  ;;  %5559 = vmatprep.mubr.bf16.mxu1 %v6219_v19  ;;  %v8505_v19 = vunpack.c.l.bf16 %v8504_v12  ;;  %v8506_v0 = vld [vmem:[#allocation13_spill] sm:$0xff]  ;;  %v8517_v32 = vunpack.c.h.bf16 %v8504_v12 }
 0x122   : > { %5783 = vmatprep.mubr.bf16.mxu0 %v8482_v29  ;;  %v8507_v29 = vunpack.c.l.bf16 %v8506_v0 }
 0x123   : > { %v1900_v30 = vrot.slane %v8505_v19, 1  ;;  %v1910_v58 = vrot.slane %v8517_v32, 1 }
 0x124   : > { %v1902_v21 = vrot.slane %v8507_v29, 1 }
 0x125   : > { %v1913_v15 = vsel %vm354_vm0, %v1910_v58, %v1912_v27 }
 0x126   : > { %v1903_v45 = vsel %vm354_vm0, %v1900_v30, %v1902_v21 }
 0x128   : > { %5560 = vmatmul.mubr.bf16.gmra.mrb[24].mxu1 %v6220_v61  ;;  %v8508_v61 = vld [vmem:[#allocation19_spill] sm:$0xff] }
 0x129   : > { %5784 = vmatmul.mubr.bf16.gmra.mrb[8].mxu0 %v8487_v7  ;;  %5563 = vmatprep.mubr.bf16.mxu1 %v6221_v13  ;;  %v8509_v13 = vld [vmem:[#allocation23_spill] sm:$0xff]  ;;  %v1901_v7 = vsel %vm354_vm0, %v1899_v48, %v1900_v30  ;;  %v1918_v48 = vsel %vm354_vm0, %v1915_v44, %v1917_v43 }
 0x12a   : > { %5787 = vmatprep.mubr.bf16.mxu0 %v8490_v36  ;;  %v8510_v34 = vpack.c.bf16 %v8508_v61, %v8509_v13  ;;  %v1962_v36 = vpack.c.bf16 %v1898_v49, %v1896_v10  ;;  %v1963_v3 = vpack.c.bf16 %v1903_v45, %v1901_v7 }
 0x130   : > { %5564 = vmatmul.mubr.bf16.gmra.mrb[28].mxu1 %v6222_v53  ;;  %v8515_v53 = vld [vmem:[#allocation15_spill] sm:$0xff] }
 0x131   : > { %5788 = vmatmul.mubr.bf16.gmra.mrb[12].mxu0 %v8496_v54  ;;  %5599 = vmatprep.mubr.bf16.mxu1 %v1959_v52  ;;  %v8516_v52 = vunpack.c.l.bf16 %v8515_v53  ;;  %v6256_v54 = vld [vmem:[%s6369_s27 + $0x138] sm:$0xff]  }
 0x132   : > { %5791 = vmatprep.mubr.bf16.mxu0 %v8499_v50  ;;  %v5014_v62 = vunpack.c.l.bf16 %v6256_v54  ;;  %v1911_v50 = vsel %vm354_vm0, %v1909_v55, %v1910_v58 }
 0x133   : > { %v1907_v42 = vrot.slane %v8516_v52, 1  ;;  %v1965_v57 = vpack.c.bf16 %v1913_v15, %v1911_v50 }
 0x135   : > { %v1908_v31 = vsel %vm354_vm0, %v1905_v35, %v1907_v42 }
 0x136   : > { %v1964_v41 = vpack.c.bf16 %v1908_v31, %v1906_v1 }
 0x138   : > { %5600 = vmatmul.mubr.bf16.vlgmr.msra.gmra.mrb[16].mxu1 %v8510_v34 }
 0x139   : > { %5792 = vmatmul.mubr.bf16.gmra.mrb[16].mxu0 %v8511_v24  ;;  %5603 = vmatprep.mubr.bf16.mxu1 %v1961_v16  ;;  %v1914_v16 = vrot.slane %v5014_v62, 1 }
 0x13a   : > { %5795 = vmatprep.mubr.bf16.mxu0 %v8512_v38 }
 0x13b   : > { %v1916_v56 = vsel %vm354_vm0, %v1914_v16, %v1915_v44 }
 0x13c   : > { %v1966_v12 = vpack.c.bf16 %v1918_v48, %v1916_v56 }
 0x140   : > { %5604 = vmatmul.mubr.bf16.gmra.mrb[20].mxu1 %v1962_v36 }
 0x141   : > { %5796 = vmatmul.mubr.bf16.gmra.mrb[20].mxu0 %v8521_v23  ;;  %5607 = vmatprep.mubr.bf16.mxu1 %v1963_v3 }
 0x142   : > { %5799 = vmatprep.mubr.bf16.mxu0 %v8524_v4 }
 0x148   : > { %5608 = vmatmul.mubr.bf16.gmra.mrb[24].mxu1 %v1964_v41 }
 0x149   : > { %5800 = vmatmul.mubr.bf16.gmra.mrb[24].mxu0 %v8529_v14  ;;  %5611 = vmatprep.mubr.bf16.mxu1 %v1965_v57 }
 0x14a   : > { %5803 = vmatprep.mubr.bf16.mxu0 %v3705_v37 }
 0x150   : > { %5612 = vmatmul.mubr.bf16.gmra.mrb[28].mxu1 %v1966_v12 }
 0x151   : > { %5804 = vmatmul.mubr.bf16.gmra.mrb[28].mxu0 %v3706_v17  ;;  %v8082_v17 = vld [vmem:[%s8211_s2] ss:$0 sm:$0xff] }
 0x1cb   : > { %v5537_v19 = vpop.f32.mrb[0].mxu1 }
 0x1cc   : > { %v1536_v30 = vpop.f32.mrb[1].mxu1 }
 0x1cd   : > { %v5538_v0 = vpop.f32.mrb[2].mxu1 }
 0x1ce   : > { %v1539_v60 = vpop.f32.mrb[3].mxu1 }
 0x1d3   : > { %v5541_v20 = vpop.f32.mrb[4].mxu1 }
 0x1d4   : > { %v1552_v29 = vpop.f32.mrb[5].mxu1 }
 0x1d5   : > { %v5542_v21 = vpop.f32.mrb[6].mxu1 }
 0x1d6   : > { %v1555_v61 = vpop.f32.mrb[7].mxu1 }
 0x1db   : > { %v5545_v13 = vpop.f32.mrb[8].mxu1 }
 0x1dc   : > { %v1568_v34 = vpop.f32.mrb[9].mxu1 }
 0x1dd   : > { %v5546_v24 = vpop.f32.mrb[10].mxu1 }
 0x1de   : > { %v8069_v10 = vpop.f32.mrb[11].mxu1 }
 0x1e3   : > { %v8071_v28 = vpop.f32.mrb[12].mxu1 }
 0x1e4   : > { %v8073_v59 = vpop.f32.mrb[13].mxu1 }
 0x1e5   : > { %v8075_v37 = vpop.f32.mrb[14].mxu1 }
 0x1e6   : > { %v8077_v33 = vpop.f32.mrb[15].mxu1 }
 0x1ec   : > { %v5777_v40 = vpop.f32.mrb[0].mxu0 }
 0x1ed   : > { %v5823_v49 = vadd.f32 %v5777_v40, %v5537_v19  ;;  %v3806_v26 = vpop.f32.mrb[1].mxu0 }
 0x1ee   : > { %v5824_v38 = vadd.f32 %v3806_v26, %v1536_v30  ;;  %v5778_v7 = vpop.f32.mrb[2].mxu0 }
 0x1ef   : > { %v3974_v45 = vmul.f32 %v5823_v49, %v8082_v17  ;;  %v5825_v18 = vadd.f32 %v5778_v7, %v5538_v0  ;;  %v3809_v36 = vpop.f32.mrb[3].mxu0 }
 0x1f0   : > { %v3972_v3 = vmul.f32 %v5824_v38, %v8082_v17  ;;  %v5826_v47 = vadd.f32 %v3809_v36, %v1539_v60 }
 0x1f1   : > { %v4013_v51 = vadd.f32 %v8087_v22, %v3974_v45  ;;  %v3975_v39 = vmul.f32 %v5825_v18, %v8082_v17 }
 0x1f2   : > { %v4011_v35 = vadd.f32 %v8087_v22, %v3972_v3  ;;  %v3973_v53 = vmul.f32 %v5826_v47, %v8082_v17 }
 0x1f3   : > { %v4014_v52 = vadd.f32 %v8087_v22, %v3975_v39  ;;  %v4045_v32 = vmax.f32 %v4013_v51, 0.0 }
 0x1f4   : > { %v4012_v42 = vadd.f32 %v8087_v22, %v3973_v53  ;;  %v5781_v55 = vpop.f32.mrb[4].mxu0  ;;  %v4043_v27 = vmax.f32 %v4011_v35, 0.0 }
 0x1f5   : > { %v4046_v58 = vmax.f32 %v4014_v52, 0.0  ;;  %v5827_v11 = vadd.f32 %v5781_v55, %v5541_v20  ;;  %v3822_v25 = vpop.f32.mrb[5].mxu0 }
 0x1f6   : > { %v4044_v46 = vmax.f32 %v4012_v42, 0.0  ;;  %v5828_v23 = vadd.f32 %v3822_v25, %v1552_v29  ;;  %v5782_v1 = vpop.f32.mrb[6].mxu0 }
 0x1f7   : > { %v5056_v31 = vpack.c.bf16 %v4046_v58, %v4045_v32  ;;  %v3978_v54 = vmul.f32 %v5827_v11, %v8082_v17  ;;  %v5829_v62 = vadd.f32 %v5782_v1, %v5542_v21  ;;  %v3825_v63 = vpop.f32.mrb[7].mxu0 }
 0x1f8   : > { %v5051_v9 = vpack.c.bf16 %v4044_v46, %v4043_v27  ;;  %v3976_v4 = vmul.f32 %v5828_v23, %v8082_v17  ;;  %v5830_v50 = vadd.f32 %v3825_v63, %v1555_v61 }
 0x1f9   : > { %5144 = vst [vmem:[%s8100_s15 + $0x8] sm:$0xff] %v5056_v31   ;;  %v4017_v15 = vadd.f32 %v8087_v22, %v3978_v54  ;;  %v3979_v41 = vmul.f32 %v5829_v62, %v8082_v17 }
 0x1fa   : > { %5052 = vst [vmem:[%s8100_s15] sm:$0xff] %v5051_v9   ;;  %v4015_v57 = vadd.f32 %v8087_v22, %v3976_v4  ;;  %v3977_v16 = vmul.f32 %v5830_v50, %v8082_v17 }
 0x1fb   : > { %v4018_v6 = vadd.f32 %v8087_v22, %v3979_v41  ;;  %v4049_v2 = vmax.f32 %v4017_v15, 0.0 }
 0x1fc   : > { %v4016_v5 = vadd.f32 %v8087_v22, %v3977_v16  ;;  %v5785_v44 = vpop.f32.mrb[8].mxu0  ;;  %v4047_v56 = vmax.f32 %v4015_v57, 0.0 }
 0x1fd   : > { %v4050_v8 = vmax.f32 %v4018_v6, 0.0  ;;  %v5831_v43 = vadd.f32 %v5785_v44, %v5545_v13  ;;  %v3838_v14 = vpop.f32.mrb[9].mxu0 }
 0x1fe   : > { %v4048_v48 = vmax.f32 %v4016_v5, 0.0  ;;  %v5832_v12 = vadd.f32 %v3838_v14, %v1568_v34  ;;  %v5786_v19 = vpop.f32.mrb[10].mxu0 }
 0x1ff   : > { %v5066_v30 = vpack.c.bf16 %v4050_v8, %v4049_v2  ;;  %v3982_v0 = vmul.f32 %v5831_v43, %v8082_v17  ;;  %v5833_v60 = vadd.f32 %v5786_v19, %v5546_v24  ;;  %v3841_v20 = vpop.f32.mrb[11].mxu0 }
 0x200   : > { %v5061_v29 = vpack.c.bf16 %v4048_v48, %v4047_v56  ;;  %v3980_v21 = vmul.f32 %v5832_v12, %v8082_v17  ;;  %v5834_v61 = vadd.f32 %v3841_v20, %v8069_v10 }
 0x201   : > { %5146 = vst [vmem:[%s8100_s15 + $0x18] sm:$0xff] %v5066_v30   ;;  %v4021_v40 = vadd.f32 %v8087_v22, %v3982_v0  ;;  %v3983_v13 = vmul.f32 %v5833_v60, %v8082_v17 }
 0x202   : > { %5145 = vst [vmem:[%s8100_s15 + $0x10] sm:$0xff] %v5061_v29   ;;  %v4019_v49 = vadd.f32 %v8087_v22, %v3980_v21  ;;  %v3981_v34 = vmul.f32 %v5834_v61, %v8082_v17 }
 0x203   : > { %v4022_v26 = vadd.f32 %v8087_v22, %v3983_v13  ;;  %v4053_v7 = vmax.f32 %v4021_v40, 0.0 }
 0x204   : > { %v4020_v24 = vadd.f32 %v8087_v22, %v3981_v34  ;;  %v5789_v38 = vpop.f32.mrb[12].mxu0  ;;  %v4051_v36 = vmax.f32 %v4019_v49, 0.0 }
 0x205   : > { %v4054_v45 = vmax.f32 %v4022_v26, 0.0  ;;  %v5835_v10 = vadd.f32 %v5789_v38, %v8071_v28  ;;  %v3854_v18 = vpop.f32.mrb[13].mxu0 }
 0x206   : > { %v4052_v3 = vmax.f32 %v4020_v24, 0.0  ;;  %v5836_v47 = vadd.f32 %v3854_v18, %v8073_v59  ;;  %v5790_v51 = vpop.f32.mrb[14].mxu0 }
 0x207   : > { %v5076_v39 = vpack.c.bf16 %v4054_v45, %v4053_v7  ;;  %v3986_v35 = vmul.f32 %v5835_v10, %v8082_v17  ;;  %v5837_v53 = vadd.f32 %v5790_v51, %v8075_v37  ;;  %v3857_v52 = vpop.f32.mrb[15].mxu0 }
 0x208   : > { %v5071_v42 = vpack.c.bf16 %v4052_v3, %v4051_v36  ;;  %v3984_v55 = vmul.f32 %v5836_v47, %v8082_v17  ;;  %v5838_v32 = vadd.f32 %v3857_v52, %v8077_v33 }
 0x209   : > { %5148 = vst [vmem:[%s8100_s15 + $0x28] sm:$0xff] %v5076_v39   ;;  %v4025_v28 = vadd.f32 %v8087_v22, %v3986_v35  ;;  %v3987_v58 = vmul.f32 %v5837_v53, %v8082_v17 }
 0x20a   : > { %5147 = vst [vmem:[%s8100_s15 + $0x20] sm:$0xff] %v5071_v42   ;;  %v4023_v59 = vadd.f32 %v8087_v22, %v3984_v55  ;;  %v3985_v11 = vmul.f32 %v5838_v32, %v8082_v17 }
 0x20b   : > { %v4026_v25 = vadd.f32 %v8087_v22, %v3987_v58  ;;  %v5601_v27 = vpop.f32.mrb[16].mxu1  ;;  %v4057_v1 = vmax.f32 %v4025_v28, 0.0 }
 0x20c   : > { %v4024_v37 = vadd.f32 %v8087_v22, %v3985_v11  ;;  %v5793_v46 = vpop.f32.mrb[16].mxu0  ;;  %v2130_v23 = vpop.f32.mrb[17].mxu1  ;;  %v4055_v63 = vmax.f32 %v4023_v59, 0.0 }
 0x20d   : > { %v4058_v31 = vmax.f32 %v4026_v25, 0.0  ;;  %v5839_v33 = vadd.f32 %v5793_v46, %v5601_v27  ;;  %v3870_v54 = vpop.f32.mrb[17].mxu0  ;;  %v5602_v62 = vpop.f32.mrb[18].mxu1 }
 0x20e   : > { %v4056_v9 = vmax.f32 %v4024_v37, 0.0  ;;  %v5840_v4 = vadd.f32 %v3870_v54, %v2130_v23  ;;  %v5794_v50 = vpop.f32.mrb[18].mxu0  ;;  %v2133_v15 = vpop.f32.mrb[19].mxu1 }
 0x20f   : > { %v5086_v41 = vpack.c.bf16 %v4058_v31, %v4057_v1  ;;  %v3990_v57 = vmul.f32 %v5839_v33, %v8082_v17  ;;  %v5841_v16 = vadd.f32 %v5794_v50, %v5602_v62  ;;  %v3873_v6 = vpop.f32.mrb[19].mxu0 }
 0x210   : > { %v5081_v5 = vpack.c.bf16 %v4056_v9, %v4055_v63  ;;  %v3988_v44 = vmul.f32 %v5840_v4, %v8082_v17  ;;  %v5842_v2 = vadd.f32 %v3873_v6, %v2133_v15 }
 0x211   : > { %5150 = vst [vmem:[%s8100_s15 + $0x38] sm:$0xff] %v5086_v41   ;;  %v4029_v8 = vadd.f32 %v8087_v22, %v3990_v57  ;;  %v3991_v43 = vmul.f32 %v5841_v16, %v8082_v17 }
 0x212   : > { %5149 = vst [vmem:[%s8100_s15 + $0x30] sm:$0xff] %v5081_v5   ;;  %v4027_v14 = vadd.f32 %v8087_v22, %v3988_v44  ;;  %v3989_v56 = vmul.f32 %v5842_v2, %v8082_v17 }
 0x213   : > { %v4030_v48 = vadd.f32 %v8087_v22, %v3991_v43  ;;  %v5605_v12 = vpop.f32.mrb[20].mxu1  ;;  %v4061_v60 = vmax.f32 %v4029_v8, 0.0 }
 0x214   : > { %v4028_v19 = vadd.f32 %v8087_v22, %v3989_v56  ;;  %v5797_v30 = vpop.f32.mrb[20].mxu0  ;;  %v2146_v0 = vpop.f32.mrb[21].mxu1  ;;  %v4059_v40 = vmax.f32 %v4027_v14, 0.0 }
 0x215   : > { %v4062_v20 = vmax.f32 %v4030_v48, 0.0  ;;  %v5843_v29 = vadd.f32 %v5797_v30, %v5605_v12  ;;  %v3886_v21 = vpop.f32.mrb[21].mxu0  ;;  %v5606_v61 = vpop.f32.mrb[22].mxu1 }
 0x216   : > { %v4060_v13 = vmax.f32 %v4028_v19, 0.0  ;;  %v5844_v49 = vadd.f32 %v3886_v21, %v2146_v0  ;;  %v5798_v34 = vpop.f32.mrb[22].mxu0  ;;  %v2149_v26 = vpop.f32.mrb[23].mxu1 }
 0x217   : > { %v5096_v24 = vpack.c.bf16 %v4062_v20, %v4061_v60  ;;  %v3994_v38 = vmul.f32 %v5843_v29, %v8082_v17  ;;  %v5845_v7 = vadd.f32 %v5798_v34, %v5606_v61  ;;  %v3889_v45 = vpop.f32.mrb[23].mxu0 }
 0x218   : > { %v5091_v10 = vpack.c.bf16 %v4060_v13, %v4059_v40  ;;  %v3992_v18 = vmul.f32 %v5844_v49, %v8082_v17  ;;  %v5846_v36 = vadd.f32 %v3889_v45, %v2149_v26 }
 0x219   : > { %5152 = vst [vmem:[%s8100_s15 + $0x48] sm:$0xff] %v5096_v24   ;;  %v4033_v3 = vadd.f32 %v8087_v22, %v3994_v38  ;;  %v3995_v47 = vmul.f32 %v5845_v7, %v8082_v17 }
 0x21a   : > { %5151 = vst [vmem:[%s8100_s15 + $0x40] sm:$0xff] %v5091_v10   ;;  %v4031_v51 = vadd.f32 %v8087_v22, %v3992_v18  ;;  %v3993_v39 = vmul.f32 %v5846_v36, %v8082_v17 }
 0x21b   : > { %v4034_v35 = vadd.f32 %v8087_v22, %v3995_v47  ;;  %v5609_v53 = vpop.f32.mrb[24].mxu1  ;;  %v4065_v32 = vmax.f32 %v4033_v3, 0.0 }
 0x21c   : > { %v4032_v52 = vadd.f32 %v8087_v22, %v3993_v39  ;;  %v5801_v42 = vpop.f32.mrb[24].mxu0  ;;  %v2162_v55 = vpop.f32.mrb[25].mxu1  ;;  %v4063_v25 = vmax.f32 %v4031_v51, 0.0  ;;  %v4269_v51 = vld [vmem:[%s8100_s15 + $0x10] sm:$0xff] (%p6331_p4)   ;;  %v4273_v39 = vld [vmem:[%s8100_s15 + $0x18] sm:$0xff] (%p6331_p4)  }
 0x21d   : > { %v4066_v28 = vmax.f32 %v4034_v35, 0.0  ;;  %v5847_v58 = vadd.f32 %v5801_v42, %v5609_v53  ;;  %v3902_v59 = vpop.f32.mrb[25].mxu0  ;;  %v5610_v11 = vpop.f32.mrb[26].mxu1  ;;  %v4277_v35 = vld [vmem:[%s8100_s15 + $0x20] sm:$0xff] (%p6331_p4)   ;;  %v4281_v53 = vld [vmem:[%s8100_s15 + $0x28] sm:$0xff] (%p6331_p4)   ;;  %4270 = vst [vmem:[%s4245_s21 + $0x10] sm:$0xff] (%p6331_p4), %v4269_v51  }
 0x21e   : > { %v4064_v27 = vmax.f32 %v4032_v52, 0.0  ;;  %v5848_v37 = vadd.f32 %v3902_v59, %v2162_v55  ;;  %v5802_v46 = vpop.f32.mrb[26].mxu0  ;;  %v2165_v23 = vpop.f32.mrb[27].mxu1  ;;  %4274 = vst [vmem:[%s4245_s21 + $0x18] sm:$0xff] (%p6331_p4), %v4273_v39   ;;  %4278 = vst [vmem:[%s4245_s21 + $0x20] sm:$0xff] (%p6331_p4), %v4277_v35   ;;  %v4285_v52 = vld [vmem:[%s8100_s15 + $0x30] sm:$0xff] (%p6331_p4)  }
 0x21f   : > { %v5106_v1 = vpack.c.bf16 %v4066_v28, %v4065_v32  ;;  %v3998_v31 = vmul.f32 %v5847_v58, %v8082_v17  ;;  %v5849_v33 = vadd.f32 %v5802_v46, %v5610_v11  ;;  %v3905_v54 = vpop.f32.mrb[27].mxu0  ;;  %4282 = vst [vmem:[%s4245_s21 + $0x28] sm:$0xff] (%p6331_p4), %v4281_v53   ;;  %v4289_v42 = vld [vmem:[%s8100_s15 + $0x38] sm:$0xff] (%p6331_p4)   ;;  %4286 = vst [vmem:[%s4245_s21 + $0x30] sm:$0xff] (%p6331_p4), %v4285_v52  }
 0x220   : > { %v5101_v62 = vpack.c.bf16 %v4064_v27, %v4063_v25  ;;  %v3996_v63 = vmul.f32 %v5848_v37, %v8082_v17  ;;  %v5850_v9 = vadd.f32 %v3905_v54, %v2165_v23  ;;  %4290 = vst [vmem:[%s4245_s21 + $0x38] sm:$0xff] (%p6331_p4), %v4289_v42   ;;  %v4297_v32 = vld [vmem:[%s8100_s15 + $0x48] sm:$0xff] (%p6331_p4)  }
 0x221   : > { %5154 = vst [vmem:[%s8100_s15 + $0x58] sm:$0xff] %v5106_v1   ;;  %v4037_v4 = vadd.f32 %v8087_v22, %v3998_v31  ;;  %v3999_v50 = vmul.f32 %v5849_v33, %v8082_v17  ;;  %v4293_v55 = vld [vmem:[%s8100_s15 + $0x40] sm:$0xff] (%p6331_p4)   ;;  %4298 = vst [vmem:[%s4245_s21 + $0x88] sm:$0xff] (%p6331_p4), %v4297_v32  }
 0x222   : > { %5153 = vst [vmem:[%s8100_s15 + $0x50] sm:$0xff] %v5101_v62   ;;  %v4035_v15 = vadd.f32 %v8087_v22, %v3996_v63  ;;  %v3997_v41 = vmul.f32 %v5850_v9, %v8082_v17  ;;  %4294 = vst [vmem:[%s4245_s21 + $0x80] sm:$0xff] (%p6331_p4), %v4293_v55  }
 0x223   : > { %v4038_v57 = vadd.f32 %v8087_v22, %v3999_v50  ;;  %v5613_v16 = vpop.f32.mrb[28].mxu1  ;;  %v4069_v2 = vmax.f32 %v4037_v4, 0.0 }
 0x224   : > { %v4036_v6 = vadd.f32 %v8087_v22, %v3997_v41  ;;  %v5805_v5 = vpop.f32.mrb[28].mxu0  ;;  %v2178_v44 = vpop.f32.mrb[29].mxu1  ;;  %v4067_v48 = vmax.f32 %v4035_v15, 0.0 }
 0x225   : > { %v4070_v8 = vmax.f32 %v4038_v57, 0.0  ;;  %v5851_v43 = vadd.f32 %v5805_v5, %v5613_v16  ;;  %v3918_v14 = vpop.f32.mrb[29].mxu0  ;;  %v5614_v56 = vpop.f32.mrb[30].mxu1 }
 0x226   : > { %v4068_v12 = vmax.f32 %v4036_v6, 0.0  ;;  %v5852_v19 = vadd.f32 %v3918_v14, %v2178_v44  ;;  %v5806_v30 = vpop.f32.mrb[30].mxu0  ;;  %v2181_v0 = vpop.f32.mrb[31].mxu1 }
 0x227   : > { %v5116_v60 = vpack.c.bf16 %v4070_v8, %v4069_v2  ;;  %v4002_v20 = vmul.f32 %v5851_v43, %v8082_v17  ;;  %v5853_v29 = vadd.f32 %v5806_v30, %v5614_v56  ;;  %v3921_v21 = vpop.f32.mrb[31].mxu0 }
 0x228   : > { %v5111_v61 = vpack.c.bf16 %v4068_v12, %v4067_v48  ;;  %v4000_v40 = vmul.f32 %v5852_v19, %v8082_v17  ;;  %v5854_v13 = vadd.f32 %v3921_v21, %v2181_v0  ;;  %v4305_v58 = vld [vmem:[%s8100_s15 + $0x58] sm:$0xff] (%p6331_p4)  }
 0x229   : > { %5156 = vst [vmem:[%s8100_s15 + $0x68] sm:$0xff] %v5116_v60   ;;  %v4041_v49 = vadd.f32 %v8087_v22, %v4002_v20  ;;  %v4003_v34 = vmul.f32 %v5853_v29, %v8082_v17  ;;  %v4301_v28 = vld [vmem:[%s8100_s15 + $0x50] sm:$0xff] (%p6331_p4)   ;;  %4306 = vst [vmem:[%s4245_s21 + $0x98] sm:$0xff] (%p6331_p4), %v4305_v58  }
 0x22a   : > { %5155 = vst [vmem:[%s8100_s15 + $0x60] sm:$0xff] %v5111_v61   ;;  %v4039_v26 = vadd.f32 %v8087_v22, %v4000_v40  ;;  %v4001_v24 = vmul.f32 %v5854_v13, %v8082_v17  ;;  %v4261_v17 = vld [vmem:[%s8100_s15] sm:$0xff] (%p6331_p4)   ;;  %4302 = vst [vmem:[%s4245_s21 + $0x90] sm:$0xff] (%p6331_p4), %v4301_v28  }
 0x22b   : > { %v4042_v38 = vadd.f32 %v8087_v22, %v4003_v34  ;;  %v4073_v45 = vmax.f32 %v4041_v49, 0.0  ;;  %4262 = vst [vmem:[%s4245_s21] sm:$0xff] (%p6331_p4), %v4261_v17  }
 0x22c   : > { %v4040_v7 = vadd.f32 %v8087_v22, %v4001_v24  ;;  %v4071_v18 = vmax.f32 %v4039_v26, 0.0  ;;  %4241 = sbr.rel (!%p6331_p4) target bundleno = 571 (0x23b), region = 40  ;;  %v4265_v22 = vld [vmem:[%s8100_s15 + $0x8] sm:$0xff] (%p6331_p4)  }
 0x22d   : > { %v4074_v10 = vmax.f32 %v4042_v38, 0.0  ;;  %4266 = vst [vmem:[%s4245_s21 + $0x8] sm:$0xff] (%p6331_p4), %v4265_v22  }
 0x22e   : > { %v4072_v36 = vmax.f32 %v4040_v7, 0.0 }
 0x22f   : > { %v5126_v3 = vpack.c.bf16 %v4074_v10, %v4073_v45 }
 0x230   : > { %v5121_v47 = vpack.c.bf16 %v4072_v36, %v4071_v18  ;;  %v4313_v11 = vld [vmem:[%s8100_s15 + $0x68] sm:$0xff] (%p6331_p4)  }
 0x231   : > { %5158 = vst [vmem:[%s8100_s15 + $0x78] sm:$0xff] %v5126_v3   ;;  %v4309_v59 = vld [vmem:[%s8100_s15 + $0x60] sm:$0xff] (%p6331_p4)   ;;  %4314 = vst [vmem:[%s4245_s21 + $0xa8] sm:$0xff] (%p6331_p4), %v4313_v11  }
 0x232   : > { %5157 = vst [vmem:[%s8100_s15 + $0x70] sm:$0xff] %v5121_v47   ;;  %4310 = vst [vmem:[%s4245_s21 + $0xa0] sm:$0xff] (%p6331_p4), %v4309_v59  }
 0x238   : > { %v4321_v27 = vld [vmem:[%s8100_s15 + $0x78] sm:$0xff]  }
 0x239   : > { %v4317_v25 = vld [vmem:[%s8100_s15 + $0x70] sm:$0xff]   ;;  %4322 = vst [vmem:[%s4245_s21 + $0xb8] sm:$0xff] %v4321_v27  }
 0x23a   : > { %4318 = vst [vmem:[%s4245_s21 + $0xb0] sm:$0xff] %v4317_v25  }
 0x23b PF: > { %p11_p7 = scmp.ge.s32.totalorder %s6321_s19, 4   ;;  %s8530_s15 = smov %s6275_s16 }
 0x23c   : > { %s8531_s16 = smov %s6329_s22  ;;  %s8532_s17 = smov %s6321_s19 }
 0x23d   :  { %13 = sbr.rel (!%p11_p7) target bundleno = 2 (0x2), region = 115 }

// kernel: _lambda_.18
= control target key start
LH: loop header
LB: loop body
LE: loop exit
PB: predicated region body
PF: predicated region fallthrough
CT: control target
= control target key end

     0   :  { %v194_v0 = vmov 0.0   ;;  %vm195_vm0 = vmmov 0   ;;  %s257_s1 = inlined_call_operand.vmem [shape: bf16[128,128], index: 1, kind: input, shape index: {}]   ;;  %s258_s0 = inlined_call_operand.vmem [shape: bf16[8,128], index: 0, kind: input, shape index: {}]   ;;  %s259_s2 = inlined_call_operand.vmem [shape: f32[1,128], index: 2, kind: input, shape index: {}]   ;;  %s260_s3 = inlined_call_operand.vmem [shape: f32[1,128], index: 3, kind: input, shape index: {}]   ;;  %s261_s4 = inlined_call_operand.vmem [shape: bf16[8,128], index: 4, kind: output, shape index: {}]  }
   0x1   :  { %164 = vmatprep.subr.bf16.mxu0 %v194_v0  ;;  %v186_v1 = vld [vmem:[%s257_s1] sm:$0xff]   ;;  %180 = vmatprep.mubr.msk.bf16.mxu0 %vm195_vm0, %v194_v0  ;;  %v187_v2 = vld [vmem:[%s257_s1 + $0x8] sm:$0xff]   ;;  %v188_v3 = vld [vmem:[%s257_s1 + $0x10] sm:$0xff]  }
   0x2   :  { %165 = vmatpush3.bf16.msra.mxu0 %v186_v1  ;;  %v189_v4 = vld [vmem:[%s257_s1 + $0x18] sm:$0xff]   ;;  %v190_v5 = vld [vmem:[%s257_s1 + $0x20] sm:$0xff]   ;;  %v191_v6 = vld [vmem:[%s257_s1 + $0x28] sm:$0xff]  }
   0x3   :  { %166 = vmatprep.subr.bf16.mxu0 %v194_v0  ;;  %v192_v7 = vld [vmem:[%s257_s1 + $0x30] sm:$0xff]   ;;  %v193_v8 = vld [vmem:[%s257_s1 + $0x38] sm:$0xff]   ;;  %v18_v9 = vld [vmem:[%s258_s0] sm:$0xf] }
   0x4   :  { %v153_v10 = vld [vmem:[%s259_s2] ss:$0 sm:$0xff] }
   0x5   :  { %v154_v12 = vld [vmem:[%s260_s3] ss:$0 sm:$0xff] }
   0x6   :  { %167 = vmatpush3.bf16.msra.mxu0 %v187_v2 }
   0x7   :  { %168 = vmatprep.subr.bf16.mxu0 %v194_v0 }
   0xa   :  { %169 = vmatpush3.bf16.msra.mxu0 %v188_v3 }
   0xb   :  { %170 = vmatprep.subr.bf16.mxu0 %v194_v0 }
   0xe   :  { %171 = vmatpush3.bf16.msra.mxu0 %v189_v4 }
   0xf   :  { %172 = vmatprep.subr.bf16.mxu0 %v194_v0 }
  0x12   :  { %173 = vmatpush3.bf16.msra.mxu0 %v190_v5 }
  0x13   :  { %174 = vmatprep.subr.bf16.mxu0 %v194_v0 }
  0x16   :  { %175 = vmatpush3.bf16.msra.mxu0 %v191_v6 }
  0x17   :  { %176 = vmatprep.subr.bf16.mxu0 %v194_v0 }
  0x1a   :  { %177 = vmatpush3.bf16.msra.mxu0 %v192_v7 }
  0x1b   :  { %178 = vmatprep.subr.bf16.mxu0 %v194_v0 }
  0x1e   :  { %179 = vmatpush3.bf16.msra.mxu0 %v193_v8 }
  0x21   :  { %181 = vmatmul.mubr.bf16.vlgmr.msra.gmra.mrb[0].mxu0 %v18_v9 }
  0xf4   :  { %v117_v11 = vpop.f32.mrb[0].mxu0 }
  0xf5   :  { %v130_v13 = vmul.f32 %v153_v10, %v117_v11  ;;  %v182_v14 = vpop.f32.mrb[1].mxu0 }
  0xf6   :  { %v120_v15 = vpop.f32.mrb[2].mxu0 }
  0xf7   :  { %v138_v16 = vadd.f32 %v154_v12, %v130_v13  ;;  %v183_v17 = vpop.f32.mrb[3].mxu0 }
  0xf9   :  { %v139_v18 = vpack.c.bf16 %v138_v16, %v138_v16 }
  0xfb   :  { %140 = vst [vmem:[%s261_s4] sm:$0xf] %v139_v18 }

// kernel: _lambda_.22
= control target key start
LH: loop header
LB: loop body
LE: loop exit
PB: predicated region body
PF: predicated region fallthrough
CT: control target
= control target key end

     0   :  { %s1748_s21 = smov 0   ;;  %s2223_s0 = inlined_call_operand.vmem [shape: bf16[512,128], index: 0, kind: input, shape index: {}]   ;;  %s2224_s1 = inlined_call_operand.vmem [shape: bf16[128,128], index: 1, kind: input, shape index: {}]   ;;  %s2225_s2 = inlined_call_operand.vmem [shape: f32[1,128], index: 2, kind: input, shape index: {}, may-alias: {2,3}]   ;;  %s2226_s3 = inlined_call_operand.vmem [shape: f32[1,128], index: 3, kind: input, shape index: {}, may-alias: {2,3}]   ;;  %s2227_s4 = inlined_call_operand.vmem [shape: bf16[512,128], index: 4, kind: input, shape index: {}]   ;;  %s2228_s5 = inlined_call_operand.vmem [shape: bf16[512,128], index: 5, kind: input, shape index: {}]   ;;  %s2229_s6 = inlined_call_operand.vmem [shape: bf16[512,128], index: 6, kind: output, shape index: {}]  }
   0x1 LB: > { %s1227_s22 = sadd.s32 4294967295, %s1711_s21   ;;  %p1231_p0 = scmp.ge.s32.totalorder %s1711_s21, 1  ;;  %s1711_s21 = sphi %s1748_s21, %s16_s21  }
   0x2   : > { %p235_p1 = scmp.lt.s32.totalorder %s1711_s21, 3 }
   0x4   : > { %p236_p2 = pnand %p1231_p0, %p235_p1 }
   0x5   : > { %v1681_v0 = vld [vmem:[%s2224_s1] sm:$0xff] (!%p236_p2)   ;;  %s1232_s25 = sshll.u32 (!%p236_p2), %s1227_s22, 5  ;;  %v1682_v1 = vld [vmem:[%s2224_s1 + $0x8] sm:$0xff] (!%p236_p2)   ;;  %v1683_v2 = vld [vmem:[%s2224_s1 + $0x10] sm:$0xff] (!%p236_p2)  }
   0x6   : > { %239 = sbr.rel (%p236_p2) target bundleno = 319 (0x13f), region = 44  ;;  %p276_p3 = scmp.lt.s32.totalorder (!%p236_p2), %s1232_s25, 63  ;;  %1609 = vmatprep.subr.bf16.mxu0 (!%p236_p2), %v1681_v0  ;;  %1657 = vmatprep.subr.bf16.mxu1 (!%p236_p2), %v1681_v0  ;;  %v1684_v3 = vld [vmem:[%s2224_s1 + $0x18] sm:$0xff] (!%p236_p2)   ;;  %v1685_v6 = vld [vmem:[%s2224_s1 + $0x20] sm:$0xff] (!%p236_p2)   ;;  %v1686_v7 = vld [vmem:[%s2224_s1 + $0x28] sm:$0xff] (!%p236_p2)  }
   0x7   : > { %1610 = vmatpush3.bf16.msra.mxu0 (!%p236_p2), %v1681_v0  ;;  %1665 = vmatpush3.bf16.msra.mxu1 (!%p236_p2), %v1681_v0  ;;  %v1687_v8 = vld [vmem:[%s2224_s1 + $0x30] sm:$0xff] (!%p236_p2)   ;;  %v1688_v9 = vld [vmem:[%s2224_s1 + $0x38] sm:$0xff] (!%p236_p2)  }
   0x8   : > { %1611 = vmatprep.subr.bf16.mxu0 (!%p236_p2), %v1682_v1  ;;  %1658 = vmatprep.subr.bf16.mxu1 (!%p236_p2), %v1682_v1 }
   0xb   : > { %1612 = vmatpush3.bf16.msra.mxu0 (!%p236_p2), %v1682_v1  ;;  %1666 = vmatpush3.bf16.msra.mxu1 (!%p236_p2), %v1682_v1 }
   0xc   : > { %1613 = vmatprep.subr.bf16.mxu0 (!%p236_p2), %v1683_v2  ;;  %1659 = vmatprep.subr.bf16.mxu1 (!%p236_p2), %v1683_v2 }
   0xd   : > { %s2267_s25 = smov (!%p276_p3, %s1232_s25), 63 }
   0xe   : > { %s1765_s30 = sshll.u32 %s2267_s25, 2 }
   0xf   : > { %s1771_s9 = scalar_lea.vmem %s2223_s0, %s1765_s30  ;;  %1614 = vmatpush3.bf16.msra.mxu0 %v1683_v2  ;;  %1667 = vmatpush3.bf16.msra.mxu1 %v1683_v2  ;;  %s1808_s23 = scalar_lea.vmem %s2227_s4, %s1765_s30 }
  0x10   : > { %v1689_v4 = vld [vmem:[%s1771_s9] sm:$0xff]   ;;  %1615 = vmatprep.subr.bf16.mxu0 %v1684_v3  ;;  %1660 = vmatprep.subr.bf16.mxu1 %v1684_v3  ;;  %v1691_v10 = vld [vmem:[%s1771_s9 + $0x8] sm:$0xff]   ;;  %v1693_v12 = vld [vmem:[%s1771_s9 + $0x10] sm:$0xff]   ;;  %s1814_s26 = scalar_lea.vmem %s2228_s5, %s1765_s30  ;;  %s2016_s10 = scalar_lea.vmem %s2229_s6, %s1765_s30 }
  0x11   : > { %v1690_v5 = vld [vmem:[%s1771_s9 + $0x40] sm:$0xff]   ;;  %1625 = vmatprep.mubr.bf16.mxu0 %v1689_v4  ;;  %v1692_v11 = vld [vmem:[%s1771_s9 + $0x48] sm:$0xff]   ;;  %v1694_v13 = vld [vmem:[%s1771_s9 + $0x50] sm:$0xff]  }
  0x12   : > { %1641 = vmatprep.mubr.bf16.mxu1 %v1690_v5  ;;  %v1695_v14 = vld [vmem:[%s1771_s9 + $0x18] sm:$0xff]   ;;  %v1697_v16 = vld [vmem:[%s1771_s9 + $0x20] sm:$0xff]   ;;  %v1699_v18 = vld [vmem:[%s1771_s9 + $0x28] sm:$0xff]  }
  0x13   : > { %1616 = vmatpush3.bf16.msra.mxu0 %v1684_v3  ;;  %1668 = vmatpush3.bf16.msra.mxu1 %v1684_v3  ;;  %v1696_v15 = vld [vmem:[%s1771_s9 + $0x58] sm:$0xff]   ;;  %v1698_v17 = vld [vmem:[%s1771_s9 + $0x60] sm:$0xff]   ;;  %v1700_v19 = vld [vmem:[%s1771_s9 + $0x68] sm:$0xff]  }
  0x14   : > { %1617 = vmatprep.subr.bf16.mxu0 %v1685_v6  ;;  %1661 = vmatprep.subr.bf16.mxu1 %v1685_v6  ;;  %v1701_v20 = vld [vmem:[%s1771_s9 + $0x30] sm:$0xff]   ;;  %v1703_v22 = vld [vmem:[%s1771_s9 + $0x38] sm:$0xff]   ;;  %v1817_v24 = vld [vmem:[%s1808_s23 + $0x8] sm:$0xff]  }
  0x15   : > { %v1702_v21 = vld [vmem:[%s1771_s9 + $0x70] sm:$0xff]   ;;  %v1704_v23 = vld [vmem:[%s1771_s9 + $0x78] sm:$0xff]   ;;  %v1820_v25 = vld [vmem:[%s1808_s23 + $0x48] sm:$0xff]   ;;  %v1338_v32 = vunpack.c.l.bf16 %v1817_v24  ;;  %v1339_v37 = vunpack.c.h.bf16 %v1817_v24 }
  0x16   : > { %v1823_v26 = vld [vmem:[%s1808_s23] sm:$0xff]   ;;  %v1829_v28 = vld [vmem:[%s1814_s26 + $0x8] sm:$0xff]   ;;  %v1370_v33 = vunpack.c.l.bf16 %v1820_v25  ;;  %v1845_v36 = vld [vmem:[%s1808_s23 + $0x18] sm:$0xff]   ;;  %v1371_v38 = vunpack.c.h.bf16 %v1820_v25 }
  0x17   : > { %1618 = vmatpush3.bf16.msra.mxu0 %v1685_v6  ;;  %1669 = vmatpush3.bf16.msra.mxu1 %v1685_v6  ;;  %v1826_v27 = vld [vmem:[%s1808_s23 + $0x40] sm:$0xff]   ;;  %v1832_v29 = vld [vmem:[%s1814_s26 + $0x48] sm:$0xff]   ;;  %v1334_v34 = vunpack.c.l.bf16 %v1823_v26  ;;  %v1335_v39 = vunpack.c.h.bf16 %v1823_v26  ;;  %v1852_v41 = vld [vmem:[%s1808_s23 + $0x58] sm:$0xff]   ;;  %v1402_v44 = vunpack.c.l.bf16 %v1829_v28  ;;  %v1403_v50 = vunpack.c.h.bf16 %v1829_v28 }
  0x18   : > { %1619 = vmatprep.subr.bf16.mxu0 %v1686_v7  ;;  %1662 = vmatprep.subr.bf16.mxu1 %v1686_v7  ;;  %v1835_v30 = vld [vmem:[%s1814_s26] sm:$0xff]   ;;  %v1366_v35 = vunpack.c.l.bf16 %v1826_v27  ;;  %v1367_v40 = vunpack.c.h.bf16 %v1826_v27  ;;  %v1855_v42 = vld [vmem:[%s1808_s23 + $0x10] sm:$0xff]   ;;  %v1434_v45 = vunpack.c.l.bf16 %v1832_v29  ;;  %v1865_v48 = vld [vmem:[%s1814_s26 + $0x18] sm:$0xff]   ;;  %v1435_v51 = vunpack.c.h.bf16 %v1832_v29 }
  0x19   : > { %v1838_v31 = vld [vmem:[%s1814_s26 + $0x40] sm:$0xff]   ;;  %v1858_v43 = vld [vmem:[%s1808_s23 + $0x50] sm:$0xff]   ;;  %v1398_v46 = vunpack.c.l.bf16 %v1835_v30  ;;  %v1868_v49 = vld [vmem:[%s1814_s26 + $0x58] sm:$0xff]   ;;  %v1399_v52 = vunpack.c.h.bf16 %v1835_v30 }
  0x1a   : > { %v1430_v47 = vunpack.c.l.bf16 %v1838_v31  ;;  %v1431_v53 = vunpack.c.h.bf16 %v1838_v31  ;;  %v1875_v54 = vld [vmem:[%s1814_s26 + $0x10] sm:$0xff]   ;;  %v1885_v60 = vld [vmem:[%s1808_s23 + $0x28] sm:$0xff]   ;;  %v1898_v3 = vld [vmem:[%s1808_s23 + $0x20] sm:$0xff]  }
  0x1b   : > { %1620 = vmatpush3.bf16.msra.mxu0 %v1686_v7  ;;  %1670 = vmatpush3.bf16.msra.mxu1 %v1686_v7  ;;  %v1878_v55 = vld [vmem:[%s1814_s26 + $0x50] sm:$0xff]   ;;  %v1888_v61 = vld [vmem:[%s1808_s23 + $0x68] sm:$0xff]   ;;  %v1901_v4 = vld [vmem:[%s1808_s23 + $0x60] sm:$0xff]  }
  0x1c   : > { %1621 = vmatprep.subr.bf16.mxu0 %v1687_v8  ;;  %1663 = vmatprep.subr.bf16.mxu1 %v1687_v8  ;;  %v1895_v2 = vld [vmem:[%s1814_s26 + $0x28] sm:$0xff]  }
  0x1f   : > { %1622 = vmatpush3.bf16.msra.mxu0 %v1687_v8  ;;  %1671 = vmatpush3.bf16.msra.mxu1 %v1687_v8 }
  0x20   : > { %1623 = vmatprep.subr.bf16.mxu0 %v1688_v9  ;;  %1664 = vmatprep.subr.bf16.mxu1 %v1688_v9 }
  0x23   : > { %1624 = vmatpush3.bf16.msra.mxu0 %v1688_v9  ;;  %1672 = vmatpush3.bf16.msra.mxu1 %v1688_v9  ;;  %v1908_v9 = vld [vmem:[%s1814_s26 + $0x68] sm:$0xff]  }
  0x26   : > { %1626 = vmatmul.mubr.bf16.vlgmr.msra.gmra.mrb[0].mxu0 %v1691_v10  ;;  %1642 = vmatmul.mubr.bf16.vlgmr.msra.gmra.mrb[0].mxu1 %v1692_v11  ;;  %v1911_v10 = vld [vmem:[%s1814_s26 + $0x20] sm:$0xff]  }
  0x27   : > { %1629 = vmatprep.mubr.bf16.mxu0 %v1693_v12  ;;  %1645 = vmatprep.mubr.bf16.mxu1 %v1694_v13  ;;  %v1914_v11 = vld [vmem:[%s1814_s26 + $0x60] sm:$0xff]   ;;  %v1944_v12 = vld [vmem:[%s1808_s23 + $0x30] sm:$0xff]  }
  0x2e   : > { %1630 = vmatmul.mubr.bf16.gmra.mrb[4].mxu0 %v1695_v14  ;;  %1646 = vmatmul.mubr.bf16.gmra.mrb[4].mxu1 %v1696_v15  ;;  %v1934_v15 = vld [vmem:[%s1808_s23 + $0x38] sm:$0xff]  }
  0x2f   : > { %1633 = vmatprep.mubr.bf16.mxu0 %v1697_v16  ;;  %1649 = vmatprep.mubr.bf16.mxu1 %v1698_v17  ;;  %v1937_v17 = vld [vmem:[%s1808_s23 + $0x78] sm:$0xff]   ;;  %v1952_v16 = vld [vmem:[%s2226_s3] ss:$0 sm:$0xff] }
  0x36   : > { %1634 = vmatmul.mubr.bf16.gmra.mrb[8].mxu0 %v1699_v18  ;;  %1650 = vmatmul.mubr.bf16.gmra.mrb[8].mxu1 %v1700_v19 }
  0x37   : > { %1637 = vmatprep.mubr.bf16.mxu0 %v1701_v20  ;;  %1653 = vmatprep.mubr.bf16.mxu1 %v1702_v21  ;;  %v1927_v20 = vld [vmem:[%s2225_s2] ss:$0 sm:$0xff]  ;;  %v1947_v21 = vld [vmem:[%s1808_s23 + $0x70] sm:$0xff]  }
  0x3e   : > { %1638 = vmatmul.mubr.bf16.gmra.mrb[12].mxu0 %v1703_v22  ;;  %1654 = vmatmul.mubr.bf16.gmra.mrb[12].mxu1 %v1704_v23 }
  0xf9   : > { %v1627_v22 = vpop.f32.mrb[0].mxu0  ;;  %v1643_v23 = vpop.f32.mrb[0].mxu1 }
  0xfa   : > { %v662_v13 = vmul.f32 %v1627_v22, %v1927_v20  ;;  %v678_v7 = vmul.f32 %v1643_v23, %v1927_v20  ;;  %v526_v6 = vpop.f32.mrb[1].mxu0  ;;  %v590_v5 = vpop.f32.mrb[1].mxu1 }
  0xfb   : > { %v660_v63 = vmul.f32 %v1927_v20, %v526_v6  ;;  %v676_v8 = vmul.f32 %v1927_v20, %v590_v5  ;;  %v1628_v62 = vpop.f32.mrb[2].mxu0  ;;  %v1644_v18 = vpop.f32.mrb[2].mxu1 }
  0xfc   : > { %v701_v22 = vadd.f32 %v1952_v16, %v662_v13  ;;  %v717_v23 = vadd.f32 %v1952_v16, %v678_v7  ;;  %v663_v59 = vmul.f32 %v1628_v62, %v1927_v20  ;;  %v679_v1 = vmul.f32 %v1644_v18, %v1927_v20  ;;  %v529_v58 = vpop.f32.mrb[3].mxu0  ;;  %v593_v0 = vpop.f32.mrb[3].mxu1 }
  0xfd   : > { %v699_v6 = vadd.f32 %v1952_v16, %v660_v63  ;;  %v715_v5 = vadd.f32 %v1952_v16, %v676_v8  ;;  %v661_v57 = vmul.f32 %v1927_v20, %v529_v58  ;;  %v677_v19 = vmul.f32 %v1927_v20, %v593_v0 }
  0xfe   : > { %v797_v14 = vadd.f32 %v1338_v32, %v701_v22  ;;  %v813_v7 = vadd.f32 %v1370_v33, %v717_v23  ;;  %v702_v62 = vadd.f32 %v1952_v16, %v663_v59  ;;  %v718_v13 = vadd.f32 %v1952_v16, %v679_v1 }
  0xff   : > { %v795_v18 = vadd.f32 %v1334_v34, %v699_v6  ;;  %v811_v63 = vadd.f32 %v1366_v35, %v715_v5  ;;  %v700_v58 = vadd.f32 %v1952_v16, %v661_v57  ;;  %v716_v0 = vadd.f32 %v1952_v16, %v677_v19 }
 0x100   : > { %v829_v8 = vmax.f32 %v797_v14, 0.0  ;;  %v845_v56 = vmax.f32 %v813_v7, 0.0  ;;  %v798_v32 = vadd.f32 %v1339_v37, %v702_v62  ;;  %v814_v33 = vadd.f32 %v1371_v38, %v718_v13 }
 0x101   : > { %v827_v59 = vmax.f32 %v795_v18, 0.0  ;;  %v843_v1 = vmax.f32 %v811_v63, 0.0  ;;  %v796_v34 = vadd.f32 %v1335_v39, %v700_v58  ;;  %v812_v35 = vadd.f32 %v1367_v40, %v716_v0  ;;  %v1631_v22 = vpop.f32.mrb[4].mxu0  ;;  %v1647_v57 = vpop.f32.mrb[4].mxu1 }
 0x102   : > { %v925_v14 = vadd.f32 %v1402_v44, %v829_v8  ;;  %v941_v24 = vadd.f32 %v1434_v45, %v845_v56  ;;  %v830_v37 = vmax.f32 %v798_v32, 0.0  ;;  %v846_v19 = vmax.f32 %v814_v33, 0.0  ;;  %v542_v25 = vpop.f32.mrb[5].mxu0  ;;  %v606_v38 = vpop.f32.mrb[5].mxu1 }
 0x103   : > { %v923_v23 = vadd.f32 %v1398_v46, %v827_v59  ;;  %v939_v26 = vadd.f32 %v1430_v47, %v843_v1  ;;  %v828_v27 = vmax.f32 %v796_v34, 0.0  ;;  %v844_v39 = vmax.f32 %v812_v35, 0.0  ;;  %v1632_v40 = vpop.f32.mrb[6].mxu0  ;;  %v1648_v6 = vpop.f32.mrb[6].mxu1 }
 0x104   : > { %v957_v5 = vmax.f32 %v925_v14, 0.0  ;;  %v973_v44 = vmax.f32 %v941_v24, 0.0  ;;  %v926_v45 = vadd.f32 %v1403_v50, %v830_v37  ;;  %v942_v56 = vadd.f32 %v1435_v51, %v846_v19  ;;  %v545_v7 = vpop.f32.mrb[7].mxu0  ;;  %v609_v62 = vpop.f32.mrb[7].mxu1 }
 0x105   : > { %v955_v13 = vmax.f32 %v923_v23, 0.0  ;;  %v971_v46 = vmax.f32 %v939_v26, 0.0  ;;  %v924_v47 = vadd.f32 %v1399_v52, %v828_v27  ;;  %v940_v18 = vadd.f32 %v1431_v53, %v844_v39 }
 0x106   : > { %v958_v63 = vmax.f32 %v926_v45, 0.0  ;;  %v974_v58 = vmax.f32 %v942_v56, 0.0  ;;  %v666_v0 = vmul.f32 %v1631_v22, %v1927_v20  ;;  %v682_v28 = vmul.f32 %v1647_v57, %v1927_v20 }
 0x107   : > { %v956_v29 = vmax.f32 %v924_v47, 0.0  ;;  %v972_v50 = vmax.f32 %v940_v18, 0.0  ;;  %v664_v30 = vmul.f32 %v1927_v20, %v542_v25  ;;  %v680_v31 = vmul.f32 %v1927_v20, %v606_v38 }
 0x108   : > { %v1468_v51 = vpack.c.bf16 %v958_v63, %v957_v5  ;;  %v1508_v52 = vpack.c.bf16 %v974_v58, %v973_v44  ;;  %v705_v53 = vadd.f32 %v1952_v16, %v666_v0  ;;  %v721_v8 = vadd.f32 %v1952_v16, %v682_v28 }
 0x109   : > { %v1463_v32 = vpack.c.bf16 %v956_v29, %v955_v13  ;;  %v1503_v33 = vpack.c.bf16 %v972_v50, %v971_v46  ;;  %v703_v59 = vadd.f32 %v1952_v16, %v664_v30  ;;  %v719_v1 = vadd.f32 %v1952_v16, %v680_v31  ;;  %v1635_v34 = vpop.f32.mrb[8].mxu0  ;;  %v1651_v35 = vpop.f32.mrb[8].mxu1 }
 0x10a   : > { %1570 = vst [vmem:[%s2016_s10 + $0x8] sm:$0xff] %v1468_v51   ;;  %1578 = vst [vmem:[%s2016_s10 + $0x48] sm:$0xff] %v1508_v52   ;;  %v2230_v22 = vunpack.c.l.bf16 %v1845_v36  ;;  %v2231_v14 = vunpack.c.l.bf16 %v1852_v41  ;;  %v667_v37 = vmul.f32 %v1632_v40, %v1927_v20  ;;  %v683_v19 = vmul.f32 %v1648_v6, %v1927_v20  ;;  %v558_v25 = vpop.f32.mrb[9].mxu0  ;;  %v622_v38 = vpop.f32.mrb[9].mxu1 }
 0x10b   : > { %1464 = vst [vmem:[%s2016_s10] sm:$0xff] %v1463_v32   ;;  %1577 = vst [vmem:[%s2016_s10 + $0x40] sm:$0xff] %v1503_v33   ;;  %v2232_v23 = vunpack.c.l.bf16 %v1855_v42  ;;  %v2233_v27 = vunpack.c.l.bf16 %v1858_v43  ;;  %v665_v5 = vmul.f32 %v1927_v20, %v545_v7  ;;  %v681_v44 = vmul.f32 %v1927_v20, %v609_v62  ;;  %v2040_v45 = vpop.f32.mrb[10].mxu0  ;;  %v2042_v56 = vpop.f32.mrb[10].mxu1 }
 0x10c   : > { %v801_v57 = vadd.f32 %v2230_v22, %v705_v53  ;;  %v817_v24 = vadd.f32 %v2231_v14, %v721_v8  ;;  %v706_v13 = vadd.f32 %v1952_v16, %v667_v37  ;;  %v722_v46 = vadd.f32 %v1952_v16, %v683_v19  ;;  %v2046_v47 = vpop.f32.mrb[11].mxu0  ;;  %v2048_v18 = vpop.f32.mrb[11].mxu1 }
 0x10d   : > { %v799_v26 = vadd.f32 %v2232_v23, %v703_v59  ;;  %v815_v39 = vadd.f32 %v2233_v27, %v719_v1  ;;  %v704_v7 = vadd.f32 %v1952_v16, %v665_v5  ;;  %v720_v62 = vadd.f32 %v1952_v16, %v681_v44 }
 0x10e   : > { %v833_v40 = vmax.f32 %v801_v57, 0.0  ;;  %v849_v6 = vmax.f32 %v817_v24, 0.0  ;;  %v2234_v0 = vunpack.c.l.bf16 %v1865_v48  ;;  %v2235_v29 = vunpack.c.l.bf16 %v1868_v49 }
 0x10f   : > { %v831_v63 = vmax.f32 %v799_v26, 0.0  ;;  %v847_v58 = vmax.f32 %v815_v39, 0.0  ;;  %v2236_v30 = vunpack.c.h.bf16 %v1845_v36  ;;  %v2237_v51 = vunpack.c.h.bf16 %v1852_v41 }
 0x110   : > { %v929_v28 = vadd.f32 %v2234_v0, %v833_v40  ;;  %v945_v50 = vadd.f32 %v2235_v29, %v849_v6  ;;  %v2238_v53 = vunpack.c.l.bf16 %v1875_v54  ;;  %v2239_v32 = vunpack.c.l.bf16 %v1878_v55 }
 0x111   : > { %v802_v31 = vadd.f32 %v2236_v30, %v706_v13  ;;  %v818_v52 = vadd.f32 %v2237_v51, %v722_v46  ;;  %v2240_v59 = vunpack.c.h.bf16 %v1855_v42  ;;  %v2241_v22 = vunpack.c.h.bf16 %v1858_v43  ;;  %v2068_v27 = vpop.f32.mrb[12].mxu0  ;;  %v2070_v39 = vpop.f32.mrb[12].mxu1 }
 0x112   : > { %v927_v8 = vadd.f32 %v2238_v53, %v831_v63  ;;  %v943_v33 = vadd.f32 %v2239_v32, %v847_v58  ;;  %v961_v14 = vmax.f32 %v929_v28, 0.0  ;;  %v977_v24 = vmax.f32 %v945_v50, 0.0  ;;  %v2078_v13 = vpop.f32.mrb[13].mxu0  ;;  %v2080_v46 = vpop.f32.mrb[13].mxu1 }
 0x113   : > { %v800_v1 = vadd.f32 %v2240_v59, %v704_v7  ;;  %v816_v57 = vadd.f32 %v2241_v22, %v720_v62  ;;  %v834_v37 = vmax.f32 %v802_v31, 0.0  ;;  %v850_v36 = vmax.f32 %v818_v52, 0.0  ;;  %v2090_v28 = vpop.f32.mrb[14].mxu1 }
 0x114   : > { %v959_v19 = vmax.f32 %v927_v8, 0.0  ;;  %v975_v23 = vmax.f32 %v943_v33, 0.0  ;;  %v2242_v5 = vunpack.c.h.bf16 %v1865_v48  ;;  %v2243_v42 = vunpack.c.h.bf16 %v1868_v49  ;;  %v2088_v49 = vpop.f32.mrb[14].mxu0 }
 0x115   : > { %v832_v41 = vmax.f32 %v800_v1, 0.0  ;;  %v848_v26 = vmax.f32 %v816_v57, 0.0  ;;  %v670_v43 = vmul.f32 %v1635_v34, %v1927_v20  ;;  %v686_v6 = vmul.f32 %v1651_v35, %v1927_v20 }
 0x116   : > { %v930_v44 = vadd.f32 %v2242_v5, %v834_v37  ;;  %v946_v40 = vadd.f32 %v2243_v42, %v850_v36  ;;  %v2244_v63 = vunpack.c.h.bf16 %v1875_v54  ;;  %v2245_v7 = vunpack.c.h.bf16 %v1878_v55  ;;  %v2094_v54 = vpop.f32.mrb[15].mxu0  ;;  %v2096_v55 = vpop.f32.mrb[15].mxu1 }
 0x117   : > { %v668_v48 = vmul.f32 %v1927_v20, %v558_v25  ;;  %v684_v0 = vmul.f32 %v1927_v20, %v622_v38  ;;  %v709_v29 = vadd.f32 %v1952_v16, %v670_v43  ;;  %v725_v50 = vadd.f32 %v1952_v16, %v686_v6 }
 0x118   : > { %v928_v58 = vadd.f32 %v2244_v63, %v832_v41  ;;  %v944_v62 = vadd.f32 %v2245_v7, %v848_v26  ;;  %v962_v34 = vmax.f32 %v930_v44, 0.0  ;;  %v978_v35 = vmax.f32 %v946_v40, 0.0  ;;  %v2124_v44 = vld [vmem:[%s1814_s26 + $0x70] sm:$0xff]  }
 0x119   : > { %v707_v30 = vadd.f32 %v1952_v16, %v668_v48  ;;  %v723_v31 = vadd.f32 %v1952_v16, %v684_v0  ;;  %v2246_v53 = vunpack.c.l.bf16 %v1885_v60  ;;  %v2247_v32 = vunpack.c.l.bf16 %v1888_v61 }
 0x11a   : > { %v960_v25 = vmax.f32 %v928_v58, 0.0  ;;  %v976_v38 = vmax.f32 %v944_v62, 0.0  ;;  %v1478_v51 = vpack.c.bf16 %v962_v34, %v961_v14  ;;  %v1518_v52 = vpack.c.bf16 %v978_v35, %v977_v24  ;;  %v2109_v14 = vld [vmem:[%s1814_s26 + $0x38] sm:$0xff]  }
 0x11b   : > { %v805_v8 = vadd.f32 %v2246_v53, %v709_v29  ;;  %v821_v33 = vadd.f32 %v2247_v32, %v725_v50  ;;  %v2248_v22 = vunpack.c.l.bf16 %v1898_v3  ;;  %v2249_v37 = vunpack.c.l.bf16 %v1901_v4  ;;  %v2112_v24 = vld [vmem:[%s1814_s26 + $0x78] sm:$0xff]  }
 0x11c   : > { %v1473_v59 = vpack.c.bf16 %v960_v25, %v959_v19  ;;  %v1513_v1 = vpack.c.bf16 %v976_v38, %v975_v23  ;;  %1572 = vst [vmem:[%s2016_s10 + $0x18] sm:$0xff] %v1478_v51   ;;  %1580 = vst [vmem:[%s2016_s10 + $0x58] sm:$0xff] %v1518_v52   ;;  %v671_v5 = vmul.f32 %v2040_v45, %v1927_v20  ;;  %v2121_v23 = vld [vmem:[%s1814_s26 + $0x30] sm:$0xff]   ;;  %v1458_v58 = vunpack.c.l.bf16 %v2112_v24 }
 0x11d   : > { %v803_v57 = vadd.f32 %v2248_v22, %v707_v30  ;;  %v819_v36 = vadd.f32 %v2249_v37, %v723_v31  ;;  %v837_v41 = vmax.f32 %v805_v8, 0.0  ;;  %v853_v26 = vmax.f32 %v821_v33, 0.0 }
 0x11e   : > { %v687_v19 = vmul.f32 %v2042_v56, %v1927_v20  ;;  %1571 = vst [vmem:[%s2016_s10 + $0x10] sm:$0xff] %v1473_v59   ;;  %1579 = vst [vmem:[%s2016_s10 + $0x50] sm:$0xff] %v1513_v1   ;;  %v669_v43 = vmul.f32 %v1927_v20, %v2046_v47  ;;  %v685_v6 = vmul.f32 %v1927_v20, %v2048_v18  ;;  %v1426_v56 = vunpack.c.l.bf16 %v2109_v14 }
 0x11f   : > { %v835_v42 = vmax.f32 %v803_v57, 0.0  ;;  %v851_v40 = vmax.f32 %v819_v36, 0.0  ;;  %v710_v63 = vadd.f32 %v1952_v16, %v671_v5  ;;  %v1422_v48 = vunpack.c.l.bf16 %v2121_v23 }
 0x120   : > { %v726_v45 = vadd.f32 %v1952_v16, %v687_v19  ;;  %v708_v7 = vadd.f32 %v1952_v16, %v669_v43  ;;  %v724_v62 = vadd.f32 %v1952_v16, %v685_v6  ;;  %v1454_v0 = vunpack.c.l.bf16 %v2124_v44 }
 0x121   : > { %v2250_v47 = vunpack.c.l.bf16 %v1895_v2  ;;  %v2251_v18 = vunpack.c.l.bf16 %v1908_v9  ;;  %v2252_v29 = vunpack.c.h.bf16 %v1885_v60  ;;  %v2253_v25 = vunpack.c.h.bf16 %v1888_v61 }
 0x122   : > { %v2254_v30 = vunpack.c.l.bf16 %v1911_v10  ;;  %v2255_v51 = vunpack.c.l.bf16 %v1914_v11  ;;  %v2256_v53 = vunpack.c.h.bf16 %v1898_v3  ;;  %v2257_v32 = vunpack.c.h.bf16 %v1901_v4 }
 0x123   : > { %v933_v34 = vadd.f32 %v2250_v47, %v837_v41  ;;  %v949_v35 = vadd.f32 %v2251_v18, %v853_v26  ;;  %v806_v50 = vadd.f32 %v2252_v29, %v710_v63  ;;  %v822_v38 = vadd.f32 %v2253_v25, %v726_v45 }
 0x124   : > { %v931_v31 = vadd.f32 %v2254_v30, %v835_v42  ;;  %v947_v52 = vadd.f32 %v2255_v51, %v851_v40  ;;  %v804_v8 = vadd.f32 %v2256_v53, %v708_v7  ;;  %v820_v33 = vadd.f32 %v2257_v32, %v724_v62 }
 0x125   : > { %v838_v59 = vmax.f32 %v806_v50, 0.0  ;;  %v854_v1 = vmax.f32 %v822_v38, 0.0  ;;  %v674_v60 = vmul.f32 %v2068_v27, %v1927_v20  ;;  %v690_v61 = vmul.f32 %v2070_v39, %v1927_v20 }
 0x126   : > { %v836_v22 = vmax.f32 %v804_v8, 0.0  ;;  %v852_v57 = vmax.f32 %v820_v33, 0.0  ;;  %v672_v37 = vmul.f32 %v1927_v20, %v2078_v13  ;;  %v688_v3 = vmul.f32 %v1927_v20, %v2080_v46 }
 0x127   : > { %v2258_v36 = vunpack.c.h.bf16 %v1895_v2  ;;  %v2259_v41 = vunpack.c.h.bf16 %v1908_v9  ;;  %v713_v5 = vadd.f32 %v1952_v16, %v674_v60  ;;  %v729_v27 = vadd.f32 %v1952_v16, %v690_v61 }
 0x128   : > { %v2260_v39 = vunpack.c.h.bf16 %v1911_v10  ;;  %v2261_v42 = vunpack.c.h.bf16 %v1914_v11  ;;  %v711_v13 = vadd.f32 %v1952_v16, %v672_v37  ;;  %v727_v46 = vadd.f32 %v1952_v16, %v688_v3 }
 0x129   : > { %v934_v4 = vadd.f32 %v2258_v36, %v838_v59  ;;  %v950_v26 = vadd.f32 %v2259_v41, %v854_v1  ;;  %v965_v43 = vmax.f32 %v933_v34, 0.0  ;;  %v981_v2 = vmax.f32 %v949_v35, 0.0 }
 0x12a   : > { %v932_v19 = vadd.f32 %v2260_v39, %v836_v22  ;;  %v948_v40 = vadd.f32 %v2261_v42, %v852_v57  ;;  %v963_v63 = vmax.f32 %v931_v31, 0.0  ;;  %v979_v45 = vmax.f32 %v947_v52, 0.0 }
 0x12b   : > { %v966_v9 = vmax.f32 %v934_v4, 0.0  ;;  %v982_v6 = vmax.f32 %v950_v26, 0.0  ;;  %v2262_v11 = vunpack.c.l.bf16 %v1934_v15  ;;  %v2263_v29 = vunpack.c.l.bf16 %v1937_v17 }
 0x12c   : > { %v964_v7 = vmax.f32 %v932_v19, 0.0  ;;  %v980_v62 = vmax.f32 %v948_v40, 0.0  ;;  %v2264_v35 = vunpack.c.l.bf16 %v1944_v12  ;;  %v2265_v30 = vunpack.c.l.bf16 %v1947_v21 }
 0x12d   : > { %v1488_v10 = vpack.c.bf16 %v966_v9, %v965_v43  ;;  %v1528_v47 = vpack.c.bf16 %v982_v6, %v981_v2  ;;  %v809_v18 = vadd.f32 %v2262_v11, %v713_v5  ;;  %v825_v50 = vadd.f32 %v2263_v29, %v729_v27 }
 0x12e   : > { %v1483_v34 = vpack.c.bf16 %v964_v7, %v963_v63  ;;  %v1523_v25 = vpack.c.bf16 %v980_v62, %v979_v45  ;;  %v807_v38 = vadd.f32 %v2264_v35, %v711_v13  ;;  %v823_v31 = vadd.f32 %v2265_v30, %v727_v46 }
 0x12f   : > { %1574 = vst [vmem:[%s2016_s10 + $0x28] sm:$0xff] %v1488_v10   ;;  %1582 = vst [vmem:[%s2016_s10 + $0x68] sm:$0xff] %v1528_v47   ;;  %v675_v51 = vmul.f32 %v2088_v49, %v1927_v20  ;;  %v1363_v52 = vunpack.c.h.bf16 %v1934_v15  ;;  %v691_v53 = vmul.f32 %v2090_v28, %v1927_v20  ;;  %v1395_v8 = vunpack.c.h.bf16 %v1937_v17 }
 0x130   : > { %1573 = vst [vmem:[%s2016_s10 + $0x20] sm:$0xff] %v1483_v34   ;;  %1581 = vst [vmem:[%s2016_s10 + $0x60] sm:$0xff] %v1523_v25   ;;  %v673_v32 = vmul.f32 %v1927_v20, %v2094_v54  ;;  %v1359_v33 = vunpack.c.h.bf16 %v1944_v12  ;;  %v689_v59 = vmul.f32 %v1927_v20, %v2096_v55  ;;  %v1391_v1 = vunpack.c.h.bf16 %v1947_v21 }
 0x131   : > { %v841_v49 = vmax.f32 %v809_v18, 0.0  ;;  %v857_v60 = vmax.f32 %v825_v50, 0.0  ;;  %v714_v15 = vadd.f32 %v1952_v16, %v675_v51  ;;  %v730_v28 = vadd.f32 %v1952_v16, %v691_v53 }
 0x132   : > { %v839_v61 = vmax.f32 %v807_v38, 0.0  ;;  %v855_v17 = vmax.f32 %v823_v31, 0.0  ;;  %v712_v22 = vadd.f32 %v1952_v16, %v673_v32  ;;  %v728_v57 = vadd.f32 %v1952_v16, %v689_v59 }
 0x133   : > { %v810_v54 = vadd.f32 %v1363_v52, %v714_v15  ;;  %v1427_v12 = vunpack.c.h.bf16 %v2109_v14  ;;  %v826_v37 = vadd.f32 %v1395_v8, %v730_v28  ;;  %v1459_v20 = vunpack.c.h.bf16 %v2112_v24 }
 0x134   : > { %v808_v55 = vadd.f32 %v1359_v33, %v712_v22  ;;  %v1423_v21 = vunpack.c.h.bf16 %v2121_v23  ;;  %v824_v3 = vadd.f32 %v1391_v1, %v728_v57  ;;  %v1455_v36 = vunpack.c.h.bf16 %v2124_v44 }
 0x135   : > { %v937_v4 = vadd.f32 %v1426_v56, %v841_v49  ;;  %v953_v41 = vadd.f32 %v1458_v58, %v857_v60  ;;  %v842_v26 = vmax.f32 %v810_v54, 0.0  ;;  %v858_v16 = vmax.f32 %v826_v37, 0.0 }
 0x136   : > { %v935_v5 = vadd.f32 %v1422_v48, %v839_v61  ;;  %v951_v27 = vadd.f32 %v1454_v0, %v855_v17  ;;  %v840_v39 = vmax.f32 %v808_v55, 0.0  ;;  %v856_v19 = vmax.f32 %v824_v3, 0.0 }
 0x137   : > { %v938_v42 = vadd.f32 %v1427_v12, %v842_v26  ;;  %v954_v40 = vadd.f32 %v1459_v20, %v858_v16  ;;  %v969_v24 = vmax.f32 %v937_v4, 0.0  ;;  %v985_v56 = vmax.f32 %v953_v41, 0.0 }
 0x138   : > { %v936_v13 = vadd.f32 %v1423_v21, %v840_v39  ;;  %v952_v14 = vadd.f32 %v1455_v36, %v856_v19  ;;  %v967_v43 = vmax.f32 %v935_v5, 0.0  ;;  %v983_v23 = vmax.f32 %v951_v27, 0.0 }
 0x139   : > { %v970_v58 = vmax.f32 %v938_v42, 0.0  ;;  %v986_v46 = vmax.f32 %v954_v40, 0.0 }
 0x13a   : > { %v968_v48 = vmax.f32 %v936_v13, 0.0  ;;  %v984_v2 = vmax.f32 %v952_v14, 0.0 }
 0x13b   : > { %v1498_v44 = vpack.c.bf16 %v970_v58, %v969_v24  ;;  %v1538_v0 = vpack.c.bf16 %v986_v46, %v985_v56 }
 0x13c   : > { %v1493_v9 = vpack.c.bf16 %v968_v48, %v967_v43  ;;  %v1533_v6 = vpack.c.bf16 %v984_v2, %v983_v23 }
 0x13d   : > { %1576 = vst [vmem:[%s2016_s10 + $0x38] sm:$0xff] %v1498_v44   ;;  %1584 = vst [vmem:[%s2016_s10 + $0x78] sm:$0xff] %v1538_v0  }
 0x13e   : > { %1575 = vst [vmem:[%s2016_s10 + $0x30] sm:$0xff] %v1493_v9   ;;  %1583 = vst [vmem:[%s2016_s10 + $0x70] sm:$0xff] %v1533_v6  }
 0x13f PF: > { %s16_s21 = sadd.s32 1, %s1711_s21  }
 0x140   : > { %p13_p4 = scmp.ge.s32.totalorder %s16_s21, 4  }
 0x142   :  { %15 = sbr.rel (!%p13_p4) target bundleno = 1 (0x1), region = 80 }

// kernel: _lambda_.17
= control target key start
LH: loop header
LB: loop body
LE: loop exit
PB: predicated region body
PF: predicated region fallthrough
CT: control target
= control target key end

     0   :  { %vm142_vm0 = vcmask 1046528   ;;  %vm570_vm1 = vcmask 1045504   ;;  %s5022_s1 = inlined_call_operand.vmem [shape: bf16[9,128,128], index: 1, kind: input, shape index: {}]   ;;  %s5023_s0 = inlined_call_operand.vmem [shape: bf16[1,2,10,10,128], index: 0, kind: input, shape index: {}]   ;;  %s5024_s2 = inlined_call_operand.vmem [shape: f32[1,128], index: 2, kind: input, shape index: {}]   ;;  %s5025_s3 = inlined_call_operand.vmem [shape: f32[1,128], index: 3, kind: input, shape index: {}]   ;;  %s5026_s4 = inlined_call_operand.vmem [shape: bf16[2,8,8,128], index: 4, kind: output, shape index: {}]  }
   0x1   :  { %v3630_v0 = vld [vmem:[%s5022_s1 + $0x40] sm:$0xff]   ;;  %v3632_v2 = vld [vmem:[%s5022_s1 + $0x48] sm:$0xff]   ;;  %v3634_v4 = vld [vmem:[%s5022_s1 + $0x50] sm:$0xff]  }
   0x2   :  { %v3631_v1 = vld [vmem:[%s5022_s1 + $0x100] sm:$0xff]   ;;  %3198 = vmatprep.subr.bf16.mxu1 %v3630_v0  ;;  %v3633_v3 = vld [vmem:[%s5022_s1 + $0x108] sm:$0xff]   ;;  %v3635_v5 = vld [vmem:[%s5022_s1 + $0x110] sm:$0xff]  }
   0x3   :  { %3326 = vmatprep.subr.bf16.mxu0 %v3631_v1  ;;  %3199 = vmatpush3.bf16.msra.mxu1 %v3630_v0  ;;  %v3636_v6 = vld [vmem:[%s5022_s1 + $0x58] sm:$0xff]   ;;  %v3638_v8 = vld [vmem:[%s5022_s1 + $0x60] sm:$0xff]   ;;  %v3640_v10 = vld [vmem:[%s5022_s1 + $0x68] sm:$0xff]  }
   0x4   :  { %3327 = vmatpush3.bf16.msra.mxu0 %v3631_v1  ;;  %3200 = vmatprep.subr.bf16.mxu1 %v3632_v2  ;;  %v3637_v7 = vld [vmem:[%s5022_s1 + $0x118] sm:$0xff]   ;;  %v3639_v9 = vld [vmem:[%s5022_s1 + $0x120] sm:$0xff]   ;;  %v3641_v11 = vld [vmem:[%s5022_s1 + $0x128] sm:$0xff]  }
   0x5   :  { %3328 = vmatprep.subr.bf16.mxu0 %v3633_v3  ;;  %v3790_v12 = vld [vmem:[%s5023_s0] sm:$0xf]  ;;  %v3795_v13 = vld [vmem:[%s5023_s0 + $0x8] sm:$0xf]  ;;  %v3800_v14 = vld [vmem:[%s5023_s0 + $0x4] sm:$0x1] }
   0x6   :  { %v38_v15 = vunpack.c.l.bf16 %v3790_v12  ;;  %v39_v16 = vunpack.c.l.bf16 %v3795_v13  ;;  %v3807_v17 = vld [vmem:[%s5023_s0 + $0xc] sm:$0x1]  ;;  %v5034_v18 = vunpack.c.l.bf16 %v3800_v14  ;;  %v2765_v19 = vld [vmem:[%s5023_s0 + $0x8] ss:$8 sps:$4 sm:$0xff]   ;;  %v3822_v22 = vld [vmem:[%s5023_s0 + $0x14] sm:$0x1] }
   0x7   :  { %3201 = vmatpush3.bf16.msra.mxu1 %v3632_v2  ;;  %v3816_v20 = vld [vmem:[%s5023_s0 + $0xc] sm:$0x1]  ;;  %v5031_v21 = vunpack.c.l.bf16 %v3807_v17  ;;  %v1075_v23 = vunpack.c.l.bf16 %v2765_v19  ;;  %v1077_v25 = vunpack.c.h.bf16 %v2765_v19  ;;  %v3828_v26 = vld [vmem:[%s5023_s0 + $0x10] sm:$0xf]  ;;  %v3833_v27 = vld [vmem:[%s5023_s0 + $0x18] sm:$0xf]  ;;  %v5047_v32 = vunpack.c.l.bf16 %v3822_v22 }
   0x8   :  { %3329 = vmatpush3.bf16.msra.mxu0 %v3633_v3  ;;  %3202 = vmatprep.subr.bf16.mxu1 %v3634_v4  ;;  %v5048_v24 = vunpack.c.l.bf16 %v3816_v20  ;;  %v3642_v28 = vld [vmem:[%s5022_s1 + $0x70] sm:$0xff]   ;;  %v143_v29 = vrot.slane %v38_v15, 1  ;;  %v144_v30 = vrot.slane %v5034_v18, 1  ;;  %v146_v31 = vrot.slane %v39_v16, 1  ;;  %v3853_v38 = vld [vmem:[%s5023_s0 + $0x1c] sm:$0x1] }
   0x9   :  { %3330 = vmatprep.subr.bf16.mxu0 %v3635_v5  ;;  %v3844_v33 = vld [vmem:[%s5023_s0 + $0x14] sm:$0x1]  ;;  %v147_v34 = vrot.slane %v5031_v21, 1  ;;  %v1139_v35 = vrot.slane %v1075_v23, 1  ;;  %v1142_v37 = vrot.slane %v1077_v25, 1  ;;  %v1143_v41 = vrot.slane %v5047_v32, 1 }
   0xa   :  { %v1140_v36 = vrot.slane %v5048_v24, 1  ;;  %v3643_v39 = vld [vmem:[%s5022_s1 + $0x130] sm:$0xff]   ;;  %v145_v40 = vsel %vm142_vm0, %v143_v29, %v144_v30  ;;  %v40_v42 = vunpack.c.l.bf16 %v3828_v26  ;;  %v41_v43 = vunpack.c.l.bf16 %v3833_v27  ;;  %v2769_v48 = vld [vmem:[%s5023_s0 + $0x18] ss:$8 sps:$4 sm:$0xff]   ;;  %v2770_v49 = vld [vmem:[%s5023_s0 + $0x1c] sm:$0x1] }
   0xb   :  { %3203 = vmatpush3.bf16.msra.mxu1 %v3634_v4  ;;  %v148_v44 = vsel %vm142_vm0, %v146_v31, %v147_v34  ;;  %v5036_v46 = vunpack.c.l.bf16 %v3844_v33  ;;  %v5035_v47 = vunpack.c.l.bf16 %v3853_v38  ;;  %v2772_v50 = vld [vmem:[%s5023_s0 + $0x24] sm:$0x1]  ;;  %v1144_v52 = vsel %vm142_vm0, %v1142_v37, %v1143_v41  ;;  %v3644_v55 = vld [vmem:[%s5022_s1 + $0x78] sm:$0xff]   ;;  %v3892_v2 = vld [vmem:[%s5023_s0 + $0x20] sm:$0xf] }
   0xc   :  { %3331 = vmatpush3.bf16.msra.mxu0 %v3635_v5  ;;  %3204 = vmatprep.subr.bf16.mxu1 %v3636_v6  ;;  %v1141_v45 = vsel %vm142_vm0, %v1139_v35, %v1140_v36  ;;  %v207_v51 = vpack.c.bf16 %v148_v44, %v145_v40  ;;  %v149_v53 = vrot.slane %v40_v42, 1  ;;  %v152_v54 = vrot.slane %v41_v43, 1  ;;  %v3645_v59 = vld [vmem:[%s5022_s1 + $0x138] sm:$0xff]   ;;  %v3897_v3 = vld [vmem:[%s5023_s0 + $0x28] sm:$0xf]  ;;  %v3647_v19 = vld [vmem:[%s5022_s1 + $0x140] sm:$0xff]  }
   0xd   :  { %3332 = vmatprep.subr.bf16.mxu0 %v3637_v7  ;;  %v1203_v56 = vpack.c.bf16 %v1144_v52, %v1141_v45  ;;  %v150_v57 = vrot.slane %v5036_v46, 1  ;;  %v153_v58 = vrot.slane %v5035_v47, 1  ;;  %v1079_v60 = vunpack.c.l.bf16 %v2769_v48  ;;  %v3920_v25 = vld [vmem:[%s5023_s0 + $0x2c] sm:$0x1]  ;;  %v2773_v34 = vld [vmem:[%s5023_s0 + $0x28] ss:$8 sps:$4 sm:$0xff]  }
   0xe   :  { %3214 = vmatprep.mubr.bf16.mxu1 %v207_v51  ;;  %v1080_v61 = vunpack.c.l.bf16 %v2770_v49  ;;  %v1081_v62 = vunpack.c.h.bf16 %v2769_v48  ;;  %v1082_v1 = vunpack.c.l.bf16 %v2772_v50  ;;  %v42_v23 = vunpack.c.l.bf16 %v3892_v2  ;;  %v3932_v35 = vld [vmem:[%s5023_s0 + $0x2c] sm:$0x1]  ;;  %v3937_v36 = vld [vmem:[%s5023_s0 + $0x34] sm:$0x1]  ;;  %v3947_v43 = vld [vmem:[%s5023_s0 + $0x30] sm:$0xf] }
   0xf   :  { %3205 = vmatpush3.bf16.msra.mxu1 %v3636_v6  ;;  %3342 = vmatprep.mubr.bf16.mxu0 %v1203_v56  ;;  %v151_v63 = vsel %vm142_vm0, %v149_v53, %v150_v57  ;;  %v154_v0 = vsel %vm142_vm0, %v152_v54, %v153_v58  ;;  %v3646_v6 = vld [vmem:[%s5022_s1] sm:$0xff]   ;;  %v43_v29 = vunpack.c.l.bf16 %v3897_v3  ;;  %v5029_v31 = vunpack.c.l.bf16 %v3920_v25  ;;  %v3952_v44 = vld [vmem:[%s5023_s0 + $0x38] sm:$0xf]  ;;  %v3649_v48 = vld [vmem:[%s5022_s1 + $0x148] sm:$0xff]  }
  0x10   :  { %3333 = vmatpush3.bf16.msra.mxu0 %v3637_v7  ;;  %3206 = vmatprep.subr.bf16.mxu1 %v3638_v8  ;;  %v208_v5 = vpack.c.bf16 %v154_v0, %v151_v63  ;;  %v1145_v7 = vrot.slane %v1079_v60, 1  ;;  %v3909_v15 = vrot.slane %v1080_v61, 2  ;;  %v3911_v16 = vrot.slane %v1082_v1, 2  ;;  %v3964_v52 = vld [vmem:[%s5023_s0 + $0x34] sm:$0x1] }
  0x11   :  { %3334 = vmatprep.subr.bf16.mxu0 %v3639_v9  ;;  %v155_v40 = vrot.slane %v42_v23, 1  ;;  %v1083_v41 = vunpack.c.l.bf16 %v2773_v34  ;;  %v5046_v42 = vunpack.c.l.bf16 %v3932_v35  ;;  %v158_v50 = vrot.slane %v43_v29, 1  ;;  %5065 = vst [vmem:[#allocation2_spill] sm:$0xff] %v3964_v52  ;;  %v3972_v57 = vld [vmem:[%s5023_s0 + $0x3c] sm:$0x1] }
  0x12   :  { %v159_v51 = vrot.slane %v5029_v31, 1  ;;  %v1085_v53 = vunpack.c.h.bf16 %v2773_v34  ;;  %v5045_v54 = vunpack.c.l.bf16 %v3937_v36  ;;  %5066 = vst [vmem:[#allocation3_spill] sm:$0xff] %v3972_v57  ;;  %v3984_v63 = vld [vmem:[%s5023_s0 + $0x3c] sm:$0x1]  ;;  %v5027_v23 = vunpack.c.l.bf16 %v3972_v57  ;;  %v4002_v34 = vld [vmem:[%s5022_s1 + $0x150] sm:$0xff]  }
  0x13   :  { %3207 = vmatpush3.bf16.msra.mxu1 %v3638_v8  ;;  %v1146_v8 = vrot.slane %v1080_v61, 1  ;;  %v1152_v56 = vrot.slane %v5046_v42, 1  ;;  %v45_v61 = vunpack.c.l.bf16 %v3952_v44  ;;  %v4109_v18 = vld [vmem:[%s5023_s0 + $0x74] sm:$0x1]  ;;  %v4183_v42 = vld [vmem:[%s5023_s0 + $0x80] sm:$0xf]  ;;  %v5077_v57 = vunpack.c.l.bf16 %v3816_v20 }
  0x14   :  { %3335 = vmatpush3.bf16.msra.mxu0 %v3639_v9  ;;  %3208 = vmatprep.subr.bf16.mxu1 %v3640_v10  ;;  %v1148_v9 = vrot.slane %v1081_v62, 1  ;;  %v160_v60 = vsel %vm142_vm0, %v158_v50, %v159_v51  ;;  %v2777_v62 = vld [vmem:[%s5023_s0 + $0x38] ss:$8 sps:$4 sm:$0xff]   ;;  %v165_v50 = vrot.slane %v5027_v23, 1  ;;  %v4076_v23 = vld [vmem:[%s5023_s0 + $0x64] sm:$0x1] }
  0x15   :  { %3336 = vmatprep.subr.bf16.mxu0 %v3641_v11  ;;  %v164_v29 = vrot.slane %v45_v61, 1  ;;  %5069 = vst [vmem:[#allocation6_spill] sm:$0xff] %v4076_v23  ;;  %v4194_v4 = vld [vmem:[%s5023_s0 + $0x84] sm:$0x1]  ;;  %v4199_v32 = vld [vmem:[%s5023_s0 + $0x8c] sm:$0x1] }
  0x16   :  { %5073 = vst [vmem:[#allocation10_spill] sm:$0xff] %v4194_v4  ;;  %5074 = vst [vmem:[#allocation11_spill] sm:$0xff] %v4199_v32  ;;  %v2825_v20 = vld [vmem:[%s5023_s0 + $0x28] sm:$0xe] }
  0x17   :  { %3209 = vmatpush3.bf16.msra.mxu1 %v3640_v10  ;;  %v3907_v10 = vld [vmem:[%s5023_s0 + $0x24] sm:$0x1] }
  0x18   :  { %3337 = vmatpush3.bf16.msra.mxu0 %v3641_v11  ;;  %3210 = vmatprep.subr.bf16.mxu1 %v3642_v28  ;;  %v1149_v11 = vrot.slane %v1082_v1, 1  ;;  %v5030_v30 = vunpack.c.l.bf16 %v3907_v10 }
  0x19   :  { %3338 = vmatprep.subr.bf16.mxu0 %v3643_v39 }
  0x1a   :  { %v1150_v37 = vsel %vm142_vm0, %v1148_v9, %v1149_v11  ;;  %v156_v49 = vrot.slane %v5030_v30, 1  ;;  %v3650_v9 = vld [vmem:[%s5022_s1 + $0x10] sm:$0xff]   ;;  %v3995_v11 = vld [vmem:[%s5023_s0 + $0x44] sm:$0x1] }
  0x1b   :  { %3211 = vmatpush3.bf16.msra.mxu1 %v3642_v28  ;;  %v1147_v28 = vsel %vm142_vm0, %v1145_v7, %v1146_v8  ;;  %v1154_v7 = vrot.slane %v1085_v53, 1  ;;  %v1155_v8 = vrot.slane %v5045_v54, 1  ;;  %v5038_v51 = vunpack.c.l.bf16 %v3995_v11  ;;  %v4019_v53 = vld [vmem:[%s5023_s0 + $0x58] sm:$0xf]  ;;  %v4178_v54 = vld [vmem:[%s5023_s0 + $0x84] sm:$0x1] }
  0x1c   :  { %3339 = vmatpush3.bf16.msra.mxu0 %v3643_v39  ;;  %3212 = vmatprep.subr.bf16.mxu1 %v3644_v55  ;;  %v3648_v39 = vld [vmem:[%s5022_s1 + $0x8] sm:$0xff]   ;;  %v1204_v45 = vpack.c.bf16 %v1150_v37, %v1147_v28  ;;  %v157_v58 = vsel %vm142_vm0, %v155_v40, %v156_v49  ;;  %v1087_v40 = vunpack.c.l.bf16 %v2777_v62 }
  0x1d   :  { %3340 = vmatprep.subr.bf16.mxu0 %v3645_v59  ;;  %v209_v0 = vpack.c.bf16 %v160_v60, %v157_v58  ;;  %v1156_v37 = vsel %vm142_vm0, %v1154_v7, %v1155_v8  ;;  %v47_v7 = vunpack.c.l.bf16 %v4019_v53  ;;  %v4040_v8 = vld [vmem:[%s5023_s0 + $0x5c] sm:$0x1] }
  0x1e   :  { %5068 = vst [vmem:[#allocation5_spill] sm:$0xff] %v4040_v8 }
  0x1f   :  { %3213 = vmatpush3.bf16.msra.mxu1 %v3644_v55  ;;  %v1151_v55 = vrot.slane %v1083_v41, 1  ;;  %v5039_v41 = vunpack.c.l.bf16 %v3984_v63 }
  0x20   :  { %3341 = vmatpush3.bf16.msra.mxu0 %v3645_v59  ;;  %3230 = vmatprep.subr.bf16.mxu1 %v3646_v6  ;;  %v44_v59 = vunpack.c.l.bf16 %v3947_v43 }
  0x21   :  { %3358 = vmatprep.subr.bf16.mxu0 %v3647_v19  ;;  %v1153_v1 = vsel %vm142_vm0, %v1151_v55, %v1152_v56  ;;  %v1157_v55 = vrot.slane %v1087_v40, 1  ;;  %v1158_v56 = vrot.slane %v5039_v41, 1 }
  0x22   :  { %3215 = vmatmul.mubr.bf16.vlgmr.msra.gmra.mrb[0].mxu1 %v208_v5  ;;  %v5028_v5 = vunpack.c.l.bf16 %v3964_v52  ;;  %v161_v28 = vrot.slane %v44_v59, 1  ;;  %v4027_v59 = vld [vmem:[%s5023_s0 + $0x54] sm:$0x1] }
  0x23   :  { %3343 = vmatmul.mubr.bf16.vlgmr.msra.gmra.mrb[0].mxu0 %v1204_v45  ;;  %3231 = vmatpush3.bf16.msra.mxu1 %v3646_v6  ;;  %v1089_v45 = vunpack.c.h.bf16 %v2777_v62  ;;  %v1205_v6 = vpack.c.bf16 %v1156_v37, %v1153_v1  ;;  %5067 = vst [vmem:[#allocation4_spill] sm:$0xff] %v4027_v59  ;;  %v166_v62 = vsel %vm142_vm0, %v164_v29, %v165_v50  ;;  %v3652_v1 = vld [vmem:[%s5022_s1 + $0x18] sm:$0xff]   ;;  %v5033_v40 = vunpack.c.l.bf16 %v4027_v59 }
  0x24   :  { %3359 = vmatpush3.bf16.msra.mxu0 %v3647_v19  ;;  %3232 = vmatprep.subr.bf16.mxu1 %v3648_v39  ;;  %v162_v49 = vrot.slane %v5028_v5, 1  ;;  %v4014_v19 = vld [vmem:[%s5023_s0 + $0x50] sm:$0xf]  ;;  %v1159_v29 = vsel %vm142_vm0, %v1157_v55, %v1158_v56  ;;  %v3653_v37 = vld [vmem:[%s5022_s1 + $0x158] sm:$0xff]   ;;  %v170_v56 = vrot.slane %v47_v7, 1 }
  0x25   :  { %3360 = vmatprep.subr.bf16.mxu0 %v3649_v48  ;;  %3218 = vmatprep.mubr.bf16.mxu1 %v209_v0  ;;  %v1160_v58 = vrot.slane %v1089_v45, 1  ;;  %v46_v60 = vunpack.c.l.bf16 %v4014_v19  ;;  %v1161_v0 = vrot.slane %v5038_v51, 1  ;;  %v5032_v45 = vunpack.c.l.bf16 %v4040_v8  ;;  %v4086_v7 = vld [vmem:[%s5023_s0 + $0x6c] sm:$0x1] }
  0x26   :  { %3346 = vmatprep.mubr.bf16.mxu0 %v1205_v6  ;;  %v163_v61 = vsel %vm142_vm0, %v161_v28, %v162_v49  ;;  %v4054_v6 = vld [vmem:[%s5023_s0 + $0x5c] sm:$0x1]  ;;  %v4064_v49 = vld [vmem:[%s5023_s0 + $0x60] sm:$0xf]  ;;  %5070 = vst [vmem:[#allocation7_spill] sm:$0xff] %v4086_v7  ;;  %v5041_v46 = vunpack.c.l.bf16 %v4086_v7  ;;  %v52_v8 = vunpack.c.l.bf16 %v4183_v42 }
  0x27   :  { %3233 = vmatpush3.bf16.msra.mxu1 %v3648_v39  ;;  %v2781_v39 = vld [vmem:[%s5023_s0 + $0x58] ss:$8 sps:$4 sm:$0xff]   ;;  %v210_v28 = vpack.c.bf16 %v166_v62, %v163_v61  ;;  %v1162_v50 = vsel %vm142_vm0, %v1160_v58, %v1161_v0  ;;  %v167_v55 = vrot.slane %v46_v60, 1  ;;  %v4071_v62 = vld [vmem:[%s5023_s0 + $0x68] sm:$0xf]  ;;  %v168_v58 = vrot.slane %v5033_v40, 1 }
  0x28   :  { %3361 = vmatpush3.bf16.msra.mxu0 %v3649_v48  ;;  %3234 = vmatprep.subr.bf16.mxu1 %v3650_v9  ;;  %v4059_v48 = vld [vmem:[%s5023_s0 + $0x64] sm:$0x1]  ;;  %v1091_v61 = vunpack.c.l.bf16 %v2781_v39  ;;  %v1206_v5 = vpack.c.bf16 %v1162_v50, %v1159_v29  ;;  %v171_v60 = vrot.slane %v5032_v45, 1  ;;  %v5037_v0 = vunpack.c.l.bf16 %v4054_v6  ;;  %v2785_v50 = vld [vmem:[%s5023_s0 + $0x68] ss:$8 sps:$4 sm:$0xff]   ;;  %v3660_v7 = vld [vmem:[%s5022_s1 + $0x38] sm:$0xff]  }
  0x29   :  { %3362 = vmatprep.subr.bf16.mxu0 %v4002_v34  ;;  %v1093_v31 = vunpack.c.h.bf16 %v2781_v39  ;;  %v5040_v30 = vunpack.c.l.bf16 %v4059_v48  ;;  %v3654_v29 = vld [vmem:[%s5022_s1 + $0x20] sm:$0xff]   ;;  %v169_v45 = vsel %vm142_vm0, %v167_v55, %v168_v58  ;;  %v4104_v40 = vld [vmem:[%s5023_s0 + $0x6c] sm:$0x1] }
  0x2a   :  { %3219 = vmatmul.mubr.bf16.gmra.mrb[4].mxu1 %v210_v28  ;;  %v1163_v21 = vrot.slane %v1091_v61, 1  ;;  %v48_v28 = vunpack.c.l.bf16 %v4064_v49  ;;  %v1164_v39 = vrot.slane %v5037_v0, 1  ;;  %v49_v61 = vunpack.c.l.bf16 %v4071_v62 }
  0x2b   :  { %3235 = vmatpush3.bf16.msra.mxu1 %v3650_v9  ;;  %3347 = vmatmul.mubr.bf16.gmra.mrb[4].mxu0 %v1206_v5  ;;  %v172_v9 = vsel %vm142_vm0, %v170_v56, %v171_v60  ;;  %v3655_v5 = vld [vmem:[%s5022_s1 + $0x160] sm:$0xff]   ;;  %v1166_v56 = vrot.slane %v1093_v31, 1  ;;  %v1167_v58 = vrot.slane %v5040_v30, 1  ;;  %v5042_v60 = vunpack.c.l.bf16 %v4076_v23 }
  0x2c   :  { %3236 = vmatprep.subr.bf16.mxu1 %v3652_v1  ;;  %3363 = vmatpush3.bf16.msra.mxu0 %v4002_v34  ;;  %v211_v55 = vpack.c.bf16 %v172_v9, %v169_v45  ;;  %v1165_v47 = vsel %vm142_vm0, %v1163_v21, %v1164_v39  ;;  %v173_v0 = vrot.slane %v48_v28, 1  ;;  %v176_v51 = vrot.slane %v49_v61, 1  ;;  %v3656_v9 = vld [vmem:[%s5022_s1 + $0x28] sm:$0xff]   ;;  %v4136_v61 = vld [vmem:[%s5023_s0 + $0x70] sm:$0xf] }
  0x2d   :  { %3364 = vmatprep.subr.bf16.mxu0 %v3653_v37  ;;  %v1168_v41 = vsel %vm142_vm0, %v1166_v56, %v1167_v58  ;;  %v174_v34 = vrot.slane %v5042_v60, 1  ;;  %v1095_v31 = vunpack.c.l.bf16 %v2785_v50  ;;  %v5043_v45 = vunpack.c.l.bf16 %v4104_v40  ;;  %v3657_v39 = vld [vmem:[%s5022_s1 + $0x168] sm:$0xff]   ;;  %v4150_v58 = vld [vmem:[%s5023_s0 + $0x74] sm:$0x1]  ;;  %v2789_v60 = vld [vmem:[%s5023_s0 + $0x78] ss:$8 sps:$4 sm:$0xff]  }
  0x2e   :  { %3222 = vmatprep.mubr.bf16.mxu1 %v211_v55  ;;  %v1207_v30 = vpack.c.bf16 %v1168_v41, %v1165_v47  ;;  %v177_v21 = vrot.slane %v5041_v46, 1  ;;  %v1097_v28 = vunpack.c.h.bf16 %v2785_v50  ;;  %v4141_v47 = vld [vmem:[%s5023_s0 + $0x78] sm:$0xf]  ;;  %v50_v56 = vunpack.c.l.bf16 %v4136_v61  ;;  %5071 = vst [vmem:[#allocation8_spill] sm:$0xff] %v4150_v58  ;;  %v4155_v46 = vld [vmem:[%s5023_s0 + $0x7c] sm:$0x1] }
  0x2f   :  { %3237 = vmatpush3.bf16.msra.mxu1 %v3652_v1  ;;  %v5044_v1 = vunpack.c.l.bf16 %v4109_v18  ;;  %v175_v41 = vsel %vm142_vm0, %v173_v0, %v174_v34  ;;  %v1169_v50 = vrot.slane %v1095_v31, 1  ;;  %v1170_v55 = vrot.slane %v5043_v45, 1  ;;  %5072 = vst [vmem:[#allocation9_spill] sm:$0xff] %v4155_v46  ;;  %v4167_v45 = vld [vmem:[%s5023_s0 + $0x7c] sm:$0x1] }
  0x30   :  { %3238 = vmatprep.subr.bf16.mxu1 %v3654_v29  ;;  %3365 = vmatpush3.bf16.msra.mxu0 %v3653_v37  ;;  %v178_v37 = vsel %vm142_vm0, %v176_v51, %v177_v21  ;;  %v1172_v0 = vrot.slane %v1097_v28, 1  ;;  %v51_v31 = vunpack.c.l.bf16 %v4141_v47  ;;  %v5053_v28 = vunpack.c.l.bf16 %v4150_v58 }
  0x31   :  { %3350 = vmatprep.mubr.bf16.mxu0 %v1207_v30  ;;  %v1173_v34 = vrot.slane %v5044_v1, 1  ;;  %3366 = vmatprep.subr.bf16.mxu0 %v3655_v5  ;;  %v3658_v30 = vld [vmem:[%s5022_s1 + $0x30] sm:$0xff]   ;;  %v212_v51 = vpack.c.bf16 %v178_v37, %v175_v41  ;;  %v1171_v21 = vsel %vm142_vm0, %v1169_v50, %v1170_v55  ;;  %v5052_v1 = vunpack.c.l.bf16 %v4155_v46  ;;  %v4188_v41 = vld [vmem:[%s5023_s0 + $0x88] sm:$0xf] }
  0x32   :  { %v179_v50 = vrot.slane %v50_v56, 1  ;;  %v182_v55 = vrot.slane %v51_v31, 1  ;;  %v1099_v37 = vunpack.c.l.bf16 %v2789_v60  ;;  %v1101_v31 = vunpack.c.h.bf16 %v2789_v60 }
  0x33   :  { %3239 = vmatpush3.bf16.msra.mxu1 %v3654_v29  ;;  %v1174_v29 = vsel %vm142_vm0, %v1172_v0, %v1173_v34  ;;  %v180_v0 = vrot.slane %v5053_v28, 1  ;;  %v183_v56 = vrot.slane %v5052_v1, 1  ;;  %v5054_v34 = vunpack.c.l.bf16 %v4167_v45  ;;  %v4227_v28 = vld [vmem:[%s5023_s0 + $0x94] sm:$0x1] }
  0x34   :  { %3240 = vmatprep.subr.bf16.mxu1 %v3656_v9  ;;  %3223 = vmatmul.mubr.bf16.gmra.mrb[8].mxu1 %v212_v51  ;;  %v1208_v24 = vpack.c.bf16 %v1174_v29, %v1171_v21  ;;  %v1175_v23 = vrot.slane %v1099_v37, 1  ;;  %v4214_v51 = vld [vmem:[%s5023_s0 + $0x8c] sm:$0x1]  ;;  %v3659_v21 = vld [vmem:[%s5022_s1 + $0x170] sm:$0xff]   ;;  %v53_v1 = vunpack.c.l.bf16 %v4188_v41  ;;  %v185_v46 = vrot.slane %v52_v8, 1 }
  0x35   :  { %3367 = vmatpush3.bf16.msra.mxu0 %v3655_v5  ;;  %v2793_v5 = vld [vmem:[%s5023_s0 + $0x88] ss:$8 sps:$4 sm:$0xff]   ;;  %v181_v60 = vsel %vm142_vm0, %v179_v50, %v180_v0  ;;  %v184_v29 = vsel %vm142_vm0, %v182_v55, %v183_v56  ;;  %v1176_v37 = vrot.slane %v5054_v34, 1  ;;  %v5075_v50 = vunpack.c.l.bf16 %v4178_v54 }
  0x36   :  { %3368 = vmatprep.subr.bf16.mxu0 %v3657_v39  ;;  %3351 = vmatmul.mubr.bf16.gmra.mrb[8].mxu0 %v1208_v24  ;;  %v213_v24 = vpack.c.bf16 %v184_v29, %v181_v60  ;;  %v5058_v55 = vunpack.c.l.bf16 %v4194_v4  ;;  %v5059_v34 = vunpack.c.l.bf16 %v4199_v32  ;;  %v188_v58 = vrot.slane %v53_v1, 1 }
  0x37   :  { %3241 = vmatpush3.bf16.msra.mxu1 %v3656_v9  ;;  %v1178_v9 = vrot.slane %v1101_v31, 1  ;;  %v1179_v0 = vrot.slane %v5075_v50, 1  ;;  %v1177_v56 = vsel %vm142_vm0, %v1175_v23, %v1176_v37  ;;  %v1103_v31 = vunpack.c.l.bf16 %v2793_v5  ;;  %v2821_v23 = vld [vmem:[%s5023_s0 + $0x8] sm:$0xe]  ;;  %v4256_v50 = vld [vmem:[%s5022_s1 + $0x80] sm:$0xff]  }
  0x38   :  { %3242 = vmatprep.subr.bf16.mxu1 %v3658_v30  ;;  %3226 = vmatprep.mubr.bf16.mxu1 %v213_v24  ;;  %v186_v60 = vrot.slane %v5058_v55, 1  ;;  %v5060_v29 = vunpack.c.l.bf16 %v4214_v51  ;;  %v189_v1 = vrot.slane %v5059_v34, 1  ;;  %v1105_v37 = vunpack.c.h.bf16 %v2793_v5 }
  0x39   :  { %3369 = vmatpush3.bf16.msra.mxu0 %v3657_v39  ;;  %v1180_v59 = vsel %vm142_vm0, %v1178_v9, %v1179_v0  ;;  %v3661_v39 = vld [vmem:[%s5022_s1 + $0x178] sm:$0xff]   ;;  %v2822_v9 = vld [vmem:[%s5023_s0 + $0x10] sm:$0xe]  ;;  %v1181_v55 = vrot.slane %v1103_v31, 1  ;;  %v1405_v5 = vunpack.c.l.bf16 %v2821_v23  ;;  %v2824_v23 = vld [vmem:[%s5023_s0 + $0x20] sm:$0xe] }
  0x3a   :  { %3370 = vmatprep.subr.bf16.mxu0 %v3659_v21  ;;  %v1209_v8 = vpack.c.bf16 %v1180_v59, %v1177_v56  ;;  %v187_v0 = vsel %vm142_vm0, %v185_v46, %v186_v60  ;;  %v1182_v59 = vrot.slane %v5060_v29, 1  ;;  %v4267_v56 = vld [vmem:[%s5022_s1 + $0x180] sm:$0xff]   ;;  %v190_v34 = vsel %vm142_vm0, %v188_v58, %v189_v1 }
  0x3b   :  { %3243 = vmatpush3.bf16.msra.mxu1 %v3658_v30  ;;  %v2823_v30 = vld [vmem:[%s5023_s0 + $0x18] sm:$0xe]  ;;  %v1184_v24 = vrot.slane %v1105_v37, 1  ;;  %v5076_v46 = vunpack.c.l.bf16 %v4227_v28  ;;  %v1406_v31 = vunpack.c.l.bf16 %v2822_v9  ;;  %v214_v29 = vpack.c.bf16 %v190_v34, %v187_v0 }
  0x3c   :  { %3244 = vmatprep.subr.bf16.mxu1 %v3660_v7  ;;  %3354 = vmatprep.mubr.bf16.mxu0 %v1209_v8  ;;  %v1183_v32 = vsel %vm142_vm0, %v1181_v55, %v1182_v59  ;;  %v1437_v4 = vrot.slane %v1405_v5, 2  ;;  %v1438_v8 = vrot.slane %v5077_v57, 2  ;;  %v5078_v37 = vunpack.c.l.bf16 %v3822_v22 }
  0x3d   :  { %v1185_v60 = vrot.slane %v5076_v46, 1  ;;  %3371 = vmatpush3.bf16.msra.mxu0 %v3659_v21  ;;  %v1440_v1 = vrot.slane %v1406_v31, 2  ;;  %v1407_v9 = vunpack.c.l.bf16 %v2823_v30  ;;  %3227 = vmatmul.mubr.bf16.gmra.mrb[12].mxu1 %v214_v29  ;;  %v1408_v34 = vunpack.c.l.bf16 %v2824_v23 }
  0x3e   :  { %3372 = vmatprep.subr.bf16.mxu0 %v3661_v39  ;;  %v1441_v21 = vrot.slane %v5078_v37, 2  ;;  %v1439_v52 = vsel %vm570_vm1, %v1437_v4, %v1438_v8  ;;  %v5079_v57 = vcombine.low %v3790_v12, %v3795_v13  ;;  %v1409_v4 = vunpack.c.l.bf16 %v2825_v20 }
  0x3f   :  { %v1186_v58 = vsel %vm142_vm0, %v1184_v24, %v1185_v60  ;;  %3245 = vmatpush3.bf16.msra.mxu1 %v3660_v7  ;;  %v1443_v7 = vrot.slane %v1407_v9, 2  ;;  %v5080_v55 = vunpack.c.l.bf16 %v3932_v35  ;;  %v1446_v0 = vrot.slane %v1408_v34, 2  ;;  %v2827_v35 = vld [vmem:[%s5023_s0 + $0x38] sm:$0xe]  ;;  %v3667_v34 = vld [vmem:[%s5022_s1 + $0x188] sm:$0xff]  }
  0x40   :  { %v1210_v46 = vpack.c.bf16 %v1186_v58, %v1183_v32  ;;  %3262 = vmatprep.subr.bf16.mxu1 %v4256_v50  ;;  %3246 = vmatprep.mubr.bf16.mxu1 %v5079_v57  ;;  %v1442_v22 = vsel %vm570_vm1, %v1440_v1, %v1441_v21  ;;  %v2826_v32 = vld [vmem:[%s5023_s0 + $0x30] sm:$0xe]  ;;  %v5081_v12 = vunpack.c.l.bf16 %v3937_v36  ;;  %v2654_v59 = vcombine.low %v3828_v26, %v3833_v27  ;;  %v3666_v26 = vld [vmem:[%s5022_s1 + $0x88] sm:$0xff]  }
  0x41   :  { %3373 = vmatpush3.bf16.msra.mxu0 %v3661_v39  ;;  %v1450_v29 = vrot.slane %v5080_v55, 2  ;;  %v1501_v24 = vpack.c.bf16 %v1442_v22, %v1439_v52  ;;  %v1410_v39 = vunpack.c.l.bf16 %v2826_v32  ;;  %v1445_v5 = vsel %vm570_vm1, %v1443_v7, %v3909_v15  ;;  %v2828_v52 = vld [vmem:[%s5023_s0 + $0x40] sm:$0xe] }
  0x42   :  { %3355 = vmatmul.mubr.bf16.gmra.mrb[12].mxu0 %v1210_v46  ;;  %3390 = vmatprep.subr.bf16.mxu0 %v4267_v56  ;;  %v1453_v13 = vrot.slane %v5081_v12, 2  ;;  %v1449_v30 = vrot.slane %v1409_v4, 2  ;;  %v1448_v36 = vsel %vm570_vm1, %v1446_v0, %v3911_v16  ;;  %v1411_v60 = vunpack.c.l.bf16 %v2827_v35  ;;  %v3670_v4 = vld [vmem:[%s5022_s1 + $0x90] sm:$0xff]  }
  0x43   :  { %3374 = vmatprep.mubr.bf16.mxu0 %v1501_v24  ;;  %v1452_v27 = vrot.slane %v1410_v39, 2  ;;  %v1412_v15 = vunpack.c.l.bf16 %v2828_v52  ;;  %v2655_v31 = vcombine.low %v3892_v2, %v3897_v3  ;;  %v5082_v8 = vunpack.c.l.bf16 %v3984_v63  ;;  %v2829_v2 = vld [vmem:[%s5023_s0 + $0x58] sm:$0xe]  ;;  %v2830_v3 = vld [vmem:[%s5023_s0 + $0x60] sm:$0xe] }
  0x44   :  { %v1451_v23 = vsel %vm570_vm1, %v1449_v30, %v1450_v29  ;;  %v5083_v1 = vunpack.c.l.bf16 %v3995_v11  ;;  %v1502_v21 = vpack.c.bf16 %v1448_v36, %v1445_v5  ;;  %v1455_v9 = vrot.slane %v1411_v60, 2  ;;  %v2831_v24 = vld [vmem:[%s5023_s0 + $0x68] sm:$0xe]  ;;  %v2834_v60 = vld [vmem:[%s5023_s0 + $0x80] sm:$0xe] }
  0x45   :  { %v1456_v58 = vrot.slane %v5082_v8, 2  ;;  %v1454_v16 = vsel %vm570_vm1, %v1452_v27, %v1453_v13  ;;  %v1458_v46 = vrot.slane %v1412_v15, 2  ;;  %3247 = vmatmul.mubr.bf16.vlgmr.msra.gmra.mrb[0].mxu1 %v2654_v59  ;;  %v1413_v63 = vunpack.c.l.bf16 %v2829_v2  ;;  %v3671_v13 = vld [vmem:[%s5022_s1 + $0x190] sm:$0xff]   ;;  %v3672_v59 = vld [vmem:[%s5022_s1 + $0x98] sm:$0xff]   ;;  %v3676_v2 = vld [vmem:[%s5022_s1 + $0xa0] sm:$0xff]  }
  0x46   :  { %v1459_v37 = vrot.slane %v5083_v1, 2  ;;  %v1503_v20 = vpack.c.bf16 %v1454_v16, %v1451_v23  ;;  %v1414_v11 = vunpack.c.l.bf16 %v2830_v3  ;;  %v5084_v57 = vunpack.c.l.bf16 %v4054_v6  ;;  %3263 = vmatpush3.bf16.msra.mxu1 %v4256_v50  ;;  %3250 = vmatprep.mubr.bf16.mxu1 %v2655_v31  ;;  %v2832_v6 = vld [vmem:[%s5023_s0 + $0x70] sm:$0xe]  ;;  %v2833_v27 = vld [vmem:[%s5023_s0 + $0x78] sm:$0xe] }
  0x47   :  { %v5085_v7 = vunpack.c.l.bf16 %v4059_v48  ;;  %v1457_v55 = vsel %vm570_vm1, %v1455_v9, %v1456_v58  ;;  %3264 = vmatprep.subr.bf16.mxu1 %v3666_v26  ;;  %v1461_v48 = vrot.slane %v1413_v63, 2  ;;  %v1415_v0 = vunpack.c.l.bf16 %v2831_v24  ;;  %v2835_v1 = vld [vmem:[%s5023_s0 + $0x88] sm:$0xe] }
  0x48   :  { %v1462_v22 = vrot.slane %v5084_v57, 2  ;;  %v1460_v29 = vsel %vm570_vm1, %v1458_v46, %v1459_v37  ;;  %v1464_v50 = vrot.slane %v1414_v11, 2  ;;  %v1416_v39 = vunpack.c.l.bf16 %v2832_v6  ;;  %v2836_v37 = vld [vmem:[%s5023_s0 + $0x90] sm:$0xe] }
  0x49   :  { %v1465_v32 = vrot.slane %v5085_v7, 2  ;;  %v2656_v12 = vcombine.low %v3947_v43, %v3952_v44  ;;  %v5086_v35 = vunpack.c.l.bf16 %v4104_v40  ;;  %v5087_v52 = vunpack.c.l.bf16 %v4109_v18  ;;  %v3673_v40 = vld [vmem:[%s5022_s1 + $0x198] sm:$0xff]  }
  0x4a   :  { %3375 = vmatmul.mubr.bf16.vlgmr.msra.gmra.mrb[0].mxu0 %v1502_v21  ;;  %v1463_v5 = vsel %vm570_vm1, %v1461_v48, %v1462_v22  ;;  %3265 = vmatpush3.bf16.msra.mxu1 %v3666_v26  ;;  %v1504_v43 = vpack.c.bf16 %v1460_v29, %v1457_v55  ;;  %v2657_v44 = vcombine.low %v4014_v19, %v4019_v53  ;;  %v1467_v18 = vrot.slane %v1415_v0, 2  ;;  %v522_v55 = vld [vmem:[%s5023_s0] sm:$0xe] }
  0x4b   :  { %3391 = vmatpush3.bf16.msra.mxu0 %v4267_v56  ;;  %3378 = vmatprep.mubr.bf16.mxu0 %v1503_v20  ;;  %v1466_v30 = vsel %vm570_vm1, %v1464_v50, %v1465_v32  ;;  %v1468_v56 = vrot.slane %v5086_v35, 2  ;;  %v1471_v36 = vrot.slane %v5087_v52, 2  ;;  %v1470_v15 = vrot.slane %v1416_v39, 2 }
  0x4c   :  { %3392 = vmatprep.subr.bf16.mxu0 %v3667_v34  ;;  %3266 = vmatprep.subr.bf16.mxu1 %v3670_v4  ;;  %v1417_v26 = vunpack.c.l.bf16 %v2833_v27  ;;  %v1418_v31 = vunpack.c.l.bf16 %v2834_v60  ;;  %v1505_v23 = vpack.c.bf16 %v1466_v30, %v1463_v5  ;;  %v5088_v19 = vunpack.c.l.bf16 %v4167_v45  ;;  %v525_v5 = vld [vmem:[%s5023_s0 + $0x18] sm:$0xe] }
  0x4d   :  { %v5089_v8 = vunpack.c.l.bf16 %v4178_v54  ;;  %3251 = vmatmul.mubr.bf16.gmra.mrb[4].mxu1 %v2656_v12  ;;  %v1419_v9 = vunpack.c.l.bf16 %v2835_v1  ;;  %v1420_v46 = vunpack.c.l.bf16 %v2836_v37  ;;  %v5090_v45 = vunpack.c.l.bf16 %v3844_v33  ;;  %v3677_v33 = vld [vmem:[%s5022_s1 + $0x1a0] sm:$0xff]  }
  0x4e   :  { %v1474_v53 = vrot.slane %v5088_v19, 2  ;;  %v1473_v21 = vrot.slane %v1417_v26, 2  ;;  %v1476_v16 = vrot.slane %v1418_v31, 2  ;;  %v5091_v54 = vunpack.c.l.bf16 %v3853_v38  ;;  %3267 = vmatpush3.bf16.msra.mxu1 %v3670_v4  ;;  %3254 = vmatprep.mubr.bf16.mxu1 %v2657_v44  ;;  %v3682_v44 = vld [vmem:[%s5022_s1 + $0xb0] sm:$0xff]   ;;  %v526_v26 = vld [vmem:[%s5023_s0 + $0x20] sm:$0xe] }
  0x4f   :  { %3393 = vmatpush3.bf16.msra.mxu0 %v3667_v34  ;;  %v1477_v58 = vrot.slane %v5089_v8, 2  ;;  %v578_v34 = vrot.slane %v5090_v45, 2  ;;  %3268 = vmatprep.subr.bf16.mxu1 %v3672_v59  ;;  %v1469_v3 = vsel %vm570_vm1, %v1467_v18, %v1468_v56  ;;  %v1472_v63 = vsel %vm570_vm1, %v1470_v15, %v1471_v36  ;;  %v3683_v18 = vld [vmem:[%s5022_s1 + $0x1b0] sm:$0xff]   ;;  %v3684_v8 = vld [vmem:[%s5022_s1 + $0xb8] sm:$0xff]  }
  0x50   :  { %3394 = vmatprep.subr.bf16.mxu0 %v3671_v13  ;;  %v581_v20 = vrot.slane %v5091_v54, 2  ;;  %v5092_v11 = vunpack.c.l.bf16 %v4214_v51  ;;  %v5093_v57 = vunpack.c.l.bf16 %v4227_v28  ;;  %v2658_v7 = vcombine.low %v4064_v49, %v4071_v62  ;;  %v523_v51 = vld [vmem:[%s5023_s0 + $0x8] sm:$0xe] }
  0x51   :  { %v1475_v32 = vsel %vm570_vm1, %v1473_v21, %v1474_v53  ;;  %v1478_v4 = vsel %vm570_vm1, %v1476_v16, %v1477_v58  ;;  %v3678_v28 = vld [vmem:[%s5022_s1 + $0xa8] sm:$0xff]   ;;  %v1479_v29 = vrot.slane %v1419_v9, 2  ;;  %v1482_v24 = vrot.slane %v1420_v46, 2  ;;  %v529_v9 = vld [vmem:[%s5023_s0 + $0x38] sm:$0xe]  ;;  %v5098_v46 = vld [vmem:[#allocation2_spill] sm:$0xff] }
  0x52   :  { %3379 = vmatmul.mubr.bf16.gmra.mrb[4].mxu0 %v1504_v43  ;;  %v1480_v38 = vrot.slane %v5092_v11, 2  ;;  %v1483_v22 = vrot.slane %v5093_v57, 2  ;;  %v538_v49 = vunpack.c.l.bf16 %v522_v55  ;;  %v539_v62 = vunpack.c.l.bf16 %v523_v51  ;;  %3269 = vmatpush3.bf16.msra.mxu1 %v3672_v59  ;;  %v527_v58 = vld [vmem:[%s5023_s0 + $0x28] sm:$0xe]  ;;  %v3685_v11 = vld [vmem:[%s5022_s1 + $0x1b8] sm:$0xff]  }
  0x53   :  { %3395 = vmatpush3.bf16.msra.mxu0 %v3671_v13  ;;  %3382 = vmatprep.mubr.bf16.mxu0 %v1505_v23  ;;  %v1506_v6 = vpack.c.bf16 %v1472_v63, %v1469_v3  ;;  %v2659_v48 = vcombine.low %v4136_v61, %v4141_v47  ;;  %v5094_v50 = vunpack.c.l.bf16 %v3800_v14  ;;  %v5095_v39 = vunpack.c.l.bf16 %v3807_v17  ;;  %v524_v13 = vld [vmem:[%s5023_s0 + $0x10] sm:$0xe]  ;;  %v3679_v14 = vld [vmem:[%s5022_s1 + $0x1a8] sm:$0xff]  }
  0x54   :  { %3396 = vmatprep.subr.bf16.mxu0 %v3673_v40  ;;  %3270 = vmatprep.subr.bf16.mxu1 %v3676_v2  ;;  %v571_v59 = vrot.slane %v538_v49, 2  ;;  %v574_v30 = vrot.slane %v539_v62, 2  ;;  %v540_v35 = vunpack.c.l.bf16 %v524_v13  ;;  %v541_v56 = vunpack.c.l.bf16 %v525_v5  ;;  %v5100_v3 = vld [vmem:[#allocation3_spill] sm:$0xff]  ;;  %v531_v49 = vld [vmem:[%s5023_s0 + $0x58] sm:$0xe] }
  0x55   :  { %v572_v0 = vrot.slane %v5094_v50, 2  ;;  %v575_v12 = vrot.slane %v5095_v39, 2  ;;  %v1507_v61 = vpack.c.bf16 %v1478_v4, %v1475_v32  ;;  %3255 = vmatmul.mubr.bf16.gmra.mrb[8].mxu1 %v2658_v7  ;;  %v1481_v52 = vsel %vm570_vm1, %v1479_v29, %v1480_v38  ;;  %v3687_v32 = vld [vmem:[%s5022_s1 + $0xc0] sm:$0xff]   ;;  %v5104_v13 = vld [vmem:[#allocation5_spill] sm:$0xff] }
  0x56   :  { %v577_v17 = vrot.slane %v540_v35, 2  ;;  %v580_v47 = vrot.slane %v541_v56, 2  ;;  %3271 = vmatpush3.bf16.msra.mxu1 %v3676_v2  ;;  %3258 = vmatprep.mubr.bf16.mxu1 %v2659_v48  ;;  %v1484_v36 = vsel %vm570_vm1, %v1482_v24, %v1483_v22  ;;  %v5096_v31 = vunpack.c.l.bf16 %v3907_v10  ;;  %v3686_v10 = vld [vmem:[%s5023_s0 + $0x10] ss:$8 sps:$4 sm:$0xff]   ;;  %v3688_v62 = vld [vmem:[%s5023_s0 + $0x20] ss:$8 sps:$4 sm:$0xff]  }
  0x57   :  { %3397 = vmatpush3.bf16.msra.mxu0 %v3673_v40  ;;  %v573_v43 = vsel %vm570_vm1, %v571_v59, %v572_v0  ;;  %3272 = vmatprep.subr.bf16.mxu1 %v3678_v28  ;;  %v576_v27 = vsel %vm570_vm1, %v574_v30, %v575_v12  ;;  %v2660_v19 = vcombine.low %v4183_v42, %v4188_v41  ;;  %v542_v1 = vunpack.c.l.bf16 %v526_v26  ;;  %v528_v41 = vld [vmem:[%s5023_s0 + $0x30] sm:$0xe]  ;;  %v532_v30 = vld [vmem:[%s5023_s0 + $0x60] sm:$0xe]  ;;  %v533_v35 = vld [vmem:[%s5023_s0 + $0x68] sm:$0xe] }
  0x58   :  { %3398 = vmatprep.subr.bf16.mxu0 %v3677_v33  ;;  %v4434_v60 = vsel %vm570_vm1, %v577_v17, %v578_v34  ;;  %v4437_v40 = vsel %vm570_vm1, %v580_v47, %v581_v20  ;;  %v584_v23 = vrot.slane %v5096_v31, 2  ;;  %v1508_v53 = vpack.c.bf16 %v1484_v36, %v1481_v52  ;;  %v530_v24 = vld [vmem:[%s5023_s0 + $0x50] sm:$0xe]  ;;  %v5106_v56 = vld [vmem:[#allocation6_spill] sm:$0xff]  ;;  %v5108_v17 = vld [vmem:[#allocation7_spill] sm:$0xff] }
  0x59   :  { %v636_v15 = vpack.c.bf16 %v4437_v40, %v4434_v60  ;;  %v635_v37 = vpack.c.bf16 %v576_v27, %v573_v43  ;;  %v543_v21 = vunpack.c.l.bf16 %v527_v58  ;;  %v5097_v16 = vunpack.c.l.bf16 %v3920_v25  ;;  %v5102_v0 = vld [vmem:[#allocation4_spill] sm:$0xff]  ;;  %v3691_v26 = vld [vmem:[%s5022_s1 + $0x1c8] sm:$0xff]  }
  0x5a   :  { %3383 = vmatmul.mubr.bf16.gmra.mrb[8].mxu0 %v1506_v6  ;;  %3273 = vmatpush3.bf16.msra.mxu1 %v3678_v28  ;;  %v5099_v45 = vunpack.c.l.bf16 %v5098_v46  ;;  %v583_v54 = vrot.slane %v542_v1, 2  ;;  %v544_v20 = vunpack.c.l.bf16 %v528_v41  ;;  %v545_v2 = vunpack.c.l.bf16 %v529_v9  ;;  %v3689_v28 = vld [vmem:[%s5022_s1 + $0x1c0] sm:$0xff]   ;;  %v3690_v6 = vld [vmem:[%s5022_s1 + $0xc8] sm:$0xff]   ;;  %v3693_v60 = vld [vmem:[%s5022_s1 + $0xd0] sm:$0xff]  }
  0x5b   :  { %3399 = vmatpush3.bf16.msra.mxu0 %v3677_v33  ;;  %3386 = vmatprep.mubr.bf16.mxu0 %v1507_v61  ;;  %v587_v42 = vrot.slane %v5097_v16, 2  ;;  %v5101_v63 = vunpack.c.l.bf16 %v5100_v3  ;;  %v586_v25 = vrot.slane %v543_v21, 2  ;;  %v546_v48 = vunpack.c.l.bf16 %v530_v24  ;;  %v3695_v58 = vld [vmem:[%s5022_s1 + $0x1d0] sm:$0xff]   ;;  %v3696_v41 = vld [vmem:[%s5022_s1 + $0xd8] sm:$0xff]   ;;  %v536_v3 = vld [vmem:[%s5023_s0 + $0x80] sm:$0xe] }
  0x5c   :  { %3400 = vmatprep.subr.bf16.mxu0 %v3679_v14  ;;  %v590_v34 = vrot.slane %v5099_v45, 2  ;;  %3274 = vmatprep.subr.bf16.mxu1 %v3682_v44  ;;  %v585_v38 = vsel %vm570_vm1, %v583_v54, %v584_v23  ;;  %v589_v57 = vrot.slane %v544_v20, 2  ;;  %v592_v22 = vrot.slane %v545_v2, 2  ;;  %v535_v9 = vld [vmem:[%s5023_s0 + $0x78] sm:$0xe] }
  0x5d   :  { %v593_v33 = vrot.slane %v5101_v63, 2  ;;  %3259 = vmatmul.mubr.bf16.gmra.mrb[12].mxu1 %v2660_v19  ;;  %v588_v7 = vsel %vm570_vm1, %v586_v25, %v587_v42  ;;  %v547_v50 = vunpack.c.l.bf16 %v531_v49  ;;  %v5103_v39 = vunpack.c.l.bf16 %v5102_v0  ;;  %v3694_v42 = vld [vmem:[%s5023_s0 + $0x40] ss:$8 sps:$4 sm:$0xff]   ;;  %v5112_v54 = vld [vmem:[#allocation9_spill] sm:$0xff] }
  0x5e   :  { %3275 = vmatpush3.bf16.msra.mxu1 %v3682_v44  ;;  %3278 = vmatprep.mubr.bf16.mxu1 %v635_v37  ;;  %v637_v4 = vpack.c.bf16 %v588_v7, %v585_v38  ;;  %v4481_v55 = vsel %vm570_vm1, %v589_v57, %v590_v34  ;;  %v5105_v5 = vunpack.c.l.bf16 %v5104_v13  ;;  %v5107_v61 = vunpack.c.l.bf16 %v5106_v56  ;;  %v534_v37 = vld [vmem:[%s5023_s0 + $0x70] sm:$0xe]  ;;  %v3698_v45 = vld [vmem:[%s5023_s0 + $0x60] ss:$8 sps:$4 sm:$0xff]  }
  0x5f   :  { %3401 = vmatpush3.bf16.msra.mxu0 %v3679_v14  ;;  %3276 = vmatprep.subr.bf16.mxu1 %v3684_v8  ;;  %v4484_v51 = vsel %vm570_vm1, %v592_v22, %v593_v33  ;;  %v596_v12 = vrot.slane %v5103_v39, 2  ;;  %v5109_v47 = vunpack.c.l.bf16 %v5108_v17  ;;  %v595_v36 = vrot.slane %v546_v48, 2  ;;  %v537_v63 = vld [vmem:[%s5023_s0 + $0x88] sm:$0xe]  ;;  %v5114_v33 = vld [vmem:[#allocation10_spill] sm:$0xff] }
  0x60   :  { %3402 = vmatprep.subr.bf16.mxu0 %v3683_v18  ;;  %v638_v29 = vpack.c.bf16 %v4484_v51, %v4481_v55  ;;  %v599_v59 = vrot.slane %v5105_v5, 2  ;;  %v602_v14 = vrot.slane %v5107_v61, 2  ;;  %v598_v43 = vrot.slane %v547_v50, 2  ;;  %v5116_v7 = vld [vmem:[#allocation11_spill] sm:$0xff]  ;;  %v3697_v51 = vld [vmem:[%s5022_s1 + $0x1d8] sm:$0xff]   ;;  %v3701_v0 = vld [vmem:[%s5022_s1 + $0x1e0] sm:$0xff]  }
  0x61   :  { %v605_v52 = vrot.slane %v5109_v47, 2  ;;  %v548_v44 = vunpack.c.l.bf16 %v532_v30  ;;  %v549_v27 = vunpack.c.l.bf16 %v533_v35  ;;  %v597_v31 = vsel %vm570_vm1, %v595_v36, %v596_v12  ;;  %v3700_v12 = vld [vmem:[%s5023_s0 + $0x70] ss:$8 sps:$4 sm:$0xff]   ;;  %v3702_v13 = vld [vmem:[%s5022_s1 + $0xe8] sm:$0xff]   ;;  %v4607_v30 = vld [vmem:[%s5023_s0 + $0x1c] sm:$0x1] }
  0x62   :  { %3387 = vmatmul.mubr.bf16.gmra.mrb[12].mxu0 %v1508_v53  ;;  %3277 = vmatpush3.bf16.msra.mxu1 %v3684_v8  ;;  %v600_v23 = vsel %vm570_vm1, %v598_v43, %v599_v59  ;;  %v550_v46 = vunpack.c.l.bf16 %v534_v37  ;;  %v551_v34 = vunpack.c.l.bf16 %v535_v9  ;;  %v5113_v20 = vunpack.c.l.bf16 %v5112_v54  ;;  %v2909_v5 = vld [vmem:[%s5023_s0 + $0x10] ss:$8 sps:$4 sm:$0xff]   ;;  %v4602_v59 = vld [vmem:[%s5023_s0 + $0x14] sm:$0x1]  ;;  %v2913_v47 = vld [vmem:[%s5023_s0 + $0x20] ss:$8 sps:$4 sm:$0xff]  }
  0x63   :  { %3403 = vmatpush3.bf16.msra.mxu0 %v3683_v18  ;;  %3406 = vmatprep.mubr.bf16.mxu0 %v3686_v10  ;;  %v3692_v18 = vld [vmem:[%s5023_s0 + $0x30] ss:$8 sps:$4 sm:$0xff]   ;;  %v601_v19 = vrot.slane %v548_v44, 2  ;;  %v604_v53 = vrot.slane %v549_v27, 2  ;;  %v639_v8 = vpack.c.bf16 %v600_v23, %v597_v31  ;;  %v5115_v25 = vunpack.c.l.bf16 %v5114_v33  ;;  %v3704_v36 = vld [vmem:[%s5023_s0 + $0x80] ss:$8 sps:$4 sm:$0xff]  }
  0x64   :  { %3404 = vmatprep.subr.bf16.mxu0 %v3685_v11  ;;  %3294 = vmatprep.subr.bf16.mxu1 %v3687_v32  ;;  %v5110_v10 = vld [vmem:[#allocation8_spill] sm:$0xff]  ;;  %v611_v2 = vrot.slane %v5113_v20, 2  ;;  %v607_v38 = vrot.slane %v550_v46, 2  ;;  %v552_v57 = vunpack.c.l.bf16 %v536_v3  ;;  %v553_v22 = vunpack.c.l.bf16 %v537_v63  ;;  %v4630_v27 = vld [vmem:[%s5023_s0 + $0x2c] sm:$0x1] }
  0x65   :  { %3279 = vmatmul.mubr.bf16.vlgmr.msra.gmra.mrb[0].mxu1 %v636_v15  ;;  %v4532_v40 = vsel %vm570_vm1, %v601_v19, %v602_v14  ;;  %v4535_v15 = vsel %vm570_vm1, %v604_v53, %v605_v52  ;;  %v5111_v21 = vunpack.c.l.bf16 %v5110_v10  ;;  %v610_v55 = vrot.slane %v551_v34, 2  ;;  %v3703_v14 = vld [vmem:[%s5022_s1 + $0x1e8] sm:$0xff]   ;;  %v4620_v52 = vld [vmem:[%s5023_s0 + $0x24] sm:$0x1]  ;;  %v3706_v37 = vld [vmem:[%s5023_s0 + $0x90] ss:$8 sps:$4 sm:$0xff]  }
  0x66   :  { %3295 = vmatpush3.bf16.msra.mxu1 %v3687_v32  ;;  %3282 = vmatprep.mubr.bf16.mxu1 %v637_v4  ;;  %v640_v1 = vpack.c.bf16 %v4535_v15, %v4532_v40  ;;  %v5117_v32 = vunpack.c.l.bf16 %v5116_v7  ;;  %v613_v24 = vrot.slane %v552_v57, 2  ;;  %v616_v49 = vrot.slane %v553_v22, 2  ;;  %v3710_v40 = vld [vmem:[%s5023_s0 + $0x8] ss:$8 sps:$4 sm:$0xff]   ;;  %v3708_v10 = vld [vmem:[%s5022_s1 + $0xf8] sm:$0xff]  }
  0x67   :  { %3405 = vmatpush3.bf16.msra.mxu0 %v3685_v11  ;;  %3296 = vmatprep.subr.bf16.mxu1 %v3690_v6  ;;  %v608_v16 = vrot.slane %v5111_v21, 2  ;;  %v614_v11 = vrot.slane %v5115_v25, 2  ;;  %v1941_v35 = vunpack.c.l.bf16 %v2909_v5  ;;  %v1942_v56 = vunpack.c.l.bf16 %v4602_v59  ;;  %v4678_v33 = vld [vmem:[%s5023_s0 + $0x44] sm:$0x1]  ;;  %v4683_v25 = vld [vmem:[%s5023_s0 + $0x4c] sm:$0x1] }
  0x68   :  { %3422 = vmatprep.subr.bf16.mxu0 %v3689_v28  ;;  %v617_v4 = vrot.slane %v5117_v32, 2  ;;  %v1943_v61 = vunpack.c.h.bf16 %v2909_v5  ;;  %v1944_v17 = vunpack.c.l.bf16 %v4607_v30  ;;  %v1946_v23 = vunpack.c.l.bf16 %v4620_v52  ;;  %v3709_v22 = vld [vmem:[%s5022_s1 + $0x1f8] sm:$0xff]  }
  0x69   :  { %v4580_v48 = vsel %vm570_vm1, %v613_v24, %v614_v11  ;;  %v2005_v43 = vrot.slane %v1941_v35, 1  ;;  %v2006_v44 = vrot.slane %v1942_v56, 1  ;;  %v1947_v19 = vunpack.c.h.bf16 %v2913_v47  ;;  %v3712_v24 = vld [vmem:[%s5022_s1 + $0x200] sm:$0xff]   ;;  %v3725_v52 = vld [vmem:[%s5022_s1 + $0x238] sm:$0xff]  }
  0x6a   :  { %3407 = vmatmul.mubr.bf16.vlgmr.msra.gmra.mrb[0].mxu0 %v3688_v62  ;;  %3297 = vmatpush3.bf16.msra.mxu1 %v3690_v6  ;;  %v612_v62 = vsel %vm570_vm1, %v610_v55, %v611_v2  ;;  %v3699_v6 = vld [vmem:[%s5022_s1 + $0xe0] sm:$0xff]   ;;  %v4583_v50 = vsel %vm570_vm1, %v616_v49, %v617_v4  ;;  %v2009_v31 = vrot.slane %v1944_v17, 1  ;;  %v1948_v53 = vunpack.c.l.bf16 %v4630_v27 }
  0x6b   :  { %3423 = vmatpush3.bf16.msra.mxu0 %v3689_v28  ;;  %3410 = vmatprep.mubr.bf16.mxu0 %v3692_v18  ;;  %v609_v28 = vsel %vm570_vm1, %v607_v38, %v608_v16  ;;  %v642_v39 = vpack.c.bf16 %v4583_v50, %v4580_v48  ;;  %v1945_v18 = vunpack.c.l.bf16 %v2913_v47  ;;  %v2007_v21 = vsel %vm142_vm0, %v2005_v43, %v2006_v44  ;;  %v2921_v2 = vld [vmem:[%s5023_s0 + $0x40] ss:$8 sps:$4 sm:$0xff]   ;;  %v4731_v47 = vld [vmem:[%s5023_s0 + $0x74] sm:$0x1]  ;;  %v4738_v44 = vld [vmem:[%s5023_s0 + $0x7c] sm:$0x1] }
  0x6c   :  { %3424 = vmatprep.subr.bf16.mxu0 %v3691_v26  ;;  %3298 = vmatprep.subr.bf16.mxu1 %v3693_v60  ;;  %v2015_v34 = vrot.slane %v1948_v53, 1  ;;  %v1953_v7 = vunpack.c.l.bf16 %v2921_v2  ;;  %v1954_v55 = vunpack.c.l.bf16 %v4678_v33  ;;  %v1956_v49 = vunpack.c.l.bf16 %v4683_v25 }
  0x6d   :  { %3283 = vmatmul.mubr.bf16.gmra.mrb[4].mxu1 %v638_v29  ;;  %v641_v29 = vpack.c.bf16 %v612_v62, %v609_v28  ;;  %v2011_v15 = vrot.slane %v1945_v18, 1  ;;  %v3711_v28 = vld [vmem:[%s5023_s0 + $0x18] ss:$8 sps:$4 sm:$0xff]  }
  0x6e   :  { %3299 = vmatpush3.bf16.msra.mxu1 %v3693_v60  ;;  %3286 = vmatprep.mubr.bf16.mxu1 %v639_v8  ;;  %v3705_v8 = vld [vmem:[%s5022_s1 + $0xf0] sm:$0xff]   ;;  %v2925_v62 = vld [vmem:[%s5023_s0 + $0x60] ss:$8 sps:$4 sm:$0xff]   ;;  %v2023_v5 = vrot.slane %v1953_v7, 1 }
  0x6f   :  { %3425 = vmatpush3.bf16.msra.mxu0 %v3691_v26  ;;  %3300 = vmatprep.subr.bf16.mxu1 %v3696_v41  ;;  %v2008_v26 = vrot.slane %v1943_v61, 1  ;;  %v3707_v60 = vld [vmem:[%s5022_s1 + $0x1f0] sm:$0xff]   ;;  %v1959_v35 = vunpack.c.h.bf16 %v2925_v62  ;;  %v3715_v7 = vld [vmem:[%s5023_s0 + $0x38] ss:$8 sps:$4 sm:$0xff]  }
  0x70   :  { %3426 = vmatprep.subr.bf16.mxu0 %v3695_v58 }
  0x71   :  { %v2010_v16 = vsel %vm142_vm0, %v2008_v26, %v2009_v31  ;;  %v1962_v26 = vunpack.c.l.bf16 %v4731_v47  ;;  %v3713_v31 = vld [vmem:[%s5022_s1 + $0x208] sm:$0xff]   ;;  %v2970_v47 = vld [vmem:[%s5023_s0 + $0x38] sm:$0xe] }
  0x72   :  { %3411 = vmatmul.mubr.bf16.gmra.mrb[4].mxu0 %v3694_v42  ;;  %3301 = vmatpush3.bf16.msra.mxu1 %v3696_v41  ;;  %v4661_v42 = vld [vmem:[%s5023_s0 + $0x34] sm:$0x1]  ;;  %v4666_v41 = vld [vmem:[%s5023_s0 + $0x3c] sm:$0x1]  ;;  %v2069_v11 = vpack.c.bf16 %v2010_v16, %v2007_v21 }
  0x73   :  { %3427 = vmatpush3.bf16.msra.mxu0 %v3695_v58  ;;  %3414 = vmatprep.mubr.bf16.mxu0 %v3698_v45  ;;  %v2012_v58 = vrot.slane %v1946_v23, 1  ;;  %v2014_v45 = vrot.slane %v1947_v19, 1  ;;  %v1950_v54 = vunpack.c.l.bf16 %v4661_v42  ;;  %v1952_v20 = vunpack.c.l.bf16 %v4666_v41 }
  0x74   :  { %3428 = vmatprep.subr.bf16.mxu0 %v3697_v51  ;;  %3302 = vmatprep.subr.bf16.mxu1 %v3699_v6  ;;  %v2036_v16 = vrot.slane %v1962_v26, 1 }
  0x75   :  { %3287 = vmatmul.mubr.bf16.gmra.mrb[8].mxu1 %v640_v1  ;;  %v2917_v1 = vld [vmem:[%s5023_s0 + $0x30] ss:$8 sps:$4 sm:$0xff]   ;;  %v2018_v38 = vrot.slane %v1950_v54, 1  ;;  %v2021_v57 = vrot.slane %v1952_v20, 1  ;;  %v2013_v32 = vsel %vm142_vm0, %v2011_v15, %v2012_v58  ;;  %v2016_v4 = vsel %vm142_vm0, %v2014_v45, %v2015_v34 }
  0x76   :  { %3303 = vmatpush3.bf16.msra.mxu1 %v3699_v6  ;;  %3290 = vmatprep.mubr.bf16.mxu1 %v641_v29  ;;  %v1949_v9 = vunpack.c.l.bf16 %v2917_v1  ;;  %v1951_v46 = vunpack.c.h.bf16 %v2917_v1  ;;  %v4711_v6 = vld [vmem:[%s5023_s0 + $0x64] sm:$0x1]  ;;  %v3714_v29 = vld [vmem:[%s5023_s0 + $0x28] ss:$8 sps:$4 sm:$0xff]   ;;  %v2032_v1 = vrot.slane %v1959_v35, 1 }
  0x77   :  { %3429 = vmatpush3.bf16.msra.mxu0 %v3697_v51  ;;  %3304 = vmatprep.subr.bf16.mxu1 %v3702_v13  ;;  %v1955_v51 = vunpack.c.h.bf16 %v2921_v2  ;;  %v2933_v2 = vld [vmem:[%s5023_s0 + $0x80] ss:$8 sps:$4 sm:$0xff]  }
  0x78   :  { %3430 = vmatprep.subr.bf16.mxu0 %v3701_v0  ;;  %v2017_v3 = vrot.slane %v1949_v9, 1  ;;  %v2020_v63 = vrot.slane %v1951_v46, 1 }
  0x79   :  { %v2026_v43 = vrot.slane %v1955_v51, 1  ;;  %v2937_v51 = vld [vmem:[%s5023_s0 + $0x90] ss:$8 sps:$4 sm:$0xff]  }
  0x7a   :  { %3415 = vmatmul.mubr.bf16.gmra.mrb[8].mxu0 %v3700_v12  ;;  %3305 = vmatpush3.bf16.msra.mxu1 %v3702_v13  ;;  %v2019_v48 = vsel %vm142_vm0, %v2017_v3, %v2018_v38  ;;  %v2022_v50 = vsel %vm142_vm0, %v2020_v63, %v2021_v57  ;;  %v1958_v12 = vunpack.c.l.bf16 %v4711_v6  ;;  %v2070_v13 = vpack.c.bf16 %v2016_v4, %v2013_v32  ;;  %v4766_v3 = vld [vmem:[%s5023_s0 + $0x84] sm:$0x1]  ;;  %v4771_v63 = vld [vmem:[%s5023_s0 + $0x8c] sm:$0x1] }
  0x7b   :  { %3431 = vmatpush3.bf16.msra.mxu0 %v3701_v0  ;;  %3418 = vmatprep.mubr.bf16.mxu0 %v3704_v36  ;;  %v4721_v0 = vld [vmem:[%s5023_s0 + $0x6c] sm:$0x1]  ;;  %v2024_v36 = vrot.slane %v1954_v55, 1  ;;  %v2071_v19 = vpack.c.bf16 %v2022_v50, %v2019_v48  ;;  %v1965_v57 = vunpack.c.l.bf16 %v2933_v2  ;;  %v1967_v32 = vunpack.c.h.bf16 %v2933_v2  ;;  %v3717_v48 = vld [vmem:[%s5022_s1 + $0x218] sm:$0xff]  }
  0x7c   :  { %3432 = vmatprep.subr.bf16.mxu0 %v3703_v14  ;;  %3306 = vmatprep.subr.bf16.mxu1 %v3705_v8  ;;  %v1960_v61 = vunpack.c.l.bf16 %v4721_v0  ;;  %v2030_v58 = vrot.slane %v1958_v12, 1  ;;  %v1968_v4 = vunpack.c.l.bf16 %v4771_v63  ;;  %v2307_v6 = vrot.slane %v1944_v17, 2 }
  0x7d   :  { %3291 = vmatmul.mubr.bf16.gmra.mrb[12].mxu1 %v642_v39  ;;  %v1957_v39 = vunpack.c.l.bf16 %v2925_v62  ;;  %v2025_v45 = vsel %vm142_vm0, %v2023_v5, %v2024_v36  ;;  %v4794_v62 = vld [vmem:[%s5023_s0 + $0x9c] sm:$0x1]  ;;  %v2041_v5 = vrot.slane %v1965_v57, 1  ;;  %v2334_v0 = vrot.slane %v1962_v26, 2  ;;  %v2977_v26 = vld [vmem:[%s5023_s0 + $0x80] sm:$0xe] }
  0x7e   :  { %3307 = vmatpush3.bf16.msra.mxu1 %v3705_v8  ;;  %3310 = vmatprep.mubr.bf16.mxu1 %v3710_v40  ;;  %v2027_v8 = vrot.slane %v1956_v49, 1  ;;  %v1964_v40 = vunpack.c.l.bf16 %v4738_v44  ;;  %v2316_v63 = vrot.slane %v1950_v54, 2 }
  0x7f   :  { %3433 = vmatpush3.bf16.msra.mxu0 %v3703_v14  ;;  %3308 = vmatprep.subr.bf16.mxu1 %v3708_v10  ;;  %v2929_v14 = vld [vmem:[%s5023_s0 + $0x70] ss:$8 sps:$4 sm:$0xff]   ;;  %v2029_v15 = vrot.slane %v1957_v39, 1 }
  0x80   :  { %3434 = vmatprep.subr.bf16.mxu0 %v3707_v60  ;;  %v1961_v18 = vunpack.c.l.bf16 %v2929_v14  ;;  %v2039_v46 = vrot.slane %v1964_v40, 1  ;;  %v2028_v34 = vsel %vm142_vm0, %v2026_v43, %v2027_v8  ;;  %v2965_v43 = vld [vmem:[%s5023_s0 + $0x10] sm:$0xe]  ;;  %v1971_v8 = vunpack.c.h.bf16 %v2937_v51 }
  0x82   :  { %3419 = vmatmul.mubr.bf16.gmra.mrb[12].mxu0 %v3706_v37  ;;  %3309 = vmatpush3.bf16.msra.mxu1 %v3708_v10  ;;  %v2033_v37 = vrot.slane %v1960_v61, 1  ;;  %v3716_v10 = vld [vmem:[%s5022_s1 + $0x210] sm:$0xff]   ;;  %v2035_v21 = vrot.slane %v1961_v18, 1  ;;  %v2044_v18 = vrot.slane %v1967_v32, 1  ;;  %v2050_v57 = vrot.slane %v1971_v8, 1 }
  0x83   :  { %3435 = vmatpush3.bf16.msra.mxu0 %v3707_v60  ;;  %3438 = vmatprep.mubr.bf16.mxu0 %v2069_v11  ;;  %v1963_v60 = vunpack.c.h.bf16 %v2929_v14  ;;  %v2031_v11 = vsel %vm142_vm0, %v2029_v15, %v2030_v58  ;;  %v1969_v14 = vunpack.c.l.bf16 %v2937_v51  ;;  %v2973_v15 = vld [vmem:[%s5023_s0 + $0x60] sm:$0xe]  ;;  %v2974_v58 = vld [vmem:[%s5023_s0 + $0x68] sm:$0xe]  ;;  %v2975_v51 = vld [vmem:[%s5023_s0 + $0x70] sm:$0xe] }
  0x84   :  { %3436 = vmatprep.subr.bf16.mxu0 %v3709_v22  ;;  %3486 = vmatprep.subr.bf16.mxu1 %v3712_v24  ;;  %v2034_v38 = vsel %vm142_vm0, %v2032_v1, %v2033_v37  ;;  %v4800_v39 = vsel %vm142_vm0, %v2035_v21, %v2036_v16  ;;  %v3720_v1 = vld [vmem:[%s5022_s1 + $0x220] sm:$0xff]   ;;  %v2271_v37 = vunpack.c.l.bf16 %v2965_v43  ;;  %v2279_v16 = vunpack.c.l.bf16 %v2973_v15 }
  0x85   :  { %3311 = vmatmul.mubr.bf16.vlgmr.msra.gmra.mrb[0].mxu1 %v3711_v28  ;;  %v2038_v9 = vrot.slane %v1963_v60, 1  ;;  %v4786_v28 = vld [vmem:[%s5023_s0 + $0x94] sm:$0x1]  ;;  %v2073_v50 = vpack.c.bf16 %v2034_v38, %v2031_v11  ;;  %v2966_v60 = vld [vmem:[%s5023_s0 + $0x18] sm:$0xe]  ;;  %v2047_v2 = vrot.slane %v1969_v14, 1  ;;  %v2281_v30 = vunpack.c.l.bf16 %v2975_v51 }
  0x86   :  { %3494 = vmatpush3.bf16.msra.mxu1 %v3712_v24  ;;  %3314 = vmatprep.mubr.bf16.mxu1 %v3714_v29  ;;  %v2072_v29 = vpack.c.bf16 %v2028_v34, %v2025_v45  ;;  %v1970_v36 = vunpack.c.l.bf16 %v4786_v28  ;;  %v2272_v21 = vunpack.c.l.bf16 %v2966_v60  ;;  %v3722_v34 = vld [vmem:[%s5023_s0 + $0x78] ss:$8 sps:$4 sm:$0xff]   ;;  %v2304_v14 = vrot.slane %v1942_v56, 2 }
  0x87   :  { %3437 = vmatpush3.bf16.msra.mxu0 %v3709_v22  ;;  %3487 = vmatprep.subr.bf16.mxu1 %v3713_v31  ;;  %v1966_v22 = vunpack.c.l.bf16 %v4766_v3  ;;  %v2967_v32 = vld [vmem:[%s5023_s0 + $0x20] sm:$0xe]  ;;  %v2980_v3 = vld [vmem:[%s5023_s0 + $0x98] sm:$0xe] }
  0x88   :  { %3454 = vmatprep.subr.bf16.mxu0 %v3712_v24  ;;  %v2048_v11 = vrot.slane %v1970_v36, 1  ;;  %v2306_v43 = vrot.slane %v2272_v21, 2  ;;  %v2273_v56 = vunpack.c.l.bf16 %v2967_v32 }
  0x89   :  { %v2042_v35 = vrot.slane %v1966_v22, 1 }
  0x8a   :  { %3439 = vmatmul.mubr.bf16.vlgmr.msra.gmra.mrb[0].mxu0 %v2070_v13  ;;  %3495 = vmatpush3.bf16.msra.mxu1 %v3713_v31  ;;  %v4803_v13 = vsel %vm142_vm0, %v2038_v9, %v2039_v46  ;;  %v2280_v9 = vunpack.c.l.bf16 %v2974_v58  ;;  %v3719_v46 = vld [vmem:[%s5023_s0 + $0x68] ss:$8 sps:$4 sm:$0xff]   ;;  %v2049_v59 = vsel %vm142_vm0, %v2047_v2, %v2048_v11  ;;  %v2308_v21 = vsel %vm570_vm1, %v2306_v43, %v2307_v6 }
  0x8b   :  { %3455 = vmatpush3.bf16.msra.mxu0 %v3712_v24  ;;  %3442 = vmatprep.mubr.bf16.mxu0 %v2071_v19  ;;  %v3718_v24 = vld [vmem:[%s5023_s0 + $0x58] ss:$8 sps:$4 sm:$0xff]   ;;  %v2045_v19 = vrot.slane %v1968_v4, 1  ;;  %v2074_v45 = vpack.c.bf16 %v4803_v13, %v4800_v39  ;;  %v2043_v38 = vsel %vm142_vm0, %v2041_v5, %v2042_v35  ;;  %v2331_v39 = vrot.slane %v1960_v61, 2  ;;  %v3721_v5 = vld [vmem:[%s5022_s1 + $0x228] sm:$0xff]   ;;  %v3724_v58 = vld [vmem:[%s5022_s1 + $0x230] sm:$0xff]  }
  0x8c   :  { %3456 = vmatprep.subr.bf16.mxu0 %v3713_v31  ;;  %3488 = vmatprep.subr.bf16.mxu1 %v3716_v10  ;;  %v2976_v13 = vld [vmem:[%s5023_s0 + $0x78] sm:$0xe]  ;;  %v2303_v35 = vrot.slane %v2271_v37, 2  ;;  %v2968_v61 = vld [vmem:[%s5023_s0 + $0x28] sm:$0xe]  ;;  %v2309_v11 = vrot.slane %v2273_v56, 2 }
  0x8d   :  { %3315 = vmatmul.mubr.bf16.gmra.mrb[4].mxu1 %v3715_v7  ;;  %v2282_v17 = vunpack.c.l.bf16 %v2976_v13  ;;  %v2274_v44 = vunpack.c.l.bf16 %v2968_v61  ;;  %v2971_v13 = vld [vmem:[%s5023_s0 + $0x40] sm:$0xe]  ;;  %v2346_v56 = vrot.slane %v1970_v36, 2 }
  0x8e   :  { %3496 = vmatpush3.bf16.msra.mxu1 %v3716_v10  ;;  %3318 = vmatprep.mubr.bf16.mxu1 %v3718_v24  ;;  %v2327_v24 = vrot.slane %v2279_v16, 2  ;;  %v2305_v37 = vsel %vm570_vm1, %v2303_v35, %v2304_v14 }
  0x8f   :  { %3457 = vmatpush3.bf16.msra.mxu0 %v3713_v31  ;;  %v1972_v31 = vunpack.c.l.bf16 %v4794_v62  ;;  %3489 = vmatprep.subr.bf16.mxu1 %v3717_v48  ;;  %v2367_v51 = vpack.c.bf16 %v2308_v21, %v2305_v37 }
  0x90   :  { %3458 = vmatprep.subr.bf16.mxu0 %v3716_v10 }
  0x91   :  { %v2051_v7 = vrot.slane %v1972_v31, 1 }
  0x92   :  { %3443 = vmatmul.mubr.bf16.gmra.mrb[4].mxu0 %v2072_v29  ;;  %3497 = vmatpush3.bf16.msra.mxu1 %v3717_v48  ;;  %v2328_v29 = vrot.slane %v1958_v12, 2 }
  0x93   :  { %3459 = vmatpush3.bf16.msra.mxu0 %v3716_v10  ;;  %3446 = vmatprep.mubr.bf16.mxu0 %v2073_v50  ;;  %v2046_v10 = vsel %vm142_vm0, %v2044_v18, %v2045_v19  ;;  %v2330_v50 = vrot.slane %v2280_v9, 2  ;;  %v2969_v18 = vld [vmem:[%s5023_s0 + $0x30] sm:$0xe]  ;;  %v2337_v19 = vrot.slane %v1964_v40, 2  ;;  %v2052_v8 = vsel %vm142_vm0, %v2050_v57, %v2051_v7 }
  0x94   :  { %3460 = vmatprep.subr.bf16.mxu0 %v3717_v48  ;;  %3490 = vmatprep.subr.bf16.mxu1 %v3720_v1  ;;  %v2075_v12 = vpack.c.bf16 %v2046_v10, %v2043_v38  ;;  %v2329_v60 = vsel %vm570_vm1, %v2327_v24, %v2328_v29  ;;  %v2310_v40 = vrot.slane %v1946_v23, 2  ;;  %v2275_v16 = vunpack.c.l.bf16 %v2969_v18 }
  0x95   :  { %3319 = vmatmul.mubr.bf16.gmra.mrb[8].mxu1 %v3719_v46  ;;  %v2332_v15 = vsel %vm570_vm1, %v2330_v50, %v2331_v39  ;;  %v2276_v9 = vunpack.c.l.bf16 %v2970_v47  ;;  %v2283_v46 = vunpack.c.l.bf16 %v2977_v26  ;;  %v2333_v38 = vrot.slane %v2281_v30, 2  ;;  %v2979_v50 = vld [vmem:[%s5023_s0 + $0x90] sm:$0xe] }
  0x96   :  { %3498 = vmatpush3.bf16.msra.mxu1 %v3720_v1  ;;  %3322 = vmatprep.mubr.bf16.mxu1 %v3722_v34  ;;  %v2371_v2 = vpack.c.bf16 %v2332_v15, %v2329_v60  ;;  %v2336_v10 = vrot.slane %v2282_v17, 2  ;;  %v2343_v7 = vrot.slane %v1968_v4, 2  ;;  %v2076_v32 = vpack.c.bf16 %v2052_v8, %v2049_v59 }
  0x97   :  { %3461 = vmatpush3.bf16.msra.mxu0 %v3717_v48  ;;  %v2978_v48 = vld [vmem:[%s5023_s0 + $0x88] sm:$0xe]  ;;  %3491 = vmatprep.subr.bf16.mxu1 %v3721_v5  ;;  %v2339_v23 = vrot.slane %v2283_v46, 2  ;;  %v2312_v24 = vrot.slane %v2274_v44, 2  ;;  %v2313_v29 = vrot.slane %v1948_v53, 2  ;;  %v2318_v4 = vrot.slane %v2276_v9, 2 }
  0x98   :  { %3462 = vmatprep.subr.bf16.mxu0 %v3720_v1  ;;  %v2284_v34 = vunpack.c.l.bf16 %v2978_v48  ;;  %v2319_v39 = vrot.slane %v1952_v20, 2  ;;  %v2335_v27 = vsel %vm570_vm1, %v2333_v38, %v2334_v0  ;;  %v2338_v53 = vsel %vm570_vm1, %v2336_v10, %v2337_v19 }
  0x99   :  { %v2285_v54 = vunpack.c.l.bf16 %v2979_v50  ;;  %v2286_v20 = vunpack.c.l.bf16 %v2980_v3  ;;  %v2311_v35 = vsel %vm570_vm1, %v2309_v11, %v2310_v40  ;;  %v2314_v14 = vsel %vm570_vm1, %v2312_v24, %v2313_v29 }
  0x9a   :  { %3447 = vmatmul.mubr.bf16.gmra.mrb[8].mxu0 %v2074_v45  ;;  %v3723_v45 = vld [vmem:[%s5023_s0 + $0x88] ss:$8 sps:$4 sm:$0xff]   ;;  %3499 = vmatpush3.bf16.msra.mxu1 %v3721_v5  ;;  %v2342_v57 = vrot.slane %v2284_v34, 2  ;;  %v2320_v6 = vsel %vm570_vm1, %v2318_v4, %v2319_v39  ;;  %v2277_v0 = vunpack.c.l.bf16 %v2971_v13  ;;  %v2372_v61 = vpack.c.bf16 %v2338_v53, %v2335_v27  ;;  %v4953_v27 = vld [vmem:[%s5024_s2] ss:$0 sm:$0xff] }
  0x9b   :  { %3463 = vmatpush3.bf16.msra.mxu0 %v3720_v1  ;;  %3450 = vmatprep.mubr.bf16.mxu0 %v2075_v12  ;;  %v2340_v1 = vrot.slane %v1966_v22, 2  ;;  %v2315_v22 = vrot.slane %v2275_v16, 2  ;;  %v2345_v59 = vrot.slane %v2285_v54, 2  ;;  %v2348_v30 = vrot.slane %v2286_v20, 2 }
  0x9c   :  { %3464 = vmatprep.subr.bf16.mxu0 %v3721_v5  ;;  %3492 = vmatprep.subr.bf16.mxu1 %v3724_v58  ;;  %v2344_v41 = vsel %vm570_vm1, %v2342_v57, %v2343_v7  ;;  %v2349_v17 = vrot.slane %v1972_v31, 2  ;;  %v2368_v47 = vpack.c.bf16 %v2314_v14, %v2311_v35  ;;  %v2321_v48 = vrot.slane %v2277_v0, 2 }
  0x9d   :  { %3323 = vmatmul.mubr.bf16.gmra.mrb[12].mxu1 %v3723_v45  ;;  %v2341_v42 = vsel %vm570_vm1, %v2339_v23, %v2340_v1  ;;  %v2317_v43 = vsel %vm570_vm1, %v2315_v22, %v2316_v63  ;;  %v2322_v19 = vrot.slane %v1954_v55, 2  ;;  %v2325_v60 = vrot.slane %v1956_v49, 2 }
  0x9e   :  { %3500 = vmatpush3.bf16.msra.mxu1 %v3724_v58  ;;  %3478 = vmatprep.mubr.bf16.mxu1 %v2371_v2  ;;  %v2373_v18 = vpack.c.bf16 %v2344_v41, %v2341_v42  ;;  %v2369_v26 = vpack.c.bf16 %v2320_v6, %v2317_v43  ;;  %v2347_v28 = vsel %vm570_vm1, %v2345_v59, %v2346_v56  ;;  %v4958_v41 = vld [vmem:[%s5025_s3] ss:$0 sm:$0xff] }
  0x9f   :  { %3465 = vmatpush3.bf16.msra.mxu0 %v3721_v5  ;;  %v2972_v5 = vld [vmem:[%s5023_s0 + $0x48] sm:$0xe]  ;;  %3493 = vmatprep.subr.bf16.mxu1 %v3725_v52  ;;  %v2350_v36 = vsel %vm570_vm1, %v2348_v30, %v2349_v17  ;;  %v2323_v62 = vsel %vm570_vm1, %v2321_v48, %v2322_v19 }
  0xa0   :  { %3466 = vmatprep.subr.bf16.mxu0 %v3724_v58  ;;  %v2278_v12 = vunpack.c.l.bf16 %v2972_v5  ;;  %v2374_v15 = vpack.c.bf16 %v2350_v36, %v2347_v28 }
  0xa2   :  { %3451 = vmatmul.mubr.bf16.gmra.mrb[12].mxu0 %v2076_v32  ;;  %3501 = vmatpush3.bf16.msra.mxu1 %v3725_v52  ;;  %v2324_v8 = vrot.slane %v2278_v12, 2 }
  0xa3   :  { %3467 = vmatpush3.bf16.msra.mxu0 %v3724_v58  ;;  %3470 = vmatprep.mubr.bf16.mxu0 %v2367_v51 }
  0xa4   :  { %3468 = vmatprep.subr.bf16.mxu0 %v3725_v52  ;;  %v2326_v31 = vsel %vm570_vm1, %v2324_v8, %v2325_v60 }
  0xa5   :  { %3479 = vmatmul.mubr.bf16.vlgmr.msra.gmra.mrb[16].mxu1 %v2372_v61  ;;  %v2370_v58 = vpack.c.bf16 %v2326_v31, %v2323_v62 }
  0xa6   :  { %3482 = vmatprep.mubr.bf16.mxu1 %v2373_v18 }
  0xa7   :  { %3469 = vmatpush3.bf16.msra.mxu0 %v3725_v52 }
  0xaa   :  { %3471 = vmatmul.mubr.bf16.vlgmr.msra.gmra.mrb[0].mxu0 %v2368_v47 }
  0xab   :  { %3474 = vmatprep.mubr.bf16.mxu0 %v2369_v26 }
  0xad   :  { %3483 = vmatmul.mubr.bf16.gmra.mrb[20].mxu1 %v2374_v15 }
  0xb2   :  { %3475 = vmatmul.mubr.bf16.gmra.mrb[4].mxu0 %v2370_v58 }
 0x158   :  { %v3312_v33 = vpop.f32.mrb[0].mxu1 }
 0x159   :  { %v964_v55 = vpop.f32.mrb[1].mxu1 }
 0x15a   :  { %v3313_v25 = vpop.f32.mrb[2].mxu1 }
 0x15b   :  { %v967_v49 = vpop.f32.mrb[3].mxu1 }
 0x160   :  { %v4938_v37 = vpop.f32.mrb[4].mxu1 }
 0x161   :  { %v4940_v21 = vpop.f32.mrb[5].mxu1 }
 0x162   :  { %v4942_v44 = vpop.f32.mrb[6].mxu1 }
 0x163   :  { %v4944_v40 = vpop.f32.mrb[7].mxu1 }
 0x168   :  { %v3320_v16 = vpop.f32.mrb[8].mxu1 }
 0x169   :  { %v996_v9 = vpop.f32.mrb[9].mxu1 }
 0x16a   :  { %v3321_v34 = vpop.f32.mrb[10].mxu1 }
 0x16b   :  { %v999_v11 = vpop.f32.mrb[11].mxu1 }
 0x16d   :  { %v3448_v46 = vpop.f32.mrb[8].mxu0 }
 0x16e   :  { %v3510_v45 = vadd.f32 %v3448_v46, %v3320_v16  ;;  %v2208_v2 = vpop.f32.mrb[9].mxu0 }
 0x16f   :  { %v3512_v38 = vadd.f32 %v2208_v2, %v996_v9  ;;  %v3449_v10 = vpop.f32.mrb[10].mxu0 }
 0x170   :  { %v3514_v52 = vadd.f32 %v3449_v10, %v3321_v34  ;;  %v2211_v23 = vpop.f32.mrb[11].mxu0  ;;  %v3324_v57 = vpop.f32.mrb[12].mxu1 }
 0x171   :  { %v3516_v1 = vadd.f32 %v2211_v23, %v999_v11  ;;  %v1012_v7 = vpop.f32.mrb[13].mxu1 }
 0x172   :  { %v3325_v51 = vpop.f32.mrb[14].mxu1 }
 0x173   :  { %v1015_v50 = vpop.f32.mrb[15].mxu1 }
 0x175   :  { %v3452_v32 = vpop.f32.mrb[12].mxu0 }
 0x176   :  { %v3518_v24 = vadd.f32 %v3452_v32, %v3324_v57  ;;  %v2224_v29 = vpop.f32.mrb[13].mxu0 }
 0x177   :  { %v3520_v3 = vadd.f32 %v2224_v29, %v1012_v7  ;;  %v3453_v22 = vpop.f32.mrb[14].mxu0 }
 0x178   :  { %v4946_v63 = vadd.f32 %v3453_v22, %v3325_v51  ;;  %v2227_v4 = vpop.f32.mrb[15].mxu0  ;;  %v3480_v53 = vpop.f32.mrb[16].mxu1 }
 0x179   :  { %v4948_v39 = vadd.f32 %v2227_v4, %v1015_v50  ;;  %v3511_v13 = vadd.f32 %v3510_v45, %v3480_v53  ;;  %v2506_v5 = vpop.f32.mrb[17].mxu1 }
 0x17a   :  { %v3513_v54 = vadd.f32 %v3512_v38, %v2506_v5  ;;  %v3481_v20 = vpop.f32.mrb[18].mxu1 }
 0x17b   :  { %v2570_v14 = vmul.f32 %v3511_v13, %v4953_v27  ;;  %v3515_v6 = vadd.f32 %v3514_v52, %v3481_v20  ;;  %v2509_v0 = vpop.f32.mrb[19].mxu1 }
 0x17c   :  { %v2568_v61 = vmul.f32 %v3513_v54, %v4953_v27  ;;  %v3517_v59 = vadd.f32 %v3516_v1, %v2509_v0 }
 0x17d   :  { %v3472_v42 = vpop.f32.mrb[0].mxu0  ;;  %v2593_v30 = vadd.f32 %v4958_v41, %v2570_v14  ;;  %v2571_v47 = vmul.f32 %v3515_v6, %v4953_v27 }
 0x17e   :  { %v3502_v35 = vadd.f32 %v3472_v42, %v3312_v33  ;;  %v2474_v43 = vpop.f32.mrb[1].mxu0  ;;  %v2591_v19 = vadd.f32 %v4958_v41, %v2568_v61  ;;  %v2569_v60 = vmul.f32 %v3517_v59, %v4953_v27 }
 0x17f   :  { %v3503_v12 = vadd.f32 %v2474_v43, %v964_v55  ;;  %v3473_v18 = vpop.f32.mrb[2].mxu0  ;;  %v2594_v62 = vadd.f32 %v4958_v41, %v2571_v47  ;;  %v2609_v31 = vmax.f32 %v2593_v30, 0.0 }
 0x180   :  { %v2562_v56 = vmul.f32 %v3502_v35, %v4953_v27  ;;  %v3504_v17 = vadd.f32 %v3473_v18, %v3313_v25  ;;  %v2477_v26 = vpop.f32.mrb[3].mxu0  ;;  %v2592_v33 = vadd.f32 %v4958_v41, %v2569_v60  ;;  %v3484_v55 = vpop.f32.mrb[20].mxu1  ;;  %v2607_v25 = vmax.f32 %v2591_v19, 0.0 }
 0x181   :  { %v2560_v48 = vmul.f32 %v3503_v12, %v4953_v27  ;;  %v3505_v8 = vadd.f32 %v2477_v26, %v967_v49  ;;  %v2610_v49 = vmax.f32 %v2594_v62, 0.0  ;;  %v3519_v9 = vadd.f32 %v3518_v24, %v3484_v55  ;;  %v2522_v46 = vpop.f32.mrb[21].mxu1 }
 0x182   :  { %v2585_v28 = vadd.f32 %v4958_v41, %v2562_v56  ;;  %v2563_v36 = vmul.f32 %v3504_v17, %v4953_v27  ;;  %v2608_v2 = vmax.f32 %v2592_v33, 0.0  ;;  %v3521_v38 = vadd.f32 %v3520_v3, %v2522_v46  ;;  %v3485_v10 = vpop.f32.mrb[22].mxu1 }
 0x183   :  { %v2583_v15 = vadd.f32 %v4958_v41, %v2560_v48  ;;  %v2561_v58 = vmul.f32 %v3505_v8, %v4953_v27  ;;  %v3035_v1 = vpack.c.bf16 %v2610_v49, %v2609_v31  ;;  %v2525_v32 = vpop.f32.mrb[23].mxu1  ;;  %v2574_v50 = vmul.f32 %v3519_v9, %v4953_v27 }
 0x184   :  { %v2586_v16 = vadd.f32 %v4958_v41, %v2563_v36  ;;  %v2601_v34 = vmax.f32 %v2585_v28, 0.0  ;;  %v3030_v29 = vpack.c.bf16 %v2608_v2, %v2607_v25  ;;  %v3523_v42 = vadd.f32 %v4946_v63, %v3485_v10 }
 0x185   :  { %v2584_v45 = vadd.f32 %v4958_v41, %v2561_v58  ;;  %v3476_v11 = vpop.f32.mrb[4].mxu0  ;;  %v2599_v52 = vmax.f32 %v2583_v15, 0.0  ;;  %3051 = vst [vmem:[%s5026_s4 + $0x28] sm:$0xff] %v3035_v1   ;;  %v2597_v35 = vadd.f32 %v4958_v41, %v2574_v50  ;;  %v3525_v63 = vadd.f32 %v4948_v39, %v2525_v32 }
 0x186   :  { %v2602_v23 = vmax.f32 %v2586_v16, 0.0  ;;  %v3506_v57 = vadd.f32 %v3476_v11, %v4938_v37  ;;  %v2490_v7 = vpop.f32.mrb[5].mxu0  ;;  %3050 = vst [vmem:[%s5026_s4 + $0x20] sm:$0xff] %v3030_v29   ;;  %v2575_v14 = vmul.f32 %v3523_v42, %v4953_v27 }
 0x187   :  { %v2600_v51 = vmax.f32 %v2584_v45, 0.0  ;;  %v3507_v24 = vadd.f32 %v2490_v7, %v4940_v21  ;;  %v3477_v22 = vpop.f32.mrb[6].mxu0  ;;  %v2572_v21 = vmul.f32 %v3521_v38, %v4953_v27  ;;  %v2573_v61 = vmul.f32 %v3525_v63, %v4953_v27 }
 0x188   :  { %v3015_v4 = vpack.c.bf16 %v2602_v23, %v2601_v34  ;;  %v2566_v3 = vmul.f32 %v3506_v57, %v4953_v27  ;;  %v3508_v53 = vadd.f32 %v3477_v22, %v4942_v44  ;;  %v2493_v13 = vpop.f32.mrb[7].mxu0  ;;  %v2613_v30 = vmax.f32 %v2597_v35, 0.0 }
 0x189   :  { %v3010_v37 = vpack.c.bf16 %v2600_v51, %v2599_v52  ;;  %v2564_v5 = vmul.f32 %v3507_v24, %v4953_v27  ;;  %v3509_v20 = vadd.f32 %v2493_v13, %v4944_v40  ;;  %v2595_v12 = vadd.f32 %v4958_v41, %v2572_v21 }
 0x18a   :  { %3047 = vst [vmem:[%s5026_s4 + $0x8] sm:$0xff] %v3015_v4   ;;  %v2589_v54 = vadd.f32 %v4958_v41, %v2566_v3  ;;  %v2567_v44 = vmul.f32 %v3508_v53, %v4953_v27  ;;  %v2598_v40 = vadd.f32 %v4958_v41, %v2575_v14  ;;  %v2596_v39 = vadd.f32 %v4958_v41, %v2573_v61 }
 0x18b   :  { %3011 = vst [vmem:[%s5026_s4] sm:$0xff] %v3010_v37   ;;  %v2587_v43 = vadd.f32 %v4958_v41, %v2564_v5  ;;  %v2565_v0 = vmul.f32 %v3509_v20, %v4953_v27  ;;  %v2611_v19 = vmax.f32 %v2595_v12, 0.0 }
 0x18c   :  { %v2590_v6 = vadd.f32 %v4958_v41, %v2567_v44  ;;  %v2605_v18 = vmax.f32 %v2589_v54, 0.0  ;;  %v2614_v17 = vmax.f32 %v2598_v40, 0.0  ;;  %v2612_v60 = vmax.f32 %v2596_v39, 0.0 }
 0x18d   :  { %v2588_v56 = vadd.f32 %v4958_v41, %v2565_v0  ;;  %v2603_v47 = vmax.f32 %v2587_v43, 0.0 }
 0x18e   :  { %v2606_v59 = vmax.f32 %v2590_v6, 0.0  ;;  %v3045_v8 = vpack.c.bf16 %v2614_v17, %v2613_v30  ;;  %v3040_v27 = vpack.c.bf16 %v2612_v60, %v2611_v19 }
 0x18f   :  { %v2604_v48 = vmax.f32 %v2588_v56, 0.0 }
 0x190   :  { %v3025_v26 = vpack.c.bf16 %v2606_v59, %v2605_v18  ;;  %3053 = vst [vmem:[%s5026_s4 + $0x38] sm:$0xff] %v3045_v8   ;;  %3052 = vst [vmem:[%s5026_s4 + $0x30] sm:$0xff] %v3040_v27  }
 0x191   :  { %v3020_v28 = vpack.c.bf16 %v2604_v48, %v2603_v47 }
 0x192   :  { %3049 = vst [vmem:[%s5026_s4 + $0x18] sm:$0xff] %v3025_v26  }
 0x193   :  { %3048 = vst [vmem:[%s5026_s4 + $0x10] sm:$0xff] %v3020_v28  }

</bundles_post_ra>
